<compile_context>
chip_gen: v7x
topology: tpu7x:2x2x1
jax: 0.10.0
libtpu: 0.0.40
codegen_flags: <defaults>
</compile_context>

<pallas_src>
import functools

import jax
import jax.numpy as jnp
from jax import lax
from jax.experimental import pallas as pl
from jax.experimental.pallas import tpu as pltpu

# ---- Model dimensions (from the PyTorch module) --------------------------------------------
NUM_FEATURES = 60
N_CODES = 5
EMB_SIZE = 30
HIDDEN = 30
NUM_CLASSES = 3
NUM_NEW_FEATURES = 20
BN_EPS = 1e-5

# ---- Lane-padded kernel dimensions ----------------------------------------------------------
IN_RAW = NUM_FEATURES * N_CODES            # 300
IN_PAD = 384                               # 300 -> 3 * 128
FLAT_RAW = NUM_NEW_FEATURES * EMB_SIZE     # 600
FLAT_PAD = 640                             # 600 -> 5 * 128
H1 = 512
H2 = 128
H3_PAD = 128                               # hidden 30 -> 128 (padded gamma/beta = 0)
OUT_PAD = 128                              # classes 3 -> 128 (lane-dense output store)
NEG_BIG = -1e30                            # disables padded logit columns in the softmax
NUM_PASSES = 4                             # 3 BN-stats passes + finalize pass


def _round_up(x, m):
    return (x + m - 1) // m * m


# ---------------- Fused kernel: front GEMM + (Linear+BN+ReLU)x3 + Linear + Softmax -----------
def fused_mlp_kernel(x_ref, wc_ref, bc_ref, w1_ref, aux1_ref, w2_ref, aux2_ref,
                     w3_ref, aux3_ref, w4_ref, b4_ref,
                     o_ref, h1_hbm, h2_hbm, h3_hbm,
                     buf1, buf2, buf3, st1, st2, st3, sem,
                     *, batch, batch_pad, tile):
    p = pl.program_id(0)                       # pass index: 0..3
    i = pl.program_id(1)                       # batch-tile index
    row0 = pl.multiple_of(i * tile, 8)
    inv_n = 1.0 / batch

    def copy(src, dst):
        cp = pltpu.make_async_copy(src, dst, sem)
        cp.start()
        cp.wait()

    def accumulate(st_ref, h):
        # Single-pass BN statistics: sum and sum-of-squares (masked against batch padding rows).
        if batch_pad > batch:
            rows = row0 + lax.broadcasted_iota(jnp.int32, (tile, 1), 0)
            h = h * (rows < batch).astype(jnp.float32)
        st_ref[0:1, :] += jnp.sum(h, axis=0, keepdims=True)
        st_ref[1:2, :] += jnp.sum(h * h, axis=0, keepdims=True)

    def bn_relu(h, st_ref, aux_ref):
        mean = st_ref[0:1, :] * inv_n
        var = jnp.maximum(st_ref[1:2, :] * inv_n - mean * mean, 0.0)   # clamp cancellation
        scale = aux_ref[1:2, :] * lax.rsqrt(var + BN_EPS)              # gamma folded (EUP rsqrt)
        shift = aux_ref[2:3, :] - mean * scale
        return jnp.maximum(h * scale + shift, 0.0)

    def mm(a, w_ref, b):
        # bf16 MXU operands, f32 accumulation.
        return jnp.dot(a.astype(jnp.bfloat16), w_ref[...],
                       preferred_element_type=jnp.float32) + b

    @pl.when(jnp.logical_and(p == 0, i == 0))
    def _init_stats():
        st1[...] = jnp.zeros_like(st1)
        st2[...] = jnp.zeros_like(st2)
        st3[...] = jnp.zeros_like(st3)

    @pl.when(p == 0)
    def _pass0():
        # Folded front end (embedding mix + fc + relu) and first hidden linear.
        flat = jnp.maximum(mm(x_ref[...], wc_ref, bc_ref[...]), 0.0)         # (TB, 640)
        h1 = mm(flat, w1_ref, aux1_ref[0:1, :])                              # (TB, 512)
        accumulate(st1, h1)
        buf1[...] = h1
        copy(buf1, h1_hbm.at[pl.ds(row0, tile), :])

    @pl.when(p == 1)
    def _pass1():
        copy(h1_hbm.at[pl.ds(row0, tile), :], buf1)
        a1 = bn_relu(buf1[...], st1, aux1_ref)
        h2 = mm(a1, w2_ref, aux2_ref[0:1, :])                                # (TB, 128)
        accumulate(st2, h2)
        buf2[...] = h2
        copy(buf2, h2_hbm.at[pl.ds(row0, tile), :])

    @pl.when(p == 2)
    def _pass2():
        copy(h2_hbm.at[pl.ds(row0, tile), :], buf2)
        a2 = bn_relu(buf2[...], st2, aux2_ref)
        h3 = mm(a2, w3_ref, aux3_ref[0:1, :])                                # (TB, 128)
        accumulate(st3, h3)
        buf3[...] = h3
        copy(buf3, h3_hbm.at[pl.ds(row0, tile), :])

    @pl.when(p == 3)
    def _pass3():
        copy(h3_hbm.at[pl.ds(row0, tile), :], buf3)
        a3 = bn_relu(buf3[...], st3, aux3_ref)
        # Final linear kept in f32 (tiny); padded logit columns carry a -1e30 bias.
        logits = jnp.dot(a3, w4_ref[...], preferred_element_type=jnp.float32) + b4_ref[...]
        # Softmax over the 3 real classes via explicit lane slices (no axis-1 XLU reduce).
        l0, l1, l2 = logits[:, 0:1], logits[:, 1:2], logits[:, 2:3]
        m = jnp.maximum(jnp.maximum(l0, l1), l2)
        e = jnp.exp(logits - m)                                              # padded cols -> 0
        s = e[:, 0:1] + e[:, 1:2] + e[:, 2:3]
        o_ref[...] = e * pl.reciprocal(s, approx=True)                       # unmasked (TB,128) store


# ---------------- One-time parameter folding / packing (hoisted out of the call path) --------
def prepack_params(p):
    """W_comb[f*5+c, n*30+e] = fc_w[n, f] * emb[c, e]  (== kron(fc_w.T, emb)) folds the
    embedding mix + fc(60->20) + relu + transpose/reshape front end into one lane-dense GEMM.
    Everything is zero-padded to lane multiples; padded BN columns get gamma = beta = 0 so they
    stay exactly zero, padded logit columns get a -1e30 bias so the softmax ignores them."""
    w_comb = jnp.kron(p["fc_w"].T, p["emb_w"])                               # (300, 600)
    w_comb = jnp.pad(w_comb, ((0, IN_PAD - IN_RAW), (0, FLAT_PAD - FLAT_RAW)))
    b_comb = jnp.pad(jnp.repeat(p["fc_b"], EMB_SIZE), (0, FLAT_PAD - FLAT_RAW))

    w1 = jnp.pad(p["w1"].T, ((0, FLAT_PAD - FLAT_RAW), (0, 0)))              # (640, 512)
    w3 = jnp.pad(p["w3"].T, ((0, 0), (0, H3_PAD - HIDDEN)))                  # (128, 128)
    aux3 = jnp.pad(jnp.stack([p["b3"], p["g3"], p["be3"]]),
                   ((0, 0), (0, H3_PAD - HIDDEN)))                           # (3, 128)
    w4 = jnp.pad(p["w4"].T, ((0, H3_PAD - HIDDEN), (0, OUT_PAD - NUM_CLASSES)))
    b4 = jnp.concatenate([p["b4"],
                          jnp.full((OUT_PAD - NUM_CLASSES,), NEG_BIG, jnp.float32)])

    return dict(
        wc=w_comb.astype(jnp.bfloat16),
        bc=b_comb[None, :],
        w1=w1.astype(jnp.bfloat16),
        aux1=jnp.stack([p["b1"], p["g1"], p["be1"]]),                        # (3, 512)
        w2=p["w2"].T.astype(jnp.bfloat16),                                   # (512, 128)
        aux2=jnp.stack([p["b2"], p["g2"], p["be2"]]),                        # (3, 128)
        w3=w3.astype(jnp.bfloat16),
        aux3=aux3,
        w4=w4,                                                               # (128, 128) f32
        b4=b4[None, :],
    )


def _vmem_limit_bytes():
    # ~30% headroom below physical per-core VMEM (v5e/v6e: 128 MiB, v7x: 64 MiB).
    try:
        cap = pltpu.get_tpu_info().vmem_capacity_bytes
    except Exception:
        cap = 64 * 1024 * 1024
    return int(cap * 0.7)


# ---------------- Wrapper: batch-tiled grid, resident weights, single pallas_call ------------
def mlp_forward(x, packed, tb=None):
    B = x.shape[0]
    assert B >= 2, "training-mode BatchNorm needs at least 2 rows"
    if tb is None:
        # TODO(synk): per-generation tile size (1024-2048 on v5e/v6e, 512-1024 on v7x).
        tb = 512
    tb = max(8, _round_up(min(tb, _round_up(B, 8)), 8))
    b_pad = _round_up(B, tb)
    nb = b_pad // tb

    # Lane-dense, bf16, zero-padded input: x[b, f, c] -> xflat[b, f*5 + c].
    xflat = x.reshape(B, IN_RAW).astype(jnp.bfloat16)
    xflat = jnp.pad(xflat, ((0, b_pad - B), (0, IN_PAD - IN_RAW)))

    kernel = functools.partial(fused_mlp_kernel, batch=B, batch_pad=b_pad, tile=tb)
    const = lambda p_, i_: (0, 0)                     # weights stay VMEM-resident

    in_specs = [
        # x is only consumed in pass 0; later passes pin block 0 so it is not re-fetched.
        pl.BlockSpec((tb, IN_PAD), lambda p_, i_: (jnp.where(p_ == 0, i_, 0), 0)),
        pl.BlockSpec((IN_PAD, FLAT_PAD), const),
        pl.BlockSpec((1, FLAT_PAD), const),
        pl.BlockSpec((FLAT_PAD, H1), const),
        pl.BlockSpec((3, H1), const),
        pl.BlockSpec((H1, H2), const),
        pl.BlockSpec((3, H2), const),
        pl.BlockSpec((H2, H3_PAD), const),
        pl.BlockSpec((3, H3_PAD), const),
        pl.BlockSpec((H3_PAD, OUT_PAD), const),
        pl.BlockSpec((1, OUT_PAD), const),
    ]
    out_shape = (
        jax.ShapeDtypeStruct((b_pad, OUT_PAD), jnp.float32),   # padded softmax output
        jax.ShapeDtypeStruct((b_pad, H1), jnp.float32),        # HBM staging: pre-BN h1
        jax.ShapeDtypeStruct((b_pad, H2), jnp.float32),        # HBM staging: pre-BN h2
        jax.ShapeDtypeStruct((b_pad, H3_PAD), jnp.float32),    # HBM staging: pre-BN h3
    )
    out_specs = (
        # Only pass 3 produces the result; earlier passes keep block 0 resident (no writeback).
        pl.BlockSpec((tb, OUT_PAD), lambda p_, i_: (jnp.where(p_ == 3, i_, 0), 0)),
        pl.BlockSpec(memory_space=pl.ANY),
        pl.BlockSpec(memory_space=pl.ANY),
        pl.BlockSpec(memory_space=pl.ANY),
    )
    scratch_shapes = [
        pltpu.VMEM((tb, H1), jnp.float32),       # staging buffer, layer 1
        pltpu.VMEM((tb, H2), jnp.float32),       # staging buffer, layer 2
        pltpu.VMEM((tb, H3_PAD), jnp.float32),   # staging buffer, layer 3
        pltpu.VMEM((2, H1), jnp.float32),        # [sum; sumsq] layer 1
        pltpu.VMEM((2, H2), jnp.float32),        # [sum; sumsq] layer 2
        pltpu.VMEM((2, H3_PAD), jnp.float32),    # [sum; sumsq] layer 3
        pltpu.SemaphoreType.DMA(()),
    ]

    # TODO(synk): on v7x, shard the batch-tile axis across the two TensorCores (core_map /
    # CORE_PARALLEL) with a cross-core combine of the BN sum/sumsq scratch; with the
    # cross-tile stats accumulation both axes must stay "arbitrary" on a single core.
    probs, _, _, _ = pl.pallas_call(
        kernel,
        grid=(NUM_PASSES, nb),
        in_specs=in_specs,
        out_specs=out_specs,
        out_shape=out_shape,
        scratch_shapes=scratch_shapes,
        compiler_params=pltpu.CompilerParams(
            dimension_semantics=("arbitrary", "arbitrary"),
            vmem_limit_bytes=_vmem_limit_bytes()),
    )(xflat, packed["wc"], packed["bc"], packed["w1"], packed["aux1"],
      packed["w2"], packed["aux2"], packed["w3"], packed["aux3"],
      packed["w4"], packed["b4"])
    return probs[:B, :NUM_CLASSES]


# ---------------- Deterministic parameter init (mirrors the nn module shapes) ----------------
def init_params(key):
    ks = jax.random.split(key, 9)

    # nn.Embedding(5, 30, padding_idx=-1, max_norm=1.0): N(0,1) init, padding row zeroed.
    # TODO(synk): max_norm renorm is applied once to the (frozen) table here rather than
    # in-place at every lookup as PyTorch does; equivalent for pure inference.
    emb = jax.random.normal(ks[0], (N_CODES, EMB_SIZE), jnp.float32)
    emb = emb.at[N_CODES - 1].set(0.0)
    norm = jnp.linalg.norm(emb, axis=1, keepdims=True)
    emb = jnp.where(norm > 1.0, emb * (1.0 / (norm + 1e-7)), emb)

    def linear(k, out_f, in_f):
        k1, k2 = jax.random.split(k)
        bound = 1.0 / (in_f ** 0.5)
        w = jax.random.uniform(k1, (out_f, in_f), jnp.float32, -bound, bound)
        b = jax.random.uniform(k2, (out_f,), jnp.float32, -bound, bound)
        return w, b

    def bn(k, n):
        k1, k2 = jax.random.split(k)
        g = jax.random.uniform(k1, (n,), jnp.float32, 0.8, 1.2)
        b = jax.random.uniform(k2, (n,), jnp.float32, -0.1, 0.1)
        return g, b

    fc_w, fc_b = linear(ks[1], NUM_NEW_FEATURES, NUM_FEATURES)
    w1, b1 = linear(ks[2], H1, NUM_NEW_FEATURES * EMB_SIZE)
    g1, be1 = bn(ks[3], H1)
    w2, b2 = linear(ks[4], H2, H1)
    g2, be2 = bn(ks[5], H2)
    w3, b3 = linear(ks[6], HIDDEN, H2)
    g3, be3 = bn(ks[7], HIDDEN)
    w4, b4 = linear(ks[8], NUM_CLASSES, HIDDEN)
    return dict(emb_w=emb, fc_w=fc_w, fc_b=fc_b,
                w1=w1, b1=b1, g1=g1, be1=be1,
                w2=w2, b2=b2, g2=g2, be2=be2,
                w3=w3, b3=b3, g3=g3, be3=be3,
                w4=w4, b4=b4)


# ---------------- Pure-JAX f32 reference mirroring the PyTorch forward -----------------------
def ref_forward(x, p):
    E = jnp.einsum("bfc,ce->bfe", x, p["emb_w"])                    # (B,60,30)
    t = jnp.transpose(E, (0, 2, 1))                                 # (B,30,60)
    y = jnp.einsum("bef,nf->ben", t, p["fc_w"]) + p["fc_b"]         # (B,30,20)
    y = jnp.maximum(y, 0.0)
    h = jnp.transpose(y, (0, 2, 1)).reshape(x.shape[0], -1)         # (B,600)
    for w, b, g, be in ((p["w1"], p["b1"], p["g1"], p["be1"]),
                        (p["w2"], p["b2"], p["g2"], p["be2"]),
                        (p["w3"], p["b3"], p["g3"], p["be3"])):
        h = h @ w.T + b
        m = jnp.mean(h, axis=0, keepdims=True)
        v = jnp.mean((h - m) ** 2, axis=0, keepdims=True)
        h = jnp.maximum((h - m) / jnp.sqrt(v + BN_EPS) * g + be, 0.0)
    logits = h @ p["w4"].T + p["b4"]
    return jax.nn.softmax(logits, axis=1)


if __name__ == "__main__":
    key = jax.random.PRNGKey(0)
    kx, kp = jax.random.split(key)
    B = 200                                   # not a multiple of the tile -> exercises masking
    x = jax.random.uniform(kx, (B, NUM_FEATURES, N_CODES), jnp.float32)

    params = init_params(kp)
    packed = prepack_params(params)           # one-time weight folding / packing

    fwd = jax.jit(mlp_forward, static_argnames=("tb",))
    out = jax.block_until_ready(fwd(x, packed, tb=128))   # grid = (4 passes, 2 batch tiles)
    ref = ref_forward(x, params)

    assert out.shape == (B, NUM_CLASSES)
    assert bool(jnp.all(jnp.isfinite(out)))
    # approx reciprocal in the softmax: rows sum to 1 within ~1e-3
    assert bool(jnp.allclose(jnp.sum(out, axis=1), 1.0, atol=5e-3))
    assert bool(jnp.allclose(out, ref, atol=2e-2, rtol=2e-2))
    print("KERNEL_OK")
</pallas_src>

<mosaic_0001>
module attributes {stable_mosaic.version = 11 : i64} {
  func.func @fused_mlp_kernel(%arg0: i32, %arg1: i32, %arg2: memref<128x384xbf16, #tpu.memory_space<vmem>>, %arg3: memref<384x640xbf16, #tpu.memory_space<vmem>>, %arg4: memref<1x640xf32, #tpu.memory_space<vmem>>, %arg5: memref<640x512xbf16, #tpu.memory_space<vmem>>, %arg6: memref<3x512xf32, #tpu.memory_space<vmem>>, %arg7: memref<512x128xbf16, #tpu.memory_space<vmem>>, %arg8: memref<3x128xf32, #tpu.memory_space<vmem>>, %arg9: memref<128x128xbf16, #tpu.memory_space<vmem>>, %arg10: memref<3x128xf32, #tpu.memory_space<vmem>>, %arg11: memref<128x128xf32, #tpu.memory_space<vmem>>, %arg12: memref<1x128xf32, #tpu.memory_space<vmem>>, %arg13: memref<128x128xf32, #tpu.memory_space<vmem>>, %arg14: memref<256x512xf32, #tpu.memory_space<any>>, %arg15: memref<256x128xf32, #tpu.memory_space<any>>, %arg16: memref<256x128xf32, #tpu.memory_space<any>>, %arg17: memref<128x512xf32, #tpu.memory_space<vmem>>, %arg18: memref<128x128xf32, #tpu.memory_space<vmem>>, %arg19: memref<128x128xf32, #tpu.memory_space<vmem>>, %arg20: memref<2x512xf32, #tpu.memory_space<vmem>>, %arg21: memref<2x128xf32, #tpu.memory_space<vmem>>, %arg22: memref<2x128xf32, #tpu.memory_space<vmem>>, %arg23: memref<!tpu.dma_semaphore, #tpu.memory_space<semaphore_mem>>) attributes {dimension_semantics = [#tpu.dimension_semantics<arbitrary>, #tpu.dimension_semantics<arbitrary>], iteration_bounds = array<i64: 4, 2>, scalar_prefetch = 0 : i64, scratch_operands = 7 : i64, tpu.core_type = #tpu.core_type<tc>, window_params = [{transform_indices = @transform_0, window_bounds = array<i64: 128, 384>}, {pipeline_mode = #tpu.pipeline_mode<synchronous>, transform_indices = @transform_1, window_bounds = array<i64: 384, 640>}, {pipeline_mode = #tpu.pipeline_mode<synchronous>, transform_indices = @transform_2, window_bounds = array<i64: 1, 640>}, {pipeline_mode = #tpu.pipeline_mode<synchronous>, transform_indices = @transform_3, window_bounds = array<i64: 640, 512>}, {pipeline_mode = #tpu.pipeline_mode<synchronous>, transform_indices = @transform_4, window_bounds = array<i64: 3, 512>}, {pipeline_mode = #tpu.pipeline_mode<synchronous>, transform_indices = @transform_5, window_bounds = array<i64: 512, 128>}, {pipeline_mode = #tpu.pipeline_mode<synchronous>, transform_indices = @transform_6, window_bounds = array<i64: 3, 128>}, {pipeline_mode = #tpu.pipeline_mode<synchronous>, transform_indices = @transform_7, window_bounds = array<i64: 128, 128>}, {pipeline_mode = #tpu.pipeline_mode<synchronous>, transform_indices = @transform_8, window_bounds = array<i64: 3, 128>}, {pipeline_mode = #tpu.pipeline_mode<synchronous>, transform_indices = @transform_9, window_bounds = array<i64: 128, 128>}, {pipeline_mode = #tpu.pipeline_mode<synchronous>, transform_indices = @transform_10, window_bounds = array<i64: 1, 128>}, {transform_indices = @transform_11, window_bounds = array<i64: 128, 128>}, {}, {}, {}]} {
    %c128_i32 = arith.constant 128 : i32
    %0 = arith.muli %arg1, %c128_i32 : i32
    %1 = tpu.assume_multiple %0, 8 : i32
    %c0_i32 = arith.constant 0 : i32
    %2 = arith.cmpi eq, %arg0, %c0_i32 : i32
    %c0_i32_0 = arith.constant 0 : i32
    %3 = arith.cmpi eq, %arg1, %c0_i32_0 : i32
    %4 = arith.andi %2, %3 : i1
    %5 = arith.extui %4 : i1 to i32
    %c0_i32_1 = arith.constant 0 : i32
    %6 = arith.cmpi ne, %5, %c0_i32_1 : i32
    scf.if %6 {
      %cst = arith.constant 0.000000e+00 : f32
      %19 = vector.broadcast %cst : f32 to vector<2x512xf32>
      %c0 = arith.constant 0 : index
      %c0_7 = arith.constant 0 : index
      %20 = vector.load %arg20[%c0, %c0_7] : memref<2x512xf32, #tpu.memory_space<vmem>>, vector<2x512xf32>
      tpu.vector_store %arg20[%c0, %c0_7], %19 {strides = array<i32>} : memref<2x512xf32, #tpu.memory_space<vmem>>, vector<2x512xf32>,
      %cst_8 = arith.constant 0.000000e+00 : f32
      %21 = vector.broadcast %cst_8 : f32 to vector<2x128xf32>
      %c0_9 = arith.constant 0 : index
      %c0_10 = arith.constant 0 : index
      %22 = vector.load %arg21[%c0_9, %c0_10] : memref<2x128xf32, #tpu.memory_space<vmem>>, vector<2x128xf32>
      tpu.vector_store %arg21[%c0_9, %c0_10], %21 {strides = array<i32>} : memref<2x128xf32, #tpu.memory_space<vmem>>, vector<2x128xf32>,
      %cst_11 = arith.constant 0.000000e+00 : f32
      %23 = vector.broadcast %cst_11 : f32 to vector<2x128xf32>
      %c0_12 = arith.constant 0 : index
      %c0_13 = arith.constant 0 : index
      %24 = vector.load %arg22[%c0_12, %c0_13] : memref<2x128xf32, #tpu.memory_space<vmem>>, vector<2x128xf32>
      tpu.vector_store %arg22[%c0_12, %c0_13], %23 {strides = array<i32>} : memref<2x128xf32, #tpu.memory_space<vmem>>, vector<2x128xf32>,
    } else {
    }
    %c0_i32_2 = arith.constant 0 : i32
    %7 = arith.cmpi eq, %arg0, %c0_i32_2 : i32
    %8 = arith.extui %7 : i1 to i32
    %c0_i32_3 = arith.constant 0 : i32
    %9 = arith.cmpi ne, %8, %c0_i32_3 : i32
    scf.if %9 {
      %c0 = arith.constant 0 : index
      %c0_7 = arith.constant 0 : index
      %19 = vector.load %arg2[%c0, %c0_7] : memref<128x384xbf16, #tpu.memory_space<vmem>>, vector<128x384xbf16>
      %c0_8 = arith.constant 0 : index
      %c0_9 = arith.constant 0 : index
      %20 = vector.load %arg4[%c0_8, %c0_9] : memref<1x640xf32, #tpu.memory_space<vmem>>, vector<1x640xf32>
      %c0_10 = arith.constant 0 : index
      %c0_11 = arith.constant 0 : index
      %21 = vector.load %arg3[%c0_10, %c0_11] : memref<384x640xbf16, #tpu.memory_space<vmem>>, vector<384x640xbf16>
      %cst = arith.constant dense<0.000000e+00> : vector<128x640xf32>
      %22 = tpu.matmul %19, %21, %cst {dimension_numbers = #tpu.dot_dimension_numbers<[1], [0], [0], [1], [0, 0, 1, 1], [], []>} : vector<128x384xbf16>, vector<384x640xbf16>, vector<128x640xf32> -> vector<128x640xf32>
      %23 = vector.broadcast %20 : vector<1x640xf32> to vector<128x640xf32>
      %24 = arith.addf %22, %23 : vector<128x640xf32>
      %cst_12 = arith.constant 0.000000e+00 : f32
      %25 = vector.broadcast %cst_12 : f32 to vector<128x640xf32>
      %26 = arith.maximumf %24, %25 : vector<128x640xf32>
      %c0_13 = arith.constant 0 : index
      %c0_14 = arith.constant 0 : index
      %27 = vector.load %arg6[%c0_13, %c0_14] : memref<3x512xf32, #tpu.memory_space<vmem>>, vector<1x512xf32>
      %28 = arith.truncf %26 : vector<128x640xf32> to vector<128x640xbf16>
      %c0_15 = arith.constant 0 : index
      %c0_16 = arith.constant 0 : index
      %29 = vector.load %arg5[%c0_15, %c0_16] : memref<640x512xbf16, #tpu.memory_space<vmem>>, vector<640x512xbf16>
      %cst_17 = arith.constant dense<0.000000e+00> : vector<128x512xf32>
      %30 = tpu.matmul %28, %29, %cst_17 {dimension_numbers = #tpu.dot_dimension_numbers<[1], [0], [0], [1], [0, 0, 1, 1], [], []>} : vector<128x640xbf16>, vector<640x512xbf16>, vector<128x512xf32> -> vector<128x512xf32>
      %31 = vector.broadcast %27 : vector<1x512xf32> to vector<128x512xf32>
      %32 = arith.addf %30, %31 : vector<128x512xf32>
      %33 = tpu.iota {dimensions = array<i32: 0>} : vector<128x1xi32>
      %34 = vector.broadcast %1 : i32 to vector<128x1xi32>
      %35 = arith.addi %34, %33 : vector<128x1xi32>
      %c200_i32 = arith.constant 200 : i32
      %36 = vector.broadcast %c200_i32 : i32 to vector<128x1xi32>
      %37 = arith.cmpi slt, %35, %36 : vector<128x1xi32>
      %38 = arith.extui %37 : vector<128x1xi1> to vector<128x1xi32>
      %39 = arith.sitofp %38 : vector<128x1xi32> to vector<128x1xf32>
      %40 = vector.broadcast %39 : vector<128x1xf32> to vector<128x512xf32>
      %41 = arith.mulf %32, %40 : vector<128x512xf32>
      %c0_18 = arith.constant 0 : index
      %c0_19 = arith.constant 0 : index
      %42 = vector.load %arg20[%c0_18, %c0_19] : memref<2x512xf32, #tpu.memory_space<vmem>>, vector<1x512xf32>
      %cst_20 = arith.constant dense<0.000000e+00> : vector<512xf32>
      %43 = vector.multi_reduction <add>, %41, %cst_20 [0] : vector<128x512xf32> to vector<512xf32>
      %44 = vector.shape_cast %43 : vector<512xf32> to vector<1x512xf32>
      %45 = arith.addf %42, %44 : vector<1x512xf32>
      %c0_21 = arith.constant 0 : index
      %c0_22 = arith.constant 0 : index
      %46 = vector.load %arg20[%c0_21, %c0_22] : memref<2x512xf32, #tpu.memory_space<vmem>>, vector<1x512xf32>
      tpu.vector_store %arg20[%c0_21, %c0_22], %45 {strides = array<i32>} : memref<2x512xf32, #tpu.memory_space<vmem>>, vector<1x512xf32>,
      %c1 = arith.constant 1 : index
      %c0_23 = arith.constant 0 : index
      %47 = vector.load %arg20[%c1, %c0_23] : memref<2x512xf32, #tpu.memory_space<vmem>>, vector<1x512xf32>
      %48 = arith.mulf %41, %41 : vector<128x512xf32>
      %cst_24 = arith.constant dense<0.000000e+00> : vector<512xf32>
      %49 = vector.multi_reduction <add>, %48, %cst_24 [0] : vector<128x512xf32> to vector<512xf32>
      %50 = vector.shape_cast %49 : vector<512xf32> to vector<1x512xf32>
      %51 = arith.addf %47, %50 : vector<1x512xf32>
      %c1_25 = arith.constant 1 : index
      %c0_26 = arith.constant 0 : index
      %52 = vector.load %arg20[%c1_25, %c0_26] : memref<2x512xf32, #tpu.memory_space<vmem>>, vector<1x512xf32>
      tpu.vector_store %arg20[%c1_25, %c0_26], %51 {strides = array<i32>} : memref<2x512xf32, #tpu.memory_space<vmem>>, vector<1x512xf32>,
      %c0_27 = arith.constant 0 : index
      %c0_28 = arith.constant 0 : index
      %53 = vector.load %arg17[%c0_27, %c0_28] : memref<128x512xf32, #tpu.memory_space<vmem>>, vector<128x512xf32>
      tpu.vector_store %arg17[%c0_27, %c0_28], %32 {strides = array<i32>} : memref<128x512xf32, #tpu.memory_space<vmem>>, vector<128x512xf32>,
      %c0_i32_29 = arith.constant 0 : i32
      %54 = tpu.memref_slice %arg14[%1, %c0_i32_29] : memref<256x512xf32, #tpu.memory_space<any>> -> memref<128x512xf32, #tpu.memory_space<any>>
      tpu.enqueue_dma source(%arg17 : memref<128x512xf32, #tpu.memory_space<vmem>>) target(%54 : memref<128x512xf32, #tpu.memory_space<any>>) target_semaphore(%arg23 : memref<!tpu.dma_semaphore, #tpu.memory_space<semaphore_mem>>)
      %c0_i32_30 = arith.constant 0 : i32
      %55 = tpu.memref_slice %arg14[%1, %c0_i32_30] : memref<256x512xf32, #tpu.memory_space<any>> -> memref<128x512xf32, #tpu.memory_space<any>>
      tpu.wait_dma2 semaphore(%arg23 : memref<!tpu.dma_semaphore, #tpu.memory_space<semaphore_mem>>) src(%arg17 : memref<128x512xf32, #tpu.memory_space<vmem>>) dst(%55 : memref<128x512xf32, #tpu.memory_space<any>>)
    } else {
    }
    %c1_i32 = arith.constant 1 : i32
    %10 = arith.cmpi eq, %arg0, %c1_i32 : i32
    %11 = arith.extui %10 : i1 to i32
    %c0_i32_4 = arith.constant 0 : i32
    %12 = arith.cmpi ne, %11, %c0_i32_4 : i32
    scf.if %12 {
      %c0_i32_7 = arith.constant 0 : i32
      %19 = tpu.memref_slice %arg14[%1, %c0_i32_7] : memref<256x512xf32, #tpu.memory_space<any>> -> memref<128x512xf32, #tpu.memory_space<any>>
      tpu.enqueue_dma source(%19 : memref<128x512xf32, #tpu.memory_space<any>>) target(%arg17 : memref<128x512xf32, #tpu.memory_space<vmem>>) target_semaphore(%arg23 : memref<!tpu.dma_semaphore, #tpu.memory_space<semaphore_mem>>)
      %c0_i32_8 = arith.constant 0 : i32
      %20 = tpu.memref_slice %arg14[%1, %c0_i32_8] : memref<256x512xf32, #tpu.memory_space<any>> -> memref<128x512xf32, #tpu.memory_space<any>>
      tpu.wait_dma2 semaphore(%arg23 : memref<!tpu.dma_semaphore, #tpu.memory_space<semaphore_mem>>) src(%20 : memref<128x512xf32, #tpu.memory_space<any>>) dst(%arg17 : memref<128x512xf32, #tpu.memory_space<vmem>>)
      %c0 = arith.constant 0 : index
      %c0_9 = arith.constant 0 : index
      %21 = vector.load %arg17[%c0, %c0_9] : memref<128x512xf32, #tpu.memory_space<vmem>>, vector<128x512xf32>
      %c0_10 = arith.constant 0 : index
      %c0_11 = arith.constant 0 : index
      %22 = vector.load %arg20[%c0_10, %c0_11] : memref<2x512xf32, #tpu.memory_space<vmem>>, vector<1x512xf32>
      %cst = arith.constant 5.000000e-03 : f32
      %23 = vector.broadcast %cst : f32 to vector<1x512xf32>
      %24 = arith.mulf %22, %23 : vector<1x512xf32>
      %c1 = arith.constant 1 : index
      %c0_12 = arith.constant 0 : index
      %25 = vector.load %arg20[%c1, %c0_12] : memref<2x512xf32, #tpu.memory_space<vmem>>, vector<1x512xf32>
      %cst_13 = arith.constant 5.000000e-03 : f32
      %26 = vector.broadcast %cst_13 : f32 to vector<1x512xf32>
      %27 = arith.mulf %25, %26 : vector<1x512xf32>
      %28 = arith.mulf %24, %24 : vector<1x512xf32>
      %29 = arith.subf %27, %28 : vector<1x512xf32>
      %cst_14 = arith.constant 0.000000e+00 : f32
      %30 = vector.broadcast %cst_14 : f32 to vector<1x512xf32>
      %31 = arith.maximumf %29, %30 : vector<1x512xf32>
      %c1_15 = arith.constant 1 : index
      %c0_16 = arith.constant 0 : index
      %32 = vector.load %arg6[%c1_15, %c0_16] : memref<3x512xf32, #tpu.memory_space<vmem>>, vector<1x512xf32>
      %cst_17 = arith.constant 9.99999974E-6 : f32
      %33 = vector.broadcast %cst_17 : f32 to vector<1x512xf32>
      %34 = arith.addf %31, %33 : vector<1x512xf32>
      %35 = math.rsqrt %34 : vector<1x512xf32>
      %36 = arith.mulf %32, %35 : vector<1x512xf32>
      %c2 = arith.constant 2 : index
      %c0_18 = arith.constant 0 : index
      %37 = vector.load %arg6[%c2, %c0_18] : memref<3x512xf32, #tpu.memory_space<vmem>>, vector<1x512xf32>
      %38 = arith.mulf %24, %36 : vector<1x512xf32>
      %39 = arith.subf %37, %38 : vector<1x512xf32>
      %40 = vector.broadcast %36 : vector<1x512xf32> to vector<128x512xf32>
      %41 = arith.mulf %21, %40 : vector<128x512xf32>
      %42 = vector.broadcast %39 : vector<1x512xf32> to vector<128x512xf32>
      %43 = arith.addf %41, %42 : vector<128x512xf32>
      %cst_19 = arith.constant 0.000000e+00 : f32
      %44 = vector.broadcast %cst_19 : f32 to vector<128x512xf32>
      %45 = arith.maximumf %43, %44 : vector<128x512xf32>
      %c0_20 = arith.constant 0 : index
      %c0_21 = arith.constant 0 : index
      %46 = vector.load %arg8[%c0_20, %c0_21] : memref<3x128xf32, #tpu.memory_space<vmem>>, vector<1x128xf32>
      %47 = arith.truncf %45 : vector<128x512xf32> to vector<128x512xbf16>
      %c0_22 = arith.constant 0 : index
      %c0_23 = arith.constant 0 : index
      %48 = vector.load %arg7[%c0_22, %c0_23] : memref<512x128xbf16, #tpu.memory_space<vmem>>, vector<512x128xbf16>
      %cst_24 = arith.constant dense<0.000000e+00> : vector<128x128xf32>
      %49 = tpu.matmul %47, %48, %cst_24 {dimension_numbers = #tpu.dot_dimension_numbers<[1], [0], [0], [1], [0, 0, 1, 1], [], []>} : vector<128x512xbf16>, vector<512x128xbf16>, vector<128x128xf32> -> vector<128x128xf32>
      %50 = vector.broadcast %46 : vector<1x128xf32> to vector<128x128xf32>
      %51 = arith.addf %49, %50 : vector<128x128xf32>
      %52 = tpu.iota {dimensions = array<i32: 0>} : vector<128x1xi32>
      %53 = vector.broadcast %1 : i32 to vector<128x1xi32>
      %54 = arith.addi %53, %52 : vector<128x1xi32>
      %c200_i32 = arith.constant 200 : i32
      %55 = vector.broadcast %c200_i32 : i32 to vector<128x1xi32>
      %56 = arith.cmpi slt, %54, %55 : vector<128x1xi32>
      %57 = arith.extui %56 : vector<128x1xi1> to vector<128x1xi32>
      %58 = arith.sitofp %57 : vector<128x1xi32> to vector<128x1xf32>
      %59 = vector.broadcast %58 : vector<128x1xf32> to vector<128x128xf32>
      %60 = arith.mulf %51, %59 : vector<128x128xf32>
      %c0_25 = arith.constant 0 : index
      %c0_26 = arith.constant 0 : index
      %61 = vector.load %arg21[%c0_25, %c0_26] : memref<2x128xf32, #tpu.memory_space<vmem>>, vector<1x128xf32>
      %cst_27 = arith.constant dense<0.000000e+00> : vector<128xf32>
      %62 = vector.multi_reduction <add>, %60, %cst_27 [0] : vector<128x128xf32> to vector<128xf32>
      %63 = vector.shape_cast %62 : vector<128xf32> to vector<1x128xf32>
      %64 = arith.addf %61, %63 : vector<1x128xf32>
      %c0_28 = arith.constant 0 : index
      %c0_29 = arith.constant 0 : index
      %65 = vector.load %arg21[%c0_28, %c0_29] : memref<2x128xf32, #tpu.memory_space<vmem>>, vector<1x128xf32>
      tpu.vector_store %arg21[%c0_28, %c0_29], %64 {strides = array<i32>} : memref<2x128xf32, #tpu.memory_space<vmem>>, vector<1x128xf32>,
      %c1_30 = arith.constant 1 : index
      %c0_31 = arith.constant 0 : index
      %66 = vector.load %arg21[%c1_30, %c0_31] : memref<2x128xf32, #tpu.memory_space<vmem>>, vector<1x128xf32>
      %67 = arith.mulf %60, %60 : vector<128x128xf32>
      %cst_32 = arith.constant dense<0.000000e+00> : vector<128xf32>
      %68 = vector.multi_reduction <add>, %67, %cst_32 [0] : vector<128x128xf32> to vector<128xf32>
      %69 = vector.shape_cast %68 : vector<128xf32> to vector<1x128xf32>
      %70 = arith.addf %66, %69 : vector<1x128xf32>
      %c1_33 = arith.constant 1 : index
      %c0_34 = arith.constant 0 : index
      %71 = vector.load %arg21[%c1_33, %c0_34] : memref<2x128xf32, #tpu.memory_space<vmem>>, vector<1x128xf32>
      tpu.vector_store %arg21[%c1_33, %c0_34], %70 {strides = array<i32>} : memref<2x128xf32, #tpu.memory_space<vmem>>, vector<1x128xf32>,
      %c0_35 = arith.constant 0 : index
      %c0_36 = arith.constant 0 : index
      %72 = vector.load %arg18[%c0_35, %c0_36] : memref<128x128xf32, #tpu.memory_space<vmem>>, vector<128x128xf32>
      tpu.vector_store %arg18[%c0_35, %c0_36], %51 {strides = array<i32>} : memref<128x128xf32, #tpu.memory_space<vmem>>, vector<128x128xf32>,
      %c0_i32_37 = arith.constant 0 : i32
      %73 = tpu.memref_slice %arg15[%1, %c0_i32_37] : memref<256x128xf32, #tpu.memory_space<any>> -> memref<128x128xf32, #tpu.memory_space<any>>
      tpu.enqueue_dma source(%arg18 : memref<128x128xf32, #tpu.memory_space<vmem>>) target(%73 : memref<128x128xf32, #tpu.memory_space<any>>) target_semaphore(%arg23 : memref<!tpu.dma_semaphore, #tpu.memory_space<semaphore_mem>>)
      %c0_i32_38 = arith.constant 0 : i32
      %74 = tpu.memref_slice %arg15[%1, %c0_i32_38] : memref<256x128xf32, #tpu.memory_space<any>> -> memref<128x128xf32, #tpu.memory_space<any>>
      tpu.wait_dma2 semaphore(%arg23 : memref<!tpu.dma_semaphore, #tpu.memory_space<semaphore_mem>>) src(%arg18 : memref<128x128xf32, #tpu.memory_space<vmem>>) dst(%74 : memref<128x128xf32, #tpu.memory_space<any>>)
    } else {
    }
    %c2_i32 = arith.constant 2 : i32
    %13 = arith.cmpi eq, %arg0, %c2_i32 : i32
    %14 = arith.extui %13 : i1 to i32
    %c0_i32_5 = arith.constant 0 : i32
    %15 = arith.cmpi ne, %14, %c0_i32_5 : i32
    scf.if %15 {
      %c0_i32_7 = arith.constant 0 : i32
      %19 = tpu.memref_slice %arg15[%1, %c0_i32_7] : memref<256x128xf32, #tpu.memory_space<any>> -> memref<128x128xf32, #tpu.memory_space<any>>
      tpu.enqueue_dma source(%19 : memref<128x128xf32, #tpu.memory_space<any>>) target(%arg18 : memref<128x128xf32, #tpu.memory_space<vmem>>) target_semaphore(%arg23 : memref<!tpu.dma_semaphore, #tpu.memory_space<semaphore_mem>>)
      %c0_i32_8 = arith.constant 0 : i32
      %20 = tpu.memref_slice %arg15[%1, %c0_i32_8] : memref<256x128xf32, #tpu.memory_space<any>> -> memref<128x128xf32, #tpu.memory_space<any>>
      tpu.wait_dma2 semaphore(%arg23 : memref<!tpu.dma_semaphore, #tpu.memory_space<semaphore_mem>>) src(%20 : memref<128x128xf32, #tpu.memory_space<any>>) dst(%arg18 : memref<128x128xf32, #tpu.memory_space<vmem>>)
      %c0 = arith.constant 0 : index
      %c0_9 = arith.constant 0 : index
      %21 = vector.load %arg18[%c0, %c0_9] : memref<128x128xf32, #tpu.memory_space<vmem>>, vector<128x128xf32>
      %c0_10 = arith.constant 0 : index
      %c0_11 = arith.constant 0 : index
      %22 = vector.load %arg21[%c0_10, %c0_11] : memref<2x128xf32, #tpu.memory_space<vmem>>, vector<1x128xf32>
      %cst = arith.constant 5.000000e-03 : f32
      %23 = vector.broadcast %cst : f32 to vector<1x128xf32>
      %24 = arith.mulf %22, %23 : vector<1x128xf32>
      %c1 = arith.constant 1 : index
      %c0_12 = arith.constant 0 : index
      %25 = vector.load %arg21[%c1, %c0_12] : memref<2x128xf32, #tpu.memory_space<vmem>>, vector<1x128xf32>
      %cst_13 = arith.constant 5.000000e-03 : f32
      %26 = vector.broadcast %cst_13 : f32 to vector<1x128xf32>
      %27 = arith.mulf %25, %26 : vector<1x128xf32>
      %28 = arith.mulf %24, %24 : vector<1x128xf32>
      %29 = arith.subf %27, %28 : vector<1x128xf32>
      %cst_14 = arith.constant 0.000000e+00 : f32
      %30 = vector.broadcast %cst_14 : f32 to vector<1x128xf32>
      %31 = arith.maximumf %29, %30 : vector<1x128xf32>
      %c1_15 = arith.constant 1 : index
      %c0_16 = arith.constant 0 : index
      %32 = vector.load %arg8[%c1_15, %c0_16] : memref<3x128xf32, #tpu.memory_space<vmem>>, vector<1x128xf32>
      %cst_17 = arith.constant 9.99999974E-6 : f32
      %33 = vector.broadcast %cst_17 : f32 to vector<1x128xf32>
      %34 = arith.addf %31, %33 : vector<1x128xf32>
      %35 = math.rsqrt %34 : vector<1x128xf32>
      %36 = arith.mulf %32, %35 : vector<1x128xf32>
      %c2 = arith.constant 2 : index
      %c0_18 = arith.constant 0 : index
      %37 = vector.load %arg8[%c2, %c0_18] : memref<3x128xf32, #tpu.memory_space<vmem>>, vector<1x128xf32>
      %38 = arith.mulf %24, %36 : vector<1x128xf32>
      %39 = arith.subf %37, %38 : vector<1x128xf32>
      %40 = vector.broadcast %36 : vector<1x128xf32> to vector<128x128xf32>
      %41 = arith.mulf %21, %40 : vector<128x128xf32>
      %42 = vector.broadcast %39 : vector<1x128xf32> to vector<128x128xf32>
      %43 = arith.addf %41, %42 : vector<128x128xf32>
      %cst_19 = arith.constant 0.000000e+00 : f32
      %44 = vector.broadcast %cst_19 : f32 to vector<128x128xf32>
      %45 = arith.maximumf %43, %44 : vector<128x128xf32>
      %c0_20 = arith.constant 0 : index
      %c0_21 = arith.constant 0 : index
      %46 = vector.load %arg10[%c0_20, %c0_21] : memref<3x128xf32, #tpu.memory_space<vmem>>, vector<1x128xf32>
      %47 = arith.truncf %45 : vector<128x128xf32> to vector<128x128xbf16>
      %c0_22 = arith.constant 0 : index
      %c0_23 = arith.constant 0 : index
      %48 = vector.load %arg9[%c0_22, %c0_23] : memref<128x128xbf16, #tpu.memory_space<vmem>>, vector<128x128xbf16>
      %cst_24 = arith.constant dense<0.000000e+00> : vector<128x128xf32>
      %49 = tpu.matmul %47, %48, %cst_24 {dimension_numbers = #tpu.dot_dimension_numbers<[1], [0], [0], [1], [0, 0, 1, 1], [], []>} : vector<128x128xbf16>, vector<128x128xbf16>, vector<128x128xf32> -> vector<128x128xf32>
      %50 = vector.broadcast %46 : vector<1x128xf32> to vector<128x128xf32>
      %51 = arith.addf %49, %50 : vector<128x128xf32>
      %52 = tpu.iota {dimensions = array<i32: 0>} : vector<128x1xi32>
      %53 = vector.broadcast %1 : i32 to vector<128x1xi32>
      %54 = arith.addi %53, %52 : vector<128x1xi32>
      %c200_i32 = arith.constant 200 : i32
      %55 = vector.broadcast %c200_i32 : i32 to vector<128x1xi32>
      %56 = arith.cmpi slt, %54, %55 : vector<128x1xi32>
      %57 = arith.extui %56 : vector<128x1xi1> to vector<128x1xi32>
      %58 = arith.sitofp %57 : vector<128x1xi32> to vector<128x1xf32>
      %59 = vector.broadcast %58 : vector<128x1xf32> to vector<128x128xf32>
      %60 = arith.mulf %51, %59 : vector<128x128xf32>
      %c0_25 = arith.constant 0 : index
      %c0_26 = arith.constant 0 : index
      %61 = vector.load %arg22[%c0_25, %c0_26] : memref<2x128xf32, #tpu.memory_space<vmem>>, vector<1x128xf32>
      %cst_27 = arith.constant dense<0.000000e+00> : vector<128xf32>
      %62 = vector.multi_reduction <add>, %60, %cst_27 [0] : vector<128x128xf32> to vector<128xf32>
      %63 = vector.shape_cast %62 : vector<128xf32> to vector<1x128xf32>
      %64 = arith.addf %61, %63 : vector<1x128xf32>
      %c0_28 = arith.constant 0 : index
      %c0_29 = arith.constant 0 : index
      %65 = vector.load %arg22[%c0_28, %c0_29] : memref<2x128xf32, #tpu.memory_space<vmem>>, vector<1x128xf32>
      tpu.vector_store %arg22[%c0_28, %c0_29], %64 {strides = array<i32>} : memref<2x128xf32, #tpu.memory_space<vmem>>, vector<1x128xf32>,
      %c1_30 = arith.constant 1 : index
      %c0_31 = arith.constant 0 : index
      %66 = vector.load %arg22[%c1_30, %c0_31] : memref<2x128xf32, #tpu.memory_space<vmem>>, vector<1x128xf32>
      %67 = arith.mulf %60, %60 : vector<128x128xf32>
      %cst_32 = arith.constant dense<0.000000e+00> : vector<128xf32>
      %68 = vector.multi_reduction <add>, %67, %cst_32 [0] : vector<128x128xf32> to vector<128xf32>
      %69 = vector.shape_cast %68 : vector<128xf32> to vector<1x128xf32>
      %70 = arith.addf %66, %69 : vector<1x128xf32>
      %c1_33 = arith.constant 1 : index
      %c0_34 = arith.constant 0 : index
      %71 = vector.load %arg22[%c1_33, %c0_34] : memref<2x128xf32, #tpu.memory_space<vmem>>, vector<1x128xf32>
      tpu.vector_store %arg22[%c1_33, %c0_34], %70 {strides = array<i32>} : memref<2x128xf32, #tpu.memory_space<vmem>>, vector<1x128xf32>,
      %c0_35 = arith.constant 0 : index
      %c0_36 = arith.constant 0 : index
      %72 = vector.load %arg19[%c0_35, %c0_36] : memref<128x128xf32, #tpu.memory_space<vmem>>, vector<128x128xf32>
      tpu.vector_store %arg19[%c0_35, %c0_36], %51 {strides = array<i32>} : memref<128x128xf32, #tpu.memory_space<vmem>>, vector<128x128xf32>,
      %c0_i32_37 = arith.constant 0 : i32
      %73 = tpu.memref_slice %arg16[%1, %c0_i32_37] : memref<256x128xf32, #tpu.memory_space<any>> -> memref<128x128xf32, #tpu.memory_space<any>>
      tpu.enqueue_dma source(%arg19 : memref<128x128xf32, #tpu.memory_space<vmem>>) target(%73 : memref<128x128xf32, #tpu.memory_space<any>>) target_semaphore(%arg23 : memref<!tpu.dma_semaphore, #tpu.memory_space<semaphore_mem>>)
      %c0_i32_38 = arith.constant 0 : i32
      %74 = tpu.memref_slice %arg16[%1, %c0_i32_38] : memref<256x128xf32, #tpu.memory_space<any>> -> memref<128x128xf32, #tpu.memory_space<any>>
      tpu.wait_dma2 semaphore(%arg23 : memref<!tpu.dma_semaphore, #tpu.memory_space<semaphore_mem>>) src(%arg19 : memref<128x128xf32, #tpu.memory_space<vmem>>) dst(%74 : memref<128x128xf32, #tpu.memory_space<any>>)
    } else {
    }
    %c3_i32 = arith.constant 3 : i32
    %16 = arith.cmpi eq, %arg0, %c3_i32 : i32
    %17 = arith.extui %16 : i1 to i32
    %c0_i32_6 = arith.constant 0 : i32
    %18 = arith.cmpi ne, %17, %c0_i32_6 : i32
    scf.if %18 {
      %c0_i32_7 = arith.constant 0 : i32
      %19 = tpu.memref_slice %arg16[%1, %c0_i32_7] : memref<256x128xf32, #tpu.memory_space<any>> -> memref<128x128xf32, #tpu.memory_space<any>>
      tpu.enqueue_dma source(%19 : memref<128x128xf32, #tpu.memory_space<any>>) target(%arg19 : memref<128x128xf32, #tpu.memory_space<vmem>>) target_semaphore(%arg23 : memref<!tpu.dma_semaphore, #tpu.memory_space<semaphore_mem>>)
      %c0_i32_8 = arith.constant 0 : i32
      %20 = tpu.memref_slice %arg16[%1, %c0_i32_8] : memref<256x128xf32, #tpu.memory_space<any>> -> memref<128x128xf32, #tpu.memory_space<any>>
      tpu.wait_dma2 semaphore(%arg23 : memref<!tpu.dma_semaphore, #tpu.memory_space<semaphore_mem>>) src(%20 : memref<128x128xf32, #tpu.memory_space<any>>) dst(%arg19 : memref<128x128xf32, #tpu.memory_space<vmem>>)
      %c0 = arith.constant 0 : index
      %c0_9 = arith.constant 0 : index
      %21 = vector.load %arg19[%c0, %c0_9] : memref<128x128xf32, #tpu.memory_space<vmem>>, vector<128x128xf32>
      %c0_10 = arith.constant 0 : index
      %c0_11 = arith.constant 0 : index
      %22 = vector.load %arg22[%c0_10, %c0_11] : memref<2x128xf32, #tpu.memory_space<vmem>>, vector<1x128xf32>
      %cst = arith.constant 5.000000e-03 : f32
      %23 = vector.broadcast %cst : f32 to vector<1x128xf32>
      %24 = arith.mulf %22, %23 : vector<1x128xf32>
      %c1 = arith.constant 1 : index
      %c0_12 = arith.constant 0 : index
      %25 = vector.load %arg22[%c1, %c0_12] : memref<2x128xf32, #tpu.memory_space<vmem>>, vector<1x128xf32>
      %cst_13 = arith.constant 5.000000e-03 : f32
      %26 = vector.broadcast %cst_13 : f32 to vector<1x128xf32>
      %27 = arith.mulf %25, %26 : vector<1x128xf32>
      %28 = arith.mulf %24, %24 : vector<1x128xf32>
      %29 = arith.subf %27, %28 : vector<1x128xf32>
      %cst_14 = arith.constant 0.000000e+00 : f32
      %30 = vector.broadcast %cst_14 : f32 to vector<1x128xf32>
      %31 = arith.maximumf %29, %30 : vector<1x128xf32>
      %c1_15 = arith.constant 1 : index
      %c0_16 = arith.constant 0 : index
      %32 = vector.load %arg10[%c1_15, %c0_16] : memref<3x128xf32, #tpu.memory_space<vmem>>, vector<1x128xf32>
      %cst_17 = arith.constant 9.99999974E-6 : f32
      %33 = vector.broadcast %cst_17 : f32 to vector<1x128xf32>
      %34 = arith.addf %31, %33 : vector<1x128xf32>
      %35 = math.rsqrt %34 : vector<1x128xf32>
      %36 = arith.mulf %32, %35 : vector<1x128xf32>
      %c2 = arith.constant 2 : index
      %c0_18 = arith.constant 0 : index
      %37 = vector.load %arg10[%c2, %c0_18] : memref<3x128xf32, #tpu.memory_space<vmem>>, vector<1x128xf32>
      %38 = arith.mulf %24, %36 : vector<1x128xf32>
      %39 = arith.subf %37, %38 : vector<1x128xf32>
      %40 = vector.broadcast %36 : vector<1x128xf32> to vector<128x128xf32>
      %41 = arith.mulf %21, %40 : vector<128x128xf32>
      %42 = vector.broadcast %39 : vector<1x128xf32> to vector<128x128xf32>
      %43 = arith.addf %41, %42 : vector<128x128xf32>
      %cst_19 = arith.constant 0.000000e+00 : f32
      %44 = vector.broadcast %cst_19 : f32 to vector<128x128xf32>
      %45 = arith.maximumf %43, %44 : vector<128x128xf32>
      %c0_20 = arith.constant 0 : index
      %c0_21 = arith.constant 0 : index
      %46 = vector.load %arg11[%c0_20, %c0_21] : memref<128x128xf32, #tpu.memory_space<vmem>>, vector<128x128xf32>
      %cst_22 = arith.constant dense<0.000000e+00> : vector<128x128xf32>
      %47 = tpu.matmul %45, %46, %cst_22 {dimension_numbers = #tpu.dot_dimension_numbers<[1], [0], [0], [1], [0, 0, 1, 1], [], []>} : vector<128x128xf32>, vector<128x128xf32>, vector<128x128xf32> -> vector<128x128xf32>
      %c0_23 = arith.constant 0 : index
      %c0_24 = arith.constant 0 : index
      %48 = vector.load %arg12[%c0_23, %c0_24] : memref<1x128xf32, #tpu.memory_space<vmem>>, vector<1x128xf32>
      %49 = vector.broadcast %48 : vector<1x128xf32> to vector<128x128xf32>
      %50 = arith.addf %47, %49 : vector<128x128xf32>
      %51 = vector.extract_strided_slice %50 {offsets = [0, 0], sizes = [128, 1], strides = [1, 1]} : vector<128x128xf32> to vector<128x1xf32>
      %52 = vector.extract_strided_slice %50 {offsets = [0, 1], sizes = [128, 1], strides = [1, 1]} : vector<128x128xf32> to vector<128x1xf32>
      %53 = vector.extract_strided_slice %50 {offsets = [0, 2], sizes = [128, 1], strides = [1, 1]} : vector<128x128xf32> to vector<128x1xf32>
      %54 = arith.maximumf %51, %52 : vector<128x1xf32>
      %55 = arith.maximumf %54, %53 : vector<128x1xf32>
      %56 = vector.broadcast %55 : vector<128x1xf32> to vector<128x128xf32>
      %57 = arith.subf %50, %56 : vector<128x128xf32>
      %58 = math.exp %57 : vector<128x128xf32>
      %59 = vector.extract_strided_slice %58 {offsets = [0, 0], sizes = [128, 1], strides = [1, 1]} : vector<128x128xf32> to vector<128x1xf32>
      %60 = vector.extract_strided_slice %58 {offsets = [0, 1], sizes = [128, 1], strides = [1, 1]} : vector<128x128xf32> to vector<128x1xf32>
      %61 = arith.addf %59, %60 : vector<128x1xf32>
      %62 = vector.extract_strided_slice %58 {offsets = [0, 2], sizes = [128, 1], strides = [1, 1]} : vector<128x128xf32> to vector<128x1xf32>
      %63 = arith.addf %61, %62 : vector<128x1xf32>
      %64 = tpu.reciprocal %63 {approx = true} : vector<128x1xf32> -> vector<128x1xf32>
      %65 = vector.broadcast %64 : vector<128x1xf32> to vector<128x128xf32>
      %66 = arith.mulf %58, %65 : vector<128x128xf32>
      %c0_25 = arith.constant 0 : index
      %c0_26 = arith.constant 0 : index
      %67 = vector.load %arg13[%c0_25, %c0_26] : memref<128x128xf32, #tpu.memory_space<vmem>>, vector<128x128xf32>
      tpu.vector_store %arg13[%c0_25, %c0_26], %66 {strides = array<i32>} : memref<128x128xf32, #tpu.memory_space<vmem>>, vector<128x128xf32>,
    } else {
    }
    return
  }
  func.func @transform_0(%arg0: i32, %arg1: i32) -> (i32, i32) {
    %c0_i32 = arith.constant 0 : i32
    %0 = arith.cmpi eq, %arg0, %c0_i32 : i32
    %c0_i32_0 = arith.constant 0 : i32
    %1 = arith.select %0, %arg1, %c0_i32_0 : i32
    %c0_i32_1 = arith.constant 0 : i32
    %c0_i32_2 = arith.constant 0 : i32
    return %1, %c0_i32_1 : i32, i32
  }
  func.func @transform_1(%arg0: i32, %arg1: i32) -> (i32, i32) {
    %c0_i32 = arith.constant 0 : i32
    %c0_i32_0 = arith.constant 0 : i32
    %c0_i32_1 = arith.constant 0 : i32
    return %c0_i32, %c0_i32_0 : i32, i32
  }
  func.func @transform_2(%arg0: i32, %arg1: i32) -> (i32, i32) {
    %c0_i32 = arith.constant 0 : i32
    %c0_i32_0 = arith.constant 0 : i32
    %c0_i32_1 = arith.constant 0 : i32
    return %c0_i32, %c0_i32_0 : i32, i32
  }
  func.func @transform_3(%arg0: i32, %arg1: i32) -> (i32, i32) {
    %c0_i32 = arith.constant 0 : i32
    %c0_i32_0 = arith.constant 0 : i32
    %c0_i32_1 = arith.constant 0 : i32
    return %c0_i32, %c0_i32_0 : i32, i32
  }
  func.func @transform_4(%arg0: i32, %arg1: i32) -> (i32, i32) {
    %c0_i32 = arith.constant 0 : i32
    %c0_i32_0 = arith.constant 0 : i32
    %c0_i32_1 = arith.constant 0 : i32
    return %c0_i32, %c0_i32_0 : i32, i32
  }
  func.func @transform_5(%arg0: i32, %arg1: i32) -> (i32, i32) {
    %c0_i32 = arith.constant 0 : i32
    %c0_i32_0 = arith.constant 0 : i32
    %c0_i32_1 = arith.constant 0 : i32
    return %c0_i32, %c0_i32_0 : i32, i32
  }
  func.func @transform_6(%arg0: i32, %arg1: i32) -> (i32, i32) {
    %c0_i32 = arith.constant 0 : i32
    %c0_i32_0 = arith.constant 0 : i32
    %c0_i32_1 = arith.constant 0 : i32
    return %c0_i32, %c0_i32_0 : i32, i32
  }
  func.func @transform_7(%arg0: i32, %arg1: i32) -> (i32, i32) {
    %c0_i32 = arith.constant 0 : i32
    %c0_i32_0 = arith.constant 0 : i32
    %c0_i32_1 = arith.constant 0 : i32
    return %c0_i32, %c0_i32_0 : i32, i32
  }
  func.func @transform_8(%arg0: i32, %arg1: i32) -> (i32, i32) {
    %c0_i32 = arith.constant 0 : i32
    %c0_i32_0 = arith.constant 0 : i32
    %c0_i32_1 = arith.constant 0 : i32
    return %c0_i32, %c0_i32_0 : i32, i32
  }
  func.func @transform_9(%arg0: i32, %arg1: i32) -> (i32, i32) {
    %c0_i32 = arith.constant 0 : i32
    %c0_i32_0 = arith.constant 0 : i32
    %c0_i32_1 = arith.constant 0 : i32
    return %c0_i32, %c0_i32_0 : i32, i32
  }
  func.func @transform_10(%arg0: i32, %arg1: i32) -> (i32, i32) {
    %c0_i32 = arith.constant 0 : i32
    %c0_i32_0 = arith.constant 0 : i32
    %c0_i32_1 = arith.constant 0 : i32
    return %c0_i32, %c0_i32_0 : i32, i32
  }
  func.func @transform_11(%arg0: i32, %arg1: i32) -> (i32, i32) {
    %c3_i32 = arith.constant 3 : i32
    %0 = arith.cmpi eq, %arg0, %c3_i32 : i32
    %c0_i32 = arith.constant 0 : i32
    %1 = arith.select %0, %arg1, %c0_i32 : i32
    %c0_i32_0 = arith.constant 0 : i32
    %c0_i32_1 = arith.constant 0 : i32
    return %1, %c0_i32_0 : i32, i32
  }
}

</mosaic_0001>

<bundles_post_ra>
// kernel: mlp_forward.1
= control target key start
LH: loop header
LB: loop body
LE: loop exit
PB: predicated region body
PF: predicated region fallthrough
CT: control target
= control target key end

     0   :  { %s8845_s29 = smov 0   ;;  %s8847_s30 = smov 0   ;;  %s11274_s0 = inlined_call_operand.vmem [shape: bf16[256,384], index: 0, kind: input, shape index: {}]   ;;  %s11275_s1 = inlined_call_operand.vmem [shape: bf16[384,640], index: 1, kind: input, shape index: {}]   ;;  %s11276_s2 = inlined_call_operand.vmem [shape: f32[1,640], index: 2, kind: input, shape index: {}]   ;;  %s11277_s3 = inlined_call_operand.vmem [shape: bf16[640,512], index: 3, kind: input, shape index: {}]   ;;  %s11278_s4 = inlined_call_operand.vmem [shape: f32[3,512], index: 4, kind: input, shape index: {}]   ;;  %s11279_s5 = inlined_call_operand.vmem [shape: bf16[512,128], index: 5, kind: input, shape index: {}]   ;;  %s11280_s6 = inlined_call_operand.vmem [shape: f32[3,128], index: 6, kind: input, shape index: {}]   ;;  %s11281_s7 = inlined_call_operand.vmem [shape: bf16[128,128], index: 7, kind: input, shape index: {}]   ;;  %s11282_s8 = inlined_call_operand.vmem [shape: f32[3,128], index: 8, kind: input, shape index: {}]   ;;  %s11283_s9 = inlined_call_operand.vmem [shape: f32[128,128], index: 9, kind: input, shape index: {}]   ;;  %s11284_s10 = inlined_call_operand.vmem [shape: f32[1,128], index: 10, kind: input, shape index: {}]   ;;  %s11285_s11 = inlined_call_operand.vmem [shape: f32[256,128], index: 11, kind: output, shape index: {0}]   ;;  %s11286_s12 = inlined_call_operand.hbm [shape: f32[256,512], index: 12, kind: output, shape index: {1}]   ;;  %s11287_s13 = inlined_call_operand.hbm [shape: f32[256,128], index: 13, kind: output, shape index: {2}]   ;;  %s11288_s14 = inlined_call_operand.hbm [shape: f32[256,128], index: 14, kind: output, shape index: {3}]  }
   0x1   :  { %11291 = sst [smem:[#allocation33_spill]] %s11274_s0  ;;  %s8849_s15 = smov 0  }
   0x2   :  { %11292 = sst [smem:[#allocation34_spill]] %s11275_s1  ;;  %s8851_s16 = smov 0  }
   0x3   :  { %s8853_s17 = smov 0  }
   0x4 LB: > { %11293 = sst [smem:[#allocation29_spill]] %s8745_s15  ;;  %s34_s18 = sadd.s32 1, %s8745_s15  ;;  %s8753_s17 = sphi %s8853_s17, %s25_s17   ;;  %s8749_s16 = sphi %s8851_s16, %s11302_s16   ;;  %s8745_s15 = sphi %s8849_s15, %s11301_s15   ;;  %s8741_s30 = sphi %s8847_s30, %s11300_s30   ;;  %s8737_s29 = sphi %s8845_s29, %s11299_s29  }
   0x5   : > { %11294 = sst [smem:[#allocation30_spill]] %s8749_s16  ;;  %s37_s19 = sadd.s32 1, %s8749_s16 }
   0x6   : > { %p35_p0 = scmp.ge.s32.totalorder %s34_s18, 2  ;;  %p6766_p1 = scmp.ge.s32.totalorder %s8753_s17, 1 }
   0x7   : > { %p367_p2 = scmp.lt.s32.totalorder %s8753_s17, 9 }
   0x8   : > { %s11304_s18 = smov (%p35_p0, %s34_s18), 0  ;;  %s11306_s19 = smov (!%p35_p0, %s37_s19), %s8749_s16 }
   0x9   : > { %11295 = sst [smem:[#allocation31_spill]] %s11304_s18  ;;  %p368_p3 = pnand %p6766_p1, %p367_p2 }
   0xa   : > { %p39_p4 = scmp.ge.s32.totalorder %s11306_s19, 4  ;;  %p412_p5 = scmp.eq.s32.totalorder (!%p368_p3), %s8741_s30, 0 }
   0xb   : > { %371 = sbr.rel (%p368_p3) target bundleno = 2442 (0x98a), region = 64  ;;  %p423_p6 = scmp.eq.s32.totalorder (!%p368_p3), %s8741_s30, 3 }
   0xc   : > { %s11308_s19 = smov (%p39_p4, %s11306_s19), 0  ;;  %s8882_s20 = sshll.u32 (!%p368_p3), %s8737_s29, 7 }
   0xd   : > { %11296 = sst [smem:[#allocation32_spill]] %s11308_s19  ;;  %p436_p7 = scmp.eq.s32.totalorder (!%p368_p3), %s8737_s29, 0 }
   0xe   : > { %s11297_s0 = sld [smem:[#allocation33_spill]] (!%p368_p3) }
   0xf   : > { %p437_p8 = pnand (!%p368_p3), %p436_p7, %p412_p5 }
  0x12   : > { %s413_s21 = scalar_select %p412_p5, %s8737_s29, 0 }
  0x13   : > { %s424_s22 = scalar_select %p423_p6, %s8737_s29, 0 }
  0x14   : > { %s6767_s23 = sshll.u32 %s413_s21, 4  ;;  %440 = sbr.rel (%p437_p8) target bundleno = 27 (0x1b), region = 68  ;;  %v8755_v0 = vmov (!%p437_p8), 0.0  }
  0x15   : > { %p415_p9 = scmp.lt.s32.totalorder %s6767_s23, 31  ;;  %s6769_s24 = sshll.u32 %s424_s22, 4  ;;  %441 = vst [vmem:[#allocation5] sm:$0xff] (!%p437_p8), %v8755_v0  ;;  %442 = vst [vmem:[#allocation6] sm:$0x3] (!%p437_p8), %v8755_v0 }
  0x16   : > { %p426_p10 = scmp.lt.s32.totalorder %s6769_s24, 31  ;;  %443 = vst [vmem:[#allocation7] sm:$0x3] (!%p437_p8), %v8755_v0 }
  0x17   : > { %s11310_s23 = smov (!%p415_p9, %s6767_s23), 31 }
  0x18   : > { %s11312_s24 = smov (!%p426_p10, %s6769_s24), 31  ;;  %s7950_s25 = smul.u32 12, %s11310_s23 }
  0x19   : > { %s6770_s26 = sshll.u32 %s11312_s24, 3 }
  0x1a   : > { %s8890_s19 = scalar_lea.vmem %s11297_s0, %s7950_s25  ;;  %s8895_s15 = scalar_lea.vmem %s11285_s11, %s6770_s26 }
  0x1b PF: > { %p6772_p11 = scmp.ne.s32.totalorder %s8741_s30, 0 }
  0x1c   : > { %s11298_s1 = sld [smem:[#allocation34_spill]] (!%p6772_p11)  ;;  %v8102_v49 = vld [vmem:[%s8890_s19 + $0x4] ss:$12 sps:$4 sm:$0xff] (!%p6772_p11)   ;;  %s4339_s18 = sshra.s32 (!%p6772_p11), %s8882_s20, 3 }
  0x1d   : > { %446 = sbr.rel (%p6772_p11) target bundleno = 849 (0x351), region = 72  ;;  %1434 = vmatprep.mubr.bf16.mxu0 (!%p6772_p11), %v8102_v49  ;;  %1660 = vmatprep.mubr.bf16.mxu1 (!%p6772_p11), %v8102_v49  ;;  %v9257_v49 = vld [vmem:[%s8890_s19 + $0xac] ss:$12 sps:$4 sm:$0xff] (!%p6772_p11)   ;;  %s7184_s25 = sshll.u32 (!%p6772_p11), %s4339_s18, 9 }
  0x1e   : > { %s8759_s26 = smov (!%p6772_p11), [#allocation2]   ;;  %s10362_s22 = scalar_lea.hbm (!%p6772_p11), %s11286_s12, %s7184_s25 }
  0x1f   : > { %s4351_s27 = sshll.u32 (!%p6772_p11), %s8759_s26, 4  ;;  %s10364_s27 = int_to_ptr.vmem [resolvable:$true] %s4351_s27 }
  0x20   : > { %p8564_p13 = scmp.lt.s32.totalorder (!%p6772_p11), %s10364_s27, %s10364_s27 }
  0x22   : > { %v8006_v1 = vld [vmem:[%s11298_s1 + $0x4] ss:$20 sps:$4 sm:$0xff] (!%p6772_p11)   ;;  %v8008_v2 = vld [vmem:[%s11298_s1 + $0xc] ss:$20 sps:$4 sm:$0xff] (!%p6772_p11)   ;;  %v8011_v4 = vld [vmem:[%s11298_s1 + $0x8] ss:$20 sps:$4 sm:$0xff] (!%p6772_p11)  }
  0x23   : > { %1402 = vmatprep.subr.bf16.mxu0 (!%p6772_p11), %v8006_v1  ;;  %v8010_v3 = vld [vmem:[%s11298_s1] ss:$20 sps:$4 sm:$0xff] (!%p6772_p11)   ;;  %1628 = vmatprep.subr.bf16.mxu1 (!%p6772_p11), %v8008_v2  ;;  %v8016_v7 = vld [vmem:[%s11298_s1 + $0x28] ss:$20 sps:$4 sm:$0xff] (!%p6772_p11)   ;;  %v8017_v8 = vld [vmem:[%s11298_s1 + $0x30] ss:$20 sps:$4 sm:$0xff] (!%p6772_p11)  }
  0x24   : > { %v8012_v5 = vld [vmem:[%s11298_s1 + $0x2c] ss:$20 sps:$4 sm:$0xff]   ;;  %1403 = vmatpush1.bf16.msra.mxu0 %v8010_v3  ;;  %1629 = vmatpush1.bf16.msra.mxu1 %v8011_v4  ;;  %v8014_v6 = vld [vmem:[%s11298_s1 + $0x34] ss:$20 sps:$4 sm:$0xff]   ;;  %v8020_v10 = vld [vmem:[%s11298_s1 + $0x5c] ss:$20 sps:$4 sm:$0xff]  }
  0x25   : > { %1404 = vmatprep.subr.bf16.mxu0 %v8012_v5  ;;  %1630 = vmatprep.subr.bf16.mxu1 %v8014_v6  ;;  %v8018_v9 = vld [vmem:[%s11298_s1 + $0x54] ss:$20 sps:$4 sm:$0xff]   ;;  %v8022_v11 = vld [vmem:[%s11298_s1 + $0x50] ss:$20 sps:$4 sm:$0xff]   ;;  %v8023_v12 = vld [vmem:[%s11298_s1 + $0x58] ss:$20 sps:$4 sm:$0xff]  }
  0x26   : > { %v8024_v13 = vld [vmem:[%s11298_s1 + $0x7c] ss:$20 sps:$4 sm:$0xff]   ;;  %v8026_v14 = vld [vmem:[%s11298_s1 + $0x84] ss:$20 sps:$4 sm:$0xff]   ;;  %v8029_v16 = vld [vmem:[%s11298_s1 + $0x80] ss:$20 sps:$4 sm:$0xff]  }
  0x27   : > { %v8028_v15 = vld [vmem:[%s11298_s1 + $0x78] ss:$20 sps:$4 sm:$0xff]   ;;  %v8034_v19 = vld [vmem:[%s11298_s1 + $0xa0] ss:$20 sps:$4 sm:$0xff]   ;;  %v8035_v20 = vld [vmem:[%s11298_s1 + $0xa8] ss:$20 sps:$4 sm:$0xff]  }
  0x28   : > { %1405 = vmatpush1.bf16.msra.mxu0 %v8016_v7  ;;  %1631 = vmatpush1.bf16.msra.mxu1 %v8017_v8  ;;  %v8030_v17 = vld [vmem:[%s11298_s1 + $0xa4] ss:$20 sps:$4 sm:$0xff]   ;;  %v8032_v18 = vld [vmem:[%s11298_s1 + $0xac] ss:$20 sps:$4 sm:$0xff]   ;;  %v8038_v22 = vld [vmem:[%s11298_s1 + $0xd4] ss:$20 sps:$4 sm:$0xff]  }
  0x29   : > { %1406 = vmatprep.subr.bf16.mxu0 %v8018_v9  ;;  %1632 = vmatprep.subr.bf16.mxu1 %v8020_v10  ;;  %v8036_v21 = vld [vmem:[%s11298_s1 + $0xcc] ss:$20 sps:$4 sm:$0xff]   ;;  %v8040_v23 = vld [vmem:[%s11298_s1 + $0xc8] ss:$20 sps:$4 sm:$0xff]   ;;  %v8041_v24 = vld [vmem:[%s11298_s1 + $0xd0] ss:$20 sps:$4 sm:$0xff]  }
  0x2a   : > { %v8042_v25 = vld [vmem:[%s11298_s1 + $0xf4] ss:$20 sps:$4 sm:$0xff]   ;;  %v8044_v26 = vld [vmem:[%s11298_s1 + $0xfc] ss:$20 sps:$4 sm:$0xff]   ;;  %v8047_v28 = vld [vmem:[%s11298_s1 + $0xf8] ss:$20 sps:$4 sm:$0xff]  }
  0x2b   : > { %v8046_v27 = vld [vmem:[%s11298_s1 + $0xf0] ss:$20 sps:$4 sm:$0xff]   ;;  %v8052_v31 = vld [vmem:[%s11298_s1 + $0x118] ss:$20 sps:$4 sm:$0xff]   ;;  %v8053_v32 = vld [vmem:[%s11298_s1 + $0x120] ss:$20 sps:$4 sm:$0xff]  }
  0x2c   : > { %1407 = vmatpush1.bf16.msra.mxu0 %v8022_v11  ;;  %1633 = vmatpush1.bf16.msra.mxu1 %v8023_v12  ;;  %v8048_v29 = vld [vmem:[%s11298_s1 + $0x11c] ss:$20 sps:$4 sm:$0xff]   ;;  %v8050_v30 = vld [vmem:[%s11298_s1 + $0x124] ss:$20 sps:$4 sm:$0xff]   ;;  %v8056_v34 = vld [vmem:[%s11298_s1 + $0x14c] ss:$20 sps:$4 sm:$0xff]  }
  0x2d   : > { %1408 = vmatprep.subr.bf16.mxu0 %v8024_v13  ;;  %1634 = vmatprep.subr.bf16.mxu1 %v8026_v14  ;;  %v8054_v33 = vld [vmem:[%s11298_s1 + $0x144] ss:$20 sps:$4 sm:$0xff]   ;;  %v8058_v35 = vld [vmem:[%s11298_s1 + $0x140] ss:$20 sps:$4 sm:$0xff]   ;;  %v8059_v36 = vld [vmem:[%s11298_s1 + $0x148] ss:$20 sps:$4 sm:$0xff]  }
  0x2e   : > { %v8060_v37 = vld [vmem:[%s11298_s1 + $0x16c] ss:$20 sps:$4 sm:$0xff]   ;;  %v8062_v38 = vld [vmem:[%s11298_s1 + $0x174] ss:$20 sps:$4 sm:$0xff]   ;;  %v8065_v40 = vld [vmem:[%s11298_s1 + $0x170] ss:$20 sps:$4 sm:$0xff]  }
  0x2f   : > { %v8064_v39 = vld [vmem:[%s11298_s1 + $0x168] ss:$20 sps:$4 sm:$0xff]   ;;  %v8070_v43 = vld [vmem:[%s11298_s1 + $0x190] ss:$20 sps:$4 sm:$0xff]   ;;  %v8071_v44 = vld [vmem:[%s11298_s1 + $0x198] ss:$20 sps:$4 sm:$0xff]  }
  0x30   : > { %1409 = vmatpush1.bf16.msra.mxu0 %v8028_v15  ;;  %1635 = vmatpush1.bf16.msra.mxu1 %v8029_v16  ;;  %v8066_v41 = vld [vmem:[%s11298_s1 + $0x194] ss:$20 sps:$4 sm:$0xff]   ;;  %v8068_v42 = vld [vmem:[%s11298_s1 + $0x19c] ss:$20 sps:$4 sm:$0xff]   ;;  %v8074_v46 = vld [vmem:[%s11298_s1 + $0x1c4] ss:$20 sps:$4 sm:$0xff]  }
  0x31   : > { %1410 = vmatprep.subr.bf16.mxu0 %v8030_v17  ;;  %1636 = vmatprep.subr.bf16.mxu1 %v8032_v18  ;;  %v8072_v45 = vld [vmem:[%s11298_s1 + $0x1bc] ss:$20 sps:$4 sm:$0xff]   ;;  %v8076_v47 = vld [vmem:[%s11298_s1 + $0x1b8] ss:$20 sps:$4 sm:$0xff]   ;;  %v8077_v48 = vld [vmem:[%s11298_s1 + $0x1c0] ss:$20 sps:$4 sm:$0xff]  }
  0x32   : > { %v8078_v50 = vld [vmem:[%s11298_s1 + $0x1e4] ss:$20 sps:$4 sm:$0xff]   ;;  %v8080_v51 = vld [vmem:[%s11298_s1 + $0x1ec] ss:$20 sps:$4 sm:$0xff]   ;;  %v8083_v53 = vld [vmem:[%s11298_s1 + $0x1e8] ss:$20 sps:$4 sm:$0xff]  }
  0x33   : > { %v8082_v52 = vld [vmem:[%s11298_s1 + $0x1e0] ss:$20 sps:$4 sm:$0xff]   ;;  %v8088_v56 = vld [vmem:[%s11298_s1 + $0x208] ss:$20 sps:$4 sm:$0xff]   ;;  %v8089_v57 = vld [vmem:[%s11298_s1 + $0x210] ss:$20 sps:$4 sm:$0xff]  }
  0x34   : > { %1411 = vmatpush1.bf16.msra.mxu0 %v8034_v19  ;;  %1637 = vmatpush1.bf16.msra.mxu1 %v8035_v20  ;;  %v8084_v54 = vld [vmem:[%s11298_s1 + $0x20c] ss:$20 sps:$4 sm:$0xff]   ;;  %v8086_v55 = vld [vmem:[%s11298_s1 + $0x214] ss:$20 sps:$4 sm:$0xff]   ;;  %v8092_v59 = vld [vmem:[%s11298_s1 + $0x23c] ss:$20 sps:$4 sm:$0xff]  }
  0x35   : > { %1412 = vmatprep.subr.bf16.mxu0 %v8036_v21  ;;  %1638 = vmatprep.subr.bf16.mxu1 %v8038_v22  ;;  %v8090_v58 = vld [vmem:[%s11298_s1 + $0x234] ss:$20 sps:$4 sm:$0xff]   ;;  %v8094_v60 = vld [vmem:[%s11298_s1 + $0x230] ss:$20 sps:$4 sm:$0xff]   ;;  %v8095_v61 = vld [vmem:[%s11298_s1 + $0x238] ss:$20 sps:$4 sm:$0xff]  }
  0x36   : > { %v8096_v62 = vld [vmem:[%s11298_s1 + $0x25c] ss:$20 sps:$4 sm:$0xff]   ;;  %v8098_v63 = vld [vmem:[%s11298_s1 + $0x264] ss:$20 sps:$4 sm:$0xff]   ;;  %v8101_v1 = vld [vmem:[%s11298_s1 + $0x260] ss:$20 sps:$4 sm:$0xff]  }
  0x37   : > { %v8100_v0 = vld [vmem:[%s11298_s1 + $0x258] ss:$20 sps:$4 sm:$0xff]   ;;  %v8105_v5 = vld [vmem:[%s11298_s1 + $0x280] ss:$20 sps:$4 sm:$0xff]   ;;  %v9104_v6 = vld [vmem:[%s8890_s19 + $0x1c] ss:$12 sps:$4 sm:$0xff]  }
  0x38   : > { %1413 = vmatpush1.bf16.msra.mxu0 %v8040_v23  ;;  %1639 = vmatpush1.bf16.msra.mxu1 %v8041_v24  ;;  %v8107_v2 = vld [vmem:[%s11298_s1 + $0x284] ss:$20 sps:$4 sm:$0xff]   ;;  %v8134_v3 = vld [vmem:[%s11298_s1 + $0x28c] ss:$20 sps:$4 sm:$0xff]   ;;  %v8132_v8 = vld [vmem:[%s11298_s1 + $0x288] ss:$20 sps:$4 sm:$0xff]  }
  0x39   : > { %1414 = vmatprep.subr.bf16.mxu0 %v8042_v25  ;;  %1640 = vmatprep.subr.bf16.mxu1 %v8044_v26  ;;  %v9098_v4 = vld [vmem:[%s8890_s19] ss:$12 sps:$4 sm:$0xff]   ;;  %v8137_v9 = vld [vmem:[%s11298_s1 + $0x2b4] ss:$20 sps:$4 sm:$0xff]   ;;  %v8135_v12 = vld [vmem:[%s11298_s1 + $0x2b0] ss:$20 sps:$4 sm:$0xff]  }
  0x3a   : > { %v8113_v7 = vld [vmem:[%s11298_s1 + $0x2ac] ss:$20 sps:$4 sm:$0xff]   ;;  %v8111_v10 = vld [vmem:[%s11298_s1 + $0x2a8] ss:$20 sps:$4 sm:$0xff]   ;;  %v9129_v13 = vld [vmem:[%s8890_s19 + $0x18] ss:$12 sps:$4 sm:$0xff]  }
  0x3b   : > { %v8119_v11 = vld [vmem:[%s11298_s1 + $0x2d4] ss:$20 sps:$4 sm:$0xff]   ;;  %v8117_v15 = vld [vmem:[%s11298_s1 + $0x2d0] ss:$20 sps:$4 sm:$0xff]   ;;  %v8144_v18 = vld [vmem:[%s11298_s1 + $0x2d8] ss:$20 sps:$4 sm:$0xff]  }
  0x3c   : > { %1415 = vmatpush1.bf16.msra.mxu0 %v8046_v27  ;;  %1641 = vmatpush1.bf16.msra.mxu1 %v8047_v28  ;;  %v9132_v14 = vld [vmem:[%s8890_s19 + $0x34] ss:$12 sps:$4 sm:$0xff]   ;;  %v8146_v16 = vld [vmem:[%s11298_s1 + $0x2dc] ss:$20 sps:$4 sm:$0xff]   ;;  %v8149_v19 = vld [vmem:[%s11298_s1 + $0x304] ss:$20 sps:$4 sm:$0xff]  }
  0x3d   : > { %1416 = vmatprep.subr.bf16.mxu0 %v8048_v29  ;;  %1642 = vmatprep.subr.bf16.mxu1 %v8050_v30  ;;  %v8125_v17 = vld [vmem:[%s11298_s1 + $0x2fc] ss:$20 sps:$4 sm:$0xff]   ;;  %v8123_v20 = vld [vmem:[%s11298_s1 + $0x2f8] ss:$20 sps:$4 sm:$0xff]   ;;  %v8147_v24 = vld [vmem:[%s11298_s1 + $0x300] ss:$20 sps:$4 sm:$0xff]  }
  0x3e   : > { %v9157_v21 = vld [vmem:[%s8890_s19 + $0x30] ss:$12 sps:$4 sm:$0xff]   ;;  %v8131_v22 = vld [vmem:[%s11298_s1 + $0x324] ss:$20 sps:$4 sm:$0xff]   ;;  %v8129_v25 = vld [vmem:[%s11298_s1 + $0x320] ss:$20 sps:$4 sm:$0xff]  }
  0x3f   : > { %v9163_v23 = vld [vmem:[%s8890_s19 + $0x4c] ss:$12 sps:$4 sm:$0xff]   ;;  %v8156_v28 = vld [vmem:[%s11298_s1 + $0x328] ss:$20 sps:$4 sm:$0xff]  }
  0x40   : > { %1417 = vmatpush1.bf16.msra.mxu0 %v8052_v31  ;;  %1643 = vmatpush1.bf16.msra.mxu1 %v8053_v32  ;;  %v8143_v26 = vld [vmem:[%s11298_s1 + $0x34c] ss:$20 sps:$4 sm:$0xff]   ;;  %v8161_v29 = vld [vmem:[%s11298_s1 + $0x354] ss:$20 sps:$4 sm:$0xff]  }
  0x41   : > { %1418 = vmatprep.subr.bf16.mxu0 %v8054_v33  ;;  %1644 = vmatprep.subr.bf16.mxu1 %v8056_v34  ;;  %v8158_v27 = vld [vmem:[%s11298_s1 + $0x32c] ss:$20 sps:$4 sm:$0xff]   ;;  %v8141_v30 = vld [vmem:[%s11298_s1 + $0x348] ss:$20 sps:$4 sm:$0xff]   ;;  %v9197_v33 = vld [vmem:[%s8890_s19 + $0x64] ss:$12 sps:$4 sm:$0xff]  }
  0x42   : > { %v9191_v31 = vld [vmem:[%s8890_s19 + $0x48] ss:$12 sps:$4 sm:$0xff]   ;;  %v8159_v34 = vld [vmem:[%s11298_s1 + $0x350] ss:$20 sps:$4 sm:$0xff]  }
  0x43   : > { %v8155_v32 = vld [vmem:[%s11298_s1 + $0x374] ss:$20 sps:$4 sm:$0xff]  }
  0x44   : > { %1419 = vmatpush1.bf16.msra.mxu0 %v8058_v35  ;;  %1645 = vmatpush1.bf16.msra.mxu1 %v8059_v36  ;;  %v8153_v35 = vld [vmem:[%s11298_s1 + $0x370] ss:$20 sps:$4 sm:$0xff]  }
  0x45   : > { %1420 = vmatprep.subr.bf16.mxu0 %v8060_v37  ;;  %1646 = vmatprep.subr.bf16.mxu1 %v8062_v38  ;;  %v8167_v36 = vld [vmem:[%s11298_s1 + $0x39c] ss:$20 sps:$4 sm:$0xff]   ;;  %v8168_v38 = vld [vmem:[%s11298_s1 + $0x378] ss:$20 sps:$4 sm:$0xff]  }
  0x46   : > { %v8170_v37 = vld [vmem:[%s11298_s1 + $0x37c] ss:$20 sps:$4 sm:$0xff]  }
  0x48   : > { %1421 = vmatpush1.bf16.msra.mxu0 %v8064_v39  ;;  %1647 = vmatpush1.bf16.msra.mxu1 %v8065_v40  ;;  %v8173_v39 = vld [vmem:[%s11298_s1 + $0x3a4] ss:$20 sps:$4 sm:$0xff]  }
  0x49   : > { %1422 = vmatprep.subr.bf16.mxu0 %v8066_v41  ;;  %1648 = vmatprep.subr.bf16.mxu1 %v8068_v42  ;;  %v8165_v40 = vld [vmem:[%s11298_s1 + $0x398] ss:$20 sps:$4 sm:$0xff]   ;;  %v8171_v41 = vld [vmem:[%s11298_s1 + $0x3a0] ss:$20 sps:$4 sm:$0xff]   ;;  %v8182_v42 = vld [vmem:[%s11298_s1 + $0x150] ss:$20 sps:$4 sm:$0xff]  }
  0x4c   : > { %1423 = vmatpush1.bf16.msra.mxu0 %v8070_v43  ;;  %1649 = vmatpush1.bf16.msra.mxu1 %v8071_v44  ;;  %v9231_v43 = vld [vmem:[%s8890_s19 + $0x60] ss:$12 sps:$4 sm:$0xff]   ;;  %v9234_v44 = vld [vmem:[%s8890_s19 + $0x7c] ss:$12 sps:$4 sm:$0xff]  }
  0x4d   : > { %1424 = vmatprep.subr.bf16.mxu0 %v8072_v45  ;;  %1650 = vmatprep.subr.bf16.mxu1 %v8074_v46  ;;  %v8184_v45 = vld [vmem:[%s11298_s1 + $0x290] ss:$20 sps:$4 sm:$0xff]  }
  0x4e   : > { %v9244_v46 = vld [vmem:[%s8890_s19 + $0x78] ss:$12 sps:$4 sm:$0xff]  }
  0x50   : > { %1425 = vmatpush1.bf16.msra.mxu0 %v8076_v47  ;;  %1651 = vmatpush1.bf16.msra.mxu1 %v8077_v48  ;;  %v9247_v47 = vld [vmem:[%s8890_s19 + $0x94] ss:$12 sps:$4 sm:$0xff]   ;;  %v9254_v48 = vld [vmem:[%s8890_s19 + $0x90] ss:$12 sps:$4 sm:$0xff]  }
  0x51   : > { %1426 = vmatprep.subr.bf16.mxu0 %v8078_v50  ;;  %1652 = vmatprep.subr.bf16.mxu1 %v8080_v51  ;;  %v9264_v50 = vld [vmem:[%s8890_s19 + $0xa8] ss:$12 sps:$4 sm:$0xff]   ;;  %v8756_v51 = vmov 0  }
  0x54   : > { %1427 = vmatpush1.bf16.msra.mxu0 %v8082_v52  ;;  %1653 = vmatpush1.bf16.msra.mxu1 %v8083_v53  ;;  %v9271_v52 = vld [vmem:[%s8890_s19 + $0x8] ss:$12 sps:$4 sm:$0xff]   ;;  %v8183_v53 = vld [vmem:[%s11298_s1 + $0x10] ss:$20 sps:$4 sm:$0xff]  }
  0x55   : > { %1428 = vmatprep.subr.bf16.mxu0 %v8084_v54  ;;  %1654 = vmatprep.subr.bf16.mxu1 %v8086_v55  ;;  %v8185_v54 = vld [vmem:[%s11298_s1 + $0x178] ss:$20 sps:$4 sm:$0xff]  }
  0x56   : > { %v8187_v55 = vld [vmem:[%s11298_s1 + $0x2b8] ss:$20 sps:$4 sm:$0xff]  }
  0x58   : > { %1429 = vmatpush1.bf16.msra.mxu0 %v8088_v56  ;;  %1655 = vmatpush1.bf16.msra.mxu1 %v8089_v57  ;;  %v8186_v56 = vld [vmem:[%s11298_s1 + $0x38] ss:$20 sps:$4 sm:$0xff]   ;;  %v8188_v57 = vld [vmem:[%s11298_s1 + $0x1a0] ss:$20 sps:$4 sm:$0xff]  }
  0x59   : > { %1430 = vmatprep.subr.bf16.mxu0 %v8090_v58  ;;  %1656 = vmatprep.subr.bf16.mxu1 %v8092_v59  ;;  %v8190_v58 = vld [vmem:[%s11298_s1 + $0x2e0] ss:$20 sps:$4 sm:$0xff]  }
  0x5a   : > { %v9296_v59 = vld [vmem:[%s8890_s19 + $0x20] ss:$12 sps:$4 sm:$0xff]  }
  0x5c   : > { %1431 = vmatpush1.bf16.msra.mxu0 %v8094_v60  ;;  %1657 = vmatpush1.bf16.msra.mxu1 %v8095_v61  ;;  %v8189_v60 = vld [vmem:[%s11298_s1 + $0x60] ss:$20 sps:$4 sm:$0xff]   ;;  %v8191_v61 = vld [vmem:[%s11298_s1 + $0x1c8] ss:$20 sps:$4 sm:$0xff]  }
  0x5d   : > { %1432 = vmatprep.subr.bf16.mxu0 %v8096_v62  ;;  %1658 = vmatprep.subr.bf16.mxu1 %v8098_v63  ;;  %v8193_v62 = vld [vmem:[%s11298_s1 + $0x308] ss:$20 sps:$4 sm:$0xff]  }
  0x5e   : > { %v8192_v63 = vld [vmem:[%s11298_s1 + $0x88] ss:$20 sps:$4 sm:$0xff]  }
  0x60   : > { %1433 = vmatpush1.bf16.msra.mxu0 %v8100_v0  ;;  %1659 = vmatpush1.bf16.msra.mxu1 %v8101_v1  ;;  %v8194_v0 = vld [vmem:[%s11298_s1 + $0x1f0] ss:$20 sps:$4 sm:$0xff]  }
  0x61   : > { %1515 = vmatprep.subr.bf16.mxu0 %v8107_v2  ;;  %1741 = vmatprep.subr.bf16.mxu1 %v8134_v3  ;;  %v8196_v1 = vld [vmem:[%s11298_s1 + $0x330] ss:$20 sps:$4 sm:$0xff]  }
  0x62   : > { %v9321_v2 = vld [vmem:[%s8890_s19 + $0x38] ss:$12 sps:$4 sm:$0xff]  }
  0x63   : > { %1435 = vmatmul.mubr.bf16.vlgmr.msra.gmra.mrb[0].mxu0 %v9098_v4  ;;  %1661 = vmatmul.mubr.bf16.vlgmr.msra.gmra.mrb[0].mxu1 %v9098_v4  ;;  %v8195_v3 = vld [vmem:[%s11298_s1 + $0xb0] ss:$20 sps:$4 sm:$0xff]  }
  0x64   : > { %1516 = vmatpush1.bf16.msra.mxu0 %v8105_v5  ;;  %1444 = vmatprep.mubr.bf16.mxu0 %v9104_v6  ;;  %v8197_v5 = vld [vmem:[%s11298_s1 + $0x218] ss:$20 sps:$4 sm:$0xff]  }
  0x65   : > { %1670 = vmatprep.mubr.bf16.mxu1 %v9104_v6  ;;  %1517 = vmatprep.subr.bf16.mxu0 %v8113_v7  ;;  %v8199_v7 = vld [vmem:[%s11298_s1 + $0x358] ss:$20 sps:$4 sm:$0xff]  }
  0x66   : > { %1742 = vmatpush1.bf16.msra.mxu1 %v8132_v8  ;;  %v8198_v8 = vld [vmem:[%s11298_s1 + $0xd8] ss:$20 sps:$4 sm:$0xff]  }
  0x67   : > { %1743 = vmatprep.subr.bf16.mxu1 %v8137_v9  ;;  %v8200_v9 = vld [vmem:[%s11298_s1 + $0x240] ss:$20 sps:$4 sm:$0xff]  }
  0x68   : > { %1518 = vmatpush1.bf16.msra.mxu0 %v8111_v10  ;;  %v8204_v10 = vld [vmem:[%s11298_s1 + $0x380] ss:$20 sps:$4 sm:$0xff]  }
  0x69   : > { %1519 = vmatprep.subr.bf16.mxu0 %v8119_v11  ;;  %v9346_v11 = vld [vmem:[%s8890_s19 + $0x50] ss:$12 sps:$4 sm:$0xff]  }
  0x6a   : > { %1744 = vmatpush1.bf16.msra.mxu1 %v8135_v12  ;;  %v8201_v12 = vld [vmem:[%s11298_s1 + $0x100] ss:$20 sps:$4 sm:$0xff]  }
  0x6b   : > { %1445 = vmatmul.mubr.bf16.gmra.mrb[4].mxu0 %v9129_v13  ;;  %1671 = vmatmul.mubr.bf16.gmra.mrb[4].mxu1 %v9129_v13 }
  0x6c   : > { %1454 = vmatprep.mubr.bf16.mxu0 %v9132_v14  ;;  %1680 = vmatprep.mubr.bf16.mxu1 %v9132_v14 }
  0x6d   : > { %1520 = vmatpush1.bf16.msra.mxu0 %v8117_v15  ;;  %1745 = vmatprep.subr.bf16.mxu1 %v8146_v16  ;;  %v8202_v15 = vld [vmem:[%s11298_s1 + $0x268] ss:$20 sps:$4 sm:$0xff]  }
  0x6e   : > { %1521 = vmatprep.subr.bf16.mxu0 %v8125_v17  ;;  %1746 = vmatpush1.bf16.msra.mxu1 %v8144_v18  ;;  %v8205_v16 = vld [vmem:[%s11298_s1 + $0x3a8] ss:$20 sps:$4 sm:$0xff]   ;;  %v8208_v18 = vld [vmem:[%s11277_s3 + $0x4] ss:$16 sps:$4 sm:$0xff]  }
  0x6f   : > { %1747 = vmatprep.subr.bf16.mxu1 %v8149_v19  ;;  %v8203_v17 = vld [vmem:[%s11298_s1 + $0x128] ss:$20 sps:$4 sm:$0xff]  }
  0x70   : > { %v8211_v19 = vld [vmem:[%s11277_s3 + $0xc] ss:$16 sps:$4 sm:$0xff]  }
  0x71   : > { %1522 = vmatpush1.bf16.msra.mxu0 %v8123_v20  ;;  %v8178_v20 = vld [vmem:[%s8890_s19 + $0x68] ss:$12 sps:$4 sm:$0xff]  }
  0x72   : > { %1523 = vmatprep.subr.bf16.mxu0 %v8131_v22  ;;  %1748 = vmatpush1.bf16.msra.mxu1 %v8147_v24  ;;  %v8179_v22 = vld [vmem:[%s8890_s19 + $0x80] ss:$12 sps:$4 sm:$0xff]   ;;  %v8180_v24 = vld [vmem:[%s8890_s19 + $0x98] ss:$12 sps:$4 sm:$0xff]  }
  0x73   : > { %1455 = vmatmul.mubr.bf16.gmra.mrb[8].mxu0 %v9157_v21  ;;  %1681 = vmatmul.mubr.bf16.gmra.mrb[8].mxu1 %v9157_v21 }
  0x74   : > { %1464 = vmatprep.mubr.bf16.mxu0 %v9163_v23  ;;  %1690 = vmatprep.mubr.bf16.mxu1 %v9163_v23 }
  0x75   : > { %1524 = vmatpush1.bf16.msra.mxu0 %v8129_v25  ;;  %1749 = vmatprep.subr.bf16.mxu1 %v8158_v27  ;;  %v9380_v25 = vld [vmem:[%s8890_s19 + $0xb0] ss:$12 sps:$4 sm:$0xff]  }
  0x76   : > { %1525 = vmatprep.subr.bf16.mxu0 %v8143_v26  ;;  %1750 = vmatpush1.bf16.msra.mxu1 %v8156_v28  ;;  %v8446_v26 = vld [vmem:[%s8890_s19 + $0x4] ss:$12 sps:$4 sm:$0xff]   ;;  %v8209_v28 = vld [vmem:[%s11277_s3 + $0x8] ss:$16 sps:$4 sm:$0xff]   ;;  %s8559_s19 = scalar_lea.vmem %s10364_s27, 8192 }
  0x77   : > { %1751 = vmatprep.subr.bf16.mxu1 %v8161_v29  ;;  %v8206_v27 = vld [vmem:[%s11277_s3] ss:$16 sps:$4 sm:$0xff]   ;;  %v8214_v29 = vld [vmem:[%s11277_s3 + $0x24] ss:$16 sps:$4 sm:$0xff]   ;;  %p8560_p12 = scmp.ne.s32.totalorder %s10364_s27, %s8559_s19  ;;  %p8565_p0 = scmp.lt.s32.totalorder %s8559_s19, %s8559_s19 }
  0x79   : > { %1526 = vmatpush1.bf16.msra.mxu0 %v8141_v30  ;;  %v8217_v30 = vld [vmem:[%s11277_s3 + $0x2c] ss:$16 sps:$4 sm:$0xff]   ;;  %p8566_p1 = por %p8565_p0, %p8564_p13 }
  0x7a   : > { %1527 = vmatprep.subr.bf16.mxu0 %v8155_v32  ;;  %1752 = vmatpush1.bf16.msra.mxu1 %v8159_v34  ;;  %v8212_v32 = vld [vmem:[%s11277_s3 + $0x20] ss:$16 sps:$4 sm:$0xff]   ;;  %v8215_v34 = vld [vmem:[%s11277_s3 + $0x28] ss:$16 sps:$4 sm:$0xff]  }
  0x7b   : > { %1465 = vmatmul.mubr.bf16.gmra.mrb[12].mxu0 %v9191_v31  ;;  %1691 = vmatmul.mubr.bf16.gmra.mrb[12].mxu1 %v9191_v31  ;;  %p8567_p2 = pnand %p8566_p1, %p8560_p12 }
  0x7c   : > { %1474 = vmatprep.mubr.bf16.mxu0 %v9197_v33  ;;  %1700 = vmatprep.mubr.bf16.mxu1 %v9197_v33 }
  0x7d   : > { %1528 = vmatpush1.bf16.msra.mxu0 %v8153_v35  ;;  %1753 = vmatprep.subr.bf16.mxu1 %v8170_v37  ;;  %v8218_v35 = vld [vmem:[%s11277_s3 + $0x40] ss:$16 sps:$4 sm:$0xff]   ;;  %v8226_v37 = vld [vmem:[%s11277_s3 + $0x64] ss:$16 sps:$4 sm:$0xff]  }
  0x7e   : > { %1529 = vmatprep.subr.bf16.mxu0 %v8167_v36  ;;  %1754 = vmatpush1.bf16.msra.mxu1 %v8168_v38  ;;  %v8221_v36 = vld [vmem:[%s11277_s3 + $0x48] ss:$16 sps:$4 sm:$0xff]   ;;  %v8229_v38 = vld [vmem:[%s11277_s3 + $0x6c] ss:$16 sps:$4 sm:$0xff]  }
  0x7f   : > { %1755 = vmatprep.subr.bf16.mxu1 %v8173_v39  ;;  %v8224_v39 = vld [vmem:[%s11277_s3 + $0x60] ss:$16 sps:$4 sm:$0xff]  }
  0x81   : > { %1530 = vmatpush1.bf16.msra.mxu0 %v8165_v40  ;;  %v8227_v40 = vld [vmem:[%s11277_s3 + $0x68] ss:$16 sps:$4 sm:$0xff]  }
  0x82   : > { %1756 = vmatpush1.bf16.msra.mxu1 %v8171_v41  ;;  %7190 = vmatprep.subr.bf16.mxu0 %v8182_v42  ;;  %v8230_v41 = vld [vmem:[%s11277_s3 + $0x80] ss:$16 sps:$4 sm:$0xff]   ;;  %v8233_v42 = vld [vmem:[%s11277_s3 + $0x88] ss:$16 sps:$4 sm:$0xff]  }
  0x83   : > { %1475 = vmatmul.mubr.bf16.gmra.mrb[16].mxu0 %v9231_v43  ;;  %1701 = vmatmul.mubr.bf16.gmra.mrb[16].mxu1 %v9231_v43 }
  0x84   : > { %1484 = vmatprep.mubr.bf16.mxu0 %v9234_v44  ;;  %1710 = vmatprep.mubr.bf16.mxu1 %v9234_v44 }
  0x85   : > { %7446 = vmatprep.subr.bf16.mxu1 %v8184_v45 }
  0x8b   : > { %1485 = vmatmul.mubr.bf16.gmra.mrb[20].mxu0 %v9244_v46  ;;  %1711 = vmatmul.mubr.bf16.gmra.mrb[20].mxu1 %v9244_v46 }
  0x8c   : > { %1494 = vmatprep.mubr.bf16.mxu0 %v9247_v47  ;;  %1720 = vmatprep.mubr.bf16.mxu1 %v9247_v47 }
  0x93   : > { %1495 = vmatmul.mubr.bf16.gmra.mrb[24].mxu0 %v9254_v48  ;;  %1721 = vmatmul.mubr.bf16.gmra.mrb[24].mxu1 %v9254_v48 }
  0x94   : > { %1504 = vmatprep.mubr.bf16.mxu0 %v9257_v49  ;;  %1730 = vmatprep.mubr.bf16.mxu1 %v9257_v49 }
  0x9b   : > { %1505 = vmatmul.mubr.bf16.gmra.mrb[28].mxu0 %v9264_v50  ;;  %1731 = vmatmul.mubr.bf16.gmra.mrb[28].mxu1 %v9264_v50 }
  0x9c   : > { %1547 = vmatprep.mubr.bf16.mxu0 %v8756_v51  ;;  %1773 = vmatprep.mubr.bf16.mxu1 %v8756_v51 }
  0xa3   : > { %1548 = vmatmul.mubr.bf16.vlgmr.msra.gmra.mrb[0].mxu0 %v9271_v52  ;;  %1774 = vmatmul.mubr.bf16.vlgmr.msra.gmra.mrb[0].mxu1 %v9271_v52 }
  0xa4   : > { %1557 = vmatprep.mubr.bf16.mxu0 %v8756_v51  ;;  %1783 = vmatprep.mubr.bf16.mxu1 %v8756_v51 }
  0xa5   : > { %7191 = vmatpush3.bf16.msra.mxu0 %v8183_v53  ;;  %7447 = vmatpush3.bf16.msra.mxu1 %v8184_v45  ;;  %v8238_v45 = vld [vmem:[%s11277_s3 + $0xa4] ss:$16 sps:$4 sm:$0xff]   ;;  %v8236_v53 = vld [vmem:[%s11277_s3 + $0xa0] ss:$16 sps:$4 sm:$0xff]  }
  0xa6   : > { %7192 = vmatprep.subr.bf16.mxu0 %v8185_v54  ;;  %7448 = vmatprep.subr.bf16.mxu1 %v8187_v55  ;;  %v8239_v54 = vld [vmem:[%s11277_s3 + $0xa8] ss:$16 sps:$4 sm:$0xff]  }
  0xa9   : > { %7193 = vmatpush3.bf16.msra.mxu0 %v8186_v56  ;;  %7449 = vmatpush3.bf16.msra.mxu1 %v8187_v55  ;;  %v8242_v55 = vld [vmem:[%s11277_s3 + $0xc0] ss:$16 sps:$4 sm:$0xff]   ;;  %v8245_v56 = vld [vmem:[%s11277_s3 + $0xc8] ss:$16 sps:$4 sm:$0xff]  }
  0xaa   : > { %7194 = vmatprep.subr.bf16.mxu0 %v8188_v57  ;;  %7450 = vmatprep.subr.bf16.mxu1 %v8190_v58  ;;  %v8250_v57 = vld [vmem:[%s11277_s3 + $0xe4] ss:$16 sps:$4 sm:$0xff]  }
  0xab   : > { %1558 = vmatmul.mubr.bf16.gmra.mrb[4].mxu0 %v9296_v59  ;;  %1784 = vmatmul.mubr.bf16.gmra.mrb[4].mxu1 %v9296_v59 }
  0xac   : > { %1567 = vmatprep.mubr.bf16.mxu0 %v8756_v51  ;;  %1793 = vmatprep.mubr.bf16.mxu1 %v8756_v51 }
  0xad   : > { %7195 = vmatpush3.bf16.msra.mxu0 %v8189_v60  ;;  %7451 = vmatpush3.bf16.msra.mxu1 %v8190_v58  ;;  %v8253_v58 = vld [vmem:[%s11277_s3 + $0xec] ss:$16 sps:$4 sm:$0xff]   ;;  %v8251_v60 = vld [vmem:[%s11277_s3 + $0xe8] ss:$16 sps:$4 sm:$0xff]  }
  0xae   : > { %7196 = vmatprep.subr.bf16.mxu0 %v8191_v61  ;;  %7452 = vmatprep.subr.bf16.mxu1 %v8193_v62  ;;  %v8254_v61 = vld [vmem:[%s11277_s3 + $0x100] ss:$16 sps:$4 sm:$0xff]  }
  0xb1   : > { %7197 = vmatpush3.bf16.msra.mxu0 %v8192_v63  ;;  %7453 = vmatpush3.bf16.msra.mxu1 %v8193_v62  ;;  %v8257_v62 = vld [vmem:[%s11277_s3 + $0x108] ss:$16 sps:$4 sm:$0xff]   ;;  %v8262_v63 = vld [vmem:[%s11277_s3 + $0x124] ss:$16 sps:$4 sm:$0xff]  }
  0xb2   : > { %7198 = vmatprep.subr.bf16.mxu0 %v8194_v0  ;;  %7454 = vmatprep.subr.bf16.mxu1 %v8196_v1  ;;  %v8265_v0 = vld [vmem:[%s11277_s3 + $0x12c] ss:$16 sps:$4 sm:$0xff]  }
  0xb3   : > { %1568 = vmatmul.mubr.bf16.gmra.mrb[8].mxu0 %v9321_v2  ;;  %1794 = vmatmul.mubr.bf16.gmra.mrb[8].mxu1 %v9321_v2 }
  0xb4   : > { %1577 = vmatprep.mubr.bf16.mxu0 %v8756_v51  ;;  %1803 = vmatprep.mubr.bf16.mxu1 %v8756_v51 }
  0xb5   : > { %7199 = vmatpush3.bf16.msra.mxu0 %v8195_v3  ;;  %7455 = vmatpush3.bf16.msra.mxu1 %v8196_v1  ;;  %v8260_v1 = vld [vmem:[%s11277_s3 + $0x120] ss:$16 sps:$4 sm:$0xff]   ;;  %v8268_v3 = vld [vmem:[%s11277_s3 + $0x144] ss:$16 sps:$4 sm:$0xff]  }
  0xb6   : > { %7200 = vmatprep.subr.bf16.mxu0 %v8197_v5  ;;  %7456 = vmatprep.subr.bf16.mxu1 %v8199_v7  ;;  %v8269_v5 = vld [vmem:[%s11277_s3 + $0x148] ss:$16 sps:$4 sm:$0xff]  }
  0xb9   : > { %7201 = vmatpush3.bf16.msra.mxu0 %v8198_v8  ;;  %7457 = vmatpush3.bf16.msra.mxu1 %v8199_v7  ;;  %v8274_v7 = vld [vmem:[%s11277_s3 + $0x164] ss:$16 sps:$4 sm:$0xff]   ;;  %v8277_v8 = vld [vmem:[%s11277_s3 + $0x16c] ss:$16 sps:$4 sm:$0xff]  }
  0xba   : > { %7202 = vmatprep.subr.bf16.mxu0 %v8200_v9  ;;  %7458 = vmatprep.subr.bf16.mxu1 %v8204_v10  ;;  %v8272_v9 = vld [vmem:[%s11277_s3 + $0x160] ss:$16 sps:$4 sm:$0xff]  }
  0xbb   : > { %1578 = vmatmul.mubr.bf16.gmra.mrb[12].mxu0 %v9346_v11  ;;  %1804 = vmatmul.mubr.bf16.gmra.mrb[12].mxu1 %v9346_v11 }
  0xbc   : > { %1587 = vmatprep.mubr.bf16.mxu0 %v8756_v51  ;;  %1813 = vmatprep.mubr.bf16.mxu1 %v8756_v51 }
  0xbd   : > { %7203 = vmatpush3.bf16.msra.mxu0 %v8201_v12  ;;  %7459 = vmatpush3.bf16.msra.mxu1 %v8204_v10  ;;  %v8275_v10 = vld [vmem:[%s11277_s3 + $0x168] ss:$16 sps:$4 sm:$0xff]  }
  0xbe   : > { %7204 = vmatprep.subr.bf16.mxu0 %v8202_v15  ;;  %7460 = vmatprep.subr.bf16.mxu1 %v8205_v16  ;;  %v8281_v12 = vld [vmem:[%s11277_s3 + $0x188] ss:$16 sps:$4 sm:$0xff]   ;;  %v8286_v15 = vld [vmem:[%s11277_s3 + $0x1a4] ss:$16 sps:$4 sm:$0xff]  }
  0xc1   : > { %7205 = vmatpush3.bf16.msra.mxu0 %v8203_v17  ;;  %7461 = vmatpush3.bf16.msra.mxu1 %v8205_v16  ;;  %v8289_v16 = vld [vmem:[%s11277_s3 + $0x1ac] ss:$16 sps:$4 sm:$0xff]   ;;  %v8284_v17 = vld [vmem:[%s11277_s3 + $0x1a0] ss:$16 sps:$4 sm:$0xff]  }
  0xc2   : > { %3150 = vmatprep.subr.bf16.mxu0 %v8208_v18  ;;  %3489 = vmatprep.subr.bf16.mxu1 %v8211_v19  ;;  %v8287_v18 = vld [vmem:[%s11277_s3 + $0x1a8] ss:$16 sps:$4 sm:$0xff]   ;;  %v8292_v19 = vld [vmem:[%s11277_s3 + $0x1c4] ss:$16 sps:$4 sm:$0xff]  }
  0xc3   : > { %1588 = vmatmul.mubr.bf16.gmra.mrb[16].mxu0 %v8178_v20  ;;  %1814 = vmatmul.mubr.bf16.gmra.mrb[16].mxu1 %v8178_v20 }
  0xc4   : > { %1597 = vmatprep.mubr.bf16.mxu0 %v8756_v51  ;;  %1823 = vmatprep.mubr.bf16.mxu1 %v8756_v51 }
  0xcb   : > { %1598 = vmatmul.mubr.bf16.gmra.mrb[20].mxu0 %v8179_v22  ;;  %1824 = vmatmul.mubr.bf16.gmra.mrb[20].mxu1 %v8179_v22 }
  0xcc   : > { %1607 = vmatprep.mubr.bf16.mxu0 %v8756_v51  ;;  %1833 = vmatprep.mubr.bf16.mxu1 %v8756_v51 }
  0xd3   : > { %1608 = vmatmul.mubr.bf16.gmra.mrb[24].mxu0 %v8180_v24  ;;  %1834 = vmatmul.mubr.bf16.gmra.mrb[24].mxu1 %v8180_v24 }
  0xd4   : > { %1617 = vmatprep.mubr.bf16.mxu0 %v8756_v51  ;;  %1843 = vmatprep.mubr.bf16.mxu1 %v8756_v51 }
  0xdb   : > { %1618 = vmatmul.mubr.bf16.gmra.mrb[28].mxu0 %v9380_v25  ;;  %1844 = vmatmul.mubr.bf16.gmra.mrb[28].mxu1 %v9380_v25 }
  0xdc   : > { %1886 = vmatprep.mubr.bf16.mxu0 %v8446_v26  ;;  %7462 = vmatprep.mubr.bf16.mxu1 %v9271_v52  ;;  %v8241_v52 = vld [vmem:[%s11277_s3 + $0xac] ss:$16 sps:$4 sm:$0xff]   ;;  %v8299_v26 = vld [vmem:[%s11277_s3 + $0x1e8] ss:$16 sps:$4 sm:$0xff]  }
  0xe3   : > { %1887 = vmatmul.mubr.bf16.vlgmr.msra.gmra.mrb[32].mxu0 %v9098_v4  ;;  %7463 = vmatmul.mubr.bf16.vlgmr.msra.gmra.mrb[32].mxu1 %v9296_v59  ;;  %v8220_v4 = vld [vmem:[%s11277_s3 + $0x44] ss:$16 sps:$4 sm:$0xff]   ;;  %v8248_v59 = vld [vmem:[%s11277_s3 + $0xe0] ss:$16 sps:$4 sm:$0xff]  }
  0xe4   : > { %1894 = vmatprep.mubr.bf16.mxu0 %v9104_v6  ;;  %7466 = vmatprep.mubr.bf16.mxu1 %v9321_v2  ;;  %v8223_v6 = vld [vmem:[%s11277_s3 + $0x4c] ss:$16 sps:$4 sm:$0xff]   ;;  %v8263_v2 = vld [vmem:[%s11277_s3 + $0x128] ss:$16 sps:$4 sm:$0xff]  }
  0xe5   : > { %3151 = vmatpush1.bf16.msra.mxu0 %v8206_v27  ;;  %3490 = vmatpush1.bf16.msra.mxu1 %v8209_v28  ;;  %v8304_v27 = vld [vmem:[%s11277_s3 + $0x204] ss:$16 sps:$4 sm:$0xff]   ;;  %v625_v28 = vlaneseq }
  0xe6   : > { %3152 = vmatprep.subr.bf16.mxu0 %v8214_v29  ;;  %3491 = vmatprep.subr.bf16.mxu1 %v8217_v30 }
  0xe7   : > { %v9598_v29 = vshrl.u32 %v625_v28, 7 }
  0xe9   : > { %3153 = vmatpush1.bf16.msra.mxu0 %v8212_v32  ;;  %3492 = vmatpush1.bf16.msra.mxu1 %v8215_v34  ;;  %v627_v30 = vsub.s32 0, %v9598_v29  ;;  %v635_v32 = vsub.s32 2, %v9598_v29  ;;  %v9605_v34 = vld [vmem:[%s11276_s2] sm:$0x1f] }
  0xea   : > { %3154 = vmatprep.subr.bf16.mxu0 %v8220_v4  ;;  %3493 = vmatprep.subr.bf16.mxu1 %v8223_v6  ;;  %v631_v4 = vsub.s32 1, %v9598_v29  ;;  %v639_v6 = vsub.s32 3, %v9598_v29 }
  0xeb   : > { %1895 = vmatmul.mubr.bf16.gmra.mrb[36].mxu0 %v9129_v13  ;;  %7467 = vmatmul.mubr.bf16.gmra.mrb[36].mxu1 %v9346_v11  ;;  %v8232_v13 = vld [vmem:[%s11277_s3 + $0x84] ss:$16 sps:$4 sm:$0xff]  }
  0xec   : > { %1902 = vmatprep.mubr.bf16.mxu0 %v9132_v14  ;;  %7470 = vmatprep.mubr.bf16.mxu1 %v8178_v20  ;;  %v8235_v14 = vld [vmem:[%s11277_s3 + $0x8c] ss:$16 sps:$4 sm:$0xff]   ;;  %v8280_v11 = vld [vmem:[%s11277_s3 + $0x184] ss:$16 sps:$4 sm:$0xff]   ;;  %v8293_v20 = vld [vmem:[%s11277_s3 + $0x1c8] ss:$16 sps:$4 sm:$0xff]  }
  0xed   : > { %3155 = vmatpush1.bf16.msra.mxu0 %v8218_v35  ;;  %3494 = vmatpush1.bf16.msra.mxu1 %v8221_v36  ;;  %v9612_v35 = vrot.slane %v9605_v34, %v627_v30  ;;  %v9617_v36 = vrot.slane %v9605_v34, %v635_v32 }
  0xee   : > { %3156 = vmatprep.subr.bf16.mxu0 %v8226_v37  ;;  %3495 = vmatprep.subr.bf16.mxu1 %v8229_v38  ;;  %v9622_v37 = vrot.slane %v9605_v34, %v631_v4  ;;  %v9627_v38 = vrot.slane %v9605_v34, %v639_v6 }
  0xf1   : > { %3157 = vmatpush1.bf16.msra.mxu0 %v8224_v39  ;;  %3496 = vmatpush1.bf16.msra.mxu1 %v8227_v40 }
  0xf2   : > { %3158 = vmatprep.subr.bf16.mxu0 %v8232_v13  ;;  %3497 = vmatprep.subr.bf16.mxu1 %v8235_v14 }
  0xf3   : > { %1903 = vmatmul.mubr.bf16.gmra.mrb[40].mxu0 %v9157_v21  ;;  %7471 = vmatmul.mubr.bf16.gmra.mrb[40].mxu1 %v8179_v22  ;;  %v8244_v21 = vld [vmem:[%s11277_s3 + $0xc4] ss:$16 sps:$4 sm:$0xff]  }
  0xf4   : > { %1910 = vmatprep.mubr.bf16.mxu0 %v9163_v23  ;;  %7474 = vmatprep.mubr.bf16.mxu1 %v8180_v24  ;;  %v8247_v23 = vld [vmem:[%s11277_s3 + $0xcc] ss:$16 sps:$4 sm:$0xff]   ;;  %v8298_v22 = vld [vmem:[%s11277_s3 + $0x1e4] ss:$16 sps:$4 sm:$0xff]  }
  0xf5   : > { %3159 = vmatpush1.bf16.msra.mxu0 %v8230_v41  ;;  %3498 = vmatpush1.bf16.msra.mxu1 %v8233_v42  ;;  %v8301_v24 = vld [vmem:[%s11277_s3 + $0x1ec] ss:$16 sps:$4 sm:$0xff]  }
  0xf6   : > { %3160 = vmatprep.subr.bf16.mxu0 %v8238_v45  ;;  %3499 = vmatprep.subr.bf16.mxu1 %v8241_v52 }
  0xf9   : > { %3161 = vmatpush1.bf16.msra.mxu0 %v8236_v53  ;;  %3500 = vmatpush1.bf16.msra.mxu1 %v8239_v54 }
  0xfa   : > { %3162 = vmatprep.subr.bf16.mxu0 %v8244_v21  ;;  %3501 = vmatprep.subr.bf16.mxu1 %v8247_v23 }
  0xfb   : > { %1911 = vmatmul.mubr.bf16.gmra.mrb[44].mxu0 %v9191_v31  ;;  %7475 = vmatmul.mubr.bf16.gmra.mrb[44].mxu1 %v9380_v25  ;;  %v8256_v31 = vld [vmem:[%s11277_s3 + $0x104] ss:$16 sps:$4 sm:$0xff]   ;;  %v8296_v25 = vld [vmem:[%s11277_s3 + $0x1e0] ss:$16 sps:$4 sm:$0xff]  }
  0xfc   : > { %1918 = vmatprep.mubr.bf16.mxu0 %v9197_v33  ;;  %v8259_v33 = vld [vmem:[%s11277_s3 + $0x10c] ss:$16 sps:$4 sm:$0xff]  }
  0xfd   : > { %3163 = vmatpush1.bf16.msra.mxu0 %v8242_v55  ;;  %3502 = vmatpush1.bf16.msra.mxu1 %v8245_v56 }
  0xfe   : > { %3164 = vmatprep.subr.bf16.mxu0 %v8250_v57  ;;  %3503 = vmatprep.subr.bf16.mxu1 %v8253_v58 }
 0x101   : > { %3165 = vmatpush1.bf16.msra.mxu0 %v8248_v59  ;;  %3504 = vmatpush1.bf16.msra.mxu1 %v8251_v60 }
 0x102   : > { %3166 = vmatprep.subr.bf16.mxu0 %v8256_v31  ;;  %3505 = vmatprep.subr.bf16.mxu1 %v8259_v33 }
 0x103   : > { %1919 = vmatmul.mubr.bf16.gmra.mrb[48].mxu0 %v9231_v43  ;;  %v8271_v43 = vld [vmem:[%s11277_s3 + $0x14c] ss:$16 sps:$4 sm:$0xff]  }
 0x104   : > { %1926 = vmatprep.mubr.bf16.mxu0 %v9234_v44  ;;  %v8266_v44 = vld [vmem:[%s11277_s3 + $0x140] ss:$16 sps:$4 sm:$0xff]  }
 0x105   : > { %3167 = vmatpush1.bf16.msra.mxu0 %v8254_v61  ;;  %3506 = vmatpush1.bf16.msra.mxu1 %v8257_v62 }
 0x106   : > { %3168 = vmatprep.subr.bf16.mxu0 %v8262_v63  ;;  %3507 = vmatprep.subr.bf16.mxu1 %v8265_v0 }
 0x109   : > { %3169 = vmatpush1.bf16.msra.mxu0 %v8260_v1  ;;  %3508 = vmatpush1.bf16.msra.mxu1 %v8263_v2 }
 0x10a   : > { %3170 = vmatprep.subr.bf16.mxu0 %v8268_v3  ;;  %3509 = vmatprep.subr.bf16.mxu1 %v8271_v43 }
 0x10b   : > { %1927 = vmatmul.mubr.bf16.gmra.mrb[52].mxu0 %v9244_v46  ;;  %v8283_v46 = vld [vmem:[%s11277_s3 + $0x18c] ss:$16 sps:$4 sm:$0xff]  }
 0x10c   : > { %1934 = vmatprep.mubr.bf16.mxu0 %v9247_v47  ;;  %v8278_v47 = vld [vmem:[%s11277_s3 + $0x180] ss:$16 sps:$4 sm:$0xff]  }
 0x10d   : > { %3171 = vmatpush1.bf16.msra.mxu0 %v8266_v44  ;;  %3510 = vmatpush1.bf16.msra.mxu1 %v8269_v5 }
 0x10e   : > { %3172 = vmatprep.subr.bf16.mxu0 %v8274_v7  ;;  %3511 = vmatprep.subr.bf16.mxu1 %v8277_v8  ;;  %v8302_v7 = vld [vmem:[%s11277_s3 + $0x200] ss:$16 sps:$4 sm:$0xff]   ;;  %v8305_v8 = vld [vmem:[%s11277_s3 + $0x208] ss:$16 sps:$4 sm:$0xff]  }
 0x111   : > { %3173 = vmatpush1.bf16.msra.mxu0 %v8272_v9  ;;  %3512 = vmatpush1.bf16.msra.mxu1 %v8275_v10 }
 0x112   : > { %3174 = vmatprep.subr.bf16.mxu0 %v8280_v11  ;;  %3513 = vmatprep.subr.bf16.mxu1 %v8283_v46 }
 0x113   : > { %1935 = vmatmul.mubr.bf16.gmra.mrb[56].mxu0 %v9254_v48  ;;  %v8295_v48 = vld [vmem:[%s11277_s3 + $0x1cc] ss:$16 sps:$4 sm:$0xff]  }
 0x114   : > { %1942 = vmatprep.mubr.bf16.mxu0 %v9257_v49  ;;  %v8290_v49 = vld [vmem:[%s11277_s3 + $0x1c0] ss:$16 sps:$4 sm:$0xff]  }
 0x115   : > { %3175 = vmatpush1.bf16.msra.mxu0 %v8278_v47  ;;  %3514 = vmatpush1.bf16.msra.mxu1 %v8281_v12  ;;  %v8310_v47 = vld [vmem:[%s11277_s3 + $0x224] ss:$16 sps:$4 sm:$0xff]   ;;  %v8313_v12 = vld [vmem:[%s11277_s3 + $0x22c] ss:$16 sps:$4 sm:$0xff]  }
 0x116   : > { %3176 = vmatprep.subr.bf16.mxu0 %v8286_v15  ;;  %3515 = vmatprep.subr.bf16.mxu1 %v8289_v16 }
 0x119   : > { %3177 = vmatpush1.bf16.msra.mxu0 %v8284_v17  ;;  %3516 = vmatpush1.bf16.msra.mxu1 %v8287_v18 }
 0x11a   : > { %3178 = vmatprep.subr.bf16.mxu0 %v8292_v19  ;;  %3517 = vmatprep.subr.bf16.mxu1 %v8295_v48 }
 0x11b   : > { %1943 = vmatmul.mubr.bf16.gmra.mrb[60].mxu0 %v9264_v50  ;;  %v8307_v50 = vld [vmem:[%s11277_s3 + $0x20c] ss:$16 sps:$4 sm:$0xff]  }
 0x11d   : > { %3179 = vmatpush1.bf16.msra.mxu0 %v8290_v49  ;;  %3518 = vmatpush1.bf16.msra.mxu1 %v8293_v20 }
 0x11e   : > { %3180 = vmatprep.subr.bf16.mxu0 %v8298_v22  ;;  %3519 = vmatprep.subr.bf16.mxu1 %v8301_v24 }
 0x121   : > { %3181 = vmatpush1.bf16.msra.mxu0 %v8296_v25  ;;  %3520 = vmatpush1.bf16.msra.mxu1 %v8299_v26  ;;  %v8308_v25 = vld [vmem:[%s11277_s3 + $0x220] ss:$16 sps:$4 sm:$0xff]   ;;  %v8311_v26 = vld [vmem:[%s11277_s3 + $0x228] ss:$16 sps:$4 sm:$0xff]  }
 0x122   : > { %3263 = vmatprep.subr.bf16.mxu0 %v8304_v27  ;;  %3602 = vmatprep.subr.bf16.mxu1 %v8307_v50  ;;  %v8316_v27 = vld [vmem:[%s11277_s3 + $0x244] ss:$16 sps:$4 sm:$0xff]  }
 0x176   : > { %v1549_v39 = vpop.f32.mrb[0].mxu0  ;;  %v1775_v40 = vpop.f32.mrb[0].mxu1 }
 0x177   : > { %v7598_v13 = vadd.f32 %v1549_v39, %v9612_v35  ;;  %v7630_v14 = vadd.f32 %v1775_v40, %v9617_v36  ;;  %v1551_v41 = vpop.f32.mrb[1].mxu0  ;;  %v1777_v42 = vpop.f32.mrb[1].mxu1 }
 0x178   : > { %v7599_v45 = vadd.f32 %v1551_v41, %v9622_v37  ;;  %v7631_v52 = vadd.f32 %v1777_v42, %v9627_v38  ;;  %v1553_v53 = vpop.f32.mrb[2].mxu0  ;;  %v1779_v54 = vpop.f32.mrb[2].mxu1 }
 0x179   : > { %v7600_v21 = vadd.f32 %v1553_v53, %v9612_v35  ;;  %v7632_v23 = vadd.f32 %v1779_v54, %v9617_v36  ;;  %v1555_v55 = vpop.f32.mrb[3].mxu0  ;;  %v1781_v56 = vpop.f32.mrb[3].mxu1  ;;  %v2048_v59 = vmax.f32 %v7598_v13, 0.0  ;;  %v2050_v60 = vmax.f32 %v7630_v14, 0.0  ;;  %v8319_v14 = vld [vmem:[%s11277_s3 + $0x24c] ss:$16 sps:$4 sm:$0xff]  }
 0x17a   : > { %v7601_v57 = vadd.f32 %v1555_v55, %v9622_v37  ;;  %v7633_v58 = vadd.f32 %v1781_v56, %v9627_v38  ;;  %v2049_v61 = vmax.f32 %v7599_v45, 0.0  ;;  %v2051_v62 = vmax.f32 %v7631_v52, 0.0 }
 0x17b   : > { %v2053_v31 = vmax.f32 %v7600_v21, 0.0  ;;  %v2055_v33 = vmax.f32 %v7632_v23, 0.0 }
 0x17c   : > { %v2054_v63 = vmax.f32 %v7601_v57, 0.0  ;;  %v2056_v0 = vmax.f32 %v7633_v58, 0.0  ;;  %v8314_v57 = vld [vmem:[%s11277_s3 + $0x240] ss:$16 sps:$4 sm:$0xff]   ;;  %v8317_v58 = vld [vmem:[%s11277_s3 + $0x248] ss:$16 sps:$4 sm:$0xff]  }
 0x17d   : > { %v2129_v1 = vpack.c.bf16 %v2053_v31, %v2048_v59  ;;  %v9637_v2 = vpack.c.bf16 %v2055_v33, %v2050_v60 }
 0x17e   : > { %v2130_v3 = vpack.c.bf16 %v2054_v63, %v2049_v61  ;;  %v9639_v43 = vpack.c.bf16 %v2056_v0, %v2051_v62  ;;  %v1559_v44 = vpop.f32.mrb[4].mxu0  ;;  %v1785_v5 = vpop.f32.mrb[4].mxu1  ;;  %v8322_v61 = vld [vmem:[%s11277_s3 + $0x264] ss:$16 sps:$4 sm:$0xff]   ;;  %v8325_v62 = vld [vmem:[%s11277_s3 + $0x26c] ss:$16 sps:$4 sm:$0xff]  }
 0x17f   : > { %v7602_v9 = vadd.f32 %v1559_v44, %v9612_v35  ;;  %v7634_v10 = vadd.f32 %v1785_v5, %v9617_v36  ;;  %v1561_v11 = vpop.f32.mrb[5].mxu0  ;;  %v1787_v46 = vpop.f32.mrb[5].mxu1 }
 0x180   : > { %v7603_v15 = vadd.f32 %v1561_v11, %v9622_v37  ;;  %v7635_v16 = vadd.f32 %v1787_v46, %v9627_v38  ;;  %v1563_v17 = vpop.f32.mrb[6].mxu0  ;;  %v1789_v18 = vpop.f32.mrb[6].mxu1  ;;  %3182 = vmatprep.mubr.bf16.mxu0 %v2130_v3  ;;  %3521 = vmatprep.mubr.bf16.mxu1 %v2130_v3  ;;  %v8320_v11 = vld [vmem:[%s11277_s3 + $0x260] ss:$16 sps:$4 sm:$0xff]   ;;  %v8323_v46 = vld [vmem:[%s11277_s3 + $0x268] ss:$16 sps:$4 sm:$0xff]  }
 0x181   : > { %v7604_v19 = vadd.f32 %v1563_v17, %v9612_v35  ;;  %v7636_v48 = vadd.f32 %v1789_v18, %v9617_v36  ;;  %v1565_v49 = vpop.f32.mrb[7].mxu0  ;;  %v1791_v20 = vpop.f32.mrb[7].mxu1  ;;  %3183 = vmatmul.mubr.bf16.vlgmr.msra.gmra.mrb[64].mxu0 %v2129_v1  ;;  %3522 = vmatmul.mubr.bf16.vlgmr.msra.gmra.mrb[48].mxu1 %v2129_v1  ;;  %v2058_v50 = vmax.f32 %v7602_v9, 0.0  ;;  %v2060_v39 = vmax.f32 %v7634_v10, 0.0  ;;  %v8331_v18 = vld [vmem:[%s11277_s3 + $0x28c] ss:$16 sps:$4 sm:$0xff]  }
 0x182   : > { %v7605_v22 = vadd.f32 %v1565_v49, %v9622_v37  ;;  %v7637_v24 = vadd.f32 %v1791_v20, %v9627_v38  ;;  %3264 = vmatpush1.bf16.msra.mxu0 %v8302_v7  ;;  %3603 = vmatpush1.bf16.msra.mxu1 %v8305_v8  ;;  %v2059_v41 = vmax.f32 %v7603_v15, 0.0  ;;  %v2061_v42 = vmax.f32 %v7635_v16, 0.0 }
 0x183   : > { %v2063_v40 = vmax.f32 %v7604_v19, 0.0  ;;  %v2065_v13 = vmax.f32 %v7636_v48, 0.0  ;;  %3265 = vmatprep.subr.bf16.mxu0 %v8310_v47  ;;  %3604 = vmatprep.subr.bf16.mxu1 %v8313_v12  ;;  %v8328_v47 = vld [vmem:[%s11277_s3 + $0x284] ss:$16 sps:$4 sm:$0xff]  }
 0x184   : > { %v2064_v45 = vmax.f32 %v7605_v22, 0.0  ;;  %v2066_v52 = vmax.f32 %v7637_v24, 0.0 }
 0x185   : > { %v2134_v53 = vpack.c.bf16 %v2063_v40, %v2058_v50  ;;  %v9673_v54 = vpack.c.bf16 %v2065_v13, %v2060_v39  ;;  %v8326_v39 = vld [vmem:[%s11277_s3 + $0x280] ss:$16 sps:$4 sm:$0xff]   ;;  %v8329_v40 = vld [vmem:[%s11277_s3 + $0x288] ss:$16 sps:$4 sm:$0xff]  }
 0x186   : > { %v2135_v21 = vpack.c.bf16 %v2064_v45, %v2059_v41  ;;  %v9675_v23 = vpack.c.bf16 %v2066_v52, %v2061_v42  ;;  %v1569_v55 = vpop.f32.mrb[8].mxu0  ;;  %v1795_v56 = vpop.f32.mrb[8].mxu1  ;;  %3266 = vmatpush1.bf16.msra.mxu0 %v8308_v25  ;;  %3605 = vmatpush1.bf16.msra.mxu1 %v8311_v26  ;;  %v8334_v45 = vld [vmem:[%s11277_s3 + $0x2a4] ss:$16 sps:$4 sm:$0xff]   ;;  %v8337_v52 = vld [vmem:[%s11277_s3 + $0x2ac] ss:$16 sps:$4 sm:$0xff]  }
 0x187   : > { %v7606_v59 = vadd.f32 %v1569_v55, %v9612_v35  ;;  %v7638_v60 = vadd.f32 %v1795_v56, %v9617_v36  ;;  %v1571_v31 = vpop.f32.mrb[9].mxu0  ;;  %v1797_v33 = vpop.f32.mrb[9].mxu1  ;;  %3267 = vmatprep.subr.bf16.mxu0 %v8316_v27  ;;  %3606 = vmatprep.subr.bf16.mxu1 %v8319_v14 }
 0x188   : > { %v7607_v63 = vadd.f32 %v1571_v31, %v9622_v37  ;;  %v7639_v0 = vadd.f32 %v1797_v33, %v9627_v38  ;;  %v1573_v1 = vpop.f32.mrb[10].mxu0  ;;  %v1799_v3 = vpop.f32.mrb[10].mxu1  ;;  %3192 = vmatprep.mubr.bf16.mxu0 %v2135_v21  ;;  %3531 = vmatprep.mubr.bf16.mxu1 %v2135_v21 }
 0x189   : > { %v7608_v44 = vadd.f32 %v1573_v1, %v9612_v35  ;;  %v7640_v5 = vadd.f32 %v1799_v3, %v9617_v36  ;;  %v1575_v7 = vpop.f32.mrb[11].mxu0  ;;  %v1801_v8 = vpop.f32.mrb[11].mxu1  ;;  %3193 = vmatmul.mubr.bf16.gmra.mrb[68].mxu0 %v2134_v53  ;;  %3532 = vmatmul.mubr.bf16.gmra.mrb[52].mxu1 %v2134_v53  ;;  %v2068_v12 = vmax.f32 %v7606_v59, 0.0  ;;  %v2070_v15 = vmax.f32 %v7638_v60, 0.0 }
 0x18a   : > { %v7609_v9 = vadd.f32 %v1575_v7, %v9622_v37  ;;  %v7641_v10 = vadd.f32 %v1801_v8, %v9627_v38  ;;  %3268 = vmatpush1.bf16.msra.mxu0 %v8314_v57  ;;  %3607 = vmatpush1.bf16.msra.mxu1 %v8317_v58  ;;  %v2069_v19 = vmax.f32 %v7607_v63, 0.0  ;;  %v2071_v48 = vmax.f32 %v7639_v0, 0.0  ;;  %v8340_v63 = vld [vmem:[%s11277_s3 + $0x2c4] ss:$16 sps:$4 sm:$0xff]  }
 0x18b   : > { %v2073_v16 = vmax.f32 %v7608_v44, 0.0  ;;  %v2075_v17 = vmax.f32 %v7640_v5, 0.0  ;;  %3269 = vmatprep.subr.bf16.mxu0 %v8322_v61  ;;  %3608 = vmatprep.subr.bf16.mxu1 %v8325_v62  ;;  %v8332_v61 = vld [vmem:[%s11277_s3 + $0x2a0] ss:$16 sps:$4 sm:$0xff]   ;;  %v8335_v62 = vld [vmem:[%s11277_s3 + $0x2a8] ss:$16 sps:$4 sm:$0xff]  }
 0x18c   : > { %v2074_v49 = vmax.f32 %v7609_v9, 0.0  ;;  %v2076_v20 = vmax.f32 %v7641_v10, 0.0  ;;  %v8343_v5 = vld [vmem:[%s11277_s3 + $0x2cc] ss:$16 sps:$4 sm:$0xff]  }
 0x18d   : > { %v2139_v22 = vpack.c.bf16 %v2073_v16, %v2068_v12  ;;  %v9709_v24 = vpack.c.bf16 %v2075_v17, %v2070_v15  ;;  %v8338_v17 = vld [vmem:[%s11277_s3 + $0x2c0] ss:$16 sps:$4 sm:$0xff]  }
 0x18e   : > { %v2140_v25 = vpack.c.bf16 %v2074_v49, %v2069_v19  ;;  %v9711_v26 = vpack.c.bf16 %v2076_v20, %v2071_v48  ;;  %v1579_v27 = vpop.f32.mrb[12].mxu0  ;;  %v1805_v50 = vpop.f32.mrb[12].mxu1  ;;  %3270 = vmatpush1.bf16.msra.mxu0 %v8320_v11  ;;  %3609 = vmatpush1.bf16.msra.mxu1 %v8323_v46 }
 0x18f   : > { %v7610_v13 = vadd.f32 %v1579_v27, %v9612_v35  ;;  %v7642_v14 = vadd.f32 %v1805_v50, %v9617_v36  ;;  %v1581_v41 = vpop.f32.mrb[13].mxu0  ;;  %v1807_v42 = vpop.f32.mrb[13].mxu1  ;;  %3271 = vmatprep.subr.bf16.mxu0 %v8328_v47  ;;  %3610 = vmatprep.subr.bf16.mxu1 %v8331_v18  ;;  %v8341_v18 = vld [vmem:[%s11277_s3 + $0x2c8] ss:$16 sps:$4 sm:$0xff]  }
 0x190   : > { %v7611_v53 = vadd.f32 %v1581_v41, %v9622_v37  ;;  %v7643_v21 = vadd.f32 %v1807_v42, %v9627_v38  ;;  %v1583_v55 = vpop.f32.mrb[14].mxu0  ;;  %v1809_v56 = vpop.f32.mrb[14].mxu1  ;;  %3202 = vmatprep.mubr.bf16.mxu0 %v2140_v25  ;;  %3541 = vmatprep.mubr.bf16.mxu1 %v2140_v25  ;;  %v8349_v25 = vld [vmem:[%s11277_s3 + $0x2ec] ss:$16 sps:$4 sm:$0xff]  }
 0x191   : > { %v7612_v57 = vadd.f32 %v1583_v55, %v9612_v35  ;;  %v7644_v58 = vadd.f32 %v1809_v56, %v9617_v36  ;;  %v1585_v59 = vpop.f32.mrb[15].mxu0  ;;  %v1811_v60 = vpop.f32.mrb[15].mxu1  ;;  %3203 = vmatmul.mubr.bf16.gmra.mrb[72].mxu0 %v2139_v22  ;;  %3542 = vmatmul.mubr.bf16.gmra.mrb[56].mxu1 %v2139_v22  ;;  %v2078_v0 = vmax.f32 %v7610_v13, 0.0  ;;  %v2080_v1 = vmax.f32 %v7642_v14, 0.0  ;;  %v8346_v22 = vld [vmem:[%s11277_s3 + $0x2e4] ss:$16 sps:$4 sm:$0xff]  }
 0x192   : > { %v7613_v31 = vadd.f32 %v1585_v59, %v9622_v37  ;;  %v7645_v33 = vadd.f32 %v1811_v60, %v9627_v38  ;;  %3272 = vmatpush1.bf16.msra.mxu0 %v8326_v39  ;;  %3611 = vmatpush1.bf16.msra.mxu1 %v8329_v40  ;;  %v2079_v7 = vmax.f32 %v7611_v53, 0.0  ;;  %v2081_v8 = vmax.f32 %v7643_v21, 0.0  ;;  %v8344_v53 = vld [vmem:[%s11277_s3 + $0x2e0] ss:$16 sps:$4 sm:$0xff]   ;;  %v8347_v21 = vld [vmem:[%s11277_s3 + $0x2e8] ss:$16 sps:$4 sm:$0xff]  }
 0x193   : > { %v2083_v3 = vmax.f32 %v7612_v57, 0.0  ;;  %v2085_v44 = vmax.f32 %v7644_v58, 0.0  ;;  %3273 = vmatprep.subr.bf16.mxu0 %v8334_v45  ;;  %3612 = vmatprep.subr.bf16.mxu1 %v8337_v52  ;;  %v8352_v55 = vld [vmem:[%s11277_s3 + $0x304] ss:$16 sps:$4 sm:$0xff]   ;;  %v8355_v60 = vld [vmem:[%s11277_s3 + $0x30c] ss:$16 sps:$4 sm:$0xff]  }
 0x194   : > { %v2084_v9 = vmax.f32 %v7613_v31, 0.0  ;;  %v2086_v10 = vmax.f32 %v7645_v33, 0.0 }
 0x195   : > { %v2144_v11 = vpack.c.bf16 %v2083_v3, %v2078_v0  ;;  %v9745_v46 = vpack.c.bf16 %v2085_v44, %v2080_v1 }
 0x196   : > { %v2145_v47 = vpack.c.bf16 %v2084_v9, %v2079_v7  ;;  %v9747_v12 = vpack.c.bf16 %v2086_v10, %v2081_v8  ;;  %v1589_v15 = vpop.f32.mrb[16].mxu0  ;;  %v1815_v16 = vpop.f32.mrb[16].mxu1  ;;  %3274 = vmatpush1.bf16.msra.mxu0 %v8332_v61  ;;  %3613 = vmatpush1.bf16.msra.mxu1 %v8335_v62  ;;  %v8350_v7 = vld [vmem:[%s11277_s3 + $0x300] ss:$16 sps:$4 sm:$0xff]   ;;  %v8353_v8 = vld [vmem:[%s11277_s3 + $0x308] ss:$16 sps:$4 sm:$0xff]  }
 0x197   : > { %v7614_v19 = vadd.f32 %v1589_v15, %v9612_v35  ;;  %v7646_v48 = vadd.f32 %v1815_v16, %v9617_v36  ;;  %v1591_v49 = vpop.f32.mrb[17].mxu0  ;;  %v1817_v20 = vpop.f32.mrb[17].mxu1  ;;  %3275 = vmatprep.subr.bf16.mxu0 %v8340_v63  ;;  %3614 = vmatprep.subr.bf16.mxu1 %v8343_v5  ;;  %v8358_v15 = vld [vmem:[%s11277_s3 + $0x324] ss:$16 sps:$4 sm:$0xff]   ;;  %v8361_v16 = vld [vmem:[%s11277_s3 + $0x32c] ss:$16 sps:$4 sm:$0xff]  }
 0x198   : > { %v7615_v27 = vadd.f32 %v1591_v49, %v9622_v37  ;;  %v7647_v50 = vadd.f32 %v1817_v20, %v9627_v38  ;;  %v1593_v39 = vpop.f32.mrb[18].mxu0  ;;  %v1819_v40 = vpop.f32.mrb[18].mxu1  ;;  %3212 = vmatprep.mubr.bf16.mxu0 %v2145_v47  ;;  %3551 = vmatprep.mubr.bf16.mxu1 %v2145_v47 }
 0x199   : > { %v7616_v13 = vadd.f32 %v1593_v39, %v9612_v35  ;;  %v7648_v14 = vadd.f32 %v1819_v40, %v9617_v36  ;;  %v1595_v41 = vpop.f32.mrb[19].mxu0  ;;  %v1821_v42 = vpop.f32.mrb[19].mxu1  ;;  %3213 = vmatmul.mubr.bf16.gmra.mrb[76].mxu0 %v2144_v11  ;;  %3552 = vmatmul.mubr.bf16.gmra.mrb[60].mxu1 %v2144_v11  ;;  %v2088_v56 = vmax.f32 %v7614_v19, 0.0  ;;  %v2090_v57 = vmax.f32 %v7646_v48, 0.0  ;;  %v8356_v39 = vld [vmem:[%s11277_s3 + $0x320] ss:$16 sps:$4 sm:$0xff]  }
 0x19a   : > { %v7617_v45 = vadd.f32 %v1595_v41, %v9622_v37  ;;  %v7649_v52 = vadd.f32 %v1821_v42, %v9627_v38  ;;  %3276 = vmatpush1.bf16.msra.mxu0 %v8338_v17  ;;  %3615 = vmatpush1.bf16.msra.mxu1 %v8341_v18  ;;  %v2089_v31 = vmax.f32 %v7615_v27, 0.0  ;;  %v2091_v33 = vmax.f32 %v7647_v50, 0.0  ;;  %v8359_v40 = vld [vmem:[%s11277_s3 + $0x328] ss:$16 sps:$4 sm:$0xff]  }
 0x19b   : > { %v2093_v58 = vmax.f32 %v7616_v13, 0.0  ;;  %v2095_v59 = vmax.f32 %v7648_v14, 0.0  ;;  %3277 = vmatprep.subr.bf16.mxu0 %v8346_v22  ;;  %3616 = vmatprep.subr.bf16.mxu1 %v8349_v25  ;;  %v8364_v13 = vld [vmem:[%s11277_s3 + $0x344] ss:$16 sps:$4 sm:$0xff]  }
 0x19c   : > { %v2094_v61 = vmax.f32 %v7617_v45, 0.0  ;;  %v2096_v62 = vmax.f32 %v7649_v52, 0.0  ;;  %v8367_v52 = vld [vmem:[%s11277_s3 + $0x34c] ss:$16 sps:$4 sm:$0xff]  }
 0x19d   : > { %v2149_v63 = vpack.c.bf16 %v2093_v58, %v2088_v56  ;;  %v9781_v0 = vpack.c.bf16 %v2095_v59, %v2090_v57 }
 0x19e   : > { %v2150_v1 = vpack.c.bf16 %v2094_v61, %v2089_v31  ;;  %v9783_v3 = vpack.c.bf16 %v2096_v62, %v2091_v33  ;;  %v1599_v44 = vpop.f32.mrb[20].mxu0  ;;  %v1825_v5 = vpop.f32.mrb[20].mxu1  ;;  %3278 = vmatpush1.bf16.msra.mxu0 %v8344_v53  ;;  %3617 = vmatpush1.bf16.msra.mxu1 %v8347_v21  ;;  %v8362_v61 = vld [vmem:[%s11277_s3 + $0x340] ss:$16 sps:$4 sm:$0xff]   ;;  %v8365_v62 = vld [vmem:[%s11277_s3 + $0x348] ss:$16 sps:$4 sm:$0xff]  }
 0x19f   : > { %v7618_v9 = vadd.f32 %v1599_v44, %v9612_v35  ;;  %v7650_v10 = vadd.f32 %v1825_v5, %v9617_v36  ;;  %v1601_v11 = vpop.f32.mrb[21].mxu0  ;;  %v1827_v47 = vpop.f32.mrb[21].mxu1  ;;  %3279 = vmatprep.subr.bf16.mxu0 %v8352_v55  ;;  %3618 = vmatprep.subr.bf16.mxu1 %v8355_v60 }
 0x1a0   : > { %v7619_v17 = vadd.f32 %v1601_v11, %v9622_v37  ;;  %v7651_v18 = vadd.f32 %v1827_v47, %v9627_v38  ;;  %v1603_v19 = vpop.f32.mrb[22].mxu0  ;;  %v1829_v48 = vpop.f32.mrb[22].mxu1  ;;  %3222 = vmatprep.mubr.bf16.mxu0 %v2150_v1  ;;  %3561 = vmatprep.mubr.bf16.mxu1 %v2150_v1 }
 0x1a1   : > { %v7620_v49 = vadd.f32 %v1603_v19, %v9612_v35  ;;  %v7652_v20 = vadd.f32 %v1829_v48, %v9617_v36  ;;  %v1605_v22 = vpop.f32.mrb[23].mxu0  ;;  %v1831_v25 = vpop.f32.mrb[23].mxu1  ;;  %3223 = vmatmul.mubr.bf16.gmra.mrb[80].mxu0 %v2149_v63  ;;  %3562 = vmatmul.mubr.bf16.gmra.mrb[64].mxu1 %v2149_v63  ;;  %v2098_v14 = vmax.f32 %v7618_v9, 0.0  ;;  %v2100_v41 = vmax.f32 %v7650_v10, 0.0 }
 0x1a2   : > { %v7621_v27 = vadd.f32 %v1605_v22, %v9622_v37  ;;  %v7653_v50 = vadd.f32 %v1831_v25, %v9627_v38  ;;  %3280 = vmatpush1.bf16.msra.mxu0 %v8350_v7  ;;  %3619 = vmatpush1.bf16.msra.mxu1 %v8353_v8  ;;  %v2099_v53 = vmax.f32 %v7619_v17, 0.0  ;;  %v2101_v21 = vmax.f32 %v7651_v18, 0.0  ;;  %v8370_v7 = vld [vmem:[%s11277_s3 + $0x364] ss:$16 sps:$4 sm:$0xff]   ;;  %v8373_v8 = vld [vmem:[%s11277_s3 + $0x36c] ss:$16 sps:$4 sm:$0xff]  }
 0x1a3   : > { %v2103_v42 = vmax.f32 %v7620_v49, 0.0  ;;  %v2105_v45 = vmax.f32 %v7652_v20, 0.0  ;;  %3281 = vmatprep.subr.bf16.mxu0 %v8358_v15  ;;  %3620 = vmatprep.subr.bf16.mxu1 %v8361_v16  ;;  %v8368_v49 = vld [vmem:[%s11277_s3 + $0x360] ss:$16 sps:$4 sm:$0xff]   ;;  %v8371_v20 = vld [vmem:[%s11277_s3 + $0x368] ss:$16 sps:$4 sm:$0xff]  }
 0x1a4   : > { %v2104_v55 = vmax.f32 %v7621_v27, 0.0  ;;  %v2106_v56 = vmax.f32 %v7653_v50, 0.0  ;;  %v8376_v22 = vld [vmem:[%s11277_s3 + $0x384] ss:$16 sps:$4 sm:$0xff]  }
 0x1a5   : > { %v2154_v57 = vpack.c.bf16 %v2103_v42, %v2098_v14  ;;  %v9817_v58 = vpack.c.bf16 %v2105_v45, %v2100_v41 }
 0x1a6   : > { %v2155_v59 = vpack.c.bf16 %v2104_v55, %v2099_v53  ;;  %v9819_v60 = vpack.c.bf16 %v2106_v56, %v2101_v21  ;;  %v1609_v31 = vpop.f32.mrb[24].mxu0  ;;  %v1835_v33 = vpop.f32.mrb[24].mxu1  ;;  %3282 = vmatpush1.bf16.msra.mxu0 %v8356_v39  ;;  %3621 = vmatpush1.bf16.msra.mxu1 %v8359_v40  ;;  %v8379_v40 = vld [vmem:[%s11277_s3 + $0x38c] ss:$16 sps:$4 sm:$0xff]  }
 0x1a7   : > { %v7622_v63 = vadd.f32 %v1609_v31, %v9612_v35  ;;  %v7654_v1 = vadd.f32 %v1835_v33, %v9617_v36  ;;  %v1611_v44 = vpop.f32.mrb[25].mxu0  ;;  %v1837_v5 = vpop.f32.mrb[25].mxu1  ;;  %3283 = vmatprep.subr.bf16.mxu0 %v8364_v13  ;;  %3622 = vmatprep.subr.bf16.mxu1 %v8367_v52 }
 0x1a8   : > { %v7623_v9 = vadd.f32 %v1611_v44, %v9622_v37  ;;  %v7655_v10 = vadd.f32 %v1837_v5, %v9627_v38  ;;  %v1613_v11 = vpop.f32.mrb[26].mxu0  ;;  %v1839_v47 = vpop.f32.mrb[26].mxu1  ;;  %3232 = vmatprep.mubr.bf16.mxu0 %v2155_v59  ;;  %3571 = vmatprep.mubr.bf16.mxu1 %v2155_v59  ;;  %v8377_v59 = vld [vmem:[%s11277_s3 + $0x388] ss:$16 sps:$4 sm:$0xff]  }
 0x1a9   : > { %v7624_v15 = vadd.f32 %v1613_v11, %v9612_v35  ;;  %v7656_v16 = vadd.f32 %v1839_v47, %v9617_v36  ;;  %v1615_v17 = vpop.f32.mrb[27].mxu0  ;;  %v1841_v18 = vpop.f32.mrb[27].mxu1  ;;  %3233 = vmatmul.mubr.bf16.gmra.mrb[84].mxu0 %v2154_v57  ;;  %3572 = vmatmul.mubr.bf16.gmra.mrb[68].mxu1 %v2154_v57  ;;  %v2108_v25 = vmax.f32 %v7622_v63, 0.0  ;;  %v2110_v27 = vmax.f32 %v7654_v1, 0.0  ;;  %v8374_v57 = vld [vmem:[%s11277_s3 + $0x380] ss:$16 sps:$4 sm:$0xff]  }
 0x1aa   : > { %v7625_v19 = vadd.f32 %v1615_v17, %v9622_v37  ;;  %v7657_v48 = vadd.f32 %v1841_v18, %v9627_v38  ;;  %3284 = vmatpush1.bf16.msra.mxu0 %v8362_v61  ;;  %3623 = vmatpush1.bf16.msra.mxu1 %v8365_v62  ;;  %v2109_v13 = vmax.f32 %v7623_v9, 0.0  ;;  %v2111_v14 = vmax.f32 %v7655_v10, 0.0  ;;  %v8382_v63 = vld [vmem:[%s11277_s3 + $0x3a4] ss:$16 sps:$4 sm:$0xff]   ;;  %v8385_v1 = vld [vmem:[%s11277_s3 + $0x3ac] ss:$16 sps:$4 sm:$0xff]  }
 0x1ab   : > { %v2113_v50 = vmax.f32 %v7624_v15, 0.0  ;;  %v2115_v39 = vmax.f32 %v7656_v16, 0.0  ;;  %3285 = vmatprep.subr.bf16.mxu0 %v8370_v7  ;;  %3624 = vmatprep.subr.bf16.mxu1 %v8373_v8  ;;  %v8380_v15 = vld [vmem:[%s11277_s3 + $0x3a0] ss:$16 sps:$4 sm:$0xff]   ;;  %v643_v18 = vsub.s32 4, %v9598_v29 }
 0x1ac   : > { %v2114_v41 = vmax.f32 %v7625_v19, 0.0  ;;  %v2116_v42 = vmax.f32 %v7657_v48, 0.0 }
 0x1ad   : > { %v2159_v45 = vpack.c.bf16 %v2113_v50, %v2108_v25  ;;  %v9853_v52 = vpack.c.bf16 %v2115_v39, %v2110_v27 }
 0x1ae   : > { %v2160_v53 = vpack.c.bf16 %v2114_v41, %v2109_v13  ;;  %v9855_v21 = vpack.c.bf16 %v2116_v42, %v2111_v14  ;;  %v1619_v55 = vpop.f32.mrb[28].mxu0  ;;  %v1845_v56 = vpop.f32.mrb[28].mxu1  ;;  %3286 = vmatpush1.bf16.msra.mxu0 %v8368_v49  ;;  %3625 = vmatpush1.bf16.msra.mxu1 %v8371_v20  ;;  %v8386_v14 = vld [vmem:[%s11277_s3 + $0x3c0] ss:$16 sps:$4 sm:$0xff]   ;;  %v9898_v42 = vrot.slane %v9605_v34, %v643_v18  ;;  %v8397_v34 = vld [vmem:[%s11277_s3 + $0x3ec] ss:$16 sps:$4 sm:$0xff]  }
 0x1af   : > { %v7626_v31 = vadd.f32 %v1619_v55, %v9612_v35  ;;  %v7658_v33 = vadd.f32 %v1845_v56, %v9617_v36  ;;  %v1621_v61 = vpop.f32.mrb[29].mxu0  ;;  %v1847_v62 = vpop.f32.mrb[29].mxu1  ;;  %3287 = vmatprep.subr.bf16.mxu0 %v8376_v22  ;;  %3626 = vmatprep.subr.bf16.mxu1 %v8379_v40  ;;  %v8406_v18 = vld [vmem:[%s11277_s3 + $0x424] ss:$16 sps:$4 sm:$0xff]  }
 0x1b0   : > { %v7627_v44 = vadd.f32 %v1621_v61, %v9622_v37  ;;  %v7659_v5 = vadd.f32 %v1847_v62, %v9627_v38  ;;  %v1623_v7 = vpop.f32.mrb[30].mxu0  ;;  %v1849_v8 = vpop.f32.mrb[30].mxu1  ;;  %3242 = vmatprep.mubr.bf16.mxu0 %v2160_v53  ;;  %3581 = vmatprep.mubr.bf16.mxu1 %v2160_v53  ;;  %v8389_v53 = vld [vmem:[%s11277_s3 + $0x3c8] ss:$16 sps:$4 sm:$0xff]  }
 0x1b1   : > { %v7628_v9 = vadd.f32 %v1623_v7, %v9612_v35  ;;  %v7660_v10 = vadd.f32 %v1849_v8, %v9617_v36  ;;  %v1625_v11 = vpop.f32.mrb[31].mxu0  ;;  %v1851_v47 = vpop.f32.mrb[31].mxu1  ;;  %3243 = vmatmul.mubr.bf16.gmra.mrb[88].mxu0 %v2159_v45  ;;  %3582 = vmatmul.mubr.bf16.gmra.mrb[72].mxu1 %v2159_v45  ;;  %v8383_v35 = vld [vmem:[%s11277_s3 + $0x3a8] ss:$16 sps:$4 sm:$0xff]   ;;  %v8388_v36 = vld [vmem:[%s11277_s3 + $0x3c4] ss:$16 sps:$4 sm:$0xff]  }
 0x1b2   : > { %v7629_v16 = vadd.f32 %v1625_v11, %v9622_v37  ;;  %v7661_v17 = vadd.f32 %v1851_v47, %v9627_v38  ;;  %3288 = vmatpush1.bf16.msra.mxu0 %v8374_v57  ;;  %3627 = vmatpush1.bf16.msra.mxu1 %v8377_v59  ;;  %v2118_v19 = vmax.f32 %v7626_v31, 0.0  ;;  %v2120_v48 = vmax.f32 %v7658_v33, 0.0  ;;  %v8391_v37 = vld [vmem:[%s11277_s3 + $0x3cc] ss:$16 sps:$4 sm:$0xff]   ;;  %v8394_v57 = vld [vmem:[%s11277_s3 + $0x3e4] ss:$16 sps:$4 sm:$0xff]  }
 0x1b3   : > { %v2123_v49 = vmax.f32 %v7628_v9, 0.0  ;;  %v2125_v20 = vmax.f32 %v7660_v10, 0.0  ;;  %3289 = vmatprep.subr.bf16.mxu0 %v8382_v63  ;;  %3628 = vmatprep.subr.bf16.mxu1 %v8385_v1  ;;  %v2119_v38 = vmax.f32 %v7627_v44, 0.0  ;;  %v2121_v22 = vmax.f32 %v7659_v5, 0.0  ;;  %v8392_v63 = vld [vmem:[%s11277_s3 + $0x3e0] ss:$16 sps:$4 sm:$0xff]  }
 0x1b4   : > { %v2124_v25 = vmax.f32 %v7629_v16, 0.0  ;;  %v2126_v27 = vmax.f32 %v7661_v17, 0.0  ;;  %v8395_v5 = vld [vmem:[%s11277_s3 + $0x3e8] ss:$16 sps:$4 sm:$0xff]   ;;  %v8400_v7 = vld [vmem:[%s11277_s3 + $0x404] ss:$16 sps:$4 sm:$0xff]  }
 0x1b5   : > { %v2164_v50 = vpack.c.bf16 %v2123_v49, %v2118_v19  ;;  %v9890_v39 = vpack.c.bf16 %v2125_v20, %v2120_v48  ;;  %v8403_v8 = vld [vmem:[%s11277_s3 + $0x40c] ss:$16 sps:$4 sm:$0xff]   ;;  %v8398_v16 = vld [vmem:[%s11277_s3 + $0x400] ss:$16 sps:$4 sm:$0xff]   ;;  %v8401_v17 = vld [vmem:[%s11277_s3 + $0x408] ss:$16 sps:$4 sm:$0xff]  }
 0x1b6   : > { %v2165_v40 = vpack.c.bf16 %v2124_v25, %v2119_v38  ;;  %v9892_v13 = vpack.c.bf16 %v2126_v27, %v2121_v22  ;;  %3290 = vmatpush1.bf16.msra.mxu0 %v8380_v15  ;;  %3629 = vmatpush1.bf16.msra.mxu1 %v8383_v35  ;;  %v7206_v41 = vpop.f32.mrb[32].mxu0  ;;  %v9900_v45 = vpop.f32.mrb[32].mxu1 }
 0x1b7   : > { %3291 = vmatprep.subr.bf16.mxu0 %v8388_v36  ;;  %3630 = vmatprep.subr.bf16.mxu1 %v8391_v37  ;;  %v7207_v55 = vpop.f32.mrb[33].mxu0  ;;  %v1985_v56 = vpop.f32.mrb[33].mxu1  ;;  %v8409_v37 = vld [vmem:[%s11277_s3 + $0x42c] ss:$16 sps:$4 sm:$0xff]  }
 0x1b8   : > { %3252 = vmatprep.mubr.bf16.mxu0 %v2165_v40  ;;  %3591 = vmatprep.mubr.bf16.mxu1 %v2165_v40  ;;  %v7208_v59 = vadd.f32 %v7207_v55, %v7206_v41  ;;  %v7209_v31 = vpop.f32.mrb[34].mxu0  ;;  %v7465_v33 = vpop.f32.mrb[34].mxu1  ;;  %v8404_v40 = vld [vmem:[%s11277_s3 + $0x420] ss:$16 sps:$4 sm:$0xff]  }
 0x1b9   : > { %3253 = vmatmul.mubr.bf16.gmra.mrb[92].mxu0 %v2164_v50  ;;  %3592 = vmatmul.mubr.bf16.gmra.mrb[76].mxu1 %v2164_v50  ;;  %v7210_v61 = vpop.f32.mrb[35].mxu0  ;;  %v1988_v62 = vpop.f32.mrb[35].mxu1 }
 0x1ba   : > { %3292 = vmatpush1.bf16.msra.mxu0 %v8386_v14  ;;  %3295 = vmatprep.mubr.bf16.mxu0 %v9639_v43  ;;  %v7211_v1 = vadd.f32 %v7210_v61, %v7209_v31  ;;  %v1889_v44 = vadd.f32 %v7208_v59, %v9898_v42  ;;  %v8412_v14 = vld [vmem:[%s11277_s3 + $0x444] ss:$16 sps:$4 sm:$0xff]   ;;  %v8410_v59 = vld [vmem:[%s11277_s3 + $0x440] ss:$16 sps:$4 sm:$0xff]  }
 0x1bb   : > { %3631 = vmatpush1.bf16.msra.mxu1 %v8389_v53  ;;  %3634 = vmatprep.mubr.bf16.mxu1 %v9639_v43 }
 0x1bc   : > { %3293 = vmatprep.subr.bf16.mxu0 %v8394_v57  ;;  %3632 = vmatprep.subr.bf16.mxu1 %v8397_v34  ;;  %v1986_v9 = vadd.f32 %v1985_v56, %v1889_v44  ;;  %v1892_v10 = vadd.f32 %v7211_v1, %v9898_v42 }
 0x1be   : > { %3294 = vmatpush1.bf16.msra.mxu0 %v8392_v63  ;;  %v7212_v11 = vpop.f32.mrb[36].mxu0  ;;  %v2052_v43 = vmax.f32 %v1986_v9, 0.0  ;;  %v1989_v47 = vadd.f32 %v1988_v62, %v1892_v10  ;;  %v9927_v15 = vpop.f32.mrb[36].mxu1 }
 0x1bf   : > { %3633 = vmatpush1.bf16.msra.mxu1 %v8395_v5  ;;  %3376 = vmatprep.subr.bf16.mxu0 %v8400_v7  ;;  %v7213_v35 = vpop.f32.mrb[37].mxu0  ;;  %v2001_v36 = vpop.f32.mrb[37].mxu1  ;;  %v8421_v5 = vld [vmem:[%s11277_s3 + $0x46c] ss:$16 sps:$4 sm:$0xff]  }
 0x1c0   : > { %3715 = vmatprep.subr.bf16.mxu1 %v8403_v8  ;;  %v7214_v19 = vadd.f32 %v7213_v35, %v7212_v11  ;;  %v7215_v48 = vpop.f32.mrb[38].mxu0  ;;  %v2057_v49 = vmax.f32 %v1989_v47, 0.0  ;;  %v9938_v20 = vpop.f32.mrb[38].mxu1  ;;  %v8424_v47 = vld [vmem:[%s11277_s3 + $0x484] ss:$16 sps:$4 sm:$0xff]  }
 0x1c1   : > { %3296 = vmatmul.mubr.bf16.vlgmr.msra.gmra.mrb[64].mxu0 %v9637_v2  ;;  %v7216_v38 = vpop.f32.mrb[39].mxu0  ;;  %v2004_v22 = vpop.f32.mrb[39].mxu1 }
 0x1c2   : > { %3635 = vmatmul.mubr.bf16.vlgmr.msra.gmra.mrb[48].mxu1 %v9637_v2  ;;  %3305 = vmatprep.mubr.bf16.mxu0 %v9675_v23  ;;  %v7217_v25 = vadd.f32 %v7216_v38, %v7215_v48  ;;  %v1897_v27 = vadd.f32 %v7214_v19, %v9898_v42  ;;  %v9947_v50 = vpack.c.bf16 %v2057_v49, %v2052_v43  ;;  %v8407_v2 = vld [vmem:[%s11277_s3 + $0x428] ss:$16 sps:$4 sm:$0xff]   ;;  %v8416_v43 = vld [vmem:[%s11277_s3 + $0x460] ss:$16 sps:$4 sm:$0xff]  }
 0x1c3   : > { %3377 = vmatpush1.bf16.msra.mxu0 %v8398_v16  ;;  %3644 = vmatprep.mubr.bf16.mxu1 %v9675_v23  ;;  %v8415_v23 = vld [vmem:[%s11277_s3 + $0x44c] ss:$16 sps:$4 sm:$0xff]   ;;  %v8422_v49 = vld [vmem:[%s11277_s3 + $0x480] ss:$16 sps:$4 sm:$0xff]  }
 0x1c4   : > { %3716 = vmatpush1.bf16.msra.mxu1 %v8401_v17  ;;  %3378 = vmatprep.subr.bf16.mxu0 %v8406_v18  ;;  %v1994_v41 = vadd.f32 %v9900_v45, %v1897_v27  ;;  %v1900_v53 = vadd.f32 %v7217_v25, %v9898_v42  ;;  %v8413_v45 = vld [vmem:[%s11277_s3 + $0x448] ss:$16 sps:$4 sm:$0xff]  }
 0x1c5   : > { %3717 = vmatprep.subr.bf16.mxu1 %v8409_v37 }
 0x1c6   : > { %v2062_v55 = vmax.f32 %v1994_v41, 0.0  ;;  %v1997_v56 = vadd.f32 %v7465_v33, %v1900_v53  ;;  %v7218_v57 = vpop.f32.mrb[40].mxu0  ;;  %v9964_v34 = vpop.f32.mrb[40].mxu1  ;;  %v8418_v33 = vld [vmem:[%s11277_s3 + $0x464] ss:$16 sps:$4 sm:$0xff]  }
 0x1c7   : > { %3379 = vmatpush1.bf16.msra.mxu0 %v8404_v40  ;;  %v7219_v31 = vpop.f32.mrb[41].mxu0  ;;  %v9972_v61 = vpop.f32.mrb[41].mxu1 }
 0x1c8   : > { %3718 = vmatpush1.bf16.msra.mxu1 %v8407_v2  ;;  %3380 = vmatprep.subr.bf16.mxu0 %v8412_v14  ;;  %v2067_v62 = vmax.f32 %v1997_v56, 0.0  ;;  %v7220_v63 = vadd.f32 %v7219_v31, %v7218_v57  ;;  %v7221_v1 = vpop.f32.mrb[42].mxu0  ;;  %v9977_v44 = vpop.f32.mrb[42].mxu1  ;;  %v8433_v14 = vld [vmem:[%s11277_s3 + $0x4ac] ss:$16 sps:$4 sm:$0xff]  }
 0x1c9   : > { %3306 = vmatmul.mubr.bf16.gmra.mrb[68].mxu0 %v9673_v54  ;;  %3719 = vmatprep.subr.bf16.mxu1 %v8415_v23  ;;  %v7222_v7 = vpop.f32.mrb[43].mxu0  ;;  %v9983_v8 = vpop.f32.mrb[43].mxu1  ;;  %v8428_v57 = vld [vmem:[%s11277_s3 + $0x4a0] ss:$16 sps:$4 sm:$0xff]  }
 0x1ca   : > { %3645 = vmatmul.mubr.bf16.gmra.mrb[52].mxu1 %v9673_v54  ;;  %3315 = vmatprep.mubr.bf16.mxu0 %v9711_v26  ;;  %v9987_v9 = vpack.c.bf16 %v2067_v62, %v2062_v55  ;;  %v7223_v10 = vadd.f32 %v7222_v7, %v7221_v1  ;;  %v1905_v11 = vadd.f32 %v7220_v63, %v9898_v42  ;;  %v8419_v54 = vld [vmem:[%s11277_s3 + $0x468] ss:$16 sps:$4 sm:$0xff]   ;;  %v8434_v1 = vld [vmem:[%s11277_s3 + $0x4c0] ss:$16 sps:$4 sm:$0xff]   ;;  %v8442_v7 = vld [vmem:[%s11277_s3 + $0x4e4] ss:$16 sps:$4 sm:$0xff]  }
 0x1cb   : > { %3654 = vmatprep.mubr.bf16.mxu1 %v9711_v26  ;;  %3381 = vmatpush1.bf16.msra.mxu0 %v8410_v59  ;;  %v8427_v26 = vld [vmem:[%s11277_s3 + $0x48c] ss:$16 sps:$4 sm:$0xff]   ;;  %v8436_v59 = vld [vmem:[%s11277_s3 + $0x4c4] ss:$16 sps:$4 sm:$0xff]  }
 0x1cc   : > { %3720 = vmatpush1.bf16.msra.mxu1 %v8413_v45  ;;  %3382 = vmatprep.subr.bf16.mxu0 %v8418_v33  ;;  %v2002_v16 = vadd.f32 %v2001_v36, %v1905_v11  ;;  %v1908_v17 = vadd.f32 %v7223_v10, %v9898_v42  ;;  %v8425_v36 = vld [vmem:[%s11277_s3 + $0x488] ss:$16 sps:$4 sm:$0xff]  }
 0x1cd   : > { %3721 = vmatprep.subr.bf16.mxu1 %v8421_v5 }
 0x1ce   : > { %v7224_v35 = vpop.f32.mrb[44].mxu0  ;;  %v2072_v18 = vmax.f32 %v2002_v16, 0.0  ;;  %v2005_v19 = vadd.f32 %v2004_v22, %v1908_v17  ;;  %v10004_v48 = vpop.f32.mrb[44].mxu1  ;;  %v8430_v22 = vld [vmem:[%s11277_s3 + $0x4a4] ss:$16 sps:$4 sm:$0xff]  }
 0x1cf   : > { %3383 = vmatpush1.bf16.msra.mxu0 %v8416_v43  ;;  %v7225_v37 = vpop.f32.mrb[45].mxu0  ;;  %v10012_v38 = vpop.f32.mrb[45].mxu1  ;;  %v8445_v43 = vld [vmem:[%s11277_s3 + $0x4ec] ss:$16 sps:$4 sm:$0xff]  }
 0x1d0   : > { %3722 = vmatpush1.bf16.msra.mxu1 %v8419_v54  ;;  %3384 = vmatprep.subr.bf16.mxu0 %v8424_v47  ;;  %v7226_v25 = vadd.f32 %v7225_v37, %v7224_v35  ;;  %v7227_v27 = vpop.f32.mrb[46].mxu0  ;;  %v2077_v40 = vmax.f32 %v2005_v19, 0.0  ;;  %v10017_v2 = vpop.f32.mrb[46].mxu1 }
 0x1d1   : > { %3316 = vmatmul.mubr.bf16.gmra.mrb[72].mxu0 %v9709_v24  ;;  %3723 = vmatprep.subr.bf16.mxu1 %v8427_v26  ;;  %v7228_v41 = vpop.f32.mrb[47].mxu0  ;;  %v10023_v53 = vpop.f32.mrb[47].mxu1  ;;  %v8440_v26 = vld [vmem:[%s11277_s3 + $0x4e0] ss:$16 sps:$4 sm:$0xff]  }
 0x1d2   : > { %3655 = vmatmul.mubr.bf16.gmra.mrb[56].mxu1 %v9709_v24  ;;  %3325 = vmatprep.mubr.bf16.mxu0 %v9747_v12  ;;  %v7229_v23 = vadd.f32 %v7228_v41, %v7227_v27  ;;  %v1913_v55 = vadd.f32 %v7226_v25, %v9898_v42  ;;  %v10028_v56 = vpack.c.bf16 %v2077_v40, %v2072_v18  ;;  %v8431_v24 = vld [vmem:[%s11277_s3 + $0x4a8] ss:$16 sps:$4 sm:$0xff]  }
 0x1d3   : > { %3664 = vmatprep.mubr.bf16.mxu1 %v9747_v12  ;;  %3385 = vmatpush1.bf16.msra.mxu0 %v8422_v49  ;;  %v8439_v12 = vld [vmem:[%s11277_s3 + $0x4cc] ss:$16 sps:$4 sm:$0xff]  }
 0x1d4   : > { %3724 = vmatpush1.bf16.msra.mxu1 %v8425_v36  ;;  %3386 = vmatprep.subr.bf16.mxu0 %v8430_v22  ;;  %v2010_v45 = vadd.f32 %v9927_v15, %v1913_v55  ;;  %v1916_v31 = vadd.f32 %v7229_v23, %v9898_v42  ;;  %v8437_v15 = vld [vmem:[%s11277_s3 + $0x4c8] ss:$16 sps:$4 sm:$0xff]  }
 0x1d5   : > { %3725 = vmatprep.subr.bf16.mxu1 %v8433_v14 }
 0x1d6   : > { %v2082_v33 = vmax.f32 %v2010_v45, 0.0  ;;  %v2013_v62 = vadd.f32 %v9938_v20, %v1916_v31  ;;  %v7230_v63 = vpop.f32.mrb[48].mxu0 }
 0x1d7   : > { %3387 = vmatpush1.bf16.msra.mxu0 %v8428_v57  ;;  %v7231_v5 = vpop.f32.mrb[49].mxu0 }
 0x1d8   : > { %3726 = vmatpush1.bf16.msra.mxu1 %v8431_v24  ;;  %3388 = vmatprep.subr.bf16.mxu0 %v8436_v59  ;;  %v2087_v10 = vmax.f32 %v2013_v62, 0.0  ;;  %v7232_v11 = vadd.f32 %v7231_v5, %v7230_v63  ;;  %v7233_v20 = vpop.f32.mrb[50].mxu0 }
 0x1d9   : > { %3326 = vmatmul.mubr.bf16.gmra.mrb[76].mxu0 %v9745_v46  ;;  %3727 = vmatprep.subr.bf16.mxu1 %v8439_v12  ;;  %v7234_v54 = vpop.f32.mrb[51].mxu0 }
 0x1da   : > { %3665 = vmatmul.mubr.bf16.gmra.mrb[60].mxu1 %v9745_v46  ;;  %3335 = vmatprep.mubr.bf16.mxu0 %v9783_v3  ;;  %v10061_v47 = vpack.c.bf16 %v2087_v10, %v2082_v33  ;;  %v7235_v16 = vadd.f32 %v7234_v54, %v7233_v20  ;;  %v1921_v17 = vadd.f32 %v7232_v11, %v9898_v42  ;;  %v8443_v46 = vld [vmem:[%s11277_s3 + $0x4e8] ss:$16 sps:$4 sm:$0xff]  }
 0x1db   : > { %3674 = vmatprep.mubr.bf16.mxu1 %v9783_v3  ;;  %3389 = vmatpush1.bf16.msra.mxu0 %v8434_v1 }
 0x1dc   : > { %3728 = vmatpush1.bf16.msra.mxu1 %v8437_v15  ;;  %3390 = vmatprep.subr.bf16.mxu0 %v8442_v7  ;;  %v2018_v35 = vadd.f32 %v9972_v61, %v1921_v17  ;;  %v1924_v18 = vadd.f32 %v7235_v16, %v9898_v42 }
 0x1dd   : > { %3729 = vmatprep.subr.bf16.mxu1 %v8445_v43 }
 0x1de   : > { %v7236_v19 = vpop.f32.mrb[52].mxu0  ;;  %v2092_v49 = vmax.f32 %v2018_v35, 0.0  ;;  %v2021_v3 = vadd.f32 %v9983_v8, %v1924_v18  ;;  %v3835_v35 = vadd.s32 48, %v9598_v29 }
 0x1df   : > { %3391 = vmatpush1.bf16.msra.mxu0 %v8440_v26  ;;  %v7237_v36 = vpop.f32.mrb[53].mxu0  ;;  %v3834_v26 = vadd.s32 40, %v9598_v29 }
 0x1e0   : > { %3730 = vmatpush1.bf16.msra.mxu1 %v8443_v46  ;;  %v7238_v37 = vadd.f32 %v7237_v36, %v7236_v19  ;;  %v7239_v22 = vpop.f32.mrb[54].mxu0  ;;  %v2097_v25 = vmax.f32 %v2021_v3, 0.0  ;;  %v3837_v19 = vadd.s32 64, %v9598_v29  ;;  %v3840_v36 = vadd.s32 88, %v9598_v29 }
 0x1e1   : > { %3336 = vmatmul.mubr.bf16.gmra.mrb[80].mxu0 %v9781_v0  ;;  %v7240_v27 = vpop.f32.mrb[55].mxu0 }
 0x1e2   : > { %3675 = vmatmul.mubr.bf16.gmra.mrb[64].mxu1 %v9781_v0  ;;  %3345 = vmatprep.mubr.bf16.mxu0 %v9819_v60  ;;  %v7241_v61 = vadd.f32 %v7240_v27, %v7239_v22  ;;  %v1929_v40 = vadd.f32 %v7238_v37, %v9898_v42  ;;  %v2153_v14 = vpack.c.bf16 %v2097_v25, %v2092_v49  ;;  %v3838_v49 = vadd.s32 72, %v9598_v29 }
 0x1e3   : > { %3684 = vmatprep.mubr.bf16.mxu1 %v9819_v60  ;;  %v3842_v37 = vadd.s32 104, %v9598_v29  ;;  %v8757_v22 = vmov 0.0  }
 0x1e4   : > { %v2026_v8 = vadd.f32 %v9964_v34, %v1929_v40  ;;  %v1932_v41 = vadd.f32 %v7241_v61, %v9898_v42  ;;  %v3843_v61 = vadd.s32 112, %v9598_v29  ;;  %v3844_v40 = vadd.s32 120, %v9598_v29 }
 0x1e6   : > { %v2102_v23 = vmax.f32 %v2026_v8, 0.0  ;;  %v2029_v55 = vadd.f32 %v9977_v44, %v1932_v41  ;;  %v7242_v57 = vpop.f32.mrb[56].mxu0 }
 0x1e7   : > { %v7243_v24 = vpop.f32.mrb[57].mxu0 }
 0x1e8   : > { %v2107_v59 = vmax.f32 %v2029_v55, 0.0  ;;  %v7244_v45 = vadd.f32 %v7243_v24, %v7242_v57  ;;  %v7245_v0 = vpop.f32.mrb[58].mxu0 }
 0x1e9   : > { %3346 = vmatmul.mubr.bf16.gmra.mrb[84].mxu0 %v9817_v58  ;;  %v7246_v31 = vpop.f32.mrb[59].mxu0 }
 0x1ea   : > { %3685 = vmatmul.mubr.bf16.gmra.mrb[68].mxu1 %v9817_v58  ;;  %3355 = vmatprep.mubr.bf16.mxu0 %v9855_v21  ;;  %v2158_v60 = vpack.c.bf16 %v2107_v59, %v2102_v23  ;;  %v7247_v12 = vadd.f32 %v7246_v31, %v7245_v0  ;;  %v1937_v34 = vadd.f32 %v7244_v45, %v9898_v42 }
 0x1eb   : > { %3694 = vmatprep.mubr.bf16.mxu1 %v9855_v21 }
 0x1ec   : > { %v2034_v44 = vadd.f32 %v10012_v38, %v1937_v34  ;;  %v1940_v33 = vadd.f32 %v7247_v12, %v9898_v42 }
 0x1ee   : > { %v7248_v62 = vpop.f32.mrb[60].mxu0  ;;  %v2112_v63 = vmax.f32 %v2034_v44, 0.0  ;;  %v2037_v1 = vadd.f32 %v10023_v53, %v1940_v33 }
 0x1ef   : > { %v7249_v5 = vpop.f32.mrb[61].mxu0 }
 0x1f0   : > { %v7250_v15 = vadd.f32 %v7249_v5, %v7248_v62  ;;  %v7251_v7 = vpop.f32.mrb[62].mxu0  ;;  %v2117_v58 = vmax.f32 %v2037_v1, 0.0 }
 0x1f1   : > { %3356 = vmatmul.mubr.bf16.gmra.mrb[88].mxu0 %v9853_v52  ;;  %v7252_v10 = vpop.f32.mrb[63].mxu0 }
 0x1f2   : > { %3695 = vmatmul.mubr.bf16.gmra.mrb[72].mxu1 %v9853_v52  ;;  %3365 = vmatprep.mubr.bf16.mxu0 %v9892_v13  ;;  %v7253_v21 = vadd.f32 %v7252_v10, %v7251_v7  ;;  %v1945_v38 = vadd.f32 %v7250_v15, %v9898_v42  ;;  %v2163_v11 = vpack.c.bf16 %v2117_v58, %v2112_v63 }
 0x1f3   : > { %3704 = vmatprep.mubr.bf16.mxu1 %v9892_v13  ;;  %v2128_v13 = vld [vmem:[%s11278_s4] ss:$4 sm:$0xf] }
 0x1f4   : > { %v2042_v20 = vadd.f32 %v10004_v48, %v1945_v38  ;;  %v1948_v53 = vadd.f32 %v7253_v21, %v9898_v42  ;;  %v3832_v48 = vadd.s32 24, %v9598_v29  ;;  %v10147_v17 = vrot.slane %v2128_v13, %v639_v6 }
 0x1f5   : > { %v3841_v6 = vadd.s32 96, %v9598_v29 }
 0x1f6   : > { %v2122_v43 = vmax.f32 %v2042_v20, 0.0  ;;  %v2045_v54 = vadd.f32 %v10017_v2, %v1948_v53  ;;  %v10134_v2 = vrot.slane %v2128_v13, %v627_v30 }
 0x1f8   : > { %v2127_v16 = vmax.f32 %v2045_v54, 0.0 }
 0x1f9   : > { %3366 = vmatmul.mubr.bf16.gmra.mrb[92].mxu0 %v9890_v39 }
 0x1fa   : > { %3705 = vmatmul.mubr.bf16.gmra.mrb[76].mxu1 %v9890_v39  ;;  %3408 = vmatprep.mubr.bf16.mxu0 %v8756_v51  ;;  %v2168_v52 = vpack.c.bf16 %v2127_v16, %v2122_v43  ;;  %v3845_v39 = vstv %s8882_s20 }
 0x1fb   : > { %3747 = vmatprep.mubr.bf16.mxu1 %v8756_v51  ;;  %v3846_v42 = vadd.s32 %v3845_v39, %v9598_v29  ;;  %v3849_v18 = vadd.s32 %v3845_v39, %v3832_v48  ;;  %v3851_v27 = vadd.s32 %v3845_v39, %v3834_v26  ;;  %v3854_v41 = vadd.s32 %v3845_v39, %v3837_v19 }
 0x1fc   : > { %v3855_v23 = vadd.s32 %v3845_v39, %v3838_v49  ;;  %v3857_v57 = vadd.s32 %v3845_v39, %v3840_v36  ;;  %v3858_v24 = vadd.s32 %v3845_v39, %v3841_v6  ;;  %v3859_v59 = vadd.s32 %v3845_v39, %v3842_v37 }
 0x1fd   : > { %vm3862_vm0 = vcmp.lt.s32.totalorder %v3846_v42, 200  ;;  %vm3865_vm3 = vcmp.lt.s32.totalorder %v3849_v18, 200  ;;  %vm3867_vm5 = vcmp.lt.s32.totalorder %v3851_v27, 200  ;;  %v3860_v0 = vadd.s32 %v3845_v39, %v3843_v61 }
 0x1fe   : > { %v10159_v25 = vsel %vm3862_vm0, 1.0, %v8757_v22  ;;  %v3861_v31 = vadd.s32 %v3845_v39, %v3844_v40  ;;  %v10167_v12 = vsel %vm3865_vm3, 1.0, %v8757_v22  ;;  %vm3870_vm8 = vcmp.lt.s32.totalorder %v3854_v41, 200 }
 0x1ff   : > { %vm3871_vm9 = vcmp.lt.s32.totalorder %v3855_v23, 200  ;;  %v10171_v44 = vsel %vm3867_vm5, 1.0, %v8757_v22  ;;  %vm3873_vm11 = vcmp.lt.s32.totalorder %v3857_v57, 200  ;;  %vm3874_vm12 = vcmp.lt.s32.totalorder %v3858_v24, 200 }
 0x200   : > { %vm3875_vm13 = vcmp.lt.s32.totalorder %v3859_v59, 200  ;;  %vm3876_vm14 = vcmp.lt.s32.totalorder %v3860_v0, 200  ;;  %vm3877_vm15 = vcmp.lt.s32.totalorder %v3861_v31, 200  ;;  %v10177_v1 = vsel %vm3870_vm8, 1.0, %v8757_v22 }
 0x201   : > { %3409 = vmatmul.mubr.bf16.vlgmr.msra.gmra.mrb[64].mxu0 %v9947_v50  ;;  %v10179_v5 = vsel %vm3871_vm9, 1.0, %v8757_v22  ;;  %v10184_v21 = vsel %vm3873_vm11, 1.0, %v8757_v22  ;;  %v10186_v38 = vsel %vm3874_vm12, 1.0, %v8757_v22  ;;  %v10193_v16 = vsel %vm3876_vm14, 1.0, %v8757_v22 }
 0x202   : > { %3748 = vmatmul.mubr.bf16.vlgmr.msra.gmra.mrb[48].mxu1 %v9947_v50  ;;  %3418 = vmatprep.mubr.bf16.mxu0 %v8756_v51  ;;  %v3830_v50 = vadd.s32 8, %v9598_v29  ;;  %v8758_v48 = vmov 1966171168  }
 0x203   : > { %3757 = vmatprep.mubr.bf16.mxu1 %v8756_v51 }
 0x204   : > { %v3847_v46 = vadd.s32 %v3845_v39, %v3830_v50 }
 0x206   : > { %vm3863_vm1 = vcmp.lt.s32.totalorder %v3847_v46, 200 }
 0x207   : > { %v10163_v45 = vsel %vm3863_vm1, 1.0, %v8757_v22 }
 0x209   : > { %3419 = vmatmul.mubr.bf16.gmra.mrb[68].mxu0 %v9987_v9 }
 0x20a   : > { %3758 = vmatmul.mubr.bf16.gmra.mrb[52].mxu1 %v9987_v9  ;;  %3428 = vmatprep.mubr.bf16.mxu0 %v8756_v51  ;;  %v3831_v9 = vadd.s32 16, %v9598_v29 }
 0x20b   : > { %3767 = vmatprep.mubr.bf16.mxu1 %v8756_v51 }
 0x20c   : > { %v3848_v30 = vadd.s32 %v3845_v39, %v3831_v9 }
 0x20e   : > { %vm3864_vm2 = vcmp.lt.s32.totalorder %v3848_v30, 200 }
 0x211   : > { %3429 = vmatmul.mubr.bf16.gmra.mrb[72].mxu0 %v10028_v56 }
 0x212   : > { %3768 = vmatmul.mubr.bf16.gmra.mrb[56].mxu1 %v10028_v56  ;;  %3438 = vmatprep.mubr.bf16.mxu0 %v8756_v51  ;;  %v3833_v56 = vadd.s32 32, %v9598_v29 }
 0x213   : > { %3777 = vmatprep.mubr.bf16.mxu1 %v8756_v51 }
 0x214   : > { %v3850_v3 = vadd.s32 %v3845_v39, %v3833_v56  ;;  %v10201_v56 = vunpack.c.l.s4 %v8758_v48 }
 0x216   : > { %vm3866_vm4 = vcmp.lt.s32.totalorder %v3850_v3, 200 }
 0x217   : > { %v10169_v34 = vsel %vm3866_vm4, 1.0, %v8757_v22 }
 0x219   : > { %3439 = vmatmul.mubr.bf16.gmra.mrb[76].mxu0 %v10061_v47 }
 0x21a   : > { %3778 = vmatmul.mubr.bf16.gmra.mrb[60].mxu1 %v10061_v47  ;;  %3448 = vmatprep.mubr.bf16.mxu0 %v8756_v51  ;;  %v10143_v47 = vrot.slane %v2128_v13, %v631_v4  ;;  %v3839_v4 = vadd.s32 80, %v9598_v29 }
 0x21b   : > { %3787 = vmatprep.mubr.bf16.mxu1 %v8756_v51 }
 0x21c   : > { %v3856_v55 = vadd.s32 %v3845_v39, %v3839_v4 }
 0x21e   : > { %vm3872_vm10 = vcmp.lt.s32.totalorder %v3856_v55, 200 }
 0x21f   : > { %v10181_v15 = vsel %vm3872_vm10, 1.0, %v8757_v22 }
 0x221   : > { %3449 = vmatmul.mubr.bf16.gmra.mrb[80].mxu0 %v2153_v14 }
 0x222   : > { %3788 = vmatmul.mubr.bf16.gmra.mrb[64].mxu1 %v2153_v14  ;;  %3458 = vmatprep.mubr.bf16.mxu0 %v8756_v51  ;;  %v3852_v14 = vadd.s32 %v3845_v39, %v3835_v35 }
 0x223   : > { %3797 = vmatprep.mubr.bf16.mxu1 %v8756_v51 }
 0x224   : > { %vm3868_vm6 = vcmp.lt.s32.totalorder %v3852_v14, 200 }
 0x225   : > { %v10173_v33 = vsel %vm3868_vm6, 1.0, %v8757_v22 }
 0x229   : > { %3459 = vmatmul.mubr.bf16.gmra.mrb[84].mxu0 %v2158_v60 }
 0x22a   : > { %3798 = vmatmul.mubr.bf16.gmra.mrb[68].mxu1 %v2158_v60  ;;  %3468 = vmatprep.mubr.bf16.mxu0 %v8756_v51  ;;  %v10165_v60 = vsel %vm3864_vm2, 1.0, %v8757_v22 }
 0x22b   : > { %3807 = vmatprep.mubr.bf16.mxu1 %v8756_v51 }
 0x231   : > { %3469 = vmatmul.mubr.bf16.gmra.mrb[88].mxu0 %v2163_v11 }
 0x232   : > { %3808 = vmatmul.mubr.bf16.gmra.mrb[72].mxu1 %v2163_v11  ;;  %3478 = vmatprep.mubr.bf16.mxu0 %v8756_v51  ;;  %v10188_v11 = vsel %vm3875_vm13, 1.0, %v8757_v22 }
 0x233   : > { %3817 = vmatprep.mubr.bf16.mxu1 %v8756_v51  ;;  %v10138_v51 = vrot.slane %v2128_v13, %v635_v32  ;;  %v3836_v32 = vadd.s32 56, %v9598_v29 }
 0x235   : > { %v3853_v8 = vadd.s32 %v3845_v39, %v3836_v32 }
 0x237   : > { %vm3869_vm7 = vcmp.lt.s32.totalorder %v3853_v8, 200 }
 0x238   : > { %v10175_v62 = vsel %vm3869_vm7, 1.0, %v8757_v22 }
 0x239   : > { %3479 = vmatmul.mubr.bf16.gmra.mrb[92].mxu0 %v2168_v52 }
 0x23a   : > { %3818 = vmatmul.mubr.bf16.gmra.mrb[76].mxu1 %v2168_v52  ;;  %v10196_v52 = vsel %vm3877_vm15, 1.0, %v8757_v22 }
 0x2d4   : > { %v3410_v63 = vpop.f32.mrb[64].mxu0 }
 0x2d5   : > { %v7662_v7 = vadd.f32 %v3410_v63, %v10134_v2  ;;  %v3749_v58 = vpop.f32.mrb[48].mxu1  ;;  %v3412_v10 = vpop.f32.mrb[65].mxu0 }
 0x2d6   : > { %v7694_v20 = vadd.f32 %v3749_v58, %v10138_v51  ;;  %v7663_v53 = vadd.f32 %v3412_v10, %v10143_v47  ;;  %v3751_v43 = vpop.f32.mrb[49].mxu1  ;;  %v3414_v54 = vpop.f32.mrb[66].mxu0 }
 0x2d7   : > { %v3910_v39 = vmul.f32 %v7662_v7, %v10159_v25  ;;  %4275 = vst [vmem:[#allocation2] sm:$0xff] %v7662_v7  ;;  %v7695_v13 = vadd.f32 %v3751_v43, %v10147_v17  ;;  %v7664_v42 = vadd.f32 %v3414_v54, %v10134_v2  ;;  %v3753_v50 = vpop.f32.mrb[50].mxu1  ;;  %v3416_v9 = vpop.f32.mrb[67].mxu0 }
 0x2d8   : > { %v3912_v26 = vmul.f32 %v7694_v20, %v10159_v25  ;;  %4277 = vst [vmem:[#allocation2 + $0x10] sm:$0xff] %v7694_v20  ;;  %v3911_v46 = vmul.f32 %v7663_v53, %v10159_v25  ;;  %4276 = vst [vmem:[#allocation2 + $0x8] sm:$0xff] %v7663_v53  ;;  %v7696_v30 = vadd.f32 %v3753_v50, %v10138_v51  ;;  %v3755_v32 = vpop.f32.mrb[51].mxu1 }
 0x2d9   : > { %v7665_v35 = vadd.f32 %v3416_v9, %v10143_v47  ;;  %v4096_v18 = vmul.f32 %v3910_v39, %v3910_v39  ;;  %v3913_v19 = vmul.f32 %v7695_v13, %v10159_v25  ;;  %4278 = vst [vmem:[#allocation2 + $0x18] sm:$0xff] %v7695_v13  ;;  %v3914_v49 = vmul.f32 %v7664_v42, %v10163_v45 }
 0x2da   : > { %4279 = vst [vmem:[#allocation2 + $0x20] sm:$0xff] %v7664_v42  ;;  %v7697_v4 = vadd.f32 %v3755_v32, %v10147_v17  ;;  %v4098_v3 = vmul.f32 %v3912_v26, %v3912_v26  ;;  %v4097_v36 = vmul.f32 %v3911_v46, %v3911_v46  ;;  %v3916_v6 = vmul.f32 %v7696_v30, %v10163_v45 }
 0x2db   : > { %4281 = vst [vmem:[#allocation2 + $0x30] sm:$0xff] %v7696_v30  ;;  %v3915_v37 = vmul.f32 %v7665_v35, %v10163_v45  ;;  %4280 = vst [vmem:[#allocation2 + $0x28] sm:$0xff] %v7665_v35  ;;  %v4099_v22 = vmul.f32 %v3913_v19, %v3913_v19  ;;  %v3975_v27 = vadd.f32 %v3914_v49, %v3910_v39 }
 0x2dc   : > { %v4100_v61 = vmul.f32 %v3914_v49, %v3914_v49  ;;  %v3917_v40 = vmul.f32 %v7697_v4, %v10163_v45  ;;  %4282 = vst [vmem:[#allocation2 + $0x38] sm:$0xff] %v7697_v4  ;;  %v4017_v25 = vadd.f32 %v3916_v6, %v3912_v26  ;;  %v4102_v14 = vmul.f32 %v3916_v6, %v3916_v6  ;;  %v3420_v23 = vpop.f32.mrb[68].mxu0 }
 0x2dd   : > { %v3996_v8 = vadd.f32 %v3915_v37, %v3911_v46  ;;  %v4101_v41 = vmul.f32 %v3915_v37, %v3915_v37  ;;  %v7666_v59 = vadd.f32 %v3420_v23, %v10134_v2  ;;  %v3759_v0 = vpop.f32.mrb[52].mxu1  ;;  %v3422_v31 = vpop.f32.mrb[69].mxu0 }
 0x2de   : > { %v4160_v55 = vadd.f32 %v4100_v61, %v4096_v18  ;;  %v4038_v57 = vadd.f32 %v3917_v40, %v3913_v19  ;;  %v4103_v24 = vmul.f32 %v3917_v40, %v3917_v40  ;;  %v4202_v63 = vadd.f32 %v4102_v14, %v4098_v3  ;;  %v3761_v45 = vpop.f32.mrb[53].mxu1  ;;  %v3424_v20 = vpop.f32.mrb[70].mxu0 }
 0x2df   : > { %v4181_v7 = vadd.f32 %v4101_v41, %v4097_v36  ;;  %v7698_v58 = vadd.f32 %v3759_v0, %v10138_v51  ;;  %v7667_v10 = vadd.f32 %v3422_v31, %v10143_v47  ;;  %v3918_v43 = vmul.f32 %v7666_v59, %v10165_v60  ;;  %4283 = vst [vmem:[#allocation2 + $0x40] sm:$0xff] %v7666_v59  ;;  %v3763_v13 = vpop.f32.mrb[54].mxu1  ;;  %v3426_v42 = vpop.f32.mrb[71].mxu0 }
 0x2e0   : > { %v4223_v53 = vadd.f32 %v4103_v24, %v4099_v22  ;;  %v7699_v54 = vadd.f32 %v3761_v45, %v10147_v17  ;;  %v7668_v39 = vadd.f32 %v3424_v20, %v10134_v2  ;;  %v7700_v48 = vadd.f32 %v3763_v13, %v10138_v51  ;;  %v3765_v46 = vpop.f32.mrb[55].mxu1 }
 0x2e1   : > { %v3920_v50 = vmul.f32 %v7698_v58, %v10165_v60  ;;  %4285 = vst [vmem:[#allocation2 + $0x50] sm:$0xff] %v7698_v58  ;;  %v3919_v9 = vmul.f32 %v7667_v10, %v10165_v60  ;;  %4284 = vst [vmem:[#allocation2 + $0x48] sm:$0xff] %v7667_v10  ;;  %v7669_v26 = vadd.f32 %v3426_v42, %v10143_v47 }
 0x2e2   : > { %v3976_v30 = vadd.f32 %v3975_v27, %v3918_v43  ;;  %v4104_v35 = vmul.f32 %v3918_v43, %v3918_v43  ;;  %v3921_v32 = vmul.f32 %v7699_v54, %v10165_v60  ;;  %4286 = vst [vmem:[#allocation2 + $0x58] sm:$0xff] %v7699_v54  ;;  %v3922_v18 = vmul.f32 %v7668_v39, %v10167_v12 }
 0x2e3   : > { %4287 = vst [vmem:[#allocation2 + $0x60] sm:$0xff] %v7668_v39  ;;  %v4018_v19 = vadd.f32 %v4017_v25, %v3920_v50  ;;  %v4106_v49 = vmul.f32 %v3920_v50, %v3920_v50  ;;  %v3997_v4 = vadd.f32 %v3996_v8, %v3919_v9  ;;  %v4105_v3 = vmul.f32 %v3919_v9, %v3919_v9 }
 0x2e4   : > { %4289 = vst [vmem:[#allocation2 + $0x70] sm:$0xff] %v7700_v48  ;;  %4288 = vst [vmem:[#allocation2 + $0x68] sm:$0xff] %v7669_v26  ;;  %v4161_v36 = vadd.f32 %v4160_v55, %v4104_v35  ;;  %v4039_v6 = vadd.f32 %v4038_v57, %v3921_v32  ;;  %v4107_v37 = vmul.f32 %v3921_v32, %v3921_v32  ;;  %v3430_v60 = vpop.f32.mrb[72].mxu0 }
 0x2e5   : > { %v3977_v22 = vadd.f32 %v3976_v30, %v3922_v18  ;;  %v4203_v61 = vadd.f32 %v4202_v63, %v4106_v49  ;;  %v4182_v40 = vadd.f32 %v4181_v7, %v4105_v3  ;;  %v4108_v27 = vmul.f32 %v3922_v18, %v3922_v18  ;;  %v3769_v24 = vpop.f32.mrb[56].mxu1  ;;  %v3432_v59 = vpop.f32.mrb[73].mxu0 }
 0x2e6   : > { %v3924_v14 = vmul.f32 %v7700_v48, %v10167_v12  ;;  %v4224_v41 = vadd.f32 %v4223_v53, %v4107_v37  ;;  %v3923_v23 = vmul.f32 %v7669_v26, %v10167_v12  ;;  %v7701_v25 = vadd.f32 %v3765_v46, %v10147_v17  ;;  %v3771_v63 = vpop.f32.mrb[57].mxu1  ;;  %v3434_v7 = vpop.f32.mrb[74].mxu0 }
 0x2e7   : > { %v7670_v8 = vadd.f32 %v3430_v60, %v10134_v2  ;;  %v4162_v0 = vadd.f32 %v4161_v36, %v4108_v27  ;;  %v7702_v31 = vadd.f32 %v3769_v24, %v10138_v51  ;;  %v3773_v53 = vpop.f32.mrb[58].mxu1  ;;  %v3436_v43 = vpop.f32.mrb[75].mxu0  ;;  %v7671_v13 = vadd.f32 %v3432_v59, %v10143_v47 }
 0x2e8   : > { %v4019_v55 = vadd.f32 %v4018_v19, %v3924_v14  ;;  %v4110_v57 = vmul.f32 %v3924_v14, %v3924_v14  ;;  %v3998_v58 = vadd.f32 %v3997_v4, %v3923_v23  ;;  %v4109_v10 = vmul.f32 %v3923_v23, %v3923_v23  ;;  %4290 = vst [vmem:[#allocation2 + $0x78] sm:$0xff] %v7701_v25  ;;  %v3775_v50 = vpop.f32.mrb[59].mxu1 }
 0x2e9   : > { %v3925_v45 = vmul.f32 %v7701_v25, %v10167_v12  ;;  %v3926_v20 = vmul.f32 %v7670_v8, %v10169_v34  ;;  %4291 = vst [vmem:[#allocation2 + $0x80] sm:$0xff] %v7670_v8  ;;  %v3928_v39 = vmul.f32 %v7702_v31, %v10169_v34  ;;  %4293 = vst [vmem:[#allocation2 + $0x90] sm:$0xff] %v7702_v31 }
 0x2ea   : > { %v4204_v54 = vadd.f32 %v4203_v61, %v4110_v57  ;;  %v7703_v42 = vadd.f32 %v3771_v63, %v10147_v17  ;;  %v4183_v9 = vadd.f32 %v4182_v40, %v4109_v10  ;;  %v3927_v32 = vmul.f32 %v7671_v13, %v10169_v34  ;;  %4292 = vst [vmem:[#allocation2 + $0x88] sm:$0xff] %v7671_v13 }
 0x2eb   : > { %v4040_v48 = vadd.f32 %v4039_v6, %v3925_v45  ;;  %v4111_v26 = vmul.f32 %v3925_v45, %v3925_v45  ;;  %v3978_v46 = vadd.f32 %v3977_v22, %v3926_v20  ;;  %v4112_v12 = vmul.f32 %v3926_v20, %v3926_v20 }
 0x2ec   : > { %v4020_v30 = vadd.f32 %v4019_v55, %v3928_v39  ;;  %v4114_v35 = vmul.f32 %v3928_v39, %v3928_v39  ;;  %4294 = vst [vmem:[#allocation2 + $0x98] sm:$0xff] %v7703_v42  ;;  %v3929_v19 = vmul.f32 %v7703_v42, %v10169_v34  ;;  %v7672_v49 = vadd.f32 %v3434_v7, %v10134_v2  ;;  %v3440_v61 = vpop.f32.mrb[76].mxu0 }
 0x2ed   : > { %v4225_v18 = vadd.f32 %v4224_v41, %v4111_v26  ;;  %v7704_v4 = vadd.f32 %v3773_v53, %v10138_v51  ;;  %v4163_v3 = vadd.f32 %v4162_v0, %v4112_v12  ;;  %v3999_v37 = vadd.f32 %v3998_v58, %v3927_v32  ;;  %v3779_v60 = vpop.f32.mrb[60].mxu1  ;;  %v3442_v41 = vpop.f32.mrb[77].mxu0 }
 0x2ee   : > { %v4205_v36 = vadd.f32 %v4204_v54, %v4114_v35  ;;  %v4113_v6 = vmul.f32 %v3927_v32, %v3927_v32  ;;  %v4041_v22 = vadd.f32 %v4040_v48, %v3929_v19  ;;  %v4115_v40 = vmul.f32 %v3929_v19, %v3929_v19  ;;  %4295 = vst [vmem:[#allocation2 + $0xa0] sm:$0xff] %v7672_v49  ;;  %v3781_v24 = vpop.f32.mrb[61].mxu1  ;;  %v3444_v59 = vpop.f32.mrb[78].mxu0 }
 0x2ef   : > { %v3930_v27 = vmul.f32 %v7672_v49, %v10171_v44  ;;  %v3932_v14 = vmul.f32 %v7704_v4, %v10171_v44  ;;  %4297 = vst [vmem:[#allocation2 + $0xb0] sm:$0xff] %v7704_v4  ;;  %v7673_v23 = vadd.f32 %v3436_v43, %v10143_v47  ;;  %v7705_v25 = vadd.f32 %v3775_v50, %v10147_v17  ;;  %v3783_v63 = vpop.f32.mrb[62].mxu1  ;;  %v3446_v7 = vpop.f32.mrb[79].mxu0 }
 0x2f0   : > { %v4184_v34 = vadd.f32 %v4183_v9, %v4113_v6  ;;  %v7674_v8 = vadd.f32 %v3440_v61, %v10134_v2  ;;  %v4226_v0 = vadd.f32 %v4225_v18, %v4115_v40  ;;  %v3785_v53 = vpop.f32.mrb[63].mxu1  ;;  %v7706_v54 = vadd.f32 %v3779_v60, %v10138_v51 }
 0x2f1   : > { %v3979_v55 = vadd.f32 %v3978_v46, %v3930_v27  ;;  %v4116_v57 = vmul.f32 %v3930_v27, %v3930_v27  ;;  %v4021_v31 = vadd.f32 %v4020_v30, %v3932_v14  ;;  %v4118_v58 = vmul.f32 %v3932_v14, %v3932_v14  ;;  %4296 = vst [vmem:[#allocation2 + $0xa8] sm:$0xff] %v7673_v23 }
 0x2f2   : > { %v3931_v10 = vmul.f32 %v7673_v23, %v10171_v44  ;;  %v3933_v45 = vmul.f32 %v7705_v25, %v10171_v44  ;;  %4298 = vst [vmem:[#allocation2 + $0xb8] sm:$0xff] %v7705_v25  ;;  %v3934_v20 = vmul.f32 %v7674_v8, %v10173_v33  ;;  %4299 = vst [vmem:[#allocation2 + $0xc0] sm:$0xff] %v7674_v8 }
 0x2f3   : > { %v4164_v43 = vadd.f32 %v4163_v3, %v4116_v57  ;;  %v7675_v39 = vadd.f32 %v3442_v41, %v10143_v47  ;;  %v7707_v13 = vadd.f32 %v3781_v24, %v10147_v17  ;;  %v4206_v42 = vadd.f32 %v4205_v36, %v4118_v58  ;;  %4301 = vst [vmem:[#allocation2 + $0xd0] sm:$0xff] %v7706_v54 }
 0x2f4   : > { %v4000_v50 = vadd.f32 %v3999_v37, %v3931_v10  ;;  %v4117_v9 = vmul.f32 %v3931_v10, %v3931_v10  ;;  %v4042_v48 = vadd.f32 %v4041_v22, %v3933_v45  ;;  %v4119_v26 = vmul.f32 %v3933_v45, %v3933_v45  ;;  %v3450_v19 = vpop.f32.mrb[80].mxu0 }
 0x2f5   : > { %v3980_v46 = vadd.f32 %v3979_v55, %v3934_v20  ;;  %v4120_v12 = vmul.f32 %v3934_v20, %v3934_v20  ;;  %v3936_v44 = vmul.f32 %v7706_v54, %v10173_v33  ;;  %4300 = vst [vmem:[#allocation2 + $0xc8] sm:$0xff] %v7675_v39  ;;  %4302 = vst [vmem:[#allocation2 + $0xd8] sm:$0xff] %v7707_v13  ;;  %v3789_v37 = vpop.f32.mrb[64].mxu1  ;;  %v3452_v6 = vpop.f32.mrb[81].mxu0 }
 0x2f6   : > { %v4185_v30 = vadd.f32 %v4184_v34, %v4117_v9  ;;  %v3935_v35 = vmul.f32 %v7675_v39, %v10173_v33  ;;  %v3937_v32 = vmul.f32 %v7707_v13, %v10173_v33  ;;  %v7676_v18 = vadd.f32 %v3444_v59, %v10134_v2  ;;  %v3791_v14 = vpop.f32.mrb[65].mxu1  ;;  %v3454_v60 = vpop.f32.mrb[82].mxu0 }
 0x2f7   : > { %v4227_v49 = vadd.f32 %v4226_v0, %v4119_v26  ;;  %v4165_v4 = vadd.f32 %v4164_v43, %v4120_v12  ;;  %v4022_v3 = vadd.f32 %v4021_v31, %v3936_v44  ;;  %v4122_v36 = vmul.f32 %v3936_v44, %v3936_v44  ;;  %v3793_v25 = vpop.f32.mrb[66].mxu1  ;;  %v3456_v8 = vpop.f32.mrb[83].mxu0 }
 0x2f8   : > { %v4001_v61 = vadd.f32 %v4000_v50, %v3935_v35  ;;  %v4121_v22 = vmul.f32 %v3935_v35, %v3935_v35  ;;  %v4043_v40 = vadd.f32 %v4042_v48, %v3937_v32  ;;  %v4123_v27 = vmul.f32 %v3937_v32, %v3937_v32  ;;  %4303 = vst [vmem:[#allocation2 + $0xe0] sm:$0xff] %v7676_v18  ;;  %v3795_v57 = vpop.f32.mrb[67].mxu1 }
 0x2f9   : > { %v4207_v41 = vadd.f32 %v4206_v42, %v4122_v36  ;;  %v3938_v34 = vmul.f32 %v7676_v18, %v10175_v62  ;;  %v7708_v33 = vadd.f32 %v3783_v63, %v10138_v51  ;;  %v7677_v23 = vadd.f32 %v3446_v7, %v10143_v47 }
 0x2fa   : > { %v4186_v24 = vadd.f32 %v4185_v30, %v4121_v22  ;;  %v4228_v59 = vadd.f32 %v4227_v49, %v4123_v27  ;;  %v7709_v0 = vadd.f32 %v3785_v53, %v10147_v17  ;;  %v7678_v55 = vadd.f32 %v3450_v19, %v10134_v2 }
 0x2fb   : > { %v3981_v31 = vadd.f32 %v3980_v46, %v3938_v34  ;;  %v4124_v58 = vmul.f32 %v3938_v34, %v3938_v34  ;;  %v3940_v10 = vmul.f32 %v7708_v33, %v10175_v62  ;;  %4305 = vst [vmem:[#allocation2 + $0xf0] sm:$0xff] %v7708_v33  ;;  %v3939_v45 = vmul.f32 %v7677_v23, %v10175_v62 }
 0x2fc   : > { %4304 = vst [vmem:[#allocation2 + $0xe8] sm:$0xff] %v7677_v23  ;;  %v3941_v63 = vmul.f32 %v7709_v0, %v10175_v62  ;;  %4306 = vst [vmem:[#allocation2 + $0xf8] sm:$0xff] %v7709_v0  ;;  %v3942_v7 = vmul.f32 %v7678_v55, %v10177_v1  ;;  %v7710_v20 = vadd.f32 %v3789_v37, %v10138_v51  ;;  %v3460_v26 = vpop.f32.mrb[84].mxu0 }
 0x2fd   : > { %4307 = vst [vmem:[#allocation2 + $0x100] sm:$0xff] %v7678_v55  ;;  %v7679_v53 = vadd.f32 %v3452_v6, %v10143_v47  ;;  %v4166_v43 = vadd.f32 %v4165_v4, %v4124_v58  ;;  %v4023_v54 = vadd.f32 %v4022_v3, %v3940_v10  ;;  %v4126_v39 = vmul.f32 %v3940_v10, %v3940_v10  ;;  %v3799_v30 = vpop.f32.mrb[68].mxu1  ;;  %v3462_v35 = vpop.f32.mrb[85].mxu0 }
 0x2fe   : > { %v4002_v13 = vadd.f32 %v4001_v61, %v3939_v45  ;;  %v4125_v42 = vmul.f32 %v3939_v45, %v3939_v45  ;;  %v4044_v50 = vadd.f32 %v4043_v40, %v3941_v63  ;;  %v4127_v9 = vmul.f32 %v3941_v63, %v3941_v63  ;;  %4309 = vst [vmem:[#allocation2 + $0x110] sm:$0xff] %v7710_v20  ;;  %v3801_v4 = vpop.f32.mrb[69].mxu1  ;;  %v3464_v3 = vpop.f32.mrb[86].mxu0 }
 0x2ff   : > { %v3982_v48 = vadd.f32 %v3981_v31, %v3942_v7  ;;  %4308 = vst [vmem:[#allocation2 + $0x108] sm:$0xff] %v7679_v53  ;;  %v4208_v62 = vadd.f32 %v4207_v41, %v4126_v39  ;;  %v4128_v46 = vmul.f32 %v3942_v7, %v3942_v7  ;;  %v3944_v12 = vmul.f32 %v7710_v20, %v10177_v1  ;;  %v10269_v22 = vpop.f32.mrb[70].mxu1  ;;  %v10271_v40 = vpop.f32.mrb[87].mxu0 }
 0x300   : > { %v3943_v44 = vmul.f32 %v7679_v53, %v10177_v1  ;;  %v4187_v32 = vadd.f32 %v4186_v24, %v4125_v42  ;;  %v4229_v18 = vadd.f32 %v4228_v59, %v4127_v9  ;;  %v7711_v19 = vadd.f32 %v3791_v14, %v10147_v17 }
 0x301   : > { %v7680_v49 = vadd.f32 %v3454_v60, %v10134_v2  ;;  %v4167_v36 = vadd.f32 %v4166_v43, %v4128_v46  ;;  %v4024_v37 = vadd.f32 %v4023_v54, %v3944_v12  ;;  %v4130_v6 = vmul.f32 %v3944_v12, %v3944_v12  ;;  %v3805_v60 = vpop.f32.mrb[71].mxu1 }
 0x302   : > { %v4003_v61 = vadd.f32 %v4002_v13, %v3943_v44  ;;  %v4129_v27 = vmul.f32 %v3943_v44, %v3943_v44  ;;  %v3945_v41 = vmul.f32 %v7711_v19, %v10177_v1  ;;  %4310 = vst [vmem:[#allocation2 + $0x118] sm:$0xff] %v7711_v19  ;;  %v7712_v14 = vadd.f32 %v3793_v25, %v10138_v51 }
 0x303   : > { %v3946_v34 = vmul.f32 %v7680_v49, %v10179_v5  ;;  %4311 = vst [vmem:[#allocation2 + $0x120] sm:$0xff] %v7680_v49  ;;  %v4209_v33 = vadd.f32 %v4208_v62, %v4130_v6  ;;  %v7681_v23 = vadd.f32 %v3456_v8, %v10143_v47  ;;  %v7713_v24 = vadd.f32 %v3795_v57, %v10147_v17 }
 0x304   : > { %v7682_v59 = vadd.f32 %v3460_v26, %v10134_v2  ;;  %v4188_v0 = vadd.f32 %v4187_v32, %v4129_v27  ;;  %v4045_v55 = vadd.f32 %v4044_v50, %v3945_v41  ;;  %v4131_v31 = vmul.f32 %v3945_v41, %v3945_v41  ;;  %4313 = vst [vmem:[#allocation2 + $0x130] sm:$0xff] %v7712_v14  ;;  %v3470_v20 = vpop.f32.mrb[88].mxu0 }
 0x305   : > { %v3983_v58 = vadd.f32 %v3982_v48, %v3946_v34  ;;  %v4132_v1 = vmul.f32 %v3946_v34, %v3946_v34  ;;  %v3948_v10 = vmul.f32 %v7712_v14, %v10179_v5  ;;  %v3947_v45 = vmul.f32 %v7681_v23, %v10179_v5  ;;  %4312 = vst [vmem:[#allocation2 + $0x128] sm:$0xff] %v7681_v23  ;;  %v3809_v13 = vpop.f32.mrb[72].mxu1  ;;  %v3472_v42 = vpop.f32.mrb[89].mxu0 }
 0x306   : > { %v3949_v25 = vmul.f32 %v7713_v24, %v10179_v5  ;;  %4314 = vst [vmem:[#allocation2 + $0x138] sm:$0xff] %v7713_v24  ;;  %4315 = vst [vmem:[#allocation2 + $0x140] sm:$0xff] %v7682_v59  ;;  %v4230_v8 = vadd.f32 %v4229_v18, %v4131_v31  ;;  %v3950_v57 = vmul.f32 %v7682_v59, %v10181_v15  ;;  %v10285_v26 = vpop.f32.mrb[73].mxu1  ;;  %v10287_v62 = vpop.f32.mrb[90].mxu0 }
 0x307   : > { %v7714_v63 = vadd.f32 %v3799_v30, %v10138_v51  ;;  %v7683_v7 = vadd.f32 %v3462_v35, %v10143_v47  ;;  %v4168_v53 = vadd.f32 %v4167_v36, %v4132_v1  ;;  %v4025_v43 = vadd.f32 %v4024_v37, %v3948_v10  ;;  %v10291_v35 = vpop.f32.mrb[74].mxu1  ;;  %v10293_v32 = vpop.f32.mrb[91].mxu0 }
 0x308   : > { %v4134_v54 = vmul.f32 %v3948_v10, %v3948_v10  ;;  %v4004_v39 = vadd.f32 %v4003_v61, %v3947_v45  ;;  %v4133_v50 = vmul.f32 %v3947_v45, %v3947_v45  ;;  %v4046_v9 = vadd.f32 %v4045_v55, %v3949_v25  ;;  %v10297_v37 = vpop.f32.mrb[75].mxu1 }
 0x309   : > { %v4135_v48 = vmul.f32 %v3949_v25, %v3949_v25  ;;  %v3984_v5 = vadd.f32 %v3983_v58, %v3950_v57  ;;  %4317 = vst [vmem:[#allocation2 + $0x150] sm:$0xff] %v7714_v63  ;;  %4316 = vst [vmem:[#allocation2 + $0x148] sm:$0xff] %v7683_v7  ;;  %v4136_v12 = vmul.f32 %v3950_v57, %v3950_v57 }
 0x30a   : > { %v4210_v46 = vadd.f32 %v4209_v33, %v4134_v54  ;;  %v3952_v44 = vmul.f32 %v7714_v63, %v10181_v15  ;;  %v3951_v30 = vmul.f32 %v7683_v7, %v10181_v15  ;;  %v4189_v18 = vadd.f32 %v4188_v0, %v4133_v50 }
 0x30b   : > { %v4231_v19 = vadd.f32 %v4230_v8, %v4135_v48  ;;  %v7715_v49 = vadd.f32 %v3801_v4, %v10147_v17  ;;  %v7684_v36 = vadd.f32 %v3464_v3, %v10134_v2  ;;  %v4169_v6 = vadd.f32 %v4168_v53, %v4136_v12 }
 0x30c   : > { %v4026_v61 = vadd.f32 %v4025_v43, %v3952_v44  ;;  %v4138_v27 = vmul.f32 %v3952_v44, %v3952_v44  ;;  %v4005_v41 = vadd.f32 %v4004_v39, %v3951_v30  ;;  %v4137_v34 = vmul.f32 %v3951_v30, %v3951_v30 }
 0x30d   : > { %v3953_v14 = vmul.f32 %v7715_v49, %v10181_v15  ;;  %4318 = vst [vmem:[#allocation2 + $0x158] sm:$0xff] %v7715_v49  ;;  %v3954_v33 = vmul.f32 %v7684_v36, %v10184_v21  ;;  %4319 = vst [vmem:[#allocation2 + $0x160] sm:$0xff] %v7684_v36  ;;  %v7716_v23 = vadd.f32 %v10269_v22, %v10138_v51  ;;  %v3480_v15 = vpop.f32.mrb[92].mxu0 }
 0x30e   : > { %v4211_v24 = vadd.f32 %v4210_v46, %v4138_v27  ;;  %v7685_v4 = vadd.f32 %v10271_v40, %v10143_v47  ;;  %v7717_v3 = vadd.f32 %v3805_v60, %v10147_v17  ;;  %v7686_v59 = vadd.f32 %v3470_v20, %v10134_v2  ;;  %v3819_v40 = vpop.f32.mrb[76].mxu1  ;;  %v3482_v60 = vpop.f32.mrb[93].mxu0 }
 0x30f   : > { %v4190_v0 = vadd.f32 %v4189_v18, %v4137_v34  ;;  %v4047_v55 = vadd.f32 %v4046_v9, %v3953_v14  ;;  %v4139_v31 = vmul.f32 %v3953_v14, %v3953_v14  ;;  %v3985_v58 = vadd.f32 %v3984_v5, %v3954_v33  ;;  %4321 = vst [vmem:[#allocation2 + $0x170] sm:$0xff] %v7716_v23  ;;  %v10313_v7 = vpop.f32.mrb[77].mxu1  ;;  %v10315_v20 = vpop.f32.mrb[94].mxu0 }
 0x310   : > { %v4140_v1 = vmul.f32 %v3954_v33, %v3954_v33  ;;  %v3956_v10 = vmul.f32 %v7716_v23, %v10184_v21  ;;  %v3955_v45 = vmul.f32 %v7685_v4, %v10184_v21  ;;  %4320 = vst [vmem:[#allocation2 + $0x168] sm:$0xff] %v7685_v4  ;;  %v3957_v22 = vmul.f32 %v7717_v3, %v10184_v21  ;;  %v10317_v21 = vpop.f32.mrb[78].mxu1  ;;  %v10319_v50 = vpop.f32.mrb[95].mxu0 }
 0x311   : > { %4322 = vst [vmem:[#allocation2 + $0x178] sm:$0xff] %v7717_v3  ;;  %4323 = vst [vmem:[#allocation2 + $0x180] sm:$0xff] %v7686_v59  ;;  %v4232_v25 = vadd.f32 %v4231_v19, %v4139_v31  ;;  %v3958_v8 = vmul.f32 %v7686_v59, %v10186_v38  ;;  %v7718_v57 = vadd.f32 %v3809_v13, %v10138_v51  ;;  %v10321_v13 = vpop.f32.mrb[79].mxu1 }
 0x312   : > { %v7687_v63 = vadd.f32 %v3472_v42, %v10143_v47  ;;  %v4170_v53 = vadd.f32 %v4169_v6, %v4140_v1  ;;  %v4027_v43 = vadd.f32 %v4026_v61, %v3956_v10  ;;  %v4142_v54 = vmul.f32 %v3956_v10, %v3956_v10 }
 0x313   : > { %v4006_v39 = vadd.f32 %v4005_v41, %v3955_v45  ;;  %v4141_v9 = vmul.f32 %v3955_v45, %v3955_v45  ;;  %v4048_v48 = vadd.f32 %v4047_v55, %v3957_v22  ;;  %v4143_v5 = vmul.f32 %v3957_v22, %v3957_v22  ;;  %4325 = vst [vmem:[#allocation2 + $0x190] sm:$0xff] %v7718_v57 }
 0x314   : > { %v3986_v46 = vadd.f32 %v3985_v58, %v3958_v8  ;;  %4324 = vst [vmem:[#allocation2 + $0x188] sm:$0xff] %v7687_v63  ;;  %v4212_v42 = vadd.f32 %v4211_v24, %v4142_v54  ;;  %v4144_v12 = vmul.f32 %v3958_v8, %v3958_v8  ;;  %v3960_v44 = vmul.f32 %v7718_v57, %v10186_v38 }
 0x315   : > { %v3959_v30 = vmul.f32 %v7687_v63, %v10186_v38  ;;  %v4191_v18 = vadd.f32 %v4190_v0, %v4141_v9  ;;  %v4233_v19 = vadd.f32 %v4232_v25, %v4143_v5  ;;  %v7719_v49 = vadd.f32 %v10285_v26, %v10147_v17 }
 0x316   : > { %v7688_v36 = vadd.f32 %v10287_v62, %v10134_v2  ;;  %v4171_v6 = vadd.f32 %v4170_v53, %v4144_v12  ;;  %v4028_v61 = vadd.f32 %v4027_v43, %v3960_v44  ;;  %v4146_v27 = vmul.f32 %v3960_v44, %v3960_v44 }
 0x317   : > { %v4007_v41 = vadd.f32 %v4006_v39, %v3959_v30  ;;  %v4145_v34 = vmul.f32 %v3959_v30, %v3959_v30  ;;  %v3961_v14 = vmul.f32 %v7719_v49, %v10186_v38  ;;  %4326 = vst [vmem:[#allocation2 + $0x198] sm:$0xff] %v7719_v49  ;;  %v7720_v23 = vadd.f32 %v10291_v35, %v10138_v51 }
 0x318   : > { %v3962_v33 = vmul.f32 %v7688_v36, %v10188_v11  ;;  %4327 = vst [vmem:[#allocation2 + $0x1a0] sm:$0xff] %v7688_v36  ;;  %v4213_v24 = vadd.f32 %v4212_v42, %v4146_v27  ;;  %v7689_v26 = vadd.f32 %v10293_v32, %v10143_v47  ;;  %v7721_v62 = vadd.f32 %v10297_v37, %v10147_v17 }
 0x319   : > { %v7690_v4 = vadd.f32 %v3480_v15, %v10134_v2  ;;  %v4192_v3 = vadd.f32 %v4191_v18, %v4145_v34  ;;  %v4049_v59 = vadd.f32 %v4048_v48, %v3961_v14  ;;  %v4147_v0 = vmul.f32 %v3961_v14, %v3961_v14  ;;  %4329 = vst [vmem:[#allocation2 + $0x1b0] sm:$0xff] %v7720_v23 }
 0x31a   : > { %v3987_v38 = vadd.f32 %v3986_v46, %v3962_v33  ;;  %v4148_v55 = vmul.f32 %v3962_v33, %v3962_v33  ;;  %v3964_v31 = vmul.f32 %v7720_v23, %v10188_v11  ;;  %v3963_v35 = vmul.f32 %v7689_v26, %v10188_v11  ;;  %4328 = vst [vmem:[#allocation2 + $0x1a8] sm:$0xff] %v7689_v26 }
 0x31b   : > { %v3965_v58 = vmul.f32 %v7721_v62, %v10188_v11  ;;  %4330 = vst [vmem:[#allocation2 + $0x1b8] sm:$0xff] %v7721_v62  ;;  %4331 = vst [vmem:[#allocation2 + $0x1c0] sm:$0xff] %v7690_v4  ;;  %v4234_v32 = vadd.f32 %v4233_v19, %v4147_v0  ;;  %v3966_v37 = vmul.f32 %v7690_v4, %v10193_v16 }
 0x31c   : > { %v7722_v15 = vadd.f32 %v3819_v40, %v10138_v51  ;;  %v7691_v1 = vadd.f32 %v3482_v60, %v10143_v47  ;;  %v4172_v10 = vadd.f32 %v4171_v6, %v4148_v55  ;;  %v4029_v45 = vadd.f32 %v4028_v61, %v3964_v31 }
 0x31d   : > { %v4150_v22 = vmul.f32 %v3964_v31, %v3964_v31  ;;  %v4008_v25 = vadd.f32 %v4007_v41, %v3963_v35  ;;  %v4149_v8 = vmul.f32 %v3963_v35, %v3963_v35  ;;  %v4050_v57 = vadd.f32 %v4049_v59, %v3965_v58 }
 0x31e   : > { %v4151_v63 = vmul.f32 %v3965_v58, %v3965_v58  ;;  %v3988_v53 = vadd.f32 %v3987_v38, %v3966_v37  ;;  %4333 = vst [vmem:[#allocation2 + $0x1d0] sm:$0xff] %v7722_v15  ;;  %4332 = vst [vmem:[#allocation2 + $0x1c8] sm:$0xff] %v7691_v1  ;;  %v4152_v43 = vmul.f32 %v3966_v37, %v3966_v37  ;;  %v4067_v61 = vunpack.c.0.s8 %v10201_v56 }
 0x31f   : > { %v4214_v11 = vadd.f32 %v4213_v24, %v4150_v22  ;;  %v3968_v54 = vmul.f32 %v7722_v15, %v10193_v16  ;;  %v3967_v39 = vmul.f32 %v7691_v1, %v10193_v16  ;;  %v4193_v40 = vadd.f32 %v4192_v3, %v4149_v8 }
 0x320   : > { %v4235_v9 = vadd.f32 %v4234_v32, %v4151_v63  ;;  %v7723_v60 = vadd.f32 %v10313_v7, %v10147_v17  ;;  %v7692_v48 = vadd.f32 %v10315_v20, %v10134_v2  ;;  %v4173_v5 = vadd.f32 %v4172_v10, %v4152_v43 }
 0x321   : > { %v4030_v46 = vadd.f32 %v4029_v45, %v3968_v54  ;;  %v4154_v42 = vmul.f32 %v3968_v54, %v3968_v54  ;;  %v4009_v12 = vadd.f32 %v4008_v25, %v3967_v39  ;;  %v4153_v44 = vmul.f32 %v3967_v39, %v3967_v39 }
 0x322   : > { %v3969_v30 = vmul.f32 %v7723_v60, %v10193_v16  ;;  %4334 = vst [vmem:[#allocation2 + $0x1d8] sm:$0xff] %v7723_v60  ;;  %v3970_v18 = vmul.f32 %v7692_v48, %v10196_v52  ;;  %4335 = vst [vmem:[#allocation2 + $0x1e0] sm:$0xff] %v7692_v48  ;;  %v7724_v7 = vadd.f32 %v10317_v21, %v10138_v51 }
 0x323   : > { %v4215_v19 = vadd.f32 %v4214_v11, %v4154_v42  ;;  %v7693_v2 = vadd.f32 %v10319_v50, %v10143_v47  ;;  %v7725_v20 = vadd.f32 %v10321_v13, %v10147_v17  ;;  %v4194_v16 = vadd.f32 %v4193_v40, %v4153_v44 }
 0x324   : > { %v4051_v49 = vadd.f32 %v4050_v57, %v3969_v30  ;;  %v4155_v51 = vmul.f32 %v3969_v30, %v3969_v30  ;;  %v3989_v21 = vadd.f32 %v3988_v53, %v3970_v18  ;;  %4337 = vst [vmem:[#allocation2 + $0x1f0] sm:$0xff] %v7724_v7  ;;  %v4156_v36 = vmul.f32 %v3970_v18, %v3970_v18 }
 0x325   : > { %v3972_v47 = vmul.f32 %v7724_v7, %v10196_v52  ;;  %v3971_v17 = vmul.f32 %v7693_v2, %v10196_v52  ;;  %4336 = vst [vmem:[#allocation2 + $0x1e8] sm:$0xff] %v7693_v2  ;;  %v3973_v50 = vmul.f32 %v7725_v20, %v10196_v52  ;;  %4338 = vst [vmem:[#allocation2 + $0x1f8] sm:$0xff] %v7725_v20 }
 0x326   : > { %v4236_v13 = vadd.f32 %v4235_v9, %v4155_v51  ;;  %v3990_v6 = vrot.slane %v3989_v21, 4 }
 0x327   : > { %8570 = shalt.err (!%p8567_p2)  }
 0x328   : > { %s8571_s23 = scalar_lea.hbm %s10362_s22, 8192  ;;  %s8573_s18 = scalar_lea.hbm %s11286_s12, 16384 }
 0x329   : > { %p8572_p3 = scmp.ne.s32.totalorder %s10362_s22, %s8571_s23  ;;  %p8574_p4 = scmp.lt.u32.totalorder %s10362_s22, %s11286_s12 }
 0x32a   : > { %p8575_p5 = scmp.lt.u32.totalorder %s8573_s18, %s8571_s23  ;;  %p8577_p7 = scmp.lt.u32.totalorder %s8571_s23, %s10362_s22 }
 0x32c   : > { %p8576_p6 = por %p8575_p5, %p8574_p4 }
 0x32e   : > { %p8578_p8 = por %p8577_p7, %p8576_p6 }
 0x330   : > { %p8579_p9 = pnand %p8578_p8, %p8572_p3 }
 0x332   : > { %8582 = shalt.err (!%p8579_p9)  }
 0x333   : > { %4354 = dma.vmem_to_hbm [thread:$0]  %s10364_s27, 8192, %s10362_s22, [#allocation8]  ;;  %v4174_v52 = vadd.f32 %v4173_v5, %v4156_v36  ;;  %v4031_v27 = vadd.f32 %v4030_v46, %v3972_v47  ;;  %v4158_v41 = vmul.f32 %v3972_v47, %v3972_v47  ;;  %v4010_v34 = vadd.f32 %v4009_v12, %v3971_v17 }
 0x334   : > { %v3991_v14 = vadd.f32 %v3990_v6, %v3989_v21  ;;  %v4157_v33 = vmul.f32 %v3971_v17, %v3971_v17  ;;  %v4052_v23 = vadd.f32 %v4051_v49, %v3973_v50  ;;  %v4159_v24 = vmul.f32 %v3973_v50, %v3973_v50 }
 0x335   : > { %v4175_v26 = vrot.slane %v4174_v52, 4  ;;  %v4032_v62 = vrot.slane %v4031_v27, 4  ;;  %v4216_v4 = vadd.f32 %v4215_v19, %v4158_v41  ;;  %v4011_v3 = vrot.slane %v4010_v34, 4 }
 0x336   : > { %v3992_v59 = vrot.slane %v3991_v14, 2  ;;  %v4195_v0 = vadd.f32 %v4194_v16, %v4157_v33  ;;  %v4053_v38 = vrot.slane %v4052_v23, 4  ;;  %v4237_v55 = vadd.f32 %v4236_v13, %v4159_v24  ;;  %v3974_v24 = vld [vmem:[#allocation5] ss:$2 sm:$0xf] }
 0x337   : > { %v4176_v31 = vadd.f32 %v4175_v26, %v4174_v52  ;;  %v4033_v35 = vadd.f32 %v4032_v62, %v4031_v27  ;;  %v4217_v58 = vrot.slane %v4216_v4, 4  ;;  %v4012_v32 = vadd.f32 %v4011_v3, %v4010_v34 }
 0x338   : > { %v3993_v37 = vadd.f32 %v3992_v59, %v3991_v14  ;;  %v4196_v15 = vrot.slane %v4195_v0, 4  ;;  %v4054_v1 = vadd.f32 %v4053_v38, %v4052_v23  ;;  %v4238_v10 = vrot.slane %v4237_v55, 4 }
 0x339   : > { %v4177_v45 = vrot.slane %v4176_v31, 2  ;;  %v4034_v22 = vrot.slane %v4033_v35, 2  ;;  %v4218_v25 = vadd.f32 %v4217_v58, %v4216_v4  ;;  %v4013_v8 = vrot.slane %v4012_v32, 2 }
 0x33a   : > { %v3994_v57 = vrot.slane %v3993_v37, 1  ;;  %v4197_v63 = vadd.f32 %v4196_v15, %v4195_v0  ;;  %v4055_v53 = vrot.slane %v4054_v1, 2  ;;  %v4239_v11 = vadd.f32 %v4238_v10, %v4237_v55 }
 0x33b   : > { %v4178_v43 = vadd.f32 %v4177_v45, %v4176_v31  ;;  %v4035_v54 = vadd.f32 %v4034_v22, %v4033_v35  ;;  %v4219_v39 = vrot.slane %v4218_v25, 2  ;;  %v4014_v40 = vadd.f32 %v4013_v8, %v4012_v32 }
 0x33c   : > { %v3995_v9 = vadd.f32 %v3994_v57, %v3993_v37  ;;  %v4198_v60 = vrot.slane %v4197_v63, 2  ;;  %v4056_v48 = vadd.f32 %v4055_v53, %v4054_v1  ;;  %v4240_v5 = vrot.slane %v4239_v11, 2 }
 0x33d   : > { %v4179_v46 = vrot.slane %v4178_v43, 1  ;;  %v4036_v42 = vrot.slane %v4035_v54, 1  ;;  %v4220_v12 = vadd.f32 %v4219_v39, %v4218_v25  ;;  %v4015_v44 = vrot.slane %v4014_v40, 1 }
 0x33e   : > { %v4199_v30 = vadd.f32 %v4198_v60, %v4197_v63  ;;  %v4057_v18 = vrot.slane %v4056_v48, 1  ;;  %v4241_v7 = vadd.f32 %v4240_v5, %v4239_v11  ;;  %v4070_v16 = vsub.s32 %v4067_v61, %v9598_v29  ;;  %v4095_v29 = vld [vmem:[#allocation5 + $0x1] ss:$2 sm:$0xf] }
 0x33f   : > { %v4037_v19 = vadd.f32 %v4036_v42, %v4035_v54  ;;  %v4221_v2 = vrot.slane %v4220_v12, 1  ;;  %v4016_v20 = vadd.f32 %v4015_v44, %v4014_v40  ;;  %v4180_v49 = vadd.f32 %v4179_v46, %v4178_v43 }
 0x340   : > { %v4200_v51 = vrot.slane %v4199_v30, 1  ;;  %v4058_v21 = vadd.f32 %v4057_v18, %v4056_v48  ;;  %v4242_v36 = vrot.slane %v4241_v7, 1  ;;  %vm4091_vm0 = vcmp.lt.s32.totalorder %v625_v28, 512 }
 0x341   : > { %v4222_v47 = vadd.f32 %v4221_v2, %v4220_v12  ;;  %v4063_v17 = vcombine.low %v3995_v9, %v4016_v20 }
 0x342   : > { %v4201_v50 = vadd.f32 %v4200_v51, %v4199_v30  ;;  %v4064_v13 = vcombine.low %v4037_v19, %v4058_v21  ;;  %v4243_v6 = vadd.f32 %v4242_v36, %v4241_v7 }
 0x343   : > { %v4071_v52 = vrot.slane %v4063_v17, %v4070_v16 }
 0x344   : > { %v4248_v27 = vcombine.low %v4180_v49, %v4201_v50  ;;  %v4078_v41 = vrot.slane %v4064_v13, %v4070_v16  ;;  %v4249_v34 = vcombine.low %v4222_v47, %v4243_v6 }
 0x346   : > { %v4256_v14 = vrot.slane %v4248_v27, %v4070_v16  ;;  %v4079_v33 = vcombine.low %v4071_v52, %v4078_v41  ;;  %v4263_v23 = vrot.slane %v4249_v34, %v4070_v16 }
 0x348   : > { %v4086_v26 = vrot.slane %v4079_v33, %v4070_v16  ;;  %v4264_v56 = vcombine.low %v4256_v14, %v4263_v23 }
 0x34a   : > { %v4088_v61 = vadd.f32 %v4086_v26, %v3974_v24  ;;  %v4271_v62 = vrot.slane %v4264_v56, %v4070_v16 }
 0x34c   : > { %4093 = vst.msk [vmem:[#allocation5] ss:$2 sm:$0xf] %vm4091_vm0, %v4088_v61  ;;  %v4273_v4 = vadd.f32 %v4271_v62, %v4095_v29 }
 0x34e   : > { %4274 = vst.msk [vmem:[#allocation5 + $0x1] ss:$2 sm:$0xf] %vm4091_vm0, %v4273_v4 }
 0x34f   : > { %8723 = dma.done.wait [#allocation8], 8192 }
 0x350   : > { %8724 = vsyncadd [#allocation8], 4294959104 }
 0x351 PF: > { %p7095_p10 = scmp.ne.s32.totalorder %s8741_s30, 1 }
 0x352   : > { %s4363_s27 = sshra.s32 (!%p7095_p10), %s8882_s20, 3  ;;  %s8760_s21 = smov (!%p7095_p10), [#allocation2]  }
 0x353   : > { %4362 = sbr.rel (%p7095_p10) target bundleno = 1231 (0x4cf), region = 80  ;;  %s7185_s28 = sshll.u32 (!%p7095_p10), %s4363_s27, 9 }
 0x354   : > { %s4375_s22 = sshll.u32 (!%p7095_p10), %s8760_s21, 4  ;;  %s4367_s24 = scalar_lea.hbm (!%p7095_p10), %s11286_s12, %s7185_s28  ;;  %s4376_s22 = int_to_ptr.vmem [resolvable:$true] %s4375_s22 }
 0x355   : > { %s8583_s16 = scalar_lea.hbm (!%p7095_p10), %s4367_s24, 8192  ;;  %s8585_s26 = scalar_lea.hbm (!%p7095_p10), %s11286_s12, 16384 }
 0x356   : > { %p8584_p11 = scmp.ne.s32.totalorder (!%p7095_p10), %s4367_s24, %s8583_s16  ;;  %p8586_p12 = scmp.lt.u32.totalorder (!%p7095_p10), %s4367_s24, %s11286_s12 }
 0x357   : > { %p8587_p13 = scmp.lt.u32.totalorder (!%p7095_p10), %s8585_s26, %s8583_s16  ;;  %p8589_p1 = scmp.lt.u32.totalorder (!%p7095_p10), %s8583_s16, %s4367_s24 }
 0x359   : > { %p8588_p0 = por (!%p7095_p10), %p8587_p13, %p8586_p12 }
 0x35b   : > { %p8590_p2 = por %p8589_p1, %p8588_p0 }
 0x35d   : > { %p8591_p3 = pnand %p8590_p2, %p8584_p11 }
 0x35f   : > { %8594 = shalt.err (!%p8591_p3)  }
 0x360   : > { %s8595_s27 = scalar_lea.vmem %s4376_s22, 8192  ;;  %p8600_p5 = scmp.lt.s32.totalorder %s4376_s22, %s4376_s22 }
 0x361   : > { %p8596_p4 = scmp.ne.s32.totalorder %s4376_s22, %s8595_s27  ;;  %p8601_p6 = scmp.lt.s32.totalorder %s8595_s27, %s8595_s27 }
 0x363   : > { %p8602_p7 = por %p8601_p6, %p8600_p5 }
 0x365   : > { %p8603_p8 = pnand %p8602_p7, %p8596_p4 }
 0x367   : > { %8606 = shalt.err (!%p8603_p8)  }
 0x368   : > { %4378 = dma.hbm_to_vmem [thread:$0]  %s4367_s24, 8192, %s4376_s22, [#allocation8] }
 0x369   : > { %8725 = dma.done.wait [#allocation8], 8192 }
 0x36a   : > { %8726 = vsyncadd [#allocation8], 4294959104  ;;  %v8447_v28 = vld [vmem:[%s11279_s5 + $0x40] sm:$0xff]   ;;  %v8451_v38 = vld [vmem:[%s11279_s5 + $0x48] sm:$0xff]   ;;  %v4465_v16 = vlaneseq  ;;  %s7186_s23 = sshll.u32 %s8737_s29, 11  ;;  %s8762_s16 = smov [#allocation3]  }
 0x36b   : > { %v8448_v3 = vld [vmem:[%s11279_s5 + $0xc0] sm:$0xff]   ;;  %7270 = vmatprep.subr.bf16.mxu0 %v8447_v28  ;;  %v8452_v55 = vld [vmem:[%s11279_s5 + $0xc8] sm:$0xff]   ;;  %v8455_v58 = vld [vmem:[%s11279_s5 + $0x50] sm:$0xff]   ;;  %s5372_s18 = sshll.u32 %s8762_s16, 4  ;;  %s5364_s25 = scalar_lea.hbm %s11287_s13, %s7186_s23  ;;  %s5373_s18 = int_to_ptr.vmem [resolvable:$true] %s5372_s18 }
 0x36c   : > { %v8449_v59 = vld [vmem:[%s11279_s5] sm:$0xff]   ;;  %7334 = vmatprep.subr.bf16.mxu1 %v8448_v3  ;;  %v8453_v31 = vld [vmem:[%s11279_s5 + $0x8] sm:$0xff]   ;;  %v8456_v32 = vld [vmem:[%s11279_s5 + $0xd0] sm:$0xff]   ;;  %v10497_v49 = vshrl.u32 %v4465_v16, 7  ;;  %s8607_s26 = scalar_lea.vmem %s5373_s18, 2048  ;;  %p8612_p10 = scmp.lt.s32.totalorder %s5373_s18, %s5373_s18 }
 0x36d   : > { %v8450_v0 = vld [vmem:[%s11279_s5 + $0x80] sm:$0xff]   ;;  %7271 = vmatpush3.bf16.msra.mxu0 %v8449_v59  ;;  %v8454_v35 = vld [vmem:[%s11279_s5 + $0x88] sm:$0xff]   ;;  %v8457_v37 = vld [vmem:[%s11279_s5 + $0x10] sm:$0xff]   ;;  %p8608_p9 = scmp.ne.s32.totalorder %s5373_s18, %s8607_s26  ;;  %p8613_p11 = scmp.lt.s32.totalorder %s8607_s26, %s8607_s26 }
 0x36e   : > { %7335 = vmatpush3.bf16.msra.mxu1 %v8450_v0  ;;  %7272 = vmatprep.subr.bf16.mxu0 %v8451_v38  ;;  %v8458_v15 = vld [vmem:[%s11279_s5 + $0x90] sm:$0xff]   ;;  %v8459_v1 = vld [vmem:[%s11279_s5 + $0x58] sm:$0xff]   ;;  %v8463_v25 = vld [vmem:[%s11279_s5 + $0x60] sm:$0xff]   ;;  %v4471_v21 = vsub.s32 1, %v10497_v49  ;;  %v4479_v36 = vsub.s32 3, %v10497_v49  ;;  %v4467_v47 = vsub.s32 0, %v10497_v49 }
 0x36f   : > { %7336 = vmatprep.subr.bf16.mxu1 %v8452_v55  ;;  %v8460_v10 = vld [vmem:[%s11279_s5 + $0xd8] sm:$0xff]   ;;  %v8464_v8 = vld [vmem:[%s11279_s5 + $0xe0] sm:$0xff]   ;;  %v8467_v53 = vld [vmem:[%s11279_s5 + $0x68] sm:$0xff]   ;;  %v4475_v50 = vsub.s32 2, %v10497_v49  ;;  %p8614_p12 = por %p8613_p11, %p8612_p10 }
 0x370   : > { %v8461_v45 = vld [vmem:[%s11279_s5 + $0x18] sm:$0xff]   ;;  %v8465_v57 = vld [vmem:[%s11279_s5 + $0x20] sm:$0xff]   ;;  %v8468_v11 = vld [vmem:[%s11279_s5 + $0xe8] sm:$0xff]  }
 0x371   : > { %7273 = vmatpush3.bf16.msra.mxu0 %v8453_v31  ;;  %v8462_v22 = vld [vmem:[%s11279_s5 + $0x98] sm:$0xff]   ;;  %v8466_v63 = vld [vmem:[%s11279_s5 + $0xa0] sm:$0xff]   ;;  %v8469_v43 = vld [vmem:[%s11279_s5 + $0x28] sm:$0xff]   ;;  %p8615_p13 = pnand %p8614_p12, %p8608_p9 }
 0x372   : > { %7337 = vmatpush3.bf16.msra.mxu1 %v8454_v35  ;;  %7274 = vmatprep.subr.bf16.mxu0 %v8455_v58  ;;  %v8470_v54 = vld [vmem:[%s11279_s5 + $0xa8] sm:$0xff]   ;;  %v8471_v39 = vld [vmem:[%s11279_s5 + $0x70] sm:$0xff]   ;;  %v8475_v48 = vld [vmem:[%s11279_s5 + $0x78] sm:$0xff]  }
 0x373   : > { %7338 = vmatprep.subr.bf16.mxu1 %v8456_v32  ;;  %v8472_v40 = vld [vmem:[%s11279_s5 + $0xf0] sm:$0xff]   ;;  %v8476_v5 = vld [vmem:[%s11279_s5 + $0xf8] sm:$0xff]   ;;  %v4447_v12 = vld [vmem:[#allocation5] ss:$2 sm:$0xf] }
 0x374   : > { %v8473_v9 = vld [vmem:[%s11279_s5 + $0x30] sm:$0xff]   ;;  %v8477_v46 = vld [vmem:[%s11279_s5 + $0x38] sm:$0xff]   ;;  %v4448_v44 = vmul.f32 0.005, %v4447_v12  ;;  %v4384_v13 = vld [vmem:[#allocation2 + $0x8] sm:$0xff] }
 0x375   : > { %7275 = vmatpush3.bf16.msra.mxu0 %v8457_v37  ;;  %v8474_v60 = vld [vmem:[%s11279_s5 + $0xb0] sm:$0xff]   ;;  %v8478_v42 = vld [vmem:[%s11279_s5 + $0xb8] sm:$0xff]   ;;  %v4450_v30 = vld [vmem:[#allocation5 + $0x1] ss:$2 sm:$0xf] }
 0x376   : > { %7339 = vmatpush3.bf16.msra.mxu1 %v8458_v15  ;;  %7276 = vmatprep.subr.bf16.mxu0 %v8459_v1  ;;  %v4451_v18 = vmul.f32 0.005, %v4450_v30  ;;  %v4452_v7 = vmul.f32 %v4448_v44, %v4448_v44  ;;  %v7098_v51 = vld [vmem:[%s11278_s4 + $0x1] ss:$4 sm:$0xf]  ;;  %v4386_v41 = vld [vmem:[#allocation2 + $0x18] sm:$0xff] }
 0x377   : > { %7340 = vmatprep.subr.bf16.mxu1 %v8460_v10  ;;  %v4388_v6 = vld [vmem:[#allocation2 + $0x28] sm:$0xff]  ;;  %v4390_v34 = vld [vmem:[#allocation2 + $0x38] sm:$0xff]  ;;  %v4383_v24 = vld [vmem:[#allocation2] sm:$0xff] }
 0x378   : > { %v4453_v19 = vsub.f32 %v4451_v18, %v4452_v7  ;;  %v7099_v27 = vld [vmem:[%s11278_s4 + $0x2] ss:$4 sm:$0xf]  ;;  %v4385_v29 = vld [vmem:[#allocation2 + $0x10] sm:$0xff]  ;;  %v4394_v55 = vld [vmem:[#allocation2 + $0x58] sm:$0xff] }
 0x379   : > { %7277 = vmatpush3.bf16.msra.mxu0 %v8461_v45  ;;  %v4387_v26 = vld [vmem:[#allocation2 + $0x20] sm:$0xff]  ;;  %v4389_v61 = vld [vmem:[#allocation2 + $0x30] sm:$0xff]  ;;  %v4392_v0 = vld [vmem:[#allocation2 + $0x48] sm:$0xff] }
 0x37a   : > { %7341 = vmatpush3.bf16.msra.mxu1 %v8462_v22  ;;  %7278 = vmatprep.subr.bf16.mxu0 %v8463_v25  ;;  %v4454_v2 = vmax.f32 %v4453_v19, 0.0  ;;  %v4396_v38 = vld [vmem:[#allocation2 + $0x68] sm:$0xff]  ;;  %v4391_v18 = vld [vmem:[#allocation2 + $0x40] sm:$0xff] }
 0x37b   : > { %7342 = vmatprep.subr.bf16.mxu1 %v8464_v8  ;;  %v4395_v7 = vld [vmem:[#allocation2 + $0x60] sm:$0xff] }
 0x37c   : > { %v4457_v20 = vadd.f32 1e-05, %v4454_v2 }
 0x37d   : > { %7279 = vmatpush3.bf16.msra.mxu0 %v8465_v57 }
 0x37e   : > { %7343 = vmatpush3.bf16.msra.mxu1 %v8466_v63  ;;  %7280 = vmatprep.subr.bf16.mxu0 %v8467_v53  ;;  %8479 = vrsqrt.f32 %v4457_v20 }
 0x37f   : > { %7344 = vmatprep.subr.bf16.mxu1 %v8468_v11 }
 0x381   : > { %7281 = vmatpush3.bf16.msra.mxu0 %v8469_v43 }
 0x382   : > { %7345 = vmatpush3.bf16.msra.mxu1 %v8470_v54  ;;  %7282 = vmatprep.subr.bf16.mxu0 %v8471_v39 }
 0x383   : > { %7346 = vmatprep.subr.bf16.mxu1 %v8472_v40 }
 0x385   : > { %7283 = vmatpush3.bf16.msra.mxu0 %v8473_v9 }
 0x386   : > { %7347 = vmatpush3.bf16.msra.mxu1 %v8474_v60  ;;  %7284 = vmatprep.subr.bf16.mxu0 %v8475_v48 }
 0x387   : > { %7348 = vmatprep.subr.bf16.mxu1 %v8476_v5 }
 0x388   : > { %v8480_v17 = vpop.eup %8479 }
 0x389   : > { %7285 = vmatpush3.bf16.msra.mxu0 %v8477_v46  ;;  %v4459_v52 = vmul.f32 %v8480_v17, %v7098_v51  ;;  %v4398_v46 = vld [vmem:[#allocation2 + $0x78] sm:$0xff]  ;;  %v4393_v51 = vld [vmem:[#allocation2 + $0x50] sm:$0xff] }
 0x38a   : > { %7349 = vmatpush3.bf16.msra.mxu1 %v8478_v42 }
 0x38b   : > { %v4462_v14 = vmul.f32 %v4459_v52, %v4448_v44  ;;  %v10509_v33 = vrot.slane %v4459_v52, %v4471_v21  ;;  %v10511_v23 = vrot.slane %v4459_v52, %v4479_v36  ;;  %v10513_v56 = vrot.slane %v4459_v52, %v4467_v47 }
 0x38c   : > { %v10515_v62 = vrot.slane %v4459_v52, %v4475_v50 }
 0x38d   : > { %v4463_v4 = vsub.f32 %v7099_v27, %v4462_v14  ;;  %v4486_v28 = vmul.f32 %v10509_v33, %v4384_v13  ;;  %v4490_v3 = vmul.f32 %v10509_v33, %v4388_v6  ;;  %v4488_v59 = vmul.f32 %v10511_v23, %v4386_v41  ;;  %v4400_v13 = vld [vmem:[#allocation2 + $0x88] sm:$0xff] }
 0x38e   : > { %v4492_v31 = vmul.f32 %v10511_v23, %v4390_v34  ;;  %v4485_v35 = vmul.f32 %v10513_v56, %v4383_v24  ;;  %v4489_v58 = vmul.f32 %v10513_v56, %v4387_v26  ;;  %v4487_v32 = vmul.f32 %v10515_v62, %v4385_v29  ;;  %v4404_v34 = vld [vmem:[#allocation2 + $0xa8] sm:$0xff] }
 0x38f   : > { %v10524_v37 = vrot.slane %v4463_v4, %v4471_v21  ;;  %v10526_v15 = vrot.slane %v4463_v4, %v4479_v36  ;;  %v10528_v1 = vrot.slane %v4463_v4, %v4467_v47  ;;  %v4491_v10 = vmul.f32 %v10515_v62, %v4389_v61  ;;  %v4397_v21 = vld [vmem:[#allocation2 + $0x70] sm:$0xff]  ;;  %v4402_v61 = vld [vmem:[#allocation2 + $0x98] sm:$0xff] }
 0x390   : > { %v10531_v45 = vrot.slane %v4463_v4, %v4475_v50  ;;  %v4494_v22 = vmul.f32 %v10509_v33, %v4392_v0  ;;  %v4498_v25 = vmul.f32 %v10509_v33, %v4396_v38  ;;  %v4496_v8 = vmul.f32 %v10511_v23, %v4394_v55 }
 0x391   : > { %v4571_v57 = vadd.f32 %v10524_v37, %v4486_v28  ;;  %v4575_v63 = vadd.f32 %v10524_v37, %v4490_v3  ;;  %v4573_v53 = vadd.f32 %v10526_v15, %v4488_v59  ;;  %v4577_v11 = vadd.f32 %v10526_v15, %v4492_v31 }
 0x392   : > { %v4570_v43 = vadd.f32 %v10528_v1, %v4485_v35  ;;  %v4574_v54 = vadd.f32 %v10528_v1, %v4489_v58  ;;  %v4572_v39 = vadd.f32 %v10531_v45, %v4487_v32  ;;  %v4576_v40 = vadd.f32 %v10531_v45, %v4491_v10  ;;  %v4406_v35 = vld [vmem:[#allocation2 + $0xb8] sm:$0xff] }
 0x393   : > { %v4635_v9 = vmax.f32 %v4571_v57, 0.0  ;;  %v4639_v60 = vmax.f32 %v4575_v63, 0.0  ;;  %v4637_v48 = vmax.f32 %v4573_v53, 0.0  ;;  %v4641_v5 = vmax.f32 %v4577_v11, 0.0 }
 0x394   : > { %v4634_v42 = vmax.f32 %v4570_v43, 0.0  ;;  %v4638_v12 = vmax.f32 %v4574_v54, 0.0  ;;  %v4636_v44 = vmax.f32 %v4572_v39, 0.0  ;;  %v4640_v30 = vmax.f32 %v4576_v40, 0.0  ;;  %v4401_v43 = vld [vmem:[#allocation2 + $0x90] sm:$0xff] }
 0x395   : > { %v4700_v19 = vpack.c.bf16 %v4639_v60, %v4635_v9  ;;  %v4702_v2 = vpack.c.bf16 %v4641_v5, %v4637_v48  ;;  %v4579_v20 = vadd.f32 %v10524_v37, %v4494_v22  ;;  %v4583_v16 = vadd.f32 %v10524_v37, %v4498_v25  ;;  %v4399_v25 = vld [vmem:[#allocation2 + $0x80] sm:$0xff]  ;;  %v4405_v54 = vld [vmem:[#allocation2 + $0xb0] sm:$0xff] }
 0x396   : > { %v4699_v36 = vpack.c.bf16 %v4638_v12, %v4634_v42  ;;  %v4701_v47 = vpack.c.bf16 %v4640_v30, %v4636_v44  ;;  %v4500_v17 = vmul.f32 %v10511_v23, %v4398_v46  ;;  %v4581_v50 = vadd.f32 %v10526_v15, %v4496_v8  ;;  %v4403_v8 = vld [vmem:[#allocation2 + $0xa0] sm:$0xff]  ;;  %v4408_v12 = vld [vmem:[#allocation2 + $0xc8] sm:$0xff] }
 0x397   : > { %5023 = vmatprep.mubr.bf16.mxu0 %v4700_v19  ;;  %5120 = vmatprep.mubr.bf16.mxu1 %v4702_v2  ;;  %v4643_v6 = vmax.f32 %v4579_v20, 0.0  ;;  %v4647_v52 = vmax.f32 %v4583_v16, 0.0  ;;  %v4493_v27 = vmul.f32 %v10513_v56, %v4391_v18  ;;  %v4497_v41 = vmul.f32 %v10513_v56, %v4395_v7  ;;  %v4412_v19 = vld [vmem:[#allocation2 + $0xe8] sm:$0xff]  ;;  %v4410_v2 = vld [vmem:[#allocation2 + $0xd8] sm:$0xff] }
 0x398   : > { %5024 = vmatmul.mubr.bf16.vlgmr.msra.gmra.mrb[0].mxu0 %v4699_v36  ;;  %5121 = vmatmul.mubr.bf16.vlgmr.msra.gmra.mrb[0].mxu1 %v4701_v47  ;;  %v4585_v14 = vadd.f32 %v10526_v15, %v4500_v17  ;;  %v4645_v24 = vmax.f32 %v4581_v50, 0.0  ;;  %v4495_v26 = vmul.f32 %v10515_v62, %v4393_v51  ;;  %v4499_v29 = vmul.f32 %v10515_v62, %v4397_v21  ;;  %v4414_v50 = vld [vmem:[#allocation2 + $0xf8] sm:$0xff] }
 0x399   : > { %v4704_v4 = vpack.c.bf16 %v4647_v52, %v4643_v6  ;;  %v4578_v28 = vadd.f32 %v10528_v1, %v4493_v27  ;;  %v4582_v3 = vadd.f32 %v10528_v1, %v4497_v41  ;;  %v4502_v59 = vmul.f32 %v10509_v33, %v4400_v13  ;;  %v4407_v41 = vld [vmem:[#allocation2 + $0xc0] sm:$0xff] }
 0x39a   : > { %v4649_v0 = vmax.f32 %v4585_v14, 0.0  ;;  %v4580_v38 = vadd.f32 %v10531_v45, %v4495_v26  ;;  %v4584_v55 = vadd.f32 %v10531_v45, %v4499_v29  ;;  %v4506_v31 = vmul.f32 %v10509_v33, %v4404_v34  ;;  %v4411_v34 = vld [vmem:[#allocation2 + $0xe0] sm:$0xff] }
 0x39b   : > { %5031 = vmatprep.mubr.bf16.mxu0 %v4704_v4  ;;  %v4642_v58 = vmax.f32 %v4578_v28, 0.0  ;;  %v4646_v32 = vmax.f32 %v4582_v3, 0.0  ;;  %v4587_v10 = vadd.f32 %v10524_v37, %v4502_v59  ;;  %v4504_v22 = vmul.f32 %v10511_v23, %v4402_v61  ;;  %v4409_v61 = vld [vmem:[#allocation2 + $0xd0] sm:$0xff] }
 0x39c   : > { %v4706_v57 = vpack.c.bf16 %v4649_v0, %v4645_v24  ;;  %v4644_v63 = vmax.f32 %v4580_v38, 0.0  ;;  %v4648_v53 = vmax.f32 %v4584_v55, 0.0  ;;  %v4591_v11 = vadd.f32 %v10524_v37, %v4506_v31  ;;  %v4413_v0 = vld [vmem:[#allocation2 + $0xf0] sm:$0xff]  ;;  %v4416_v38 = vld [vmem:[#allocation2 + $0x108] sm:$0xff] }
 0x39d   : > { %v4703_v39 = vpack.c.bf16 %v4646_v32, %v4642_v58  ;;  %v4651_v40 = vmax.f32 %v4587_v10, 0.0  ;;  %v4508_v9 = vmul.f32 %v10511_v23, %v4406_v35  ;;  %v4589_v60 = vadd.f32 %v10526_v15, %v4504_v22  ;;  %v4420_v32 = vld [vmem:[#allocation2 + $0x128] sm:$0xff] }
 0x39e   : > { %5128 = vmatprep.mubr.bf16.mxu1 %v4706_v57  ;;  %v4705_v48 = vpack.c.bf16 %v4648_v53, %v4644_v63  ;;  %v4655_v5 = vmax.f32 %v4591_v11, 0.0  ;;  %v4501_v46 = vmul.f32 %v10513_v56, %v4399_v25  ;;  %v4505_v42 = vmul.f32 %v10513_v56, %v4403_v8 }
 0x39f   : > { %v4593_v44 = vadd.f32 %v10526_v15, %v4508_v9  ;;  %v4653_v30 = vmax.f32 %v4589_v60, 0.0  ;;  %v4503_v18 = vmul.f32 %v10515_v62, %v4401_v43  ;;  %v4507_v7 = vmul.f32 %v10515_v62, %v4405_v54  ;;  %v4418_v43 = vld [vmem:[#allocation2 + $0x118] sm:$0xff] }
 0x3a0   : > { %5032 = vmatmul.mubr.bf16.gmra.mrb[4].mxu0 %v4703_v39  ;;  %5129 = vmatmul.mubr.bf16.gmra.mrb[4].mxu1 %v4705_v48  ;;  %v4708_v20 = vpack.c.bf16 %v4655_v5, %v4651_v40  ;;  %v4586_v16 = vadd.f32 %v10528_v1, %v4501_v46  ;;  %v4590_v51 = vadd.f32 %v10528_v1, %v4505_v42  ;;  %v4422_v60 = vld [vmem:[#allocation2 + $0x138] sm:$0xff] }
 0x3a1   : > { %v4657_v21 = vmax.f32 %v4593_v44, 0.0  ;;  %v4588_v36 = vadd.f32 %v10531_v45, %v4503_v18  ;;  %v4592_v47 = vadd.f32 %v10531_v45, %v4507_v7  ;;  %v4510_v17 = vmul.f32 %v10509_v33, %v4408_v12  ;;  %v4415_v12 = vld [vmem:[#allocation2 + $0x100] sm:$0xff] }
 0x3a2   : > { %5039 = vmatprep.mubr.bf16.mxu0 %v4708_v20  ;;  %v4650_v13 = vmax.f32 %v4586_v16, 0.0  ;;  %v4654_v6 = vmax.f32 %v4590_v51, 0.0  ;;  %v4514_v52 = vmul.f32 %v10509_v33, %v4412_v19  ;;  %v4512_v27 = vmul.f32 %v10511_v23, %v4410_v2  ;;  %v4419_v44 = vld [vmem:[#allocation2 + $0x120] sm:$0xff]  ;;  %v4417_v2 = vld [vmem:[#allocation2 + $0x110] sm:$0xff] }
 0x3a3   : > { %v4710_v14 = vpack.c.bf16 %v4657_v21, %v4653_v30  ;;  %v4652_v24 = vmax.f32 %v4588_v36, 0.0  ;;  %v4656_v26 = vmax.f32 %v4592_v47, 0.0  ;;  %v4595_v29 = vadd.f32 %v10524_v37, %v4510_v17  ;;  %v4421_v20 = vld [vmem:[#allocation2 + $0x130] sm:$0xff] }
 0x3a4   : > { %v4707_v4 = vpack.c.bf16 %v4654_v6, %v4650_v13  ;;  %v4599_v28 = vadd.f32 %v10524_v37, %v4514_v52  ;;  %v4516_v3 = vmul.f32 %v10511_v23, %v4414_v50  ;;  %v4597_v59 = vadd.f32 %v10526_v15, %v4512_v27  ;;  %v4424_v6 = vld [vmem:[#allocation2 + $0x148] sm:$0xff] }
 0x3a5   : > { %5136 = vmatprep.mubr.bf16.mxu1 %v4710_v14  ;;  %v4709_v55 = vpack.c.bf16 %v4656_v26, %v4652_v24  ;;  %v4659_v31 = vmax.f32 %v4595_v29, 0.0  ;;  %v4509_v35 = vmul.f32 %v10513_v56, %v4407_v41  ;;  %v4513_v58 = vmul.f32 %v10513_v56, %v4411_v34  ;;  %v4428_v14 = vld [vmem:[#allocation2 + $0x168] sm:$0xff]  ;;  %v4426_v24 = vld [vmem:[#allocation2 + $0x158] sm:$0xff] }
 0x3a6   : > { %v4663_v10 = vmax.f32 %v4599_v28, 0.0  ;;  %v4601_v22 = vadd.f32 %v10526_v15, %v4516_v3  ;;  %v4661_v25 = vmax.f32 %v4597_v59, 0.0  ;;  %v4511_v8 = vmul.f32 %v10515_v62, %v4409_v61 }
 0x3a7   : > { %v4594_v57 = vadd.f32 %v10528_v1, %v4509_v35  ;;  %v4598_v63 = vadd.f32 %v10528_v1, %v4513_v58  ;;  %v4515_v53 = vmul.f32 %v10515_v62, %v4413_v0  ;;  %v4518_v11 = vmul.f32 %v10509_v33, %v4416_v38  ;;  %v4430_v38 = vld [vmem:[#allocation2 + $0x178] sm:$0xff] }
 0x3a8   : > { %5040 = vmatmul.mubr.bf16.gmra.mrb[8].mxu0 %v4707_v4  ;;  %5137 = vmatmul.mubr.bf16.gmra.mrb[8].mxu1 %v4709_v55  ;;  %v4712_v54 = vpack.c.bf16 %v4663_v10, %v4659_v31  ;;  %v4665_v39 = vmax.f32 %v4601_v22, 0.0  ;;  %v4596_v40 = vadd.f32 %v10531_v45, %v4511_v8  ;;  %v4522_v9 = vmul.f32 %v10509_v33, %v4420_v32  ;;  %v4423_v32 = vld [vmem:[#allocation2 + $0x140] sm:$0xff] }
 0x3a9   : > { %v4658_v48 = vmax.f32 %v4594_v57, 0.0  ;;  %v4662_v5 = vmax.f32 %v4598_v63, 0.0  ;;  %v4600_v46 = vadd.f32 %v10531_v45, %v4515_v53  ;;  %v4603_v42 = vadd.f32 %v10524_v37, %v4518_v11  ;;  %v4427_v10 = vld [vmem:[#allocation2 + $0x160] sm:$0xff]  ;;  %v4425_v63 = vld [vmem:[#allocation2 + $0x150] sm:$0xff] }
 0x3aa   : > { %5047 = vmatprep.mubr.bf16.mxu0 %v4712_v54  ;;  %v4714_v30 = vpack.c.bf16 %v4665_v39, %v4661_v25  ;;  %v4660_v18 = vmax.f32 %v4596_v40, 0.0  ;;  %v4607_v7 = vadd.f32 %v10524_v37, %v4522_v9  ;;  %v4520_v19 = vmul.f32 %v10511_v23, %v4418_v43  ;;  %v4429_v39 = vld [vmem:[#allocation2 + $0x170] sm:$0xff]  ;;  %v4432_v40 = vld [vmem:[#allocation2 + $0x188] sm:$0xff] }
 0x3ab   : > { %v4711_v16 = vpack.c.bf16 %v4662_v5, %v4658_v48  ;;  %v4664_v51 = vmax.f32 %v4600_v46, 0.0  ;;  %v4667_v21 = vmax.f32 %v4603_v42, 0.0  ;;  %v4524_v36 = vmul.f32 %v10511_v23, %v4422_v60  ;;  %v4436_v46 = vld [vmem:[#allocation2 + $0x1a8] sm:$0xff] }
 0x3ac   : > { %5144 = vmatprep.mubr.bf16.mxu1 %v4714_v30  ;;  %v4671_v47 = vmax.f32 %v4607_v7, 0.0  ;;  %v4605_v17 = vadd.f32 %v10526_v15, %v4520_v19  ;;  %v4517_v50 = vmul.f32 %v10513_v56, %v4415_v12  ;;  %v4521_v13 = vmul.f32 %v10513_v56, %v4419_v44 }
 0x3ad   : > { %v4713_v52 = vpack.c.bf16 %v4664_v51, %v4660_v18  ;;  %v4609_v27 = vadd.f32 %v10526_v15, %v4524_v36  ;;  %v4519_v41 = vmul.f32 %v10515_v62, %v4417_v2  ;;  %v4523_v34 = vmul.f32 %v10515_v62, %v4421_v20  ;;  %v4434_v20 = vld [vmem:[#allocation2 + $0x198] sm:$0xff] }
 0x3ae   : > { %v4716_v26 = vpack.c.bf16 %v4671_v47, %v4667_v21  ;;  %v4669_v29 = vmax.f32 %v4605_v17, 0.0  ;;  %v4602_v61 = vadd.f32 %v10528_v1, %v4517_v50  ;;  %v4606_v4 = vadd.f32 %v10528_v1, %v4521_v13  ;;  %v4438_v47 = vld [vmem:[#allocation2 + $0x1b8] sm:$0xff] }
 0x3af   : > { %v4673_v28 = vmax.f32 %v4609_v27, 0.0  ;;  %v4604_v3 = vadd.f32 %v10531_v45, %v4519_v41  ;;  %v4608_v59 = vadd.f32 %v10531_v45, %v4523_v34  ;;  %v4526_v0 = vmul.f32 %v10509_v33, %v4424_v6  ;;  %v4435_v27 = vld [vmem:[#allocation2 + $0x1a0] sm:$0xff] }
 0x3b0   : > { %5048 = vmatmul.mubr.bf16.gmra.mrb[12].mxu0 %v4711_v16  ;;  %5145 = vmatmul.mubr.bf16.gmra.mrb[12].mxu1 %v4713_v52  ;;  %v4666_v55 = vmax.f32 %v4602_v61, 0.0  ;;  %v4670_v31 = vmax.f32 %v4606_v4, 0.0  ;;  %v4530_v35 = vmul.f32 %v10509_v33, %v4428_v14  ;;  %v4528_v58 = vmul.f32 %v10511_v23, %v4426_v24  ;;  %v4431_v52 = vld [vmem:[#allocation2 + $0x180] sm:$0xff] }
 0x3b1   : > { %5055 = vmatprep.mubr.bf16.mxu0 %v4716_v26  ;;  %v4718_v22 = vpack.c.bf16 %v4673_v28, %v4669_v29  ;;  %v4668_v25 = vmax.f32 %v4604_v3, 0.0  ;;  %v4672_v8 = vmax.f32 %v4608_v59, 0.0  ;;  %v4611_v57 = vadd.f32 %v10524_v37, %v4526_v0  ;;  %v4433_v26 = vld [vmem:[#allocation2 + $0x190] sm:$0xff] }
 0x3b2   : > { %v4715_v53 = vpack.c.bf16 %v4670_v31, %v4666_v55  ;;  %v4615_v11 = vadd.f32 %v10524_v37, %v4530_v35  ;;  %v4532_v43 = vmul.f32 %v10511_v23, %v4430_v38  ;;  %v4613_v54 = vadd.f32 %v10526_v15, %v4528_v58  ;;  %v4437_v29 = vld [vmem:[#allocation2 + $0x1b0] sm:$0xff]  ;;  %v4440_v31 = vld [vmem:[#allocation2 + $0x1c8] sm:$0xff] }
 0x3b3   : > { %5152 = vmatprep.mubr.bf16.mxu1 %v4718_v22  ;;  %v4717_v9 = vpack.c.bf16 %v4672_v8, %v4668_v25  ;;  %v4675_v60 = vmax.f32 %v4611_v57, 0.0  ;;  %v4525_v48 = vmul.f32 %v10513_v56, %v4423_v32  ;;  %v4529_v5 = vmul.f32 %v10513_v56, %v4427_v10  ;;  %v4444_v22 = vld [vmem:[#allocation2 + $0x1e8] sm:$0xff]  ;;  %v4442_v25 = vld [vmem:[#allocation2 + $0x1d8] sm:$0xff] }
 0x3b4   : > { %v4679_v42 = vmax.f32 %v4615_v11, 0.0  ;;  %v4617_v12 = vadd.f32 %v10526_v15, %v4532_v43  ;;  %v4677_v44 = vmax.f32 %v4613_v54, 0.0  ;;  %v4527_v30 = vmul.f32 %v10515_v62, %v4425_v63 }
 0x3b5   : > { %v4610_v18 = vadd.f32 %v10528_v1, %v4525_v48  ;;  %v4614_v7 = vadd.f32 %v10528_v1, %v4529_v5  ;;  %v4531_v19 = vmul.f32 %v10515_v62, %v4429_v39  ;;  %v4534_v2 = vmul.f32 %v10509_v33, %v4432_v40  ;;  %v4446_v40 = vld [vmem:[#allocation2 + $0x1f8] sm:$0xff] }
 0x3b6   : > { %v4720_v16 = vpack.c.bf16 %v4679_v42, %v4675_v60  ;;  %v4681_v51 = vmax.f32 %v4617_v12, 0.0  ;;  %v4612_v21 = vadd.f32 %v10531_v45, %v4527_v30  ;;  %v4538_v36 = vmul.f32 %v10509_v33, %v4436_v46  ;;  %v4439_v46 = vld [vmem:[#allocation2 + $0x1c0] sm:$0xff] }
 0x3b7   : > { %v4674_v17 = vmax.f32 %v4610_v18, 0.0  ;;  %v4678_v50 = vmax.f32 %v4614_v7, 0.0  ;;  %v4616_v13 = vadd.f32 %v10531_v45, %v4531_v19  ;;  %v4619_v6 = vadd.f32 %v10524_v37, %v4534_v2  ;;  %v4443_v18 = vld [vmem:[#allocation2 + $0x1e0] sm:$0xff]  ;;  %v4441_v7 = vld [vmem:[#allocation2 + $0x1d0] sm:$0xff] }
 0x3b8   : > { %5056 = vmatmul.mubr.bf16.gmra.mrb[16].mxu0 %v4715_v53  ;;  %5153 = vmatmul.mubr.bf16.gmra.mrb[16].mxu1 %v4717_v9  ;;  %v4722_v41 = vpack.c.bf16 %v4681_v51, %v4677_v44  ;;  %v4676_v34 = vmax.f32 %v4612_v21, 0.0  ;;  %v4623_v14 = vadd.f32 %v10524_v37, %v4538_v36  ;;  %v4536_v24 = vmul.f32 %v10511_v23, %v4434_v20  ;;  %v4445_v20 = vld [vmem:[#allocation2 + $0x1f0] sm:$0xff] }
 0x3b9   : > { %5063 = vmatprep.mubr.bf16.mxu0 %v4720_v16  ;;  %v4719_v61 = vpack.c.bf16 %v4678_v50, %v4674_v17  ;;  %v4680_v4 = vmax.f32 %v4616_v13, 0.0  ;;  %v4683_v28 = vmax.f32 %v4619_v6, 0.0  ;;  %v4540_v3 = vmul.f32 %v10511_v23, %v4438_v47 }
 0x3ba   : > { %5160 = vmatprep.mubr.bf16.mxu1 %v4722_v41  ;;  %v4687_v59 = vmax.f32 %v4623_v14, 0.0  ;;  %v4621_v0 = vadd.f32 %v10526_v15, %v4536_v24  ;;  %v4533_v38 = vmul.f32 %v10513_v56, %v4431_v52  ;;  %v4537_v55 = vmul.f32 %v10513_v56, %v4435_v27 }
 0x3bb   : > { %v4721_v35 = vpack.c.bf16 %v4680_v4, %v4676_v34  ;;  %v4625_v58 = vadd.f32 %v10526_v15, %v4540_v3  ;;  %v4535_v32 = vmul.f32 %v10515_v62, %v4433_v26  ;;  %v4539_v10 = vmul.f32 %v10515_v62, %v4437_v29 }
 0x3bc   : > { %v4724_v8 = vpack.c.bf16 %v4687_v59, %v4683_v28  ;;  %v4685_v57 = vmax.f32 %v4621_v0, 0.0  ;;  %v4618_v63 = vadd.f32 %v10528_v1, %v4533_v38  ;;  %v4622_v53 = vadd.f32 %v10528_v1, %v4537_v55  ;;  %v10663_v0 = vld [vmem:[%s11280_s6] ss:$0 sm:$0xff] }
 0x3bd   : > { %v4689_v11 = vmax.f32 %v4625_v58, 0.0  ;;  %v4620_v43 = vadd.f32 %v10531_v45, %v4535_v32  ;;  %v4624_v54 = vadd.f32 %v10531_v45, %v4539_v10  ;;  %v4542_v39 = vmul.f32 %v10509_v33, %v4440_v31 }
 0x3be   : > { %v4682_v9 = vmax.f32 %v4618_v63, 0.0  ;;  %v4686_v60 = vmax.f32 %v4622_v53, 0.0  ;;  %v4546_v48 = vmul.f32 %v10509_v33, %v4444_v22  ;;  %v4544_v5 = vmul.f32 %v10511_v23, %v4442_v25 }
 0x3bf   : > { %v4726_v42 = vpack.c.bf16 %v4689_v11, %v4685_v57  ;;  %v4684_v12 = vmax.f32 %v4620_v43, 0.0  ;;  %v4688_v44 = vmax.f32 %v4624_v54, 0.0  ;;  %v4627_v30 = vadd.f32 %v10524_v37, %v4542_v39 }
 0x3c0   : > { %5064 = vmatmul.mubr.bf16.gmra.mrb[20].mxu0 %v4719_v61  ;;  %5161 = vmatmul.mubr.bf16.gmra.mrb[20].mxu1 %v4721_v35  ;;  %v4631_v19 = vadd.f32 %v10524_v37, %v4546_v48  ;;  %v4548_v2 = vmul.f32 %v10511_v23, %v4446_v40  ;;  %v4629_v16 = vadd.f32 %v10526_v15, %v4544_v5  ;;  %v5187_v4 = vadd.s32 8, %v10497_v49 }
 0x3c1   : > { %5071 = vmatprep.mubr.bf16.mxu0 %v4724_v8  ;;  %5168 = vmatprep.mubr.bf16.mxu1 %v4726_v42  ;;  %v4691_v33 = vmax.f32 %v4627_v30, 0.0  ;;  %v4541_v51 = vmul.f32 %v10513_v56, %v4439_v46  ;;  %v4545_v47 = vmul.f32 %v10513_v56, %v4443_v18  ;;  %v4543_v17 = vmul.f32 %v10515_v62, %v4441_v7 }
 0x3c2   : > { %v4695_v21 = vmax.f32 %v4631_v19, 0.0  ;;  %v4633_v36 = vadd.f32 %v10526_v15, %v4548_v2  ;;  %v4723_v50 = vpack.c.bf16 %v4686_v60, %v4682_v9  ;;  %v4725_v13 = vpack.c.bf16 %v4688_v44, %v4684_v12 }
 0x3c3   : > { %v4693_v37 = vmax.f32 %v4629_v16, 0.0  ;;  %v4547_v23 = vmul.f32 %v10515_v62, %v4445_v20  ;;  %v4626_v52 = vadd.f32 %v10528_v1, %v4541_v51  ;;  %v4630_v27 = vadd.f32 %v10528_v1, %v4545_v47 }
 0x3c4   : > { %v4697_v6 = vmax.f32 %v4633_v36, 0.0  ;;  %v4628_v41 = vadd.f32 %v10531_v45, %v4543_v17  ;;  %v4728_v34 = vpack.c.bf16 %v4695_v21, %v4691_v33  ;;  %v10654_v1 = vstv %s8882_s20 }
 0x3c5   : > { %v4632_v15 = vadd.f32 %v10531_v45, %v4547_v23  ;;  %v4690_v56 = vmax.f32 %v4626_v52, 0.0  ;;  %v4694_v24 = vmax.f32 %v4630_v27, 0.0  ;;  %v5203_v45 = vadd.s32 %v10654_v1, %v10497_v49 }
 0x3c6   : > { %v4730_v14 = vpack.c.bf16 %v4697_v6, %v4693_v37  ;;  %v4692_v26 = vmax.f32 %v4628_v41, 0.0  ;;  %v5204_v59 = vadd.s32 %v10654_v1, %v5187_v4  ;;  %v5188_v10 = vadd.s32 16, %v10497_v49 }
 0x3c7   : > { %v4696_v29 = vmax.f32 %v4632_v15, 0.0  ;;  %v4727_v62 = vpack.c.bf16 %v4694_v24, %v4690_v56  ;;  %vm5219_vm1 = vcmp.lt.s32.totalorder %v5203_v45, 200  ;;  %v5189_v8 = vadd.s32 24, %v10497_v49 }
 0x3c8   : > { %5072 = vmatmul.mubr.bf16.gmra.mrb[24].mxu0 %v4723_v50  ;;  %5169 = vmatmul.mubr.bf16.gmra.mrb[24].mxu1 %v4725_v13  ;;  %vm5220_vm2 = vcmp.lt.s32.totalorder %v5204_v59, 200  ;;  %v8761_v11 = vmov 0.0   ;;  %v5205_v40 = vadd.s32 %v10654_v1, %v5188_v10  ;;  %v5190_v48 = vadd.s32 32, %v10497_v49 }
 0x3c9   : > { %5079 = vmatprep.mubr.bf16.mxu0 %v4728_v34  ;;  %5176 = vmatprep.mubr.bf16.mxu1 %v4730_v14  ;;  %v4729_v61 = vpack.c.bf16 %v4696_v29, %v4692_v26  ;;  %v7133_v43 = vsel %vm5219_vm1, 1.0, %v8761_v11  ;;  %v7134_v9 = vsel %vm5220_vm2, 1.0, %v8761_v11  ;;  %v5206_v60 = vadd.s32 %v10654_v1, %v5189_v8 }
 0x3ca   : > { %vm5221_vm3 = vcmp.lt.s32.totalorder %v5205_v40, 200  ;;  %v5207_v21 = vadd.s32 %v10654_v1, %v5190_v48  ;;  %v5191_v23 = vadd.s32 40, %v10497_v49  ;;  %v5194_v40 = vadd.s32 64, %v10497_v49 }
 0x3cb   : > { %vm5222_vm4 = vcmp.lt.s32.totalorder %v5206_v60, 200  ;;  %v7135_v13 = vsel %vm5221_vm3, 1.0, %v8761_v11 }
 0x3cc   : > { %v7136_v41 = vsel %vm5222_vm4, 1.0, %v8761_v11  ;;  %vm5223_vm5 = vcmp.lt.s32.totalorder %v5207_v21, 200  ;;  %v5208_v29 = vadd.s32 %v10654_v1, %v5191_v23  ;;  %v5195_v23 = vadd.s32 72, %v10497_v49 }
 0x3ce   : > { %vm5224_vm6 = vcmp.lt.s32.totalorder %v5208_v29, 200  ;;  %v5212_v29 = vadd.s32 %v10654_v1, %v5195_v23  ;;  %v5199_v23 = vadd.s32 104, %v10497_v49 }
 0x3cf   : > { %v7138_v60 = vsel %vm5224_vm6, 1.0, %v8761_v11 }
 0x3d0   : > { %5080 = vmatmul.mubr.bf16.gmra.mrb[28].mxu0 %v4727_v62  ;;  %5177 = vmatmul.mubr.bf16.gmra.mrb[28].mxu1 %v4729_v61  ;;  %v5192_v62 = vadd.s32 48, %v10497_v49  ;;  %vm5228_vm10 = vcmp.lt.s32.totalorder %v5212_v29, 200  ;;  %v5216_v29 = vadd.s32 %v10654_v1, %v5199_v23 }
 0x3d2   : > { %vm5232_vm14 = vcmp.lt.s32.totalorder %v5216_v29, 200 }
 0x46b   : > { %v7286_v28 = vpop.f32.mrb[0].mxu0  ;;  %v7350_v3 = vpop.f32.mrb[0].mxu1 }
 0x46c   : > { %v7287_v38 = vpop.f32.mrb[1].mxu0  ;;  %v7351_v55 = vpop.f32.mrb[1].mxu1 }
 0x46d   : > { %v7288_v31 = vadd.f32 %v7287_v38, %v7286_v28  ;;  %v7352_v35 = vadd.f32 %v7351_v55, %v7350_v3  ;;  %v7289_v58 = vpop.f32.mrb[2].mxu0  ;;  %v7353_v32 = vpop.f32.mrb[2].mxu1  ;;  %v7137_v55 = vsel %vm5223_vm5, 1.0, %v8761_v11 }
 0x46e   : > { %v7290_v22 = vpop.f32.mrb[3].mxu0  ;;  %v7354_v25 = vpop.f32.mrb[3].mxu1 }
 0x46f   : > { %v5026_v57 = vadd.f32 %v7288_v31, %v10663_v0  ;;  %v7291_v63 = vadd.f32 %v7290_v22, %v7289_v58  ;;  %v7355_v53 = vadd.f32 %v7354_v25, %v7353_v32  ;;  %v5193_v58 = vadd.s32 56, %v10497_v49 }
 0x471   : > { %v5123_v54 = vadd.f32 %v7352_v35, %v5026_v57  ;;  %v5029_v39 = vadd.f32 %v7291_v63, %v10663_v0  ;;  %v5209_v63 = vadd.s32 %v10654_v1, %v5192_v62  ;;  %v5196_v62 = vadd.s32 80, %v10497_v49 }
 0x473   : > { %v5267_v5 = vmul.f32 %v7133_v43, %v5123_v54  ;;  %5347 = vst [vmem:[#allocation3] sm:$0xff] %v5123_v54  ;;  %v5126_v46 = vadd.f32 %v7355_v53, %v5029_v39  ;;  %v7292_v42 = vpop.f32.mrb[4].mxu0  ;;  %v7356_v12 = vpop.f32.mrb[4].mxu1  ;;  %v5210_v39 = vadd.s32 %v10654_v1, %v5193_v58  ;;  %vm5225_vm7 = vcmp.lt.s32.totalorder %v5209_v63, 200 }
 0x474   : > { %v7293_v44 = vpop.f32.mrb[5].mxu0  ;;  %v7357_v30 = vpop.f32.mrb[5].mxu1  ;;  %v5197_v58 = vadd.s32 88, %v10497_v49  ;;  %v5213_v63 = vadd.s32 %v10654_v1, %v5196_v62  ;;  %v5200_v62 = vadd.s32 112, %v10497_v49 }
 0x475   : > { %v5268_v18 = vmul.f32 %v7134_v9, %v5126_v46  ;;  %5348 = vst [vmem:[#allocation3 + $0x8] sm:$0xff] %v5126_v46  ;;  %v7294_v7 = vadd.f32 %v7293_v44, %v7292_v42  ;;  %v7358_v19 = vadd.f32 %v7357_v30, %v7356_v12  ;;  %v7295_v2 = vpop.f32.mrb[6].mxu0  ;;  %v7359_v20 = vpop.f32.mrb[6].mxu1  ;;  %v5308_v33 = vmul.f32 %v5267_v5, %v5267_v5 }
 0x476   : > { %v7296_v16 = vpop.f32.mrb[7].mxu0  ;;  %v7360_v51 = vpop.f32.mrb[7].mxu1  ;;  %vm5226_vm8 = vcmp.lt.s32.totalorder %v5210_v39, 200  ;;  %v5214_v39 = vadd.s32 %v10654_v1, %v5197_v58  ;;  %vm5229_vm11 = vcmp.lt.s32.totalorder %v5213_v63, 200  ;;  %v5201_v58 = vadd.s32 120, %v10497_v49 }
 0x477   : > { %v5284_v36 = vadd.f32 %v5268_v18, %v5267_v5  ;;  %v5309_v47 = vmul.f32 %v5268_v18, %v5268_v18  ;;  %v5034_v17 = vadd.f32 %v7294_v7, %v10663_v0  ;;  %v7297_v50 = vadd.f32 %v7296_v16, %v7295_v2 }
 0x478   : > { %v7361_v37 = vadd.f32 %v7360_v51, %v7359_v20  ;;  %v5211_v51 = vadd.s32 %v10654_v1, %v5194_v40  ;;  %v5198_v40 = vadd.s32 96, %v10497_v49  ;;  %vm5230_vm12 = vcmp.lt.s32.totalorder %v5214_v39, 200 }
 0x479   : > { %v5324_v6 = vadd.f32 %v5309_v47, %v5308_v33  ;;  %v5131_v52 = vadd.f32 %v7358_v19, %v5034_v17  ;;  %v5037_v27 = vadd.f32 %v7297_v50, %v10663_v0  ;;  %v5217_v63 = vadd.s32 %v10654_v1, %v5200_v62 }
 0x47a   : > { %vm5227_vm9 = vcmp.lt.s32.totalorder %v5211_v51, 200  ;;  %v5215_v51 = vadd.s32 %v10654_v1, %v5198_v40  ;;  %v5218_v39 = vadd.s32 %v10654_v1, %v5201_v58  ;;  %v7146_v49 = vsel %vm5232_vm14, 1.0, %v8761_v11 }
 0x47b   : > { %v5269_v34 = vmul.f32 %v7135_v13, %v5131_v52  ;;  %5349 = vst [vmem:[#allocation3 + $0x10] sm:$0xff] %v5131_v52  ;;  %v5134_v15 = vadd.f32 %v7361_v37, %v5037_v27  ;;  %v7298_v14 = vpop.f32.mrb[8].mxu0  ;;  %v7362_v56 = vpop.f32.mrb[8].mxu1  ;;  %v7139_v37 = vsel %vm5225_vm7, 1.0, %v8761_v11  ;;  %vm5233_vm15 = vcmp.lt.s32.totalorder %v5217_v63, 200 }
 0x47c   : > { %v7299_v24 = vpop.f32.mrb[9].mxu0  ;;  %v7363_v26 = vpop.f32.mrb[9].mxu1  ;;  %vm5231_vm13 = vcmp.lt.s32.totalorder %v5215_v51, 200  ;;  %vm5234_vm0 = vcmp.lt.s32.totalorder %v5218_v39, 200 }
 0x47d   : > { %v5285_v61 = vadd.f32 %v5284_v36, %v5269_v34  ;;  %v5310_v4 = vmul.f32 %v5269_v34, %v5269_v34  ;;  %v5270_v45 = vmul.f32 %v7136_v41, %v5134_v15  ;;  %5350 = vst [vmem:[#allocation3 + $0x18] sm:$0xff] %v5134_v15  ;;  %v7300_v28 = vadd.f32 %v7299_v24, %v7298_v14  ;;  %v7301_v3 = vpop.f32.mrb[10].mxu0  ;;  %v7365_v59 = vpop.f32.mrb[10].mxu1 }
 0x47e   : > { %v7364_v38 = vadd.f32 %v7363_v26, %v7362_v56  ;;  %v7302_v31 = vpop.f32.mrb[11].mxu0  ;;  %v7366_v35 = vpop.f32.mrb[11].mxu1  ;;  %v7140_v41 = vsel %vm5226_vm8, 1.0, %v8761_v11 }
 0x47f   : > { %v5325_v32 = vadd.f32 %v5324_v6, %v5310_v4  ;;  %v5286_v10 = vadd.f32 %v5285_v61, %v5270_v45  ;;  %v5311_v22 = vmul.f32 %v5270_v45, %v5270_v45  ;;  %v5042_v25 = vadd.f32 %v7300_v28, %v10663_v0 }
 0x480   : > { %v7303_v8 = vadd.f32 %v7302_v31, %v7301_v3  ;;  %v7367_v57 = vadd.f32 %v7366_v35, %v7365_v59 }
 0x481   : > { %v5326_v53 = vadd.f32 %v5325_v32, %v5311_v22  ;;  %v5139_v43 = vadd.f32 %v7364_v38, %v5042_v25 }
 0x482   : > { %v5045_v54 = vadd.f32 %v7303_v8, %v10663_v0 }
 0x483   : > { %v5271_v9 = vmul.f32 %v7137_v55, %v5139_v43  ;;  %5351 = vst [vmem:[#allocation3 + $0x20] sm:$0xff] %v5139_v43  ;;  %v7304_v48 = vpop.f32.mrb[12].mxu0  ;;  %v7368_v5 = vpop.f32.mrb[12].mxu1  ;;  %v7141_v55 = vsel %vm5227_vm9, 1.0, %v8761_v11 }
 0x484   : > { %v5142_v46 = vadd.f32 %v7367_v57, %v5045_v54  ;;  %v7305_v42 = vpop.f32.mrb[13].mxu0  ;;  %v7369_v12 = vpop.f32.mrb[13].mxu1 }
 0x485   : > { %v5287_v44 = vadd.f32 %v5286_v10, %v5271_v9  ;;  %v5312_v30 = vmul.f32 %v5271_v9, %v5271_v9  ;;  %v7306_v18 = vadd.f32 %v7305_v42, %v7304_v48  ;;  %v7370_v7 = vadd.f32 %v7369_v12, %v7368_v5  ;;  %v7307_v19 = vpop.f32.mrb[14].mxu0  ;;  %v7371_v2 = vpop.f32.mrb[14].mxu1 }
 0x486   : > { %v5272_v20 = vmul.f32 %v7138_v60, %v5142_v46  ;;  %5352 = vst [vmem:[#allocation3 + $0x28] sm:$0xff] %v5142_v46  ;;  %v7308_v33 = vpop.f32.mrb[15].mxu0  ;;  %v7372_v16 = vpop.f32.mrb[15].mxu1  ;;  %v7142_v60 = vsel %vm5228_vm10, 1.0, %v8761_v11 }
 0x487   : > { %v5327_v21 = vadd.f32 %v5326_v53, %v5312_v30  ;;  %v5050_v36 = vadd.f32 %v7306_v18, %v10663_v0  ;;  %v7309_v47 = vadd.f32 %v7308_v33, %v7307_v19  ;;  %v7373_v17 = vadd.f32 %v7372_v16, %v7371_v2 }
 0x488   : > { %v5288_v50 = vadd.f32 %v5287_v44, %v5272_v20  ;;  %v5313_v13 = vmul.f32 %v5272_v20, %v5272_v20 }
 0x489   : > { %v5147_v6 = vadd.f32 %v7370_v7, %v5050_v36  ;;  %v5053_v52 = vadd.f32 %v7309_v47, %v10663_v0 }
 0x48a   : > { %v5328_v27 = vadd.f32 %v5327_v21, %v5313_v13 }
 0x48b   : > { %v5273_v34 = vmul.f32 %v7139_v37, %v5147_v6  ;;  %5353 = vst [vmem:[#allocation3 + $0x30] sm:$0xff] %v5147_v6  ;;  %v5150_v15 = vadd.f32 %v7373_v17, %v5053_v52  ;;  %v7310_v14 = vpop.f32.mrb[16].mxu0  ;;  %v7374_v56 = vpop.f32.mrb[16].mxu1  ;;  %v7143_v37 = vsel %vm5229_vm11, 1.0, %v8761_v11 }
 0x48c   : > { %v7311_v24 = vpop.f32.mrb[17].mxu0  ;;  %v7375_v26 = vpop.f32.mrb[17].mxu1 }
 0x48d   : > { %v5289_v61 = vadd.f32 %v5288_v50, %v5273_v34  ;;  %v5314_v4 = vmul.f32 %v5273_v34, %v5273_v34  ;;  %v5274_v45 = vmul.f32 %v7140_v41, %v5150_v15  ;;  %5354 = vst [vmem:[#allocation3 + $0x38] sm:$0xff] %v5150_v15  ;;  %v7312_v28 = vadd.f32 %v7311_v24, %v7310_v14  ;;  %v7313_v3 = vpop.f32.mrb[18].mxu0  ;;  %v7377_v59 = vpop.f32.mrb[18].mxu1 }
 0x48e   : > { %v7376_v38 = vadd.f32 %v7375_v26, %v7374_v56  ;;  %v7314_v31 = vpop.f32.mrb[19].mxu0  ;;  %v7378_v35 = vpop.f32.mrb[19].mxu1  ;;  %v7144_v41 = vsel %vm5230_vm12, 1.0, %v8761_v11 }
 0x48f   : > { %v5329_v32 = vadd.f32 %v5328_v27, %v5314_v4  ;;  %v5290_v10 = vadd.f32 %v5289_v61, %v5274_v45  ;;  %v5315_v22 = vmul.f32 %v5274_v45, %v5274_v45  ;;  %v5058_v25 = vadd.f32 %v7312_v28, %v10663_v0 }
 0x490   : > { %v7315_v8 = vadd.f32 %v7314_v31, %v7313_v3  ;;  %v7379_v57 = vadd.f32 %v7378_v35, %v7377_v59 }
 0x491   : > { %v5330_v53 = vadd.f32 %v5329_v32, %v5315_v22  ;;  %v5155_v43 = vadd.f32 %v7376_v38, %v5058_v25 }
 0x492   : > { %v5061_v54 = vadd.f32 %v7315_v8, %v10663_v0 }
 0x493   : > { %v5275_v9 = vmul.f32 %v7141_v55, %v5155_v43  ;;  %5355 = vst [vmem:[#allocation3 + $0x40] sm:$0xff] %v5155_v43  ;;  %v7316_v48 = vpop.f32.mrb[20].mxu0  ;;  %v7380_v5 = vpop.f32.mrb[20].mxu1  ;;  %v7145_v55 = vsel %vm5231_vm13, 1.0, %v8761_v11 }
 0x494   : > { %v5158_v46 = vadd.f32 %v7379_v57, %v5061_v54  ;;  %v7317_v42 = vpop.f32.mrb[21].mxu0  ;;  %v7381_v12 = vpop.f32.mrb[21].mxu1 }
 0x495   : > { %v5291_v44 = vadd.f32 %v5290_v10, %v5275_v9  ;;  %v5316_v30 = vmul.f32 %v5275_v9, %v5275_v9  ;;  %v7318_v18 = vadd.f32 %v7317_v42, %v7316_v48  ;;  %v7382_v7 = vadd.f32 %v7381_v12, %v7380_v5  ;;  %v7319_v19 = vpop.f32.mrb[22].mxu0  ;;  %v7383_v2 = vpop.f32.mrb[22].mxu1 }
 0x496   : > { %v5276_v20 = vmul.f32 %v7142_v60, %v5158_v46  ;;  %5356 = vst [vmem:[#allocation3 + $0x48] sm:$0xff] %v5158_v46  ;;  %v7320_v33 = vpop.f32.mrb[23].mxu0  ;;  %v7384_v16 = vpop.f32.mrb[23].mxu1 }
 0x497   : > { %v5331_v21 = vadd.f32 %v5330_v53, %v5316_v30  ;;  %v5066_v36 = vadd.f32 %v7318_v18, %v10663_v0  ;;  %v7321_v47 = vadd.f32 %v7320_v33, %v7319_v19  ;;  %v7385_v17 = vadd.f32 %v7384_v16, %v7383_v2 }
 0x498   : > { %v5292_v50 = vadd.f32 %v5291_v44, %v5276_v20  ;;  %v5317_v13 = vmul.f32 %v5276_v20, %v5276_v20 }
 0x499   : > { %v5163_v6 = vadd.f32 %v7382_v7, %v5066_v36  ;;  %v5069_v52 = vadd.f32 %v7321_v47, %v10663_v0  ;;  %v7147_v47 = vsel %vm5233_vm15, 1.0, %v8761_v11 }
 0x49a   : > { %v5332_v27 = vadd.f32 %v5331_v21, %v5317_v13 }
 0x49b   : > { %v5277_v34 = vmul.f32 %v7143_v37, %v5163_v6  ;;  %5357 = vst [vmem:[#allocation3 + $0x50] sm:$0xff] %v5163_v6  ;;  %v5166_v15 = vadd.f32 %v7385_v17, %v5069_v52  ;;  %v7322_v14 = vpop.f32.mrb[24].mxu0  ;;  %v7386_v56 = vpop.f32.mrb[24].mxu1  ;;  %v7148_v37 = vsel %vm5234_vm0, 1.0, %v8761_v11 }
 0x49c   : > { %v7323_v24 = vpop.f32.mrb[25].mxu0  ;;  %v7387_v26 = vpop.f32.mrb[25].mxu1 }
 0x49d   : > { %v5293_v61 = vadd.f32 %v5292_v50, %v5277_v34  ;;  %v5318_v4 = vmul.f32 %v5277_v34, %v5277_v34  ;;  %v5278_v45 = vmul.f32 %v7144_v41, %v5166_v15  ;;  %5358 = vst [vmem:[#allocation3 + $0x58] sm:$0xff] %v5166_v15  ;;  %v7324_v28 = vadd.f32 %v7323_v24, %v7322_v14  ;;  %v7325_v3 = vpop.f32.mrb[26].mxu0  ;;  %v7389_v59 = vpop.f32.mrb[26].mxu1 }
 0x49e   : > { %v7388_v38 = vadd.f32 %v7387_v26, %v7386_v56  ;;  %v7326_v31 = vpop.f32.mrb[27].mxu0  ;;  %v7390_v35 = vpop.f32.mrb[27].mxu1 }
 0x49f   : > { %v5333_v32 = vadd.f32 %v5332_v27, %v5318_v4  ;;  %v5294_v10 = vadd.f32 %v5293_v61, %v5278_v45  ;;  %v5319_v22 = vmul.f32 %v5278_v45, %v5278_v45  ;;  %v5074_v25 = vadd.f32 %v7324_v28, %v10663_v0 }
 0x4a0   : > { %v7327_v8 = vadd.f32 %v7326_v31, %v7325_v3  ;;  %v7391_v57 = vadd.f32 %v7390_v35, %v7389_v59 }
 0x4a1   : > { %v5334_v53 = vadd.f32 %v5333_v32, %v5319_v22  ;;  %v5171_v43 = vadd.f32 %v7388_v38, %v5074_v25 }
 0x4a2   : > { %v5077_v54 = vadd.f32 %v7327_v8, %v10663_v0 }
 0x4a3   : > { %v5279_v40 = vmul.f32 %v7145_v55, %v5171_v43  ;;  %5359 = vst [vmem:[#allocation3 + $0x60] sm:$0xff] %v5171_v43  ;;  %v7328_v9 = vpop.f32.mrb[28].mxu0  ;;  %v7392_v60 = vpop.f32.mrb[28].mxu1 }
 0x4a4   : > { %v5174_v48 = vadd.f32 %v7391_v57, %v5077_v54  ;;  %v7329_v5 = vpop.f32.mrb[29].mxu0  ;;  %v7393_v46 = vpop.f32.mrb[29].mxu1 }
 0x4a5   : > { %v5295_v42 = vadd.f32 %v5294_v10, %v5279_v40  ;;  %v5320_v12 = vmul.f32 %v5279_v40, %v5279_v40  ;;  %v7330_v44 = vadd.f32 %v7329_v5, %v7328_v9  ;;  %v7394_v30 = vadd.f32 %v7393_v46, %v7392_v60  ;;  %v7331_v18 = vpop.f32.mrb[30].mxu0  ;;  %v7395_v7 = vpop.f32.mrb[30].mxu1 }
 0x4a6   : > { %v5280_v19 = vmul.f32 %v7146_v49, %v5174_v48  ;;  %5360 = vst [vmem:[#allocation3 + $0x68] sm:$0xff] %v5174_v48  ;;  %v7332_v1 = vpop.f32.mrb[31].mxu0  ;;  %v7396_v2 = vpop.f32.mrb[31].mxu1 }
 0x4a7   : > { %v5335_v20 = vadd.f32 %v5334_v53, %v5320_v12  ;;  %v5082_v33 = vadd.f32 %v7330_v44, %v10663_v0  ;;  %v7333_v16 = vadd.f32 %v7332_v1, %v7331_v18  ;;  %v7397_v51 = vadd.f32 %v7396_v2, %v7395_v7 }
 0x4a8   : > { %v5296_v21 = vadd.f32 %v5295_v42, %v5280_v19  ;;  %v5321_v36 = vmul.f32 %v5280_v19, %v5280_v19 }
 0x4a9   : > { %v5179_v17 = vadd.f32 %v7394_v30, %v5082_v33  ;;  %v5085_v50 = vadd.f32 %v7333_v16, %v10663_v0 }
 0x4aa   : > { %v5336_v13 = vadd.f32 %v5335_v20, %v5321_v36 }
 0x4ab   : > { %v5281_v23 = vmul.f32 %v7147_v47, %v5179_v17  ;;  %5361 = vst [vmem:[#allocation3 + $0x70] sm:$0xff] %v5179_v17  ;;  %v5182_v6 = vadd.f32 %v7397_v51, %v5085_v50 }
 0x4ad   : > { %v5297_v52 = vadd.f32 %v5296_v21, %v5281_v23  ;;  %v5322_v27 = vmul.f32 %v5281_v23, %v5281_v23  ;;  %v5282_v41 = vmul.f32 %v7148_v37, %v5182_v6  ;;  %5362 = vst [vmem:[#allocation3 + $0x78] sm:$0xff] %v5182_v6 }
 0x4ae   : > { %8618 = shalt.err (!%p8615_p13)  }
 0x4af   : > { %s8619_s27 = scalar_lea.hbm %s5364_s25, 2048  ;;  %s8621_s0 = scalar_lea.hbm %s11287_s13, 4096 }
 0x4b0   : > { %p8620_p0 = scmp.ne.s32.totalorder %s5364_s25, %s8619_s27  ;;  %p8622_p1 = scmp.lt.u32.totalorder %s5364_s25, %s11287_s13 }
 0x4b1   : > { %p8623_p2 = scmp.lt.u32.totalorder %s8621_s0, %s8619_s27  ;;  %p8625_p4 = scmp.lt.u32.totalorder %s8619_s27, %s5364_s25 }
 0x4b3   : > { %p8624_p3 = por %p8623_p2, %p8622_p1 }
 0x4b5   : > { %p8626_p5 = por %p8625_p4, %p8624_p3 }
 0x4b7   : > { %p8627_p6 = pnand %p8626_p5, %p8620_p0 }
 0x4b9   : > { %8630 = shalt.err (!%p8627_p6)  }
 0x4ba   : > { %5375 = dma.vmem_to_hbm [thread:$0]  %s5373_s18, 2048, %s5364_s25, [#allocation8]  ;;  %v5337_v0 = vadd.f32 %v5336_v13, %v5322_v27  ;;  %v5298_v11 = vadd.f32 %v5297_v52, %v5282_v41  ;;  %v5323_v34 = vmul.f32 %v5282_v41, %v5282_v41  ;;  %v5283_v28 = vld [vmem:[#allocation6] sm:$0x1]  ;;  %v5307_v38 = vld [vmem:[#allocation6 + $0x1] sm:$0x1] }
 0x4bc   : > { %v5299_v15 = vrot.slane %v5298_v11, 4  ;;  %v5338_v14 = vadd.f32 %v5337_v0, %v5323_v34 }
 0x4be   : > { %v5300_v56 = vadd.f32 %v5299_v15, %v5298_v11  ;;  %v5339_v24 = vrot.slane %v5338_v14, 4 }
 0x4c0   : > { %v5301_v26 = vrot.slane %v5300_v56, 2  ;;  %v5340_v29 = vadd.f32 %v5339_v24, %v5338_v14 }
 0x4c2   : > { %v5302_v62 = vadd.f32 %v5301_v26, %v5300_v56  ;;  %v5341_v61 = vrot.slane %v5340_v29, 2 }
 0x4c4   : > { %v5303_v4 = vrot.slane %v5302_v62, 1  ;;  %v5342_v45 = vadd.f32 %v5341_v61, %v5340_v29 }
 0x4c6   : > { %v5304_v3 = vadd.f32 %v5303_v4, %v5302_v62  ;;  %v5343_v59 = vrot.slane %v5342_v45, 1 }
 0x4c8   : > { %v5305_v55 = vadd.f32 %v5304_v3, %v5283_v28  ;;  %v5344_v31 = vadd.f32 %v5343_v59, %v5342_v45 }
 0x4ca   : > { %5306 = vst [vmem:[#allocation6] sm:$0x1] %v5305_v55  ;;  %v5345_v35 = vadd.f32 %v5344_v31, %v5307_v38 }
 0x4cc   : > { %5346 = vst [vmem:[#allocation6 + $0x1] sm:$0x1] %v5345_v35 }
 0x4cd   : > { %8727 = dma.done.wait [#allocation8], 2048 }
 0x4ce   : > { %8728 = vsyncadd [#allocation8], 4294965248 }
 0x4cf PF: > { %p7150_p7 = scmp.ne.s32.totalorder %s8741_s30, 2 }
 0x4d0   : > { %s7187_s23 = sshll.u32 (!%p7150_p7), %s8737_s29, 11  ;;  %s8763_s24 = smov (!%p7150_p7), [#allocation3]  }
 0x4d1   : > { %5382 = sbr.rel (%p7150_p7) target bundleno = 1573 (0x625), region = 92  ;;  %s5384_s22 = scalar_lea.hbm (!%p7150_p7), %s11287_s13, %s7187_s23 }
 0x4d2   : > { %s5392_s25 = sshll.u32 (!%p7150_p7), %s8763_s24, 4  ;;  %s8631_s26 = scalar_lea.hbm (!%p7150_p7), %s5384_s22, 2048  ;;  %s5393_s25 = int_to_ptr.vmem [resolvable:$true] %s5392_s25 }
 0x4d3   : > { %p8632_p8 = scmp.ne.s32.totalorder (!%p7150_p7), %s5384_s22, %s8631_s26  ;;  %s8633_s21 = scalar_lea.hbm (!%p7150_p7), %s11287_s13, 4096 }
 0x4d4   : > { %p8634_p9 = scmp.lt.u32.totalorder (!%p7150_p7), %s5384_s22, %s11287_s13  ;;  %p8635_p10 = scmp.lt.u32.totalorder (!%p7150_p7), %s8633_s21, %s8631_s26 }
 0x4d5   : > { %p8637_p12 = scmp.lt.u32.totalorder (!%p7150_p7), %s8631_s26, %s5384_s22 }
 0x4d6   : > { %p8636_p11 = por (!%p7150_p7), %p8635_p10, %p8634_p9 }
 0x4d8   : > { %p8638_p13 = por %p8637_p12, %p8636_p11 }
 0x4da   : > { %p8639_p0 = pnand %p8638_p13, %p8632_p8 }
 0x4dc   : > { %8642 = shalt.err (!%p8639_p0)  }
 0x4dd   : > { %s8643_s19 = scalar_lea.vmem %s5393_s25, 2048  ;;  %p8648_p2 = scmp.lt.s32.totalorder %s5393_s25, %s5393_s25 }
 0x4de   : > { %p8644_p1 = scmp.ne.s32.totalorder %s5393_s25, %s8643_s19  ;;  %p8649_p3 = scmp.lt.s32.totalorder %s8643_s19, %s8643_s19 }
 0x4e0   : > { %p8650_p4 = por %p8649_p3, %p8648_p2 }
 0x4e2   : > { %p8651_p5 = pnand %p8650_p4, %p8644_p1 }
 0x4e4   : > { %8654 = shalt.err (!%p8651_p5)  }
 0x4e5   : > { %5395 = dma.hbm_to_vmem [thread:$0]  %s5384_s22, 2048, %s5393_s25, [#allocation8] }
 0x4e6   : > { %8729 = dma.done.wait [#allocation8], 2048 }
 0x4e7   : > { %8730 = vsyncadd [#allocation8], 4294965248  ;;  %v8481_v58 = vld [vmem:[%s11281_s7] sm:$0xff]   ;;  %v8482_v32 = vld [vmem:[%s11281_s7 + $0x8] sm:$0xff]   ;;  %v5429_v60 = vlaneseq  ;;  %s8765_s0 = smov [#allocation4]   ;;  %s10876_s18 = scalar_lea.hbm %s11288_s14, %s7187_s23 }
 0x4e8   : > { %7478 = vmatprep.subr.bf16.mxu0 %v8481_v58  ;;  %7918 = vmatprep.subr.bf16.mxu1 %v8481_v58  ;;  %v8483_v10 = vld [vmem:[%s11281_s7 + $0x10] sm:$0xff]   ;;  %v8484_v22 = vld [vmem:[%s11281_s7 + $0x18] sm:$0xff]   ;;  %v5415_v25 = vld [vmem:[#allocation6] sm:$0x1]  ;;  %s5846_s1 = sshll.u32 %s8765_s0, 4  ;;  %s10878_s1 = int_to_ptr.vmem [resolvable:$true] %s5846_s1 }
 0x4e9   : > { %7479 = vmatpush3.bf16.msra.mxu0 %v8481_v58  ;;  %7926 = vmatpush3.bf16.msra.mxu1 %v8481_v58  ;;  %v5416_v8 = vmul.f32 0.005, %v5415_v25  ;;  %v5417_v57 = vld [vmem:[#allocation6 + $0x1] sm:$0x1]  ;;  %v8485_v43 = vld [vmem:[%s11281_s7 + $0x20] sm:$0xff]   ;;  %v8487_v9 = vld [vmem:[%s11281_s7 + $0x30] sm:$0xff]   ;;  %p8660_p7 = scmp.lt.s32.totalorder %s10878_s1, %s10878_s1 }
 0x4ea   : > { %7480 = vmatprep.subr.bf16.mxu0 %v8482_v32  ;;  %7919 = vmatprep.subr.bf16.mxu1 %v8482_v32  ;;  %v5418_v63 = vmul.f32 0.005, %v5417_v57  ;;  %v8486_v40 = vld [vmem:[%s11281_s7 + $0x28] sm:$0xff]   ;;  %v8488_v48 = vld [vmem:[%s11281_s7 + $0x38] sm:$0xff]   ;;  %v10775_v5 = vshrl.u32 %v5429_v60, 7  ;;  %v5399_v44 = vld [vmem:[#allocation3] sm:$0xff] }
 0x4eb   : > { %v5419_v53 = vmul.f32 %v5416_v8, %v5416_v8  ;;  %v5422_v46 = vld [vmem:[%s11280_s6 + $0x1] sm:$0x1]  ;;  %v5400_v30 = vld [vmem:[#allocation3 + $0x8] sm:$0xff]  ;;  %v5426_v7 = vld [vmem:[%s11280_s6 + $0x2] sm:$0x1]  ;;  %s8655_s23 = scalar_lea.vmem %s10878_s1, 2048 }
 0x4ec   : > { %v5431_v42 = vsub.s32 0, %v10775_v5  ;;  %v5401_v19 = vld [vmem:[#allocation3 + $0x10] sm:$0xff]  ;;  %v5402_v1 = vld [vmem:[#allocation3 + $0x18] sm:$0xff]  ;;  %v5403_v2 = vld [vmem:[#allocation3 + $0x20] sm:$0xff]  ;;  %p8656_p6 = scmp.ne.s32.totalorder %s10878_s1, %s8655_s23  ;;  %p8661_p8 = scmp.lt.s32.totalorder %s8655_s23, %s8655_s23 }
 0x4ed   : > { %7481 = vmatpush3.bf16.msra.mxu0 %v8482_v32  ;;  %7927 = vmatpush3.bf16.msra.mxu1 %v8482_v32  ;;  %v5420_v54 = vsub.f32 %v5418_v63, %v5419_v53  ;;  %v5404_v16 = vld [vmem:[#allocation3 + $0x28] sm:$0xff]  ;;  %v5405_v51 = vld [vmem:[#allocation3 + $0x30] sm:$0xff]  ;;  %v5406_v21 = vld [vmem:[#allocation3 + $0x38] sm:$0xff] }
 0x4ee   : > { %7482 = vmatprep.subr.bf16.mxu0 %v8483_v10  ;;  %7920 = vmatprep.subr.bf16.mxu1 %v8483_v10  ;;  %v5407_v36 = vld [vmem:[#allocation3 + $0x40] sm:$0xff]  ;;  %v5408_v47 = vld [vmem:[#allocation3 + $0x48] sm:$0xff]  ;;  %v5409_v17 = vld [vmem:[#allocation3 + $0x50] sm:$0xff]  ;;  %p8662_p9 = por %p8661_p8, %p8660_p7 }
 0x4ef   : > { %v5421_v39 = vmax.f32 %v5420_v54, 0.0  ;;  %v5410_v6 = vld [vmem:[#allocation3 + $0x58] sm:$0xff]  ;;  %v5411_v52 = vld [vmem:[#allocation3 + $0x60] sm:$0xff]  ;;  %v5412_v27 = vld [vmem:[#allocation3 + $0x68] sm:$0xff] }
 0x4f0   : > { %v5413_v54 = vld [vmem:[#allocation3 + $0x70] sm:$0xff]  ;;  %p8663_p10 = pnand %p8662_p9, %p8656_p6 }
 0x4f1   : > { %7483 = vmatpush3.bf16.msra.mxu0 %v8483_v10  ;;  %7928 = vmatpush3.bf16.msra.mxu1 %v8483_v10  ;;  %v5423_v49 = vadd.f32 1e-05, %v5421_v39  ;;  %v5414_v39 = vld [vmem:[#allocation3 + $0x78] sm:$0xff] }
 0x4f2   : > { %7484 = vmatprep.subr.bf16.mxu0 %v8484_v22  ;;  %7921 = vmatprep.subr.bf16.mxu1 %v8484_v22 }
 0x4f3   : > { %8489 = vrsqrt.f32 %v5423_v49 }
 0x4f5   : > { %7485 = vmatpush3.bf16.msra.mxu0 %v8484_v22  ;;  %7929 = vmatpush3.bf16.msra.mxu1 %v8484_v22 }
 0x4f6   : > { %7486 = vmatprep.subr.bf16.mxu0 %v8485_v43  ;;  %7922 = vmatprep.subr.bf16.mxu1 %v8485_v43 }
 0x4f9   : > { %7487 = vmatpush3.bf16.msra.mxu0 %v8485_v43  ;;  %7930 = vmatpush3.bf16.msra.mxu1 %v8485_v43 }
 0x4fa   : > { %7488 = vmatprep.subr.bf16.mxu0 %v8486_v40  ;;  %7923 = vmatprep.subr.bf16.mxu1 %v8486_v40 }
 0x4fd   : > { %7489 = vmatpush3.bf16.msra.mxu0 %v8486_v40  ;;  %7931 = vmatpush3.bf16.msra.mxu1 %v8486_v40  ;;  %v8490_v12 = vpop.eup %8489 }
 0x4fe   : > { %7490 = vmatprep.subr.bf16.mxu0 %v8487_v9  ;;  %7924 = vmatprep.subr.bf16.mxu1 %v8487_v9  ;;  %v5425_v18 = vmul.f32 %v8490_v12, %v5422_v46 }
 0x500   : > { %v5427_v20 = vmul.f32 %v5425_v18, %v5416_v8  ;;  %v5432_v33 = vrot.slane %v5425_v18, %v5431_v42 }
 0x501   : > { %7491 = vmatpush3.bf16.msra.mxu0 %v8487_v9  ;;  %7932 = vmatpush3.bf16.msra.mxu1 %v8487_v9 }
 0x502   : > { %7492 = vmatprep.subr.bf16.mxu0 %v8488_v48  ;;  %7925 = vmatprep.subr.bf16.mxu1 %v8488_v48  ;;  %v5428_v50 = vsub.f32 %v5426_v7, %v5427_v20  ;;  %v5433_v13 = vmul.f32 %v5432_v33, %v5399_v44  ;;  %v5434_v37 = vmul.f32 %v5432_v33, %v5400_v30 }
 0x503   : > { %v5435_v23 = vmul.f32 %v5432_v33, %v5401_v19  ;;  %v5436_v41 = vmul.f32 %v5432_v33, %v5402_v1  ;;  %v5437_v0 = vmul.f32 %v5432_v33, %v5403_v2  ;;  %v5438_v11 = vmul.f32 %v5432_v33, %v5404_v16 }
 0x504   : > { %v5439_v34 = vmul.f32 %v5432_v33, %v5405_v51  ;;  %v5452_v15 = vrot.slane %v5428_v50, %v5431_v42  ;;  %v5440_v14 = vmul.f32 %v5432_v33, %v5406_v21  ;;  %v5441_v56 = vmul.f32 %v5432_v33, %v5407_v36 }
 0x505   : > { %7493 = vmatpush3.bf16.msra.mxu0 %v8488_v48  ;;  %7933 = vmatpush3.bf16.msra.mxu1 %v8488_v48  ;;  %v5442_v24 = vmul.f32 %v5432_v33, %v5408_v47  ;;  %v5443_v26 = vmul.f32 %v5432_v33, %v5409_v17  ;;  %v5444_v29 = vmul.f32 %v5432_v33, %v5410_v6  ;;  %v5661_v6 = vadd.s32 8, %v10775_v5 }
 0x506   : > { %v5445_v62 = vmul.f32 %v5432_v33, %v5411_v52  ;;  %v5446_v61 = vmul.f32 %v5432_v33, %v5412_v27  ;;  %v5453_v4 = vadd.f32 %v5452_v15, %v5433_v13  ;;  %v5454_v45 = vadd.f32 %v5452_v15, %v5434_v37 }
 0x507   : > { %v5455_v28 = vadd.f32 %v5452_v15, %v5435_v23  ;;  %v5456_v3 = vadd.f32 %v5452_v15, %v5436_v41  ;;  %v5457_v59 = vadd.f32 %v5452_v15, %v5437_v0  ;;  %v5458_v38 = vadd.f32 %v5452_v15, %v5438_v11 }
 0x508   : > { %v5459_v55 = vadd.f32 %v5452_v15, %v5439_v34  ;;  %v5460_v31 = vadd.f32 %v5452_v15, %v5440_v14  ;;  %v5469_v35 = vmax.f32 %v5453_v4, 0.0  ;;  %v5470_v58 = vmax.f32 %v5454_v45, 0.0 }
 0x509   : > { %v5471_v32 = vmax.f32 %v5455_v28, 0.0  ;;  %v5472_v10 = vmax.f32 %v5456_v3, 0.0  ;;  %v5473_v22 = vmax.f32 %v5457_v59, 0.0  ;;  %v5474_v25 = vmax.f32 %v5458_v38, 0.0 }
 0x50a   : > { %v5475_v8 = vmax.f32 %v5459_v55, 0.0  ;;  %v5486_v57 = vpack.c.bf16 %v5470_v58, %v5469_v35  ;;  %v5461_v53 = vadd.f32 %v5452_v15, %v5441_v56  ;;  %v5462_v43 = vadd.f32 %v5452_v15, %v5442_v24  ;;  %v10803_v56 = vld [vmem:[%s11282_s8] ss:$0 sm:$0xff] }
 0x50b   : > { %v5487_v63 = vpack.c.bf16 %v5472_v10, %v5471_v32  ;;  %v5488_v40 = vpack.c.bf16 %v5474_v25, %v5473_v22  ;;  %v5476_v49 = vmax.f32 %v5460_v31, 0.0  ;;  %v5463_v9 = vadd.f32 %v5452_v15, %v5443_v26 }
 0x50c   : > { %v5464_v60 = vadd.f32 %v5452_v15, %v5444_v29  ;;  %7494 = vmatprep.mubr.bf16.mxu0 %v5486_v57  ;;  %v5477_v48 = vmax.f32 %v5461_v53, 0.0  ;;  %v5478_v46 = vmax.f32 %v5462_v43, 0.0  ;;  %v5465_v42 = vadd.f32 %v5452_v15, %v5445_v62 }
 0x50d   : > { %v5466_v12 = vadd.f32 %v5452_v15, %v5446_v61  ;;  %7495 = vmatmul.mubr.bf16.vlgmr.msra.gmra.mrb[0].mxu0 %v5487_v63  ;;  %v5479_v44 = vmax.f32 %v5463_v9, 0.0  ;;  %v5447_v18 = vmul.f32 %v5432_v33, %v5413_v54  ;;  %v5448_v7 = vmul.f32 %v5432_v33, %v5414_v39 }
 0x50e   : > { %v5480_v30 = vmax.f32 %v5464_v60, 0.0  ;;  %7498 = vmatprep.mubr.bf16.mxu0 %v5488_v40  ;;  %v5490_v19 = vpack.c.bf16 %v5478_v46, %v5477_v48  ;;  %v5481_v1 = vmax.f32 %v5465_v42, 0.0  ;;  %v5489_v36 = vpack.c.bf16 %v5476_v49, %v5475_v8 }
 0x50f   : > { %v5482_v2 = vmax.f32 %v5466_v12, 0.0  ;;  %v5467_v16 = vadd.f32 %v5452_v15, %v5447_v18  ;;  %v5468_v51 = vadd.f32 %v5452_v15, %v5448_v7  ;;  %v5662_v33 = vadd.s32 16, %v10775_v5 }
 0x510   : > { %v5491_v20 = vpack.c.bf16 %v5480_v30, %v5479_v44  ;;  %7502 = vmatprep.mubr.bf16.mxu1 %v5490_v19  ;;  %v10786_v13 = vstv %s8882_s20  ;;  %v5663_v37 = vadd.s32 24, %v10775_v5  ;;  %v5666_v52 = vadd.s32 48, %v10775_v5 }
 0x511   : > { %v5492_v21 = vpack.c.bf16 %v5482_v2, %v5481_v1  ;;  %v5483_v47 = vmax.f32 %v5467_v16, 0.0  ;;  %v5484_v17 = vmax.f32 %v5468_v51, 0.0  ;;  %v5679_v23 = vadd.s32 %v10786_v13, %v5662_v33 }
 0x512   : > { %7503 = vmatmul.mubr.bf16.vlgmr.msra.gmra.mrb[0].mxu1 %v5491_v20  ;;  %v5677_v27 = vadd.s32 %v10786_v13, %v10775_v5  ;;  %v5680_v41 = vadd.s32 %v10786_v13, %v5663_v37  ;;  %v5664_v0 = vadd.s32 32, %v10775_v5  ;;  %v5667_v11 = vadd.s32 56, %v10775_v5 }
 0x513   : > { %7506 = vmatprep.mubr.bf16.mxu1 %v5492_v21  ;;  %v5493_v50 = vpack.c.bf16 %v5484_v17, %v5483_v47  ;;  %vm5695_vm1 = vcmp.lt.s32.totalorder %v5679_v23, 200  ;;  %v5678_v34 = vadd.s32 %v10786_v13, %v5661_v6  ;;  %v5683_v15 = vadd.s32 %v10786_v13, %v5666_v52 }
 0x514   : > { %v5665_v14 = vadd.s32 40, %v10775_v5  ;;  %vm5693_vm2 = vcmp.lt.s32.totalorder %v5677_v27, 200  ;;  %vm5696_vm3 = vcmp.lt.s32.totalorder %v5680_v41, 200  ;;  %v5681_v24 = vadd.s32 %v10786_v13, %v5664_v0 }
 0x515   : > { %7499 = vmatmul.mubr.bf16.gmra.mrb[4].mxu0 %v5489_v36  ;;  %v5684_v26 = vadd.s32 %v10786_v13, %v5667_v11  ;;  %v5668_v29 = vadd.s32 64, %v10775_v5  ;;  %v8764_v62 = vmov 0.0   ;;  %vm5694_vm4 = vcmp.lt.s32.totalorder %v5678_v34, 200 }
 0x516   : > { %v7163_v61 = vsel %vm5695_vm1, 1.0, %v8764_v62  ;;  %vm5699_vm5 = vcmp.lt.s32.totalorder %v5683_v15, 200  ;;  %v5682_v45 = vadd.s32 %v10786_v13, %v5665_v14  ;;  %v5670_v28 = vadd.s32 80, %v10775_v5 }
 0x517   : > { %v7161_v38 = vsel %vm5693_vm2, 1.0, %v8764_v62  ;;  %v7164_v55 = vsel %vm5696_vm3, 1.0, %v8764_v62  ;;  %v5671_v31 = vadd.s32 88, %v10775_v5  ;;  %vm5697_vm6 = vcmp.lt.s32.totalorder %v5681_v24, 200 }
 0x518   : > { %vm5700_vm7 = vcmp.lt.s32.totalorder %v5684_v26, 200  ;;  %v5685_v32 = vadd.s32 %v10786_v13, %v5668_v29  ;;  %v7162_v25 = vsel %vm5694_vm4, 1.0, %v8764_v62  ;;  %v7167_v8 = vsel %vm5699_vm5, 1.0, %v8764_v62 }
 0x519   : > { %v5669_v57 = vadd.s32 72, %v10775_v5  ;;  %vm5698_vm8 = vcmp.lt.s32.totalorder %v5682_v45, 200  ;;  %v10825_v54 = vadd.s32 %v10786_v13, %v5670_v28  ;;  %v7165_v39 = vsel %vm5697_vm6, 1.0, %v8764_v62 }
 0x51a   : > { %7507 = vmatmul.mubr.bf16.gmra.mrb[4].mxu1 %v5493_v50  ;;  %v7168_v40 = vsel %vm5700_vm7, 1.0, %v8764_v62  ;;  %v10835_v60 = vadd.s32 %v10786_v13, %v5671_v31  ;;  %vm5701_vm9 = vcmp.lt.s32.totalorder %v5685_v32, 200  ;;  %v7166_v30 = vsel %vm5698_vm8, 1.0, %v8764_v62 }
 0x51b   : > { %v5686_v19 = vadd.s32 %v10786_v13, %v5669_v57  ;;  %vm5703_vm10 = vcmp.lt.s32.totalorder %v10825_v54, 200  ;;  %v7169_v47 = vsel %vm5701_vm9, 1.0, %v8764_v62  ;;  %v5672_v17 = vadd.s32 96, %v10775_v5 }
 0x51c   : > { %vm5704_vm11 = vcmp.lt.s32.totalorder %v10835_v60, 200  ;;  %v5674_v0 = vadd.s32 112, %v10775_v5  ;;  %v5673_v45 = vadd.s32 104, %v10775_v5 }
 0x51d   : > { %vm5702_vm12 = vcmp.lt.s32.totalorder %v5686_v19, 200 }
 0x5e0   : > { %v7496_v4 = vpop.f32.mrb[0].mxu0 }
 0x5e1   : > { %v5605_v3 = vadd.f32 %v7496_v4, %v10803_v56  ;;  %v5596_v59 = vpop.f32.mrb[1].mxu0  ;;  %v5689_v4 = vadd.s32 %v10786_v13, %v5672_v17 }
 0x5e2   : > { %v5597_v35 = vadd.f32 %v10803_v56, %v5596_v59  ;;  %v7497_v58 = vpop.f32.mrb[2].mxu0 }
 0x5e3   : > { %5823 = vst [vmem:[#allocation4 + $0x10] sm:$0xff] %v5605_v3  ;;  %v5608_v10 = vadd.f32 %v7497_v58, %v10803_v56  ;;  %v5599_v22 = vpop.f32.mrb[3].mxu0  ;;  %v5743_v48 = vmul.f32 %v7163_v61, %v5605_v3  ;;  %vm5705_vm13 = vcmp.lt.s32.totalorder %v5689_v4, 200 }
 0x5e4   : > { %v5741_v63 = vmul.f32 %v7161_v38, %v5597_v35  ;;  %5821 = vst [vmem:[#allocation4] sm:$0xff] %v5597_v35  ;;  %v5600_v53 = vadd.f32 %v10803_v56, %v5599_v22 }
 0x5e5   : > { %v7504_v43 = vpop.f32.mrb[0].mxu1  ;;  %5824 = vst [vmem:[#allocation4 + $0x18] sm:$0xff] %v5608_v10  ;;  %v5744_v44 = vmul.f32 %v7164_v55, %v5608_v10  ;;  %v5784_v50 = vmul.f32 %v5743_v48, %v5743_v48 }
 0x5e6   : > { %v10832_v49 = vadd.f32 %v7504_v43, %v10803_v56  ;;  %v5628_v9 = vpop.f32.mrb[1].mxu1  ;;  %v5742_v46 = vmul.f32 %v7162_v25, %v5600_v53  ;;  %5822 = vst [vmem:[#allocation4 + $0x8] sm:$0xff] %v5600_v53  ;;  %v5782_v1 = vmul.f32 %v5741_v63, %v5741_v63  ;;  %v5675_v53 = vadd.s32 120, %v10775_v5 }
 0x5e7   : > { %v5629_v42 = vadd.f32 %v10803_v56, %v5628_v9  ;;  %v7505_v12 = vpop.f32.mrb[2].mxu1  ;;  %v5785_v52 = vmul.f32 %v5744_v44, %v5744_v44  ;;  %v7171_v9 = vsel %vm5703_vm10, 1.0, %v8764_v62  ;;  %v5691_v5 = vadd.s32 %v10786_v13, %v5674_v0 }
 0x5e8   : > { %5831 = vst [vmem:[#allocation4 + $0x50] sm:$0xff] %v10832_v49  ;;  %v10842_v18 = vadd.f32 %v7505_v12, %v10803_v56  ;;  %v5631_v7 = vpop.f32.mrb[3].mxu1  ;;  %v5758_v2 = vadd.f32 %v5742_v46, %v5741_v63  ;;  %v5783_v20 = vmul.f32 %v5742_v46, %v5742_v46  ;;  %v7500_v16 = vpop.f32.mrb[4].mxu0  ;;  %v7170_v63 = vsel %vm5702_vm12, 1.0, %v8764_v62 }
 0x5e9   : > { %5829 = vst [vmem:[#allocation4 + $0x40] sm:$0xff] %v5629_v42  ;;  %v10847_v51 = vadd.f32 %v10803_v56, %v5631_v7  ;;  %v5621_v21 = vadd.f32 %v7500_v16, %v10803_v56  ;;  %v5612_v36 = vpop.f32.mrb[5].mxu0  ;;  %v5749_v35 = vmul.f32 %v7169_v47, %v5629_v42  ;;  %v7172_v46 = vsel %vm5704_vm11, 1.0, %v8764_v62 }
 0x5ea   : > { %5832 = vst [vmem:[#allocation4 + $0x58] sm:$0xff] %v10842_v18  ;;  %v5759_v33 = vadd.f32 %v5758_v2, %v5743_v48  ;;  %v5798_v37 = vadd.f32 %v5783_v20, %v5782_v1  ;;  %v5613_v23 = vadd.f32 %v10803_v56, %v5612_v36  ;;  %v7501_v6 = vpop.f32.mrb[6].mxu0 }
 0x5eb   : > { %5830 = vst [vmem:[#allocation4 + $0x48] sm:$0xff] %v10847_v51  ;;  %5827 = vst [vmem:[#allocation4 + $0x30] sm:$0xff] %v5621_v21  ;;  %v5624_v27 = vadd.f32 %v7501_v6, %v10803_v56  ;;  %v5615_v41 = vpop.f32.mrb[7].mxu0  ;;  %v5747_v26 = vmul.f32 %v7167_v8, %v5621_v21  ;;  %v5790_v48 = vmul.f32 %v5749_v35, %v5749_v35 }
 0x5ec   : > { %v5799_v11 = vadd.f32 %v5798_v37, %v5784_v50  ;;  %v5745_v34 = vmul.f32 %v7165_v39, %v5613_v23  ;;  %v5760_v15 = vadd.f32 %v5759_v33, %v5744_v44  ;;  %5825 = vst [vmem:[#allocation4 + $0x20] sm:$0xff] %v5613_v23  ;;  %v5616_v14 = vadd.f32 %v10803_v56, %v5615_v41 }
 0x5ed   : > { %v7508_v24 = vpop.f32.mrb[4].mxu1  ;;  %5828 = vst [vmem:[#allocation4 + $0x38] sm:$0xff] %v5624_v27  ;;  %v5748_v31 = vmul.f32 %v7168_v40, %v5624_v27  ;;  %v5788_v43 = vmul.f32 %v5747_v26, %v5747_v26 }
 0x5ee   : > { %v10861_v29 = vadd.f32 %v7508_v24, %v10803_v56  ;;  %v5644_v61 = vpop.f32.mrb[5].mxu1  ;;  %v5761_v28 = vadd.f32 %v5760_v15, %v5745_v34  ;;  %v5786_v3 = vmul.f32 %v5745_v34, %v5745_v34  ;;  %v5800_v59 = vadd.f32 %v5799_v11, %v5785_v52  ;;  %5826 = vst [vmem:[#allocation4 + $0x28] sm:$0xff] %v5616_v14 }
 0x5ef   : > { %v5746_v38 = vmul.f32 %v7166_v30, %v5616_v14  ;;  %v7509_v55 = vpop.f32.mrb[6].mxu1  ;;  %v5645_v58 = vadd.f32 %v10803_v56, %v5644_v61 }
 0x5f0   : > { %5835 = vst [vmem:[#allocation4 + $0x70] sm:$0xff] %v10861_v29  ;;  %v10868_v32 = vadd.f32 %v7509_v55, %v10803_v56  ;;  %v5647_v10 = vpop.f32.mrb[7].mxu1  ;;  %v5801_v22 = vadd.f32 %v5800_v59, %v5786_v3 }
 0x5f1   : > { %v5762_v25 = vadd.f32 %v5761_v28, %v5746_v38  ;;  %v5787_v8 = vmul.f32 %v5746_v38, %v5746_v38  ;;  %v5648_v57 = vadd.f32 %v10803_v56, %v5647_v10  ;;  %5833 = vst [vmem:[#allocation4 + $0x60] sm:$0xff] %v5645_v58  ;;  %v5690_v56 = vadd.s32 %v10786_v13, %v5673_v45 }
 0x5f2   : > { %5836 = vst [vmem:[#allocation4 + $0x78] sm:$0xff] %v10868_v32 }
 0x5f3   : > { %v5763_v39 = vadd.f32 %v5762_v25, %v5747_v26  ;;  %v5802_v40 = vadd.f32 %v5801_v22, %v5787_v8  ;;  %5834 = vst [vmem:[#allocation4 + $0x68] sm:$0xff] %v5648_v57 }
 0x5f4   : > { %8666 = shalt.err (!%p8663_p10)  }
 0x5f5   : > { %s8667_s24 = scalar_lea.hbm %s10876_s18, 2048  ;;  %s8669_s28 = scalar_lea.hbm %s11288_s14, 4096 }
 0x5f6   : > { %p8668_p11 = scmp.ne.s32.totalorder %s10876_s18, %s8667_s24  ;;  %p8670_p12 = scmp.lt.u32.totalorder %s10876_s18, %s11288_s14 }
 0x5f7   : > { %p8671_p13 = scmp.lt.u32.totalorder %s8669_s28, %s8667_s24  ;;  %p8673_p1 = scmp.lt.u32.totalorder %s8667_s24, %s10876_s18 }
 0x5f9   : > { %p8672_p0 = por %p8671_p13, %p8670_p12 }
 0x5fb   : > { %p8674_p2 = por %p8673_p1, %p8672_p0 }
 0x5fd   : > { %p8675_p3 = pnand %p8674_p2, %p8668_p11 }
 0x5ff   : > { %8678 = shalt.err (!%p8675_p3)  }
 0x600   : > { %5849 = dma.vmem_to_hbm [thread:$0]  %s10878_s1, 2048, %s10876_s18, [#allocation8]  ;;  %v5789_v54 = vmul.f32 %v5748_v31, %v5748_v31  ;;  %v5803_v60 = vadd.f32 %v5802_v40, %v5788_v43  ;;  %v5764_v42 = vadd.f32 %v5763_v39, %v5748_v31  ;;  %v5750_v12 = vmul.f32 %v7170_v63, %v10847_v51  ;;  %v5757_v10 = vld [vmem:[#allocation7] sm:$0x1]  ;;  %v5781_v25 = vld [vmem:[#allocation7 + $0x1] sm:$0x1] }
 0x601   : > { %v7173_v44 = vsel %vm5705_vm13, 1.0, %v8764_v62  ;;  %v5692_v30 = vadd.s32 %v10786_v13, %v5675_v53  ;;  %v5751_v7 = vmul.f32 %v7171_v9, %v10832_v49  ;;  %vm5706_vm14 = vcmp.lt.s32.totalorder %v5690_v56, 200 }
 0x602   : > { %v5765_v19 = vadd.f32 %v5764_v42, %v5749_v35  ;;  %v5804_v1 = vadd.f32 %v5803_v60, %v5789_v54  ;;  %v5752_v2 = vmul.f32 %v7172_v46, %v10842_v18  ;;  %vm5707_vm15 = vcmp.lt.s32.totalorder %v5691_v5, 200 }
 0x603   : > { %v5791_v21 = vmul.f32 %v5750_v12, %v5750_v12  ;;  %v5753_v36 = vmul.f32 %v7173_v44, %v5645_v58  ;;  %v7174_v47 = vsel %vm5706_vm14, 1.0, %v8764_v62  ;;  %v5792_v51 = vmul.f32 %v5751_v7, %v5751_v7 }
 0x604   : > { %v5805_v20 = vadd.f32 %v5804_v1, %v5790_v48  ;;  %v5766_v16 = vadd.f32 %v5765_v19, %v5750_v12  ;;  %vm5708_vm0 = vcmp.lt.s32.totalorder %v5692_v30, 200  ;;  %v5793_v33 = vmul.f32 %v5752_v2, %v5752_v2 }
 0x605   : > { %v7175_v13 = vsel %vm5707_vm15, 1.0, %v8764_v62  ;;  %v5794_v23 = vmul.f32 %v5753_v36, %v5753_v36  ;;  %v5754_v6 = vmul.f32 %v7174_v47, %v5648_v57  ;;  %v7176_v18 = vsel %vm5708_vm0, 1.0, %v8764_v62 }
 0x606   : > { %v5767_v17 = vadd.f32 %v5766_v16, %v5751_v7  ;;  %v5806_v50 = vadd.f32 %v5805_v20, %v5791_v21  ;;  %v5755_v52 = vmul.f32 %v7175_v13, %v10861_v29  ;;  %v5756_v11 = vmul.f32 %v7176_v18, %v10868_v32 }
 0x607   : > { %v5795_v15 = vmul.f32 %v5754_v6, %v5754_v6 }
 0x608   : > { %v5807_v49 = vadd.f32 %v5806_v50, %v5792_v51  ;;  %v5768_v37 = vadd.f32 %v5767_v17, %v5752_v2  ;;  %v5796_v14 = vmul.f32 %v5755_v52, %v5755_v52  ;;  %v5797_v61 = vmul.f32 %v5756_v11, %v5756_v11 }
 0x60a   : > { %v5769_v27 = vadd.f32 %v5768_v37, %v5753_v36  ;;  %v5808_v41 = vadd.f32 %v5807_v49, %v5793_v33 }
 0x60c   : > { %v5809_v0 = vadd.f32 %v5808_v41, %v5794_v23  ;;  %v5770_v34 = vadd.f32 %v5769_v27, %v5754_v6 }
 0x60e   : > { %v5771_v24 = vadd.f32 %v5770_v34, %v5755_v52  ;;  %v5810_v26 = vadd.f32 %v5809_v0, %v5795_v15 }
 0x610   : > { %v5772_v4 = vadd.f32 %v5771_v24, %v5756_v11  ;;  %v5811_v45 = vadd.f32 %v5810_v26, %v5796_v14 }
 0x612   : > { %v5773_v28 = vrot.slane %v5772_v4, 4  ;;  %v5812_v3 = vadd.f32 %v5811_v45, %v5797_v61 }
 0x614   : > { %v5774_v59 = vadd.f32 %v5773_v28, %v5772_v4  ;;  %v5813_v38 = vrot.slane %v5812_v3, 4 }
 0x616   : > { %v5775_v62 = vrot.slane %v5774_v59, 2  ;;  %v5814_v55 = vadd.f32 %v5813_v38, %v5812_v3 }
 0x618   : > { %v5776_v29 = vadd.f32 %v5775_v62, %v5774_v59  ;;  %v5815_v31 = vrot.slane %v5814_v55, 2 }
 0x61a   : > { %v5777_v35 = vrot.slane %v5776_v29, 1  ;;  %v5816_v58 = vadd.f32 %v5815_v31, %v5814_v55 }
 0x61c   : > { %v5778_v32 = vadd.f32 %v5777_v35, %v5776_v29  ;;  %v5817_v22 = vrot.slane %v5816_v58, 1 }
 0x61e   : > { %v5779_v8 = vadd.f32 %v5778_v32, %v5757_v10  ;;  %v5818_v57 = vadd.f32 %v5817_v22, %v5816_v58 }
 0x620   : > { %5780 = vst [vmem:[#allocation7] sm:$0x1] %v5779_v8  ;;  %v5819_v63 = vadd.f32 %v5818_v57, %v5781_v25 }
 0x622   : > { %5820 = vst [vmem:[#allocation7 + $0x1] sm:$0x1] %v5819_v63 }
 0x623   : > { %8731 = dma.done.wait [#allocation8], 2048 }
 0x624   : > { %8732 = vsyncadd [#allocation8], 4294965248 }
 0x625 PF: > { %p7178_p4 = scmp.ne.s32.totalorder %s8741_s30, 3 }
 0x626   : > { %s7189_s20 = sshll.u32 (!%p7178_p4), %s8737_s29, 11  ;;  %s8766_s19 = smov (!%p7178_p4), [#allocation4]  }
 0x627   : > { %5855 = sbr.rel (%p7178_p4) target bundleno = 2442 (0x98a), region = 104  ;;  %s5857_s1 = scalar_lea.hbm (!%p7178_p4), %s11288_s14, %s7189_s20 }
 0x628   : > { %s5865_s16 = sshll.u32 (!%p7178_p4), %s8766_s19, 4  ;;  %s8679_s18 = scalar_lea.hbm (!%p7178_p4), %s5857_s1, 2048  ;;  %s5866_s16 = int_to_ptr.vmem [resolvable:$true] %s5865_s16 }
 0x629   : > { %p8680_p5 = scmp.ne.s32.totalorder (!%p7178_p4), %s5857_s1, %s8679_s18  ;;  %s8681_s27 = scalar_lea.hbm (!%p7178_p4), %s11288_s14, 4096 }
 0x62a   : > { %p8682_p6 = scmp.lt.u32.totalorder (!%p7178_p4), %s5857_s1, %s11288_s14  ;;  %p8683_p7 = scmp.lt.u32.totalorder (!%p7178_p4), %s8681_s27, %s8679_s18 }
 0x62b   : > { %p8685_p9 = scmp.lt.u32.totalorder (!%p7178_p4), %s8679_s18, %s5857_s1 }
 0x62c   : > { %p8684_p8 = por (!%p7178_p4), %p8683_p7, %p8682_p6 }
 0x62e   : > { %p8686_p10 = por %p8685_p9, %p8684_p8 }
 0x630   : > { %p8687_p11 = pnand %p8686_p10, %p8680_p5 }
 0x632   : > { %8690 = shalt.err (!%p8687_p11)  }
 0x633   : > { %s8691_s29 = scalar_lea.vmem %s5866_s16, 2048  ;;  %p8696_p13 = scmp.lt.s32.totalorder %s5866_s16, %s5866_s16 }
 0x634   : > { %p8692_p12 = scmp.ne.s32.totalorder %s5866_s16, %s8691_s29  ;;  %p8697_p0 = scmp.lt.s32.totalorder %s8691_s29, %s8691_s29 }
 0x636   : > { %p8698_p1 = por %p8697_p0, %p8696_p13 }
 0x638   : > { %p8699_p2 = pnand %p8698_p1, %p8692_p12 }
 0x63a   : > { %8702 = shalt.err (!%p8699_p2)  }
 0x63b   : > { %5868 = dma.hbm_to_vmem [thread:$0]  %s5857_s1, 2048, %s5866_s16, [#allocation8] }
 0x63c   : > { %8733 = dma.done.wait [#allocation8], 2048 }
 0x63d   : > { %8734 = vsyncadd [#allocation8], 4294965248  ;;  %v5958_v53 = vld [vmem:[%s11283_s9] sm:$0xff]  ;;  %v5959_v56 = vld [vmem:[%s11283_s9 + $0x8] sm:$0xff]  ;;  %v5902_v50 = vlaneseq  ;;  %s8768_s19 = smov 127   ;;  %s8769_s18 = smov 126  }
 0x63e   : > { %v5960_v43 = vld [vmem:[%s11283_s9 + $0x10] sm:$0xff]  ;;  %v7566_v39 = vpack.c.bf16 %v5959_v56, %v5958_v53  ;;  %v5961_v40 = vld [vmem:[%s11283_s9 + $0x18] sm:$0xff]  ;;  %v5962_v48 = vld [vmem:[%s11283_s9 + $0x20] sm:$0xff] }
 0x63f   : > { %v7570_v9 = vpack.c.bf16 %v5961_v40, %v5960_v43  ;;  %v5963_v46 = vld [vmem:[%s11283_s9 + $0x28] sm:$0xff]  ;;  %v5964_v60 = vld [vmem:[%s11283_s9 + $0x30] sm:$0xff]  ;;  %v5965_v42 = vld [vmem:[%s11283_s9 + $0x38] sm:$0xff]  ;;  %v5903_v37 = vshrl.u32 %v5902_v50, 7 }
 0x640   : > { %7567 = vmatprep.subr.bf16.mxu0 %v7566_v39  ;;  %7934 = vmatprep.subr.bf16.mxu1 %v7566_v39  ;;  %v7574_v5 = vpack.c.bf16 %v5963_v46, %v5962_v48  ;;  %v5888_v54 = vld [vmem:[#allocation7] sm:$0x1]  ;;  %v5890_v44 = vld [vmem:[#allocation7 + $0x1] sm:$0x1]  ;;  %v7578_v19 = vpack.c.bf16 %v5965_v42, %v5964_v60  ;;  %v5966_v1 = vld [vmem:[%s11283_s9 + $0x40] sm:$0xff] }
 0x641   : > { %7569 = vmatpush3.bf16.msra.mxu0 %v7566_v39  ;;  %7942 = vmatpush3.bf16.msra.mxu1 %v7566_v39  ;;  %v5889_v12 = vmul.f32 0.005, %v5888_v54  ;;  %v5891_v30 = vmul.f32 0.005, %v5890_v44  ;;  %v5967_v2 = vld [vmem:[%s11283_s9 + $0x48] sm:$0xff]  ;;  %v5968_v36 = vld [vmem:[%s11283_s9 + $0x50] sm:$0xff] }
 0x642   : > { %7571 = vmatprep.subr.bf16.mxu0 %v7570_v9  ;;  %7935 = vmatprep.subr.bf16.mxu1 %v7570_v9  ;;  %v7582_v21 = vpack.c.bf16 %v5967_v2, %v5966_v1  ;;  %v5969_v47 = vld [vmem:[%s11283_s9 + $0x58] sm:$0xff]  ;;  %v5970_v33 = vld [vmem:[%s11283_s9 + $0x60] sm:$0xff]  ;;  %v5971_v13 = vld [vmem:[%s11283_s9 + $0x68] sm:$0xff]  ;;  %v5904_v27 = vsub.s32 0, %v5903_v37 }
 0x643   : > { %v5892_v7 = vmul.f32 %v5889_v12, %v5889_v12  ;;  %v7586_v17 = vpack.c.bf16 %v5969_v47, %v5968_v36  ;;  %v7590_v49 = vpack.c.bf16 %v5971_v13, %v5970_v33  ;;  %v5972_v23 = vld [vmem:[%s11283_s9 + $0x70] sm:$0xff]  ;;  %v5973_v6 = vld [vmem:[%s11283_s9 + $0x78] sm:$0xff]  ;;  %v5895_v18 = vld [vmem:[%s11282_s8 + $0x1] sm:$0x1] }
 0x644   : > { %v7594_v52 = vpack.c.bf16 %v5973_v6, %v5972_v23  ;;  %v5872_v0 = vld [vmem:[#allocation4] sm:$0xff]  ;;  %v5873_v14 = vld [vmem:[#allocation4 + $0x8] sm:$0xff]  ;;  %v5874_v4 = vld [vmem:[#allocation4 + $0x10] sm:$0xff] }
 0x645   : > { %7573 = vmatpush3.bf16.msra.mxu0 %v7570_v9  ;;  %7943 = vmatpush3.bf16.msra.mxu1 %v7570_v9  ;;  %v5893_v20 = vsub.f32 %v5891_v30, %v5892_v7  ;;  %v5899_v34 = vld [vmem:[%s11282_s8 + $0x2] sm:$0x1]  ;;  %v5881_v24 = vld [vmem:[#allocation4 + $0x48] sm:$0xff]  ;;  %v5875_v45 = vld [vmem:[#allocation4 + $0x18] sm:$0xff] }
 0x646   : > { %7575 = vmatprep.subr.bf16.mxu0 %v7574_v5  ;;  %7936 = vmatprep.subr.bf16.mxu1 %v7574_v5  ;;  %v5880_v15 = vld [vmem:[#allocation4 + $0x40] sm:$0xff]  ;;  %v5882_v28 = vld [vmem:[#allocation4 + $0x50] sm:$0xff]  ;;  %v5883_v3 = vld [vmem:[#allocation4 + $0x58] sm:$0xff] }
 0x647   : > { %v5894_v16 = vmax.f32 %v5893_v20, 0.0  ;;  %v5876_v59 = vld [vmem:[#allocation4 + $0x20] sm:$0xff]  ;;  %v5877_v38 = vld [vmem:[#allocation4 + $0x28] sm:$0xff]  ;;  %v5878_v10 = vld [vmem:[#allocation4 + $0x30] sm:$0xff] }
 0x648   : > { %v5884_v35 = vld [vmem:[#allocation4 + $0x60] sm:$0xff]  ;;  %v5885_v58 = vld [vmem:[#allocation4 + $0x68] sm:$0xff]  ;;  %v5879_v1 = vld [vmem:[#allocation4 + $0x38] sm:$0xff] }
 0x649   : > { %7577 = vmatpush3.bf16.msra.mxu0 %v7574_v5  ;;  %7944 = vmatpush3.bf16.msra.mxu1 %v7574_v5  ;;  %v5896_v51 = vadd.f32 1e-05, %v5894_v16  ;;  %v5886_v16 = vld [vmem:[#allocation4 + $0x70] sm:$0xff] }
 0x64a   : > { %7579 = vmatprep.subr.bf16.mxu0 %v7578_v19  ;;  %7937 = vmatprep.subr.bf16.mxu1 %v7578_v19 }
 0x64b   : > { %8493 = vrsqrt.f32 %v5896_v51  ;;  %v5887_v51 = vld [vmem:[#allocation4 + $0x78] sm:$0xff] }
 0x64d   : > { %7581 = vmatpush3.bf16.msra.mxu0 %v7578_v19  ;;  %7945 = vmatpush3.bf16.msra.mxu1 %v7578_v19 }
 0x64e   : > { %7583 = vmatprep.subr.bf16.mxu0 %v7582_v21  ;;  %7938 = vmatprep.subr.bf16.mxu1 %v7582_v21 }
 0x651   : > { %7585 = vmatpush3.bf16.msra.mxu0 %v7582_v21  ;;  %7946 = vmatpush3.bf16.msra.mxu1 %v7582_v21 }
 0x652   : > { %7587 = vmatprep.subr.bf16.mxu0 %v7586_v17  ;;  %7939 = vmatprep.subr.bf16.mxu1 %v7586_v17 }
 0x655   : > { %7589 = vmatpush3.bf16.msra.mxu0 %v7586_v17  ;;  %7947 = vmatpush3.bf16.msra.mxu1 %v7586_v17  ;;  %v8494_v41 = vpop.eup %8493 }
 0x656   : > { %7591 = vmatprep.subr.bf16.mxu0 %v7590_v49  ;;  %7940 = vmatprep.subr.bf16.mxu1 %v7590_v49  ;;  %v5898_v11 = vmul.f32 %v8494_v41, %v5895_v18 }
 0x658   : > { %v5900_v26 = vmul.f32 %v5898_v11, %v5889_v12  ;;  %v5905_v61 = vrot.slane %v5898_v11, %v5904_v27 }
 0x659   : > { %7593 = vmatpush3.bf16.msra.mxu0 %v7590_v49  ;;  %7948 = vmatpush3.bf16.msra.mxu1 %v7590_v49 }
 0x65a   : > { %7595 = vmatprep.subr.bf16.mxu0 %v7594_v52  ;;  %7941 = vmatprep.subr.bf16.mxu1 %v7594_v52  ;;  %v5901_v62 = vsub.f32 %v5899_v34, %v5900_v26  ;;  %v5906_v55 = vmul.f32 %v5905_v61, %v5872_v0  ;;  %v5914_v29 = vmul.f32 %v5905_v61, %v5880_v15  ;;  %v8767_v26 = vmov 0  }
 0x65b   : > { %v5907_v31 = vmul.f32 %v5905_v61, %v5873_v14  ;;  %v5915_v32 = vmul.f32 %v5905_v61, %v5881_v24  ;;  %v5908_v22 = vmul.f32 %v5905_v61, %v5874_v4  ;;  %v5909_v25 = vmul.f32 %v5905_v61, %v5875_v45  ;;  %8491 = vset.pattern.permute.xlu1 %v8767_v26 }
 0x65c   : > { %v5925_v8 = vrot.slane %v5901_v62, %v5904_v27  ;;  %v5916_v57 = vmul.f32 %v5905_v61, %v5882_v28  ;;  %v5917_v63 = vmul.f32 %v5905_v61, %v5883_v3  ;;  %v5910_v53 = vmul.f32 %v5905_v61, %v5876_v59  ;;  %8492 = vset.pattern.permute.xlu0 %v8767_v26 }
 0x65d   : > { %7597 = vmatpush3.bf16.msra.mxu0 %v7594_v52  ;;  %7949 = vmatpush3.bf16.msra.mxu1 %v7594_v52  ;;  %v5911_v56 = vmul.f32 %v5905_v61, %v5877_v38  ;;  %v5918_v43 = vmul.f32 %v5905_v61, %v5884_v35  ;;  %v5919_v39 = vmul.f32 %v5905_v61, %v5885_v58 }
 0x65e   : > { %v5912_v40 = vmul.f32 %v5905_v61, %v5878_v10  ;;  %v5926_v9 = vadd.f32 %v5925_v8, %v5906_v55  ;;  %v5934_v48 = vadd.f32 %v5925_v8, %v5914_v29  ;;  %v5927_v46 = vadd.f32 %v5925_v8, %v5907_v31 }
 0x65f   : > { %v5935_v5 = vadd.f32 %v5925_v8, %v5915_v32  ;;  %v5928_v54 = vadd.f32 %v5925_v8, %v5908_v22  ;;  %v5929_v60 = vadd.f32 %v5925_v8, %v5909_v25  ;;  %v5936_v42 = vadd.f32 %v5925_v8, %v5916_v57 }
 0x660   : > { %v5937_v12 = vadd.f32 %v5925_v8, %v5917_v63  ;;  %v5942_v44 = vmax.f32 %v5926_v9, 0.0  ;;  %v5950_v30 = vmax.f32 %v5934_v48, 0.0  ;;  %v5943_v7 = vmax.f32 %v5927_v46, 0.0 }
 0x661   : > { %v5951_v19 = vmax.f32 %v5935_v5, 0.0  ;;  %v5944_v2 = vmax.f32 %v5928_v54, 0.0  ;;  %v5952_v20 = vmax.f32 %v5936_v42, 0.0  ;;  %v5945_v21 = vmax.f32 %v5929_v60, 0.0 }
 0x662   : > { %7542 = vmatprep.mubr.f32.mxu0 %v5942_v44  ;;  %7554 = vmatprep.mubr.f32.mxu1 %v5950_v30  ;;  %v5930_v36 = vadd.f32 %v5925_v8, %v5910_v53  ;;  %v5938_v47 = vadd.f32 %v5925_v8, %v5918_v43  ;;  %v5953_v17 = vmax.f32 %v5937_v12, 0.0  ;;  %v5931_v50 = vadd.f32 %v5925_v8, %v5911_v56 }
 0x663   : > { %7543 = vmatmul.mubr.f32.vlgmr.msra.gmra.mrb[0].mxu0 %v5943_v7  ;;  %7555 = vmatmul.mubr.f32.vlgmr.msra.gmra.mrb[0].mxu1 %v5951_v19  ;;  %v5939_v33 = vadd.f32 %v5925_v8, %v5919_v39  ;;  %v5913_v13 = vmul.f32 %v5905_v61, %v5879_v1  ;;  %v5932_v23 = vadd.f32 %v5925_v8, %v5912_v40 }
 0x664   : > { %7545 = vmatprep.mubr.f32.mxu0 %v5944_v2  ;;  %7557 = vmatprep.mubr.f32.mxu1 %v5952_v20  ;;  %v5946_v49 = vmax.f32 %v5930_v36, 0.0  ;;  %v5954_v37 = vmax.f32 %v5938_v47, 0.0  ;;  %v5920_v6 = vmul.f32 %v5905_v61, %v5886_v16  ;;  %v5921_v18 = vmul.f32 %v5905_v61, %v5887_v51  ;;  %v7180_v61 = vld [vmem:[%s11284_s10] ss:$0 sm:$0xff] }
 0x665   : > { %v5947_v27 = vmax.f32 %v5931_v50, 0.0  ;;  %v5955_v41 = vmax.f32 %v5939_v33, 0.0  ;;  %v5933_v0 = vadd.f32 %v5925_v8, %v5913_v13  ;;  %v5948_v34 = vmax.f32 %v5932_v23, 0.0 }
 0x666   : > { %v5940_v52 = vadd.f32 %v5925_v8, %v5920_v6  ;;  %v5941_v11 = vadd.f32 %v5925_v8, %v5921_v18 }
 0x667   : > { %7546 = vmatmul.mubr.f32.gmra.mrb[2].mxu0 %v5945_v21  ;;  %7558 = vmatmul.mubr.f32.gmra.mrb[2].mxu1 %v5953_v17  ;;  %v5949_v14 = vmax.f32 %v5933_v0, 0.0 }
 0x668   : > { %7548 = vmatprep.mubr.f32.mxu0 %v5946_v49  ;;  %7560 = vmatprep.mubr.f32.mxu1 %v5954_v37  ;;  %v5956_v15 = vmax.f32 %v5940_v52, 0.0  ;;  %v5957_v24 = vmax.f32 %v5941_v11, 0.0 }
 0x66b   : > { %7549 = vmatmul.mubr.f32.gmra.mrb[4].mxu0 %v5947_v27  ;;  %7561 = vmatmul.mubr.f32.gmra.mrb[4].mxu1 %v5955_v41 }
 0x66c   : > { %7551 = vmatprep.mubr.f32.mxu0 %v5948_v34  ;;  %7563 = vmatprep.mubr.f32.mxu1 %v5956_v15 }
 0x66f   : > { %7552 = vmatmul.mubr.f32.gmra.mrb[6].mxu0 %v5949_v14  ;;  %7564 = vmatmul.mubr.f32.gmra.mrb[6].mxu1 %v5957_v24 }
 0x736   : > { %v7544_v4 = vpop.f32.mrb[0].mxu0  ;;  %v7556_v45 = vpop.f32.mrb[0].mxu1 }
 0x737   : > { %v10987_v28 = vadd.f32 %v7544_v4, %v7180_v61  ;;  %v10989_v3 = vadd.f32 %v7556_v45, %v7180_v61  ;;  %v6087_v59 = vpop.f32.mrb[1].mxu1  ;;  %v6047_v38 = vpop.f32.mrb[1].mxu0 }
 0x738   : > { %v10995_v29 = vadd.f32 %v7180_v61, %v6047_v38  ;;  %v11001_v32 = vadd.f32 %v7180_v61, %v6087_v59 }
 0x739   : > { %6160 = vrot.lane.b32.xlu1 %v10989_v3, %s8768_s19  ;;  %6144 = vrot.lane.b32.xlu0 %v10987_v28, %s8768_s19 }
 0x73a   : > { %v7547_v62 = vpop.f32.mrb[2].mxu0  ;;  %v7559_v55 = vpop.f32.mrb[2].mxu1 }
 0x73b   : > { %v6057_v31 = vpop.f32.mrb[3].mxu0  ;;  %v6097_v35 = vpop.f32.mrb[3].mxu1  ;;  %v11005_v8 = vadd.f32 %v7547_v62, %v7180_v61  ;;  %v11009_v43 = vadd.f32 %v7559_v55, %v7180_v61 }
 0x73c   : > { %v11019_v39 = vadd.f32 %v7180_v61, %v6097_v35  ;;  %v11025_v40 = vadd.f32 %v7180_v61, %v6057_v31 }
 0x73d   : > { %6208 = vrot.lane.b32.xlu1 %v10987_v28, %s8769_s18  ;;  %6142 = vrot.lane.b32.xlu0 %v10995_v29, %s8768_s19 }
 0x73e   : > { %v7550_v58 = vpop.f32.mrb[4].mxu0  ;;  %v7562_v10 = vpop.f32.mrb[4].mxu1 }
 0x73f   : > { %v6067_v22 = vpop.f32.mrb[5].mxu0  ;;  %v6107_v25 = vpop.f32.mrb[5].mxu1  ;;  %v11031_v9 = vadd.f32 %v7550_v58, %v7180_v61  ;;  %v11039_v46 = vadd.f32 %v7562_v10, %v7180_v61 }
 0x740   : > { %v11037_v48 = vadd.f32 %v7180_v61, %v6067_v22  ;;  %v11045_v5 = vadd.f32 %v7180_v61, %v6107_v25 }
 0x741   : > { %6224 = vrot.lane.b32.xlu1 %v10989_v3, %s8769_s18  ;;  %6158 = vrot.lane.b32.xlu0 %v11001_v32, %s8768_s19 }
 0x742   : > { %v7553_v57 = vpop.f32.mrb[6].mxu0  ;;  %v7565_v63 = vpop.f32.mrb[6].mxu1 }
 0x743   : > { %v6077_v53 = vpop.f32.mrb[7].mxu0  ;;  %v6117_v56 = vpop.f32.mrb[7].mxu1  ;;  %v11055_v54 = vadd.f32 %v7553_v57, %v7180_v61  ;;  %v11063_v42 = vadd.f32 %v7565_v63, %v7180_v61 }
 0x744   : > { %v11061_v60 = vadd.f32 %v7180_v61, %v6077_v53  ;;  %v11069_v12 = vadd.f32 %v7180_v61, %v6117_v56 }
 0x745   : > { %6148 = vrot.lane.b32.xlu1 %v11005_v8, %s8768_s19  ;;  %6206 = vrot.lane.b32.xlu0 %v10995_v29, %s8769_s18 }
 0x749   : > { %6164 = vrot.lane.b32.xlu1 %v11009_v43, %s8768_s19  ;;  %6222 = vrot.lane.b32.xlu0 %v11001_v32, %s8769_s18 }
 0x74d   : > { %6212 = vrot.lane.b32.xlu1 %v11005_v8, %s8769_s18  ;;  %6162 = vrot.lane.b32.xlu0 %v11019_v39, %s8768_s19 }
 0x751   : > { %6228 = vrot.lane.b32.xlu1 %v11009_v43, %s8769_s18  ;;  %6210 = vrot.lane.b32.xlu0 %v11025_v40, %s8769_s18 }
 0x755   : > { %6146 = vrot.lane.b32.xlu1 %v11025_v40, %s8768_s19  ;;  %6226 = vrot.lane.b32.xlu0 %v11019_v39, %s8769_s18 }
 0x759   : > { %6152 = vrot.lane.b32.xlu1 %v11031_v9, %s8768_s19  ;;  %6150 = vrot.lane.b32.xlu0 %v11037_v48, %s8768_s19 }
 0x75d   : > { %6168 = vrot.lane.b32.xlu1 %v11039_v46, %s8768_s19  ;;  %6166 = vrot.lane.b32.xlu0 %v11045_v5, %s8768_s19 }
 0x761   : > { %6216 = vrot.lane.b32.xlu1 %v11031_v9, %s8769_s18  ;;  %6214 = vrot.lane.b32.xlu0 %v11037_v48, %s8769_s18 }
 0x765   : > { %6232 = vrot.lane.b32.xlu1 %v11039_v46, %s8769_s18  ;;  %6230 = vrot.lane.b32.xlu0 %v11045_v5, %s8769_s18 }
 0x769   : > { %6156 = vrot.lane.b32.xlu1 %v11055_v54, %s8768_s19  ;;  %6154 = vrot.lane.b32.xlu0 %v11061_v60, %s8768_s19 }
 0x76d   : > { %6172 = vrot.lane.b32.xlu1 %v11063_v42, %s8768_s19  ;;  %6170 = vrot.lane.b32.xlu0 %v11069_v12, %s8768_s19 }
 0x771   : > { %6220 = vrot.lane.b32.xlu1 %v11055_v54, %s8769_s18  ;;  %6218 = vrot.lane.b32.xlu0 %v11061_v60, %s8769_s18 }
 0x775   : > { %6236 = vrot.lane.b32.xlu1 %v11063_v42, %s8769_s18  ;;  %6234 = vrot.lane.b32.xlu0 %v11069_v12, %s8769_s18 }
 0x7ab   : > { %v6161_v44 = vpop.permute.xlu1 %6160  ;;  %v6145_v30 = vpop.permute.xlu0 %6144 }
 0x7ac   : > { %v6191_v7 = vmax.f32 %v10987_v28, %v6145_v30  ;;  %v6199_v20 = vmax.f32 %v10989_v3, %v6161_v44 }
 0x7af   : > { %v6209_v19 = vpop.permute.xlu1 %6208  ;;  %v6143_v1 = vpop.permute.xlu0 %6142 }
 0x7b0   : > { %v6255_v2 = vmax.f32 %v6191_v7, %v6209_v19  ;;  %v6190_v47 = vmax.f32 %v10995_v29, %v6143_v1 }
 0x7b2   : > { %6277 = vperm.xlu1 %8491, %v6255_v2  }
 0x7b3   : > { %v6225_v16 = vpop.permute.xlu1 %6224  ;;  %v6159_v21 = vpop.permute.xlu0 %6158 }
 0x7b4   : > { %v6263_v36 = vmax.f32 %v6199_v20, %v6225_v16  ;;  %v6198_v33 = vmax.f32 %v11001_v32, %v6159_v21 }
 0x7b6   : > { %6317 = vperm.xlu0 %8492, %v6263_v36  }
 0x7b7   : > { %v6149_v51 = vpop.permute.xlu1 %6148  ;;  %v6207_v17 = vpop.permute.xlu0 %6206 }
 0x7b8   : > { %v6254_v50 = vmax.f32 %v6190_v47, %v6207_v17  ;;  %v6193_v23 = vmax.f32 %v11005_v8, %v6149_v51 }
 0x7ba   : > { %6272 = vperm.xlu0 %8492, %v6254_v50  }
 0x7bb   : > { %v6165_v13 = vpop.permute.xlu1 %6164  ;;  %v6223_v49 = vpop.permute.xlu0 %6222 }
 0x7bc   : > { %v6262_v37 = vmax.f32 %v6198_v33, %v6223_v49  ;;  %v6201_v27 = vmax.f32 %v11009_v43, %v6165_v13 }
 0x7be   : > { %6312 = vperm.xlu1 %8491, %v6262_v37  }
 0x7bf   : > { %v6213_v6 = vpop.permute.xlu1 %6212  ;;  %v6163_v18 = vpop.permute.xlu0 %6162 }
 0x7c0   : > { %v6257_v52 = vmax.f32 %v6193_v23, %v6213_v6  ;;  %v6200_v4 = vmax.f32 %v11019_v39, %v6163_v18 }
 0x7c2   : > { %6287 = vperm.xlu0 %8492, %v6257_v52  }
 0x7c3   : > { %v6229_v41 = vpop.permute.xlu1 %6228  ;;  %v6211_v0 = vpop.permute.xlu0 %6210 }
 0x7c4   : > { %v6265_v11 = vmax.f32 %v6201_v27, %v6229_v41 }
 0x7c6   : > { %6327 = vperm.xlu0 %8492, %v6265_v11  }
 0x7c7   : > { %v6147_v34 = vpop.permute.xlu1 %6146  ;;  %v6227_v15 = vpop.permute.xlu0 %6226 }
 0x7c8   : > { %v6192_v14 = vmax.f32 %v11025_v40, %v6147_v34  ;;  %v6264_v45 = vmax.f32 %v6200_v4, %v6227_v15 }
 0x7ca   : > { %v6256_v24 = vmax.f32 %v6192_v14, %v6211_v0 }
 0x7cb   : > { %v6153_v26 = vpop.permute.xlu1 %6152  ;;  %v6151_v61 = vpop.permute.xlu0 %6150 }
 0x7cc   : > { %6282 = vperm.xlu1 %8491, %v6256_v24   ;;  %v6195_v62 = vmax.f32 %v11031_v9, %v6153_v26  ;;  %v6194_v55 = vmax.f32 %v11037_v48, %v6151_v61 }
 0x7cf   : > { %v6169_v59 = vpop.permute.xlu1 %6168  ;;  %v6167_v38 = vpop.permute.xlu0 %6166 }
 0x7d0   : > { %6322 = vperm.xlu1 %8491, %v6264_v45   ;;  %v6203_v22 = vmax.f32 %v11039_v46, %v6169_v59  ;;  %v6202_v25 = vmax.f32 %v11045_v5, %v6167_v38 }
 0x7d3   : > { %v6217_v31 = vpop.permute.xlu1 %6216  ;;  %v6215_v35 = vpop.permute.xlu0 %6214 }
 0x7d4   : > { %v6259_v58 = vmax.f32 %v6195_v62, %v6217_v31  ;;  %v6258_v10 = vmax.f32 %v6194_v55, %v6215_v35 }
 0x7d6   : > { %6297 = vperm.xlu0 %8492, %v6259_v58   ;;  %6292 = vperm.xlu1 %8491, %v6258_v10  }
 0x7d7   : > { %v6233_v57 = vpop.permute.xlu1 %6232  ;;  %v6231_v63 = vpop.permute.xlu0 %6230 }
 0x7d8   : > { %v6267_v53 = vmax.f32 %v6203_v22, %v6233_v57  ;;  %v6266_v56 = vmax.f32 %v6202_v25, %v6231_v63 }
 0x7da   : > { %6337 = vperm.xlu0 %8492, %v6267_v53   ;;  %6332 = vperm.xlu1 %8491, %v6266_v56  }
 0x7db   : > { %v6157_v44 = vpop.permute.xlu1 %6156  ;;  %v6155_v30 = vpop.permute.xlu0 %6154 }
 0x7dc   : > { %v6197_v1 = vmax.f32 %v11055_v54, %v6157_v44  ;;  %v6196_v2 = vmax.f32 %v11061_v60, %v6155_v30 }
 0x7df   : > { %v6173_v7 = vpop.permute.xlu1 %6172  ;;  %v6171_v19 = vpop.permute.xlu0 %6170 }
 0x7e0   : > { %v6205_v47 = vmax.f32 %v11063_v42, %v6173_v7  ;;  %v6204_v51 = vmax.f32 %v11069_v12, %v6171_v19 }
 0x7e3   : > { %v6221_v20 = vpop.permute.xlu1 %6220  ;;  %v6219_v16 = vpop.permute.xlu0 %6218 }
 0x7e4   : > { %v6261_v21 = vmax.f32 %v6197_v1, %v6221_v20  ;;  %v6260_v36 = vmax.f32 %v6196_v2, %v6219_v16 }
 0x7e6   : > { %6307 = vperm.xlu0 %8492, %v6261_v21   ;;  %6302 = vperm.xlu1 %8491, %v6260_v36  }
 0x7e7   : > { %v6237_v17 = vpop.permute.xlu1 %6236  ;;  %v6235_v50 = vpop.permute.xlu0 %6234 }
 0x7e8   : > { %v6269_v33 = vmax.f32 %v6205_v47, %v6237_v17  ;;  %v6268_v13 = vmax.f32 %v6204_v51, %v6235_v50 }
 0x7ea   : > { %6347 = vperm.xlu0 %8492, %v6269_v33   ;;  %6342 = vperm.xlu1 %8491, %v6268_v13  }
 0x831   : > { %v6278_v49 = vpop.permute.xlu1 %6277 }
 0x832   : > { %v6351_v37 = vsub.f32 %v10987_v28, %v6278_v49 }
 0x834   : > { %v6368_v23 = vmul.f32 1.442695, %v6351_v37 }
 0x835   : > { %v6318_v6 = vpop.permute.xlu0 %6317 }
 0x836   : > { %8495 = vpow2.f32 %v6368_v23  ;;  %v6359_v18 = vsub.f32 %v10989_v3, %v6318_v6 }
 0x838   : > { %v6384_v52 = vmul.f32 1.442695, %v6359_v18 }
 0x839   : > { %v6273_v27 = vpop.permute.xlu0 %6272 }
 0x83a   : > { %8497 = vpow2.f32 %v6384_v52  ;;  %v6350_v41 = vsub.f32 %v10995_v29, %v6273_v27 }
 0x83c   : > { %v6366_v0 = vmul.f32 1.442695, %v6350_v41 }
 0x83d   : > { %v6313_v11 = vpop.permute.xlu1 %6312 }
 0x83e   : > { %8499 = vpow2.f32 %v6366_v0  ;;  %v6358_v34 = vsub.f32 %v11001_v32, %v6313_v11 }
 0x840   : > { %v11103_v15 = vpop.eup %8495  ;;  %v6382_v14 = vmul.f32 1.442695, %v6358_v34 }
 0x841   : > { %6416 = vrot.lane.b32.xlu0 %v11103_v15, %s8768_s19  ;;  %v6288_v28 = vpop.permute.xlu0 %6287 }
 0x842   : > { %8501 = vpow2.f32 %v6382_v14  ;;  %v6353_v3 = vsub.f32 %v11005_v8, %v6288_v28 }
 0x844   : > { %v11108_v24 = vpop.eup %8497  ;;  %v6372_v26 = vmul.f32 1.442695, %v6353_v3 }
 0x845   : > { %6432 = vrot.lane.b32.xlu0 %v11108_v24, %s8768_s19  ;;  %v6328_v29 = vpop.permute.xlu0 %6327 }
 0x846   : > { %8503 = vpow2.f32 %v6372_v26  ;;  %v6361_v32 = vsub.f32 %v11009_v43, %v6328_v29 }
 0x848   : > { %v11113_v61 = vpop.eup %8499  ;;  %v6388_v4 = vmul.f32 1.442695, %v6361_v32 }
 0x849   : > { %6480 = vrot.lane.b32.xlu0 %v11103_v15, %s8769_s18  ;;  %6414 = vrot.lane.b32.xlu1 %v11113_v61, %s8768_s19 }
 0x84a   : > { %8505 = vpow2.f32 %v6388_v4 }
 0x84b   : > { %v6283_v8 = vpop.permute.xlu1 %6282 }
 0x84c   : > { %v11119_v45 = vpop.eup %8501  ;;  %v6352_v59 = vsub.f32 %v11025_v40, %v6283_v8 }
 0x84d   : > { %6496 = vrot.lane.b32.xlu0 %v11108_v24, %s8769_s18  ;;  %6430 = vrot.lane.b32.xlu1 %v11119_v45, %s8768_s19 }
 0x84e   : > { %v6370_v43 = vmul.f32 1.442695, %v6352_v59 }
 0x84f   : > { %v6323_v38 = vpop.permute.xlu1 %6322 }
 0x850   : > { %v11126_v62 = vpop.eup %8503  ;;  %8507 = vpow2.f32 %v6370_v43  ;;  %v6360_v55 = vsub.f32 %v11019_v39, %v6323_v38 }
 0x851   : > { %6478 = vrot.lane.b32.xlu1 %v11113_v61, %s8769_s18  ;;  %6420 = vrot.lane.b32.xlu0 %v11126_v62, %s8768_s19 }
 0x852   : > { %v6386_v40 = vmul.f32 1.442695, %v6360_v55 }
 0x854   : > { %v11133_v31 = vpop.eup %8505  ;;  %8509 = vpow2.f32 %v6386_v40 }
 0x855   : > { %v6293_v35 = vpop.permute.xlu1 %6292  ;;  %6494 = vrot.lane.b32.xlu1 %v11119_v45, %s8769_s18  ;;  %6436 = vrot.lane.b32.xlu0 %v11133_v31, %s8768_s19  ;;  %v6298_v58 = vpop.permute.xlu0 %6297 }
 0x856   : > { %v6355_v39 = vsub.f32 %v11031_v9, %v6298_v58  ;;  %v6354_v10 = vsub.f32 %v11037_v48, %v6293_v35 }
 0x858   : > { %v6376_v22 = vmul.f32 1.442695, %v6355_v39  ;;  %v6374_v56 = vmul.f32 1.442695, %v6354_v10 }
 0x859   : > { %v6333_v25 = vpop.permute.xlu1 %6332  ;;  %6484 = vrot.lane.b32.xlu0 %v11126_v62, %s8769_s18  ;;  %v6338_v57 = vpop.permute.xlu0 %6337 }
 0x85a   : > { %v11143_v63 = vpop.eup %8507  ;;  %v6363_v53 = vsub.f32 %v11039_v46, %v6338_v57  ;;  %8511 = vpow2.f32 %v6376_v22  ;;  %v6362_v44 = vsub.f32 %v11045_v5, %v6333_v25 }
 0x85b   : > { %6418 = vrot.lane.b32.xlu1 %v11143_v63, %s8768_s19 }
 0x85c   : > { %v6392_v9 = vmul.f32 1.442695, %v6363_v53  ;;  %v6390_v30 = vmul.f32 1.442695, %v6362_v44 }
 0x85d   : > { %6500 = vrot.lane.b32.xlu0 %v11133_v31, %s8769_s18 }
 0x85e   : > { %v11151_v48 = vpop.eup %8509  ;;  %8513 = vpow2.f32 %v6392_v9 }
 0x85f   : > { %6434 = vrot.lane.b32.xlu1 %v11151_v48, %s8768_s19  ;;  %8515 = vpow2.f32 %v6374_v56 }
 0x860   : > { %8517 = vpow2.f32 %v6390_v30 }
 0x863   : > { %6482 = vrot.lane.b32.xlu1 %v11143_v63, %s8769_s18 }
 0x864   : > { %v11157_v46 = vpop.eup %8511 }
 0x865   : > { %v6303_v7 = vpop.permute.xlu1 %6302  ;;  %v6308_v5 = vpop.permute.xlu0 %6307  ;;  %6424 = vrot.lane.b32.xlu0 %v11157_v46, %s8768_s19 }
 0x866   : > { %v6357_v19 = vsub.f32 %v11055_v54, %v6308_v5  ;;  %v6356_v1 = vsub.f32 %v11061_v60, %v6303_v7 }
 0x867   : > { %6498 = vrot.lane.b32.xlu1 %v11151_v48, %s8769_s18 }
 0x868   : > { %v6380_v2 = vmul.f32 1.442695, %v6357_v19  ;;  %v11165_v20 = vpop.eup %8513  ;;  %v6378_v54 = vmul.f32 1.442695, %v6356_v1 }
 0x869   : > { %v6343_v16 = vpop.permute.xlu1 %6342  ;;  %v6348_v21 = vpop.permute.xlu0 %6347  ;;  %6440 = vrot.lane.b32.xlu0 %v11165_v20, %s8768_s19 }
 0x86a   : > { %v11167_v36 = vpop.eup %8515  ;;  %v6365_v47 = vsub.f32 %v11063_v42, %v6348_v21  ;;  %8519 = vpow2.f32 %v6380_v2  ;;  %v6364_v51 = vsub.f32 %v11069_v12, %v6343_v16 }
 0x86b   : > { %6422 = vrot.lane.b32.xlu1 %v11167_v36, %s8768_s19  ;;  %v11175_v17 = vpop.eup %8517 }
 0x86c   : > { %v6396_v60 = vmul.f32 1.442695, %v6365_v47  ;;  %v6394_v50 = vmul.f32 1.442695, %v6364_v51 }
 0x86d   : > { %6488 = vrot.lane.b32.xlu0 %v11157_v46, %s8769_s18 }
 0x86e   : > { %8521 = vpow2.f32 %v6396_v60 }
 0x86f   : > { %6438 = vrot.lane.b32.xlu1 %v11175_v17, %s8768_s19  ;;  %8523 = vpow2.f32 %v6378_v54 }
 0x870   : > { %8525 = vpow2.f32 %v6394_v50 }
 0x871   : > { %6504 = vrot.lane.b32.xlu0 %v11165_v20, %s8769_s18 }
 0x873   : > { %6486 = vrot.lane.b32.xlu1 %v11167_v36, %s8769_s18 }
 0x874   : > { %v11185_v42 = vpop.eup %8519 }
 0x875   : > { %6428 = vrot.lane.b32.xlu0 %v11185_v42, %s8768_s19 }
 0x877   : > { %6502 = vrot.lane.b32.xlu1 %v11175_v17, %s8769_s18 }
 0x878   : > { %v11191_v12 = vpop.eup %8521 }
 0x879   : > { %v11193_v33 = vpop.eup %8523  ;;  %6444 = vrot.lane.b32.xlu0 %v11191_v12, %s8768_s19 }
 0x87a   : > { %v11199_v13 = vpop.eup %8525 }
 0x87b   : > { %6426 = vrot.lane.b32.xlu1 %v11193_v33, %s8768_s19 }
 0x87d   : > { %6492 = vrot.lane.b32.xlu0 %v11185_v42, %s8769_s18 }
 0x87f   : > { %6442 = vrot.lane.b32.xlu1 %v11199_v13, %s8768_s19 }
 0x881   : > { %6508 = vrot.lane.b32.xlu0 %v11191_v12, %s8769_s18 }
 0x883   : > { %6490 = vrot.lane.b32.xlu1 %v11193_v33, %s8769_s18 }
 0x887   : > { %6506 = vrot.lane.b32.xlu1 %v11199_v13, %s8769_s18 }
 0x8b3   : > { %v6417_v49 = vpop.permute.xlu0 %6416 }
 0x8b4   : > { %v6463_v23 = vadd.f32 %v11103_v15, %v6417_v49 }
 0x8b7   : > { %v6433_v37 = vpop.permute.xlu0 %6432 }
 0x8b8   : > { %v6471_v27 = vadd.f32 %v11108_v24, %v6433_v37 }
 0x8bb   : > { %v6415_v6 = vpop.permute.xlu1 %6414  ;;  %v6481_v18 = vpop.permute.xlu0 %6480 }
 0x8bc   : > { %v6527_v52 = vadd.f32 %v6481_v18, %v6463_v23  ;;  %v6462_v34 = vadd.f32 %v11113_v61, %v6415_v6 }
 0x8be   : > { %8527 = vrcp.f32 %v6527_v52 }
 0x8bf   : > { %v6431_v41 = vpop.permute.xlu1 %6430  ;;  %v6497_v0 = vpop.permute.xlu0 %6496 }
 0x8c0   : > { %v6535_v11 = vadd.f32 %v6497_v0, %v6471_v27  ;;  %v6470_v26 = vadd.f32 %v11119_v45, %v6431_v41 }
 0x8c2   : > { %8529 = vrcp.f32 %v6535_v11 }
 0x8c3   : > { %v6479_v14 = vpop.permute.xlu1 %6478  ;;  %v6421_v28 = vpop.permute.xlu0 %6420 }
 0x8c4   : > { %v6526_v3 = vadd.f32 %v6479_v14, %v6462_v34  ;;  %v6465_v59 = vadd.f32 %v11126_v62, %v6421_v28 }
 0x8c6   : > { %8531 = vrcp.f32 %v6526_v3 }
 0x8c7   : > { %v6495_v29 = vpop.permute.xlu1 %6494  ;;  %v6437_v32 = vpop.permute.xlu0 %6436 }
 0x8c8   : > { %v8528_v4 = vpop.eup %8527  ;;  %v6534_v8 = vadd.f32 %v6495_v29, %v6470_v26  ;;  %v6473_v35 = vadd.f32 %v11133_v31, %v6437_v32 }
 0x8c9   : > { %6565 = vperm.xlu0 %8492, %v8528_v4  }
 0x8ca   : > { %8533 = vrcp.f32 %v6534_v8 }
 0x8cb   : > { %v6485_v43 = vpop.permute.xlu0 %6484 }
 0x8cc   : > { %v8530_v38 = vpop.eup %8529  ;;  %v6529_v55 = vadd.f32 %v6485_v43, %v6465_v59 }
 0x8cd   : > { %v6419_v40 = vpop.permute.xlu1 %6418  ;;  %6605 = vperm.xlu0 %8492, %v8530_v38  }
 0x8ce   : > { %8535 = vrcp.f32 %v6529_v55  ;;  %v6464_v57 = vadd.f32 %v11143_v63, %v6419_v40 }
 0x8cf   : > { %v6501_v58 = vpop.permute.xlu0 %6500 }
 0x8d0   : > { %v8532_v39 = vpop.eup %8531  ;;  %v6537_v10 = vadd.f32 %v6501_v58, %v6473_v35 }
 0x8d1   : > { %6560 = vperm.xlu1 %8491, %v8532_v39   ;;  %v6435_v22 = vpop.permute.xlu1 %6434 }
 0x8d2   : > { %8537 = vrcp.f32 %v6537_v10  ;;  %v6472_v9 = vadd.f32 %v11151_v48, %v6435_v22 }
 0x8d4   : > { %v8534_v25 = vpop.eup %8533 }
 0x8d5   : > { %6600 = vperm.xlu1 %8491, %v8534_v25   ;;  %v6483_v53 = vpop.permute.xlu1 %6482 }
 0x8d6   : > { %v6528_v56 = vadd.f32 %v6483_v53, %v6464_v57 }
 0x8d7   : > { %v6425_v30 = vpop.permute.xlu0 %6424 }
 0x8d8   : > { %v8536_v44 = vpop.eup %8535  ;;  %8539 = vrcp.f32 %v6528_v56  ;;  %v6467_v16 = vadd.f32 %v11157_v46, %v6425_v30 }
 0x8d9   : > { %v6499_v7 = vpop.permute.xlu1 %6498  ;;  %6575 = vperm.xlu0 %8492, %v8536_v44  }
 0x8da   : > { %v6536_v5 = vadd.f32 %v6499_v7, %v6472_v9 }
 0x8db   : > { %v6441_v1 = vpop.permute.xlu0 %6440 }
 0x8dc   : > { %v8538_v19 = vpop.eup %8537  ;;  %8541 = vrcp.f32 %v6536_v5  ;;  %v6475_v60 = vadd.f32 %v11165_v20, %v6441_v1 }
 0x8dd   : > { %v6423_v2 = vpop.permute.xlu1 %6422  ;;  %6615 = vperm.xlu0 %8492, %v8538_v19  }
 0x8de   : > { %v6466_v50 = vadd.f32 %v11167_v36, %v6423_v2 }
 0x8df   : > { %v6489_v21 = vpop.permute.xlu0 %6488 }
 0x8e0   : > { %v6531_v47 = vadd.f32 %v6489_v21, %v6467_v16 }
 0x8e1   : > { %v6439_v54 = vpop.permute.xlu1 %6438 }
 0x8e2   : > { %v8540_v51 = vpop.eup %8539  ;;  %8543 = vrcp.f32 %v6531_v47  ;;  %v6474_v52 = vadd.f32 %v11175_v17, %v6439_v54 }
 0x8e3   : > { %6570 = vperm.xlu1 %8491, %v8540_v51   ;;  %v6505_v49 = vpop.permute.xlu0 %6504 }
 0x8e4   : > { %v6539_v37 = vadd.f32 %v6505_v49, %v6475_v60 }
 0x8e5   : > { %v6487_v23 = vpop.permute.xlu1 %6486 }
 0x8e6   : > { %v8542_v6 = vpop.eup %8541  ;;  %v6530_v18 = vadd.f32 %v6487_v23, %v6466_v50  ;;  %8545 = vrcp.f32 %v6539_v37 }
 0x8e7   : > { %6610 = vperm.xlu1 %8491, %v8542_v6   ;;  %v6429_v27 = vpop.permute.xlu0 %6428 }
 0x8e8   : > { %8547 = vrcp.f32 %v6530_v18  ;;  %v6469_v28 = vadd.f32 %v11185_v42, %v6429_v27 }
 0x8e9   : > { %v6503_v41 = vpop.permute.xlu1 %6502 }
 0x8ea   : > { %v6538_v0 = vadd.f32 %v6503_v41, %v6474_v52 }
 0x8eb   : > { %v6445_v11 = vpop.permute.xlu0 %6444 }
 0x8ec   : > { %8549 = vrcp.f32 %v6538_v0  ;;  %v8544_v34 = vpop.eup %8543  ;;  %v6477_v8 = vadd.f32 %v11191_v12, %v6445_v11 }
 0x8ed   : > { %v6427_v14 = vpop.permute.xlu1 %6426  ;;  %6585 = vperm.xlu0 %8492, %v8544_v34  }
 0x8ee   : > { %v6468_v59 = vadd.f32 %v11193_v33, %v6427_v14 }
 0x8ef   : > { %v6493_v3 = vpop.permute.xlu0 %6492 }
 0x8f0   : > { %v8546_v26 = vpop.eup %8545  ;;  %v6533_v29 = vadd.f32 %v6493_v3, %v6469_v28 }
 0x8f1   : > { %v6443_v32 = vpop.permute.xlu1 %6442  ;;  %6625 = vperm.xlu0 %8492, %v8546_v26  }
 0x8f2   : > { %v8548_v4 = vpop.eup %8547  ;;  %8551 = vrcp.f32 %v6533_v29  ;;  %v6476_v58 = vadd.f32 %v11199_v13, %v6443_v32 }
 0x8f3   : > { %6580 = vperm.xlu1 %8491, %v8548_v4   ;;  %v6509_v43 = vpop.permute.xlu0 %6508 }
 0x8f4   : > { %v6541_v38 = vadd.f32 %v6509_v43, %v6477_v8 }
 0x8f5   : > { %v6491_v55 = vpop.permute.xlu1 %6490 }
 0x8f6   : > { %v8550_v40 = vpop.eup %8549  ;;  %v6532_v35 = vadd.f32 %v6491_v55, %v6468_v59  ;;  %8553 = vrcp.f32 %v6541_v38 }
 0x8f7   : > { %6620 = vperm.xlu1 %8491, %v8550_v40  }
 0x8f8   : > { %8555 = vrcp.f32 %v6532_v35 }
 0x8f9   : > { %v6507_v39 = vpop.permute.xlu1 %6506 }
 0x8fa   : > { %v6540_v10 = vadd.f32 %v6507_v39, %v6476_v58 }
 0x8fc   : > { %8557 = vrcp.f32 %v6540_v10  ;;  %v8552_v22 = vpop.eup %8551 }
 0x8fd   : > { %6595 = vperm.xlu0 %8492, %v8552_v22  }
 0x900   : > { %v8554_v25 = vpop.eup %8553 }
 0x901   : > { %6635 = vperm.xlu0 %8492, %v8554_v25  }
 0x902   : > { %v8556_v57 = vpop.eup %8555 }
 0x903   : > { %6590 = vperm.xlu1 %8491, %v8556_v57  }
 0x906   : > { %v8558_v53 = vpop.eup %8557 }
 0x907   : > { %6630 = vperm.xlu1 %8491, %v8558_v53  }
 0x948   : > { %v6566_v56 = vpop.permute.xlu0 %6565 }
 0x949   : > { %v6639_v44 = vmul.f32 %v11103_v15, %v6566_v56 }
 0x94b   : > { %6655 = vst [vmem:[%s8895_s15 + $0x8] sm:$0xff] %v6639_v44 }
 0x94c   : > { %v6606_v9 = vpop.permute.xlu0 %6605 }
 0x94d   : > { %v6647_v30 = vmul.f32 %v11108_v24, %v6606_v9 }
 0x94f   : > { %6663 = vst [vmem:[%s8895_s15 + $0x48] sm:$0xff] %v6647_v30 }
 0x950   : > { %v6561_v7 = vpop.permute.xlu1 %6560 }
 0x951   : > { %v6638_v5 = vmul.f32 %v11113_v61, %v6561_v7 }
 0x953   : > { %6654 = vst [vmem:[%s8895_s15] sm:$0xff] %v6638_v5 }
 0x954   : > { %v6601_v19 = vpop.permute.xlu1 %6600 }
 0x955   : > { %v6646_v1 = vmul.f32 %v11119_v45, %v6601_v19 }
 0x957   : > { %6662 = vst [vmem:[%s8895_s15 + $0x40] sm:$0xff] %v6646_v1 }
 0x958   : > { %v6576_v2 = vpop.permute.xlu0 %6575 }
 0x959   : > { %v6641_v15 = vmul.f32 %v11126_v62, %v6576_v2 }
 0x95b   : > { %6657 = vst [vmem:[%s8895_s15 + $0x18] sm:$0xff] %v6641_v15 }
 0x95c   : > { %v6616_v16 = vpop.permute.xlu0 %6615 }
 0x95d   : > { %v6649_v24 = vmul.f32 %v11133_v31, %v6616_v16 }
 0x95f   : > { %6665 = vst [vmem:[%s8895_s15 + $0x58] sm:$0xff] %v6649_v24 }
 0x962   : > { %v6571_v21 = vpop.permute.xlu1 %6570 }
 0x963   : > { %v6640_v61 = vmul.f32 %v11143_v63, %v6571_v21 }
 0x965   : > { %6656 = vst [vmem:[%s8895_s15 + $0x10] sm:$0xff] %v6640_v61 }
 0x966   : > { %v6611_v47 = vpop.permute.xlu1 %6610 }
 0x967   : > { %v6648_v45 = vmul.f32 %v11151_v48, %v6611_v47 }
 0x969   : > { %6664 = vst [vmem:[%s8895_s15 + $0x50] sm:$0xff] %v6648_v45 }
 0x96c   : > { %v6586_v54 = vpop.permute.xlu0 %6585 }
 0x96d   : > { %v6643_v62 = vmul.f32 %v11157_v46, %v6586_v54 }
 0x96f   : > { %6659 = vst [vmem:[%s8895_s15 + $0x28] sm:$0xff] %v6643_v62 }
 0x970   : > { %v6626_v51 = vpop.permute.xlu0 %6625 }
 0x971   : > { %v6651_v31 = vmul.f32 %v11165_v20, %v6626_v51 }
 0x972   : > { %v6581_v60 = vpop.permute.xlu1 %6580 }
 0x973   : > { %v6642_v50 = vmul.f32 %v11167_v36, %v6581_v60  ;;  %6667 = vst [vmem:[%s8895_s15 + $0x68] sm:$0xff] %v6651_v31 }
 0x975   : > { %6658 = vst [vmem:[%s8895_s15 + $0x20] sm:$0xff] %v6642_v50 }
 0x976   : > { %v6621_v63 = vpop.permute.xlu1 %6620 }
 0x977   : > { %v6650_v48 = vmul.f32 %v11175_v17, %v6621_v63 }
 0x979   : > { %6666 = vst [vmem:[%s8895_s15 + $0x60] sm:$0xff] %v6650_v48 }
 0x97c   : > { %v6596_v49 = vpop.permute.xlu0 %6595 }
 0x97d   : > { %v6645_v37 = vmul.f32 %v11185_v42, %v6596_v49 }
 0x97f   : > { %6661 = vst [vmem:[%s8895_s15 + $0x38] sm:$0xff] %v6645_v37 }
 0x980   : > { %v6636_v46 = vpop.permute.xlu0 %6635 }
 0x981   : > { %v6653_v23 = vmul.f32 %v11191_v12, %v6636_v46 }
 0x982   : > { %v6591_v6 = vpop.permute.xlu1 %6590 }
 0x983   : > { %v6644_v20 = vmul.f32 %v11193_v33, %v6591_v6  ;;  %6669 = vst [vmem:[%s8895_s15 + $0x78] sm:$0xff] %v6653_v23 }
 0x985   : > { %6660 = vst [vmem:[%s8895_s15 + $0x30] sm:$0xff] %v6644_v20 }
 0x986   : > { %v6631_v36 = vpop.permute.xlu1 %6630 }
 0x987   : > { %v6652_v18 = vmul.f32 %v11199_v13, %v6631_v36 }
 0x989   : > { %6668 = vst [vmem:[%s8895_s15 + $0x70] sm:$0xff] %v6652_v18 }
 0x98a PF: > { %s25_s17 = sadd.s32 1, %s8753_s17   ;;  %s11299_s29 = sld [smem:[#allocation29_spill]] }
 0x98b   : > { %p22_p3 = scmp.ge.s32.totalorder %s25_s17, 10   ;;  %s11300_s30 = sld [smem:[#allocation30_spill]] }
 0x98c   : > { %s11301_s15 = sld [smem:[#allocation31_spill]]  ;;  %s11302_s16 = sld [smem:[#allocation32_spill]] }
 0x98d   :  { %24 = sbr.rel (!%p22_p3) target bundleno = 4 (0x4), region = 148 }
 0x994   :  { %6698 = vsyncmov [#allocation8] }
 0x997   :  { %s6699_s1 = vpop.sfrf %6698 }
 0x998   :  { %p7183_p4 = scmp.ne.s32.totalorder %s6699_s1, 0 }
 0x99a   :  { %6703 = shalt.err (%p7183_p4)  }

</bundles_post_ra>
